<compile_context>
chip_gen: v7x
topology: tpu7x:2x2x1
jax: 0.10.0
libtpu: 0.0.40
codegen_flags: <defaults>
</compile_context>

<pallas_src>
import functools

import jax
import jax.numpy as jnp
from jax.experimental import pallas as pl
from jax.experimental.pallas import tpu as pltpu


def _round_up(x, d):
    return (x + d - 1) // d * d


@functools.lru_cache(maxsize=1)
def _vmem_limit_bytes():
    # Generation-aware VMEM budget: ~3/4 of physical VMEM (96 MiB on v5e/v6e,
    # 48 MiB on v7x); conservative 48 MiB fallback if the query is unavailable.
    try:
        cap = int(getattr(pltpu.get_tpu_info(), "vmem_capacity_bytes",
                          64 * 1024 * 1024))
    except Exception:
        cap = 64 * 1024 * 1024
    return max(32 * 1024 * 1024, int(cap) * 3 // 4)


# --------------- kernel 1: fused transposed GEMM (conv1 + conv2) --------------

def _gemm_fused_kernel(x_ref, w1_ref, b1_ref, w2_ref, b2_ref, a_ref, o_ref):
    # x:(1,K,tn) bf16   w1:(64,K) bf16  b1:(64,1) f32
    # w2:(32,64) bf16   b2:(32,1) f32   a:(2,) f32 SMEM   o:(1,32,tn) bf16
    y = jnp.dot(w1_ref[...], x_ref[0], preferred_element_type=jnp.float32)
    y = y + b1_ref[...]
    y = jnp.where(y > 0, y, a_ref[0] * y)                       # PReLU (conv1)
    y = jnp.dot(w2_ref[...], y.astype(jnp.bfloat16),
                preferred_element_type=jnp.float32)             # fused 1x1 conv2
    y = y + b2_ref[...]
    y = jnp.where(y > 0, y, a_ref[1] * y)                       # PReLU (conv2)
    o_ref[0] = y.astype(o_ref.dtype)                            # lane-dense store


def gemm_fused(patches, w1, b1, w2, b2, alphas, *, tn):
    n, k, mp = patches.shape
    c1 = w1.shape[0]
    c2 = w2.shape[0]
    return pl.pallas_call(
        _gemm_fused_kernel,
        out_shape=jax.ShapeDtypeStruct((n, c2, mp), jnp.bfloat16),
        grid=(n, mp // tn),
        in_specs=[
            pl.BlockSpec((1, k, tn), lambda b, i: (b, 0, i)),
            pl.BlockSpec((c1, k), lambda b, i: (0, 0)),
            pl.BlockSpec((c1, 1), lambda b, i: (0, 0)),
            pl.BlockSpec((c2, c1), lambda b, i: (0, 0)),
            pl.BlockSpec((c2, 1), lambda b, i: (0, 0)),
            pl.BlockSpec(memory_space=pltpu.MemorySpace.SMEM),
        ],
        out_specs=pl.BlockSpec((1, c2, tn), lambda b, i: (b, 0, i)),
        compiler_params=pltpu.CompilerParams(
            dimension_semantics=("parallel", "parallel"),
            vmem_limit_bytes=_vmem_limit_bytes()),
    )(patches, w1, b1, w2, b2, alphas)


# ---- kernel 2: row-tiled fused spatial conv (conv3+4 fused / conv5 subpixel) ---

def _spatial_fused_kernel(*refs, kh, kw, wp, rt, halo_w, fuse_second):
    if fuse_second:
        (xa_ref, xb_ref, w1_ref, b1_ref, w2_ref, b2_ref, a_ref,
         o_ref, acc_ref, slab_ref) = refs
    else:
        xa_ref, xb_ref, w1_ref, b1_ref, o_ref, acc_ref, slab_ref = refs

    # Stage row tile + halo into one contiguous VMEM slab (both copies are
    # 128-lane aligned).  Channels on sublanes, flattened positions on lanes.
    slab_ref[:, :rt] = xa_ref[0]
    slab_ref[:, rt:] = xb_ref[0, :, :halo_w]

    # kh MXU dots with K = kw*cin (kw taps folded into the contraction) instead
    # of kh*kw dots with K = cin: 7x/5x fewer MXU pushes and accumulator passes.
    for ki in range(kh):
        base = ki * wp
        lhs = jnp.concatenate(
            [slab_ref[:, base + j:base + j + rt] for j in range(kw)], axis=0)
        part = jnp.dot(w1_ref[ki], lhs, preferred_element_type=jnp.float32)
        if ki == 0:
            acc_ref[...] = part
        else:
            acc_ref[...] += part

    y = acc_ref[...] + b1_ref[...]
    if fuse_second:                                             # conv3 -> conv4
        y = jnp.where(y > 0, y, a_ref[0] * y)                   # PReLU (conv3)
        y = jnp.dot(w2_ref[...], y.astype(jnp.bfloat16),
                    preferred_element_type=jnp.float32)         # fused 1x1 conv4
        y = y + b2_ref[...]
        y = jnp.where(y > 0, y, a_ref[1] * y)                   # PReLU (conv4)
    o_ref[0] = y.astype(o_ref.dtype)                            # lane-dense store


def spatial_fused_conv(x, w_taps, b1, *, kh, kw, w2=None, b2=None, alphas=None,
                       out_dtype=jnp.bfloat16, tile_rows=16):
    """'same' KxK conv on channel-major x:(n,cin,ho,wo), optionally fused with
    PReLU + 1x1 conv + PReLU.  w_taps:(kh, c1, kw*cin), W[ki][co, j*cin + ch]."""
    n, cin, ho, wo = x.shape
    c1 = w_taps.shape[1]
    fuse = w2 is not None
    c_out = w2.shape[0] if fuse else c1
    ph, pw = (kh - 1) // 2, (kw - 1) // 2

    wp = _round_up(wo + kw - 1, 8)        # flattened row width (junk cols >= wo)
    tr = tile_rows                        # multiple of 16  ->  rt % 128 == 0
    ho_p = _round_up(ho, tr)
    n_tiles = ho_p // tr
    rt = tr * wp                          # output positions per grid step
    halo_w = _round_up((kh - 1) * wp + kw, 128)
    assert kh <= tr and halo_w <= rt and rt % 128 == 0

    # Zero-pad + row-flatten in XLA (one pass over this activation).
    # TODO(synk): have the producer kernel emit this padded row-flattened layout
    # directly (input_output_aliases into a zeroed canvas) to remove this hop.
    xp = jnp.pad(x, ((0, 0), (0, 0),
                     (ph, ho_p + tr - ho - ph),
                     (pw, wp - wo - pw))).astype(jnp.bfloat16)
    xflat = xp.reshape(n, cin, (ho_p + tr) * wp)

    inputs = [xflat, xflat, w_taps.astype(jnp.bfloat16),
              b1.reshape(c1, 1).astype(jnp.float32)]
    in_specs = [
        pl.BlockSpec((1, cin, rt), lambda b, t: (b, 0, t)),
        pl.BlockSpec((1, cin, rt), lambda b, t: (b, 0, t + 1)),   # halo block
        pl.BlockSpec((kh, c1, kw * cin), lambda b, t: (0, 0, 0)),
        pl.BlockSpec((c1, 1), lambda b, t: (0, 0)),
    ]
    if fuse:
        inputs += [w2.astype(jnp.bfloat16),
                   b2.reshape(c_out, 1).astype(jnp.float32),
                   alphas.astype(jnp.float32)]
        in_specs += [
            pl.BlockSpec((c_out, c1), lambda b, t: (0, 0)),
            pl.BlockSpec((c_out, 1), lambda b, t: (0, 0)),
            pl.BlockSpec(memory_space=pltpu.MemorySpace.SMEM),
        ]

    kernel = functools.partial(_spatial_fused_kernel, kh=kh, kw=kw, wp=wp,
                               rt=rt, halo_w=halo_w, fuse_second=fuse)
    # TODO(synk): if the profile shows exposed DMA on the streamed activation
    # blocks, raise their buffering with pipeline_mode=pl.Buffered(3).
    out = pl.pallas_call(
        kernel,
        out_shape=jax.ShapeDtypeStruct((n, c_out, n_tiles * rt), out_dtype),
        grid=(n, n_tiles),
        in_specs=in_specs,
        out_specs=pl.BlockSpec((1, c_out, rt), lambda b, t: (b, 0, t)),
        scratch_shapes=[
            pltpu.VMEM((c1, rt), jnp.float32),               # tap accumulator
            pltpu.VMEM((cin, rt + halo_w), jnp.bfloat16),    # tile + halo slab
        ],
        compiler_params=pltpu.CompilerParams(
            dimension_semantics=("parallel", "parallel"),
            vmem_limit_bytes=_vmem_limit_bytes()),
    )(*inputs)
    return out.reshape(n, c_out, ho_p, wp)[:, :, :ho, :wo]


# ------------------------------ JAX glue --------------------------------------

def _im2col_cm(x, kh, kw, stride, pad):
    """x:(n,1,H,W) -> channel-major patches (n, kh*kw, ho*wo), row = i*kw + j."""
    n, _, h, w = x.shape
    xp = jnp.pad(x[:, 0], ((0, 0), (pad, pad), (pad, pad)))
    ho = (h + 2 * pad - kh) // stride + 1
    wo = (w + 2 * pad - kw) // stride + 1
    cols = []
    for i in range(kh):
        for j in range(kw):
            cols.append(xp[:, i:i + stride * (ho - 1) + 1:stride,
                           j:j + stride * (wo - 1) + 1:stride])
    patches = jnp.stack(cols, axis=1).reshape(n, kh * kw, ho * wo)
    # TODO(synk): assemble these stride-2 conv1 patches inside the GEMM kernel
    # (stream the 1-channel image, strided pl.ds reads) to avoid the ~20x HBM
    # blowup of XLA-side im2col.
    return patches, ho, wo


def _subpixel_weight_kfold(w5):
    """ConvTranspose2d(64,1,9,s2,p4,op1) weight -> 5x5 stride-1 sub-pixel conv
    weight in K-folded layout (5, 8, 5*64); phase = ry*2 + rx (padded 4->8)."""
    sub = w5[:, 0, :, :]                                   # (64, 9, 9)
    wf = jnp.zeros((5, 5, 64, 4), jnp.float32)
    for ry in range(2):
        for rx in range(2):
            kys = jnp.array([8 - 2 * a + ry for a in range(ry, 5)])
            kxs = jnp.array([8 - 2 * b + rx for b in range(rx, 5)])
            blk = sub[:, kys[:, None], kxs[None, :]]       # (64, na, nb)
            blk = jnp.transpose(blk, (1, 2, 0))            # (na, nb, 64)
            wf = wf.at[ry:, rx:, :, ry * 2 + rx].set(blk)
    w = jnp.transpose(wf, (0, 3, 1, 2))                    # (a, phase, b, ch)
    w = jnp.pad(w, ((0, 0), (0, 4), (0, 0), (0, 0)))       # phases 4 -> 8
    return w.reshape(5, 8, 5 * 64)


def fast_arcnn_forward(params, x_nchw):
    x = x_nchw.astype(jnp.float32)                         # (n, 1, H, W)
    n = x.shape[0]

    # ---- conv1 (9x9,s2,p4) + PReLU + conv2 (1x1) + PReLU : fused GEMM kernel
    patches, ho, wo = _im2col_cm(x, kh=9, kw=9, stride=2, pad=4)   # (n, 81, M)
    mi = ho * wo
    tn = min(2048, _round_up(mi, 128))                     # big lane-dense tile
    mp = _round_up(mi, tn)
    patches = jnp.pad(patches, ((0, 0), (0, 128 - 81),
                                (0, mp - mi))).astype(jnp.bfloat16)
    w1m = jnp.pad(params["w1"].reshape(64, 81),
                  ((0, 0), (0, 128 - 81))).astype(jnp.bfloat16)
    w2m = params["w2"].reshape(32, 64).astype(jnp.bfloat16)
    y = gemm_fused(patches, w1m,
                   params["b1"].reshape(64, 1).astype(jnp.float32),
                   w2m, params["b2"].reshape(32, 1).astype(jnp.float32),
                   jnp.stack([params["a1"], params["a2"]]).astype(jnp.float32),
                   tn=tn)                                  # (n, 32, mp) bf16
    y = y[:, :, :mi].reshape(n, 32, ho, wo)

    # ---- conv3 (7x7,p3) + PReLU + conv4 (1x1) + PReLU : fused spatial kernel
    w3t = jnp.transpose(params["w3"], (2, 0, 3, 1)).reshape(7, 32, 7 * 32)
    w4m = params["w4"].reshape(64, 32)
    y = spatial_fused_conv(y, w3t, params["b3"], kh=7, kw=7,
                           w2=w4m, b2=params["b4"],
                           alphas=jnp.stack([params["a3"], params["a4"]]))
    #                                                     (n, 64, ho, wo) bf16

    # ---- conv5: ConvTranspose2d via sub-pixel 5x5 conv (4 phases, padded to 8)
    w5t = _subpixel_weight_kfold(params["w5"])             # (5, 8, 320)
    b5v = jnp.concatenate([jnp.broadcast_to(params["b5"], (4,)),
                           jnp.zeros((4,), jnp.float32)])
    y = spatial_fused_conv(y, w5t, b5v, kh=5, kw=5)        # (n, 8, ho, wo) bf16
    y = y[:, :4].astype(jnp.float32)

    # pixel shuffle: phase ry*2+rx at (r, c) -> pixel (2r+ry, 2c+rx)
    y = y.reshape(n, 2, 2, ho, wo)
    y = jnp.transpose(y, (0, 3, 1, 4, 2)).reshape(n, 1, 2 * ho, 2 * wo)
    return y


# --------------------------- params & reference --------------------------------

def init_params(key):
    ks = jax.random.split(key, 10)

    def conv_w(k, shape):
        fan_in = shape[1] * shape[2] * shape[3]
        return jax.random.normal(k, shape, jnp.float32) / jnp.sqrt(float(fan_in))

    def bias(k, c):
        return 0.1 * jax.random.normal(k, (c,), jnp.float32)

    return {
        "w1": conv_w(ks[0], (64, 1, 9, 9)),  "b1": bias(ks[1], 64),
        "a1": jnp.asarray(0.25, jnp.float32),
        "w2": conv_w(ks[2], (32, 64, 1, 1)), "b2": bias(ks[3], 32),
        "a2": jnp.asarray(0.25, jnp.float32),
        "w3": conv_w(ks[4], (32, 32, 7, 7)), "b3": bias(ks[5], 32),
        "a3": jnp.asarray(0.25, jnp.float32),
        "w4": conv_w(ks[6], (64, 32, 1, 1)), "b4": bias(ks[7], 64),
        "a4": jnp.asarray(0.25, jnp.float32),
        # ConvTranspose2d weight layout: (in_channels, out_channels, KH, KW)
        "w5": conv_w(ks[8], (64, 1, 9, 9)),  "b5": bias(ks[9], 1),
    }


def _ref_forward(params, x_nchw):
    """Pure-XLA f32 reference used to validate the Pallas path."""
    dn = ("NHWC", "HWIO", "NHWC")

    def conv(x, w_pt, b, stride, pad):
        w = jnp.transpose(w_pt, (2, 3, 1, 0))
        y = jax.lax.conv_general_dilated(
            x, w, (stride, stride), [(pad, pad), (pad, pad)],
            dimension_numbers=dn)
        return y + b

    def prelu(x, a):
        return jnp.where(x > 0, x, a * x)

    x = jnp.transpose(x_nchw, (0, 2, 3, 1)).astype(jnp.float32)
    y = prelu(conv(x, params["w1"], params["b1"], 2, 4), params["a1"])
    y = prelu(conv(y, params["w2"], params["b2"], 1, 0), params["a2"])
    y = prelu(conv(y, params["w3"], params["b3"], 1, 3), params["a3"])
    y = prelu(conv(y, params["w4"], params["b4"], 1, 0), params["a4"])
    # ConvTranspose2d(64,1,9,s2,p4,op1) == conv(dilated input, flipped kernel)
    w5 = jnp.transpose(jnp.flip(params["w5"], (2, 3)), (2, 3, 0, 1))   # (9,9,64,1)
    y = jax.lax.conv_general_dilated(
        y, w5, window_strides=(1, 1), padding=[(4, 5), (4, 5)],
        lhs_dilation=(2, 2), dimension_numbers=dn)
    y = y + params["b5"]
    return jnp.transpose(y, (0, 3, 1, 2))


# --------------------------------- main ----------------------------------------

if __name__ == "__main__":
    key = jax.random.PRNGKey(0)
    pkey, xkey = jax.random.split(key)
    params = init_params(pkey)

    # NCHW input matching the PyTorch module (1 input channel).
    x = jax.random.normal(xkey, (2, 1, 16, 16), jnp.float32)

    out = jax.jit(fast_arcnn_forward)(params, x)
    out = jax.block_until_ready(out)

    assert out.shape == (2, 1, 16, 16), out.shape
    assert out.dtype == jnp.float32
    assert bool(jnp.all(jnp.isfinite(out)))

    # Validate against a pure-XLA f32 reference (loose tol: bf16 MXU inputs).
    ref = _ref_forward(params, x)
    rel = jnp.linalg.norm(out - ref) / (jnp.linalg.norm(ref) + 1e-6)
    assert float(rel) < 5e-2, float(rel)

    print("KERNEL_OK")
</pallas_src>

<mosaic_0001>
module attributes {stable_mosaic.version = 11 : i64} {
  func.func @_gemm_fused_kernel(%arg0: i32, %arg1: i32, %arg2: memref<1x128x128xbf16, #tpu.memory_space<vmem>>, %arg3: memref<64x128xbf16, #tpu.memory_space<vmem>>, %arg4: memref<64x1xf32, #tpu.memory_space<vmem>>, %arg5: memref<32x64xbf16, #tpu.memory_space<vmem>>, %arg6: memref<32x1xf32, #tpu.memory_space<vmem>>, %arg7: memref<2xf32, #tpu.memory_space<smem>>, %arg8: memref<1x32x128xbf16, #tpu.memory_space<vmem>>) attributes {dimension_semantics = [#tpu.dimension_semantics<parallel>, #tpu.dimension_semantics<parallel>], iteration_bounds = array<i64: 2, 1>, scalar_prefetch = 0 : i64, scratch_operands = 0 : i64, tpu.core_type = #tpu.core_type<tc>, window_params = [{transform_indices = @transform_0, window_bounds = array<i64: 1, 128, 128>}, {pipeline_mode = #tpu.pipeline_mode<synchronous>, transform_indices = @transform_1, window_bounds = array<i64: 64, 128>}, {pipeline_mode = #tpu.pipeline_mode<synchronous>, transform_indices = @transform_2, window_bounds = array<i64: 64, 1>}, {pipeline_mode = #tpu.pipeline_mode<synchronous>, transform_indices = @transform_3, window_bounds = array<i64: 32, 64>}, {pipeline_mode = #tpu.pipeline_mode<synchronous>, transform_indices = @transform_4, window_bounds = array<i64: 32, 1>}, {transform_indices = @transform_5, window_bounds = array<i64: 2>}, {transform_indices = @transform_6, window_bounds = array<i64: 1, 32, 128>}]} {
    %c0 = arith.constant 0 : index
    %c0_0 = arith.constant 0 : index
    %0 = vector.load %arg3[%c0, %c0_0] : memref<64x128xbf16, #tpu.memory_space<vmem>>, vector<64x128xbf16>
    %c0_1 = arith.constant 0 : index
    %c0_2 = arith.constant 0 : index
    %c0_3 = arith.constant 0 : index
    %1 = vector.load %arg2[%c0_1, %c0_2, %c0_3] : memref<1x128x128xbf16, #tpu.memory_space<vmem>>, vector<1x128x128xbf16>
    %2 = vector.shape_cast %1 : vector<1x128x128xbf16> to vector<128x128xbf16>
    %cst = arith.constant dense<0.000000e+00> : vector<64x128xf32>
    %3 = tpu.matmul %0, %2, %cst {dimension_numbers = #tpu.dot_dimension_numbers<[1], [0], [0], [1], [0, 0, 1, 1], [], []>} : vector<64x128xbf16>, vector<128x128xbf16>, vector<64x128xf32> -> vector<64x128xf32>
    %c0_4 = arith.constant 0 : index
    %c0_5 = arith.constant 0 : index
    %4 = vector.load %arg4[%c0_4, %c0_5] : memref<64x1xf32, #tpu.memory_space<vmem>>, vector<64x1xf32>
    %5 = vector.broadcast %4 : vector<64x1xf32> to vector<64x128xf32>
    %6 = arith.addf %3, %5 : vector<64x128xf32>
    %cst_6 = arith.constant 0.000000e+00 : f32
    %7 = vector.broadcast %cst_6 : f32 to vector<64x128xf32>
    %8 = arith.cmpf ogt, %6, %7 : vector<64x128xf32>
    %c0_7 = arith.constant 0 : index
    %9 = memref.load %arg7[%c0_7] : memref<2xf32, #tpu.memory_space<smem>>
    %10 = vector.broadcast %9 : f32 to vector<64x128xf32>
    %11 = arith.mulf %10, %6 : vector<64x128xf32>
    %12 = arith.select %8, %6, %11 : vector<64x128xi1>, vector<64x128xf32>
    %c0_8 = arith.constant 0 : index
    %c0_9 = arith.constant 0 : index
    %13 = vector.load %arg5[%c0_8, %c0_9] : memref<32x64xbf16, #tpu.memory_space<vmem>>, vector<32x64xbf16>
    %14 = arith.truncf %12 : vector<64x128xf32> to vector<64x128xbf16>
    %cst_10 = arith.constant dense<0.000000e+00> : vector<32x128xf32>
    %15 = tpu.matmul %13, %14, %cst_10 {dimension_numbers = #tpu.dot_dimension_numbers<[1], [0], [0], [1], [0, 0, 1, 1], [], []>} : vector<32x64xbf16>, vector<64x128xbf16>, vector<32x128xf32> -> vector<32x128xf32>
    %c0_11 = arith.constant 0 : index
    %c0_12 = arith.constant 0 : index
    %16 = vector.load %arg6[%c0_11, %c0_12] : memref<32x1xf32, #tpu.memory_space<vmem>>, vector<32x1xf32>
    %17 = vector.broadcast %16 : vector<32x1xf32> to vector<32x128xf32>
    %18 = arith.addf %15, %17 : vector<32x128xf32>
    %cst_13 = arith.constant 0.000000e+00 : f32
    %19 = vector.broadcast %cst_13 : f32 to vector<32x128xf32>
    %20 = arith.cmpf ogt, %18, %19 : vector<32x128xf32>
    %c1 = arith.constant 1 : index
    %21 = memref.load %arg7[%c1] : memref<2xf32, #tpu.memory_space<smem>>
    %22 = vector.broadcast %21 : f32 to vector<32x128xf32>
    %23 = arith.mulf %22, %18 : vector<32x128xf32>
    %24 = arith.select %20, %18, %23 : vector<32x128xi1>, vector<32x128xf32>
    %25 = arith.truncf %24 : vector<32x128xf32> to vector<32x128xbf16>
    %c0_14 = arith.constant 0 : index
    %c0_15 = arith.constant 0 : index
    %c0_16 = arith.constant 0 : index
    %26 = vector.load %arg8[%c0_14, %c0_15, %c0_16] : memref<1x32x128xbf16, #tpu.memory_space<vmem>>, vector<1x32x128xbf16>
    %27 = vector.shape_cast %26 : vector<1x32x128xbf16> to vector<32x128xbf16>
    %28 = vector.shape_cast %25 : vector<32x128xbf16> to vector<1x32x128xbf16>
    tpu.vector_store %arg8[%c0_14, %c0_15, %c0_16], %28 {strides = array<i32>} : memref<1x32x128xbf16, #tpu.memory_space<vmem>>, vector<1x32x128xbf16>,
    return
  }
  func.func @transform_0(%arg0: i32, %arg1: i32) -> (i32, i32, i32) {
    %c0_i32 = arith.constant 0 : i32
    %c0_i32_0 = arith.constant 0 : i32
    return %arg0, %c0_i32, %arg1 : i32, i32, i32
  }
  func.func @transform_1(%arg0: i32, %arg1: i32) -> (i32, i32) {
    %c0_i32 = arith.constant 0 : i32
    %c0_i32_0 = arith.constant 0 : i32
    %c0_i32_1 = arith.constant 0 : i32
    return %c0_i32, %c0_i32_0 : i32, i32
  }
  func.func @transform_2(%arg0: i32, %arg1: i32) -> (i32, i32) {
    %c0_i32 = arith.constant 0 : i32
    %c0_i32_0 = arith.constant 0 : i32
    %c0_i32_1 = arith.constant 0 : i32
    return %c0_i32, %c0_i32_0 : i32, i32
  }
  func.func @transform_3(%arg0: i32, %arg1: i32) -> (i32, i32) {
    %c0_i32 = arith.constant 0 : i32
    %c0_i32_0 = arith.constant 0 : i32
    %c0_i32_1 = arith.constant 0 : i32
    return %c0_i32, %c0_i32_0 : i32, i32
  }
  func.func @transform_4(%arg0: i32, %arg1: i32) -> (i32, i32) {
    %c0_i32 = arith.constant 0 : i32
    %c0_i32_0 = arith.constant 0 : i32
    %c0_i32_1 = arith.constant 0 : i32
    return %c0_i32, %c0_i32_0 : i32, i32
  }
  func.func @transform_5(%arg0: i32, %arg1: i32) -> i32 {
    %c0_i32 = arith.constant 0 : i32
    %c0_i32_0 = arith.constant 0 : i32
    return %c0_i32 : i32
  }
  func.func @transform_6(%arg0: i32, %arg1: i32) -> (i32, i32, i32) {
    %c0_i32 = arith.constant 0 : i32
    %c0_i32_0 = arith.constant 0 : i32
    return %arg0, %c0_i32, %arg1 : i32, i32, i32
  }
}

module attributes {stable_mosaic.version = 11 : i64} {
  func.func @_spatial_fused_kernel(%arg0: i32, %arg1: i32, %arg2: memref<1x32x256xbf16, #tpu.memory_space<vmem>>, %arg3: memref<1x32x256xbf16, #tpu.memory_space<vmem>>, %arg4: memref<7x32x224xbf16, #tpu.memory_space<vmem>>, %arg5: memref<32x1xf32, #tpu.memory_space<vmem>>, %arg6: memref<64x32xbf16, #tpu.memory_space<vmem>>, %arg7: memref<64x1xf32, #tpu.memory_space<vmem>>, %arg8: memref<2xf32, #tpu.memory_space<smem>>, %arg9: memref<1x64x256xbf16, #tpu.memory_space<vmem>>, %arg10: memref<32x256xf32, #tpu.memory_space<vmem>>, %arg11: memref<32x384xbf16, #tpu.memory_space<vmem>>) attributes {dimension_semantics = [#tpu.dimension_semantics<parallel>, #tpu.dimension_semantics<parallel>], iteration_bounds = array<i64: 2, 1>, scalar_prefetch = 0 : i64, scratch_operands = 2 : i64, tpu.core_type = #tpu.core_type<tc>, window_params = [{transform_indices = @transform_0, window_bounds = array<i64: 1, 32, 256>}, {transform_indices = @transform_1, window_bounds = array<i64: 1, 32, 256>}, {pipeline_mode = #tpu.pipeline_mode<synchronous>, transform_indices = @transform_2, window_bounds = array<i64: 7, 32, 224>}, {pipeline_mode = #tpu.pipeline_mode<synchronous>, transform_indices = @transform_3, window_bounds = array<i64: 32, 1>}, {pipeline_mode = #tpu.pipeline_mode<synchronous>, transform_indices = @transform_4, window_bounds = array<i64: 64, 32>}, {pipeline_mode = #tpu.pipeline_mode<synchronous>, transform_indices = @transform_5, window_bounds = array<i64: 64, 1>}, {transform_indices = @transform_6, window_bounds = array<i64: 2>}, {transform_indices = @transform_7, window_bounds = array<i64: 1, 64, 256>}]} {
    %c0 = arith.constant 0 : index
    %c0_0 = arith.constant 0 : index
    %c0_1 = arith.constant 0 : index
    %0 = vector.load %arg2[%c0, %c0_0, %c0_1] : memref<1x32x256xbf16, #tpu.memory_space<vmem>>, vector<1x32x256xbf16>
    %1 = vector.shape_cast %0 : vector<1x32x256xbf16> to vector<32x256xbf16>
    %c0_2 = arith.constant 0 : index
    %c0_3 = arith.constant 0 : index
    %2 = vector.load %arg11[%c0_2, %c0_3] : memref<32x384xbf16, #tpu.memory_space<vmem>>, vector<32x256xbf16>
    tpu.vector_store %arg11[%c0_2, %c0_3], %1 {strides = array<i32>} : memref<32x384xbf16, #tpu.memory_space<vmem>>, vector<32x256xbf16>,
    %c0_4 = arith.constant 0 : index
    %c0_5 = arith.constant 0 : index
    %c0_6 = arith.constant 0 : index
    %3 = vector.load %arg3[%c0_4, %c0_5, %c0_6] : memref<1x32x256xbf16, #tpu.memory_space<vmem>>, vector<1x32x128xbf16>
    %4 = vector.shape_cast %3 : vector<1x32x128xbf16> to vector<32x128xbf16>
    %c0_7 = arith.constant 0 : index
    %c256 = arith.constant 256 : index
    %5 = vector.load %arg11[%c0_7, %c256] : memref<32x384xbf16, #tpu.memory_space<vmem>>, vector<32x128xbf16>
    tpu.vector_store %arg11[%c0_7, %c256], %4 {strides = array<i32>} : memref<32x384xbf16, #tpu.memory_space<vmem>>, vector<32x128xbf16>,
    %c0_8 = arith.constant 0 : index
    %c0_9 = arith.constant 0 : index
    %6 = vector.load %arg11[%c0_8, %c0_9] : memref<32x384xbf16, #tpu.memory_space<vmem>>, vector<32x256xbf16>
    %c0_10 = arith.constant 0 : index
    %c1 = arith.constant 1 : index
    %7 = vector.load %arg11[%c0_10, %c1] : memref<32x384xbf16, #tpu.memory_space<vmem>>, vector<32x256xbf16>
    %c0_11 = arith.constant 0 : index
    %c2 = arith.constant 2 : index
    %8 = vector.load %arg11[%c0_11, %c2] : memref<32x384xbf16, #tpu.memory_space<vmem>>, vector<32x256xbf16>
    %c0_12 = arith.constant 0 : index
    %c3 = arith.constant 3 : index
    %9 = vector.load %arg11[%c0_12, %c3] : memref<32x384xbf16, #tpu.memory_space<vmem>>, vector<32x256xbf16>
    %c0_13 = arith.constant 0 : index
    %c4 = arith.constant 4 : index
    %10 = vector.load %arg11[%c0_13, %c4] : memref<32x384xbf16, #tpu.memory_space<vmem>>, vector<32x256xbf16>
    %c0_14 = arith.constant 0 : index
    %c5 = arith.constant 5 : index
    %11 = vector.load %arg11[%c0_14, %c5] : memref<32x384xbf16, #tpu.memory_space<vmem>>, vector<32x256xbf16>
    %c0_15 = arith.constant 0 : index
    %c6 = arith.constant 6 : index
    %12 = vector.load %arg11[%c0_15, %c6] : memref<32x384xbf16, #tpu.memory_space<vmem>>, vector<32x256xbf16>
    %13 = tpu.concatenate %6, %7, %8, %9, %10, %11, %12 in 0 : vector<32x256xbf16>, vector<32x256xbf16>, vector<32x256xbf16>, vector<32x256xbf16>, vector<32x256xbf16>, vector<32x256xbf16>, vector<32x256xbf16> -> vector<224x256xbf16>
    %c0_16 = arith.constant 0 : index
    %c0_17 = arith.constant 0 : index
    %c0_18 = arith.constant 0 : index
    %14 = vector.load %arg4[%c0_16, %c0_17, %c0_18] : memref<7x32x224xbf16, #tpu.memory_space<vmem>>, vector<1x32x224xbf16>
    %15 = vector.shape_cast %14 : vector<1x32x224xbf16> to vector<32x224xbf16>
    %cst = arith.constant dense<0.000000e+00> : vector<32x256xf32>
    %16 = tpu.matmul %15, %13, %cst {dimension_numbers = #tpu.dot_dimension_numbers<[1], [0], [0], [1], [0, 0, 1, 1], [], []>} : vector<32x224xbf16>, vector<224x256xbf16>, vector<32x256xf32> -> vector<32x256xf32>
    %c0_19 = arith.constant 0 : index
    %c0_20 = arith.constant 0 : index
    %17 = vector.load %arg10[%c0_19, %c0_20] : memref<32x256xf32, #tpu.memory_space<vmem>>, vector<32x256xf32>
    tpu.vector_store %arg10[%c0_19, %c0_20], %16 {strides = array<i32>} : memref<32x256xf32, #tpu.memory_space<vmem>>, vector<32x256xf32>,
    %c0_21 = arith.constant 0 : index
    %c16 = arith.constant 16 : index
    %18 = vector.load %arg11[%c0_21, %c16] : memref<32x384xbf16, #tpu.memory_space<vmem>>, vector<32x256xbf16>
    %c0_22 = arith.constant 0 : index
    %c17 = arith.constant 17 : index
    %19 = vector.load %arg11[%c0_22, %c17] : memref<32x384xbf16, #tpu.memory_space<vmem>>, vector<32x256xbf16>
    %c0_23 = arith.constant 0 : index
    %c18 = arith.constant 18 : index
    %20 = vector.load %arg11[%c0_23, %c18] : memref<32x384xbf16, #tpu.memory_space<vmem>>, vector<32x256xbf16>
    %c0_24 = arith.constant 0 : index
    %c19 = arith.constant 19 : index
    %21 = vector.load %arg11[%c0_24, %c19] : memref<32x384xbf16, #tpu.memory_space<vmem>>, vector<32x256xbf16>
    %c0_25 = arith.constant 0 : index
    %c20 = arith.constant 20 : index
    %22 = vector.load %arg11[%c0_25, %c20] : memref<32x384xbf16, #tpu.memory_space<vmem>>, vector<32x256xbf16>
    %c0_26 = arith.constant 0 : index
    %c21 = arith.constant 21 : index
    %23 = vector.load %arg11[%c0_26, %c21] : memref<32x384xbf16, #tpu.memory_space<vmem>>, vector<32x256xbf16>
    %c0_27 = arith.constant 0 : index
    %c22 = arith.constant 22 : index
    %24 = vector.load %arg11[%c0_27, %c22] : memref<32x384xbf16, #tpu.memory_space<vmem>>, vector<32x256xbf16>
    %25 = tpu.concatenate %18, %19, %20, %21, %22, %23, %24 in 0 : vector<32x256xbf16>, vector<32x256xbf16>, vector<32x256xbf16>, vector<32x256xbf16>, vector<32x256xbf16>, vector<32x256xbf16>, vector<32x256xbf16> -> vector<224x256xbf16>
    %c1_28 = arith.constant 1 : index
    %c0_29 = arith.constant 0 : index
    %c0_30 = arith.constant 0 : index
    %26 = vector.load %arg4[%c1_28, %c0_29, %c0_30] : memref<7x32x224xbf16, #tpu.memory_space<vmem>>, vector<1x32x224xbf16>
    %27 = vector.shape_cast %26 : vector<1x32x224xbf16> to vector<32x224xbf16>
    %cst_31 = arith.constant dense<0.000000e+00> : vector<32x256xf32>
    %28 = tpu.matmul %27, %25, %cst_31 {dimension_numbers = #tpu.dot_dimension_numbers<[1], [0], [0], [1], [0, 0, 1, 1], [], []>} : vector<32x224xbf16>, vector<224x256xbf16>, vector<32x256xf32> -> vector<32x256xf32>
    %c0_32 = arith.constant 0 : index
    %c0_33 = arith.constant 0 : index
    %29 = vector.load %arg10[%c0_32, %c0_33] : memref<32x256xf32, #tpu.memory_space<vmem>>, vector<32x256xf32>
    %30 = arith.addf %29, %28 : vector<32x256xf32>
    %c0_34 = arith.constant 0 : index
    %c0_35 = arith.constant 0 : index
    %31 = vector.load %arg10[%c0_34, %c0_35] : memref<32x256xf32, #tpu.memory_space<vmem>>, vector<32x256xf32>
    tpu.vector_store %arg10[%c0_34, %c0_35], %30 {strides = array<i32>} : memref<32x256xf32, #tpu.memory_space<vmem>>, vector<32x256xf32>,
    %c0_36 = arith.constant 0 : index
    %c32 = arith.constant 32 : index
    %32 = vector.load %arg11[%c0_36, %c32] : memref<32x384xbf16, #tpu.memory_space<vmem>>, vector<32x256xbf16>
    %c0_37 = arith.constant 0 : index
    %c33 = arith.constant 33 : index
    %33 = vector.load %arg11[%c0_37, %c33] : memref<32x384xbf16, #tpu.memory_space<vmem>>, vector<32x256xbf16>
    %c0_38 = arith.constant 0 : index
    %c34 = arith.constant 34 : index
    %34 = vector.load %arg11[%c0_38, %c34] : memref<32x384xbf16, #tpu.memory_space<vmem>>, vector<32x256xbf16>
    %c0_39 = arith.constant 0 : index
    %c35 = arith.constant 35 : index
    %35 = vector.load %arg11[%c0_39, %c35] : memref<32x384xbf16, #tpu.memory_space<vmem>>, vector<32x256xbf16>
    %c0_40 = arith.constant 0 : index
    %c36 = arith.constant 36 : index
    %36 = vector.load %arg11[%c0_40, %c36] : memref<32x384xbf16, #tpu.memory_space<vmem>>, vector<32x256xbf16>
    %c0_41 = arith.constant 0 : index
    %c37 = arith.constant 37 : index
    %37 = vector.load %arg11[%c0_41, %c37] : memref<32x384xbf16, #tpu.memory_space<vmem>>, vector<32x256xbf16>
    %c0_42 = arith.constant 0 : index
    %c38 = arith.constant 38 : index
    %38 = vector.load %arg11[%c0_42, %c38] : memref<32x384xbf16, #tpu.memory_space<vmem>>, vector<32x256xbf16>
    %39 = tpu.concatenate %32, %33, %34, %35, %36, %37, %38 in 0 : vector<32x256xbf16>, vector<32x256xbf16>, vector<32x256xbf16>, vector<32x256xbf16>, vector<32x256xbf16>, vector<32x256xbf16>, vector<32x256xbf16> -> vector<224x256xbf16>
    %c2_43 = arith.constant 2 : index
    %c0_44 = arith.constant 0 : index
    %c0_45 = arith.constant 0 : index
    %40 = vector.load %arg4[%c2_43, %c0_44, %c0_45] : memref<7x32x224xbf16, #tpu.memory_space<vmem>>, vector<1x32x224xbf16>
    %41 = vector.shape_cast %40 : vector<1x32x224xbf16> to vector<32x224xbf16>
    %cst_46 = arith.constant dense<0.000000e+00> : vector<32x256xf32>
    %42 = tpu.matmul %41, %39, %cst_46 {dimension_numbers = #tpu.dot_dimension_numbers<[1], [0], [0], [1], [0, 0, 1, 1], [], []>} : vector<32x224xbf16>, vector<224x256xbf16>, vector<32x256xf32> -> vector<32x256xf32>
    %c0_47 = arith.constant 0 : index
    %c0_48 = arith.constant 0 : index
    %43 = vector.load %arg10[%c0_47, %c0_48] : memref<32x256xf32, #tpu.memory_space<vmem>>, vector<32x256xf32>
    %44 = arith.addf %43, %42 : vector<32x256xf32>
    %c0_49 = arith.constant 0 : index
    %c0_50 = arith.constant 0 : index
    %45 = vector.load %arg10[%c0_49, %c0_50] : memref<32x256xf32, #tpu.memory_space<vmem>>, vector<32x256xf32>
    tpu.vector_store %arg10[%c0_49, %c0_50], %44 {strides = array<i32>} : memref<32x256xf32, #tpu.memory_space<vmem>>, vector<32x256xf32>,
    %c0_51 = arith.constant 0 : index
    %c48 = arith.constant 48 : index
    %46 = vector.load %arg11[%c0_51, %c48] : memref<32x384xbf16, #tpu.memory_space<vmem>>, vector<32x256xbf16>
    %c0_52 = arith.constant 0 : index
    %c49 = arith.constant 49 : index
    %47 = vector.load %arg11[%c0_52, %c49] : memref<32x384xbf16, #tpu.memory_space<vmem>>, vector<32x256xbf16>
    %c0_53 = arith.constant 0 : index
    %c50 = arith.constant 50 : index
    %48 = vector.load %arg11[%c0_53, %c50] : memref<32x384xbf16, #tpu.memory_space<vmem>>, vector<32x256xbf16>
    %c0_54 = arith.constant 0 : index
    %c51 = arith.constant 51 : index
    %49 = vector.load %arg11[%c0_54, %c51] : memref<32x384xbf16, #tpu.memory_space<vmem>>, vector<32x256xbf16>
    %c0_55 = arith.constant 0 : index
    %c52 = arith.constant 52 : index
    %50 = vector.load %arg11[%c0_55, %c52] : memref<32x384xbf16, #tpu.memory_space<vmem>>, vector<32x256xbf16>
    %c0_56 = arith.constant 0 : index
    %c53 = arith.constant 53 : index
    %51 = vector.load %arg11[%c0_56, %c53] : memref<32x384xbf16, #tpu.memory_space<vmem>>, vector<32x256xbf16>
    %c0_57 = arith.constant 0 : index
    %c54 = arith.constant 54 : index
    %52 = vector.load %arg11[%c0_57, %c54] : memref<32x384xbf16, #tpu.memory_space<vmem>>, vector<32x256xbf16>
    %53 = tpu.concatenate %46, %47, %48, %49, %50, %51, %52 in 0 : vector<32x256xbf16>, vector<32x256xbf16>, vector<32x256xbf16>, vector<32x256xbf16>, vector<32x256xbf16>, vector<32x256xbf16>, vector<32x256xbf16> -> vector<224x256xbf16>
    %c3_58 = arith.constant 3 : index
    %c0_59 = arith.constant 0 : index
    %c0_60 = arith.constant 0 : index
    %54 = vector.load %arg4[%c3_58, %c0_59, %c0_60] : memref<7x32x224xbf16, #tpu.memory_space<vmem>>, vector<1x32x224xbf16>
    %55 = vector.shape_cast %54 : vector<1x32x224xbf16> to vector<32x224xbf16>
    %cst_61 = arith.constant dense<0.000000e+00> : vector<32x256xf32>
    %56 = tpu.matmul %55, %53, %cst_61 {dimension_numbers = #tpu.dot_dimension_numbers<[1], [0], [0], [1], [0, 0, 1, 1], [], []>} : vector<32x224xbf16>, vector<224x256xbf16>, vector<32x256xf32> -> vector<32x256xf32>
    %c0_62 = arith.constant 0 : index
    %c0_63 = arith.constant 0 : index
    %57 = vector.load %arg10[%c0_62, %c0_63] : memref<32x256xf32, #tpu.memory_space<vmem>>, vector<32x256xf32>
    %58 = arith.addf %57, %56 : vector<32x256xf32>
    %c0_64 = arith.constant 0 : index
    %c0_65 = arith.constant 0 : index
    %59 = vector.load %arg10[%c0_64, %c0_65] : memref<32x256xf32, #tpu.memory_space<vmem>>, vector<32x256xf32>
    tpu.vector_store %arg10[%c0_64, %c0_65], %58 {strides = array<i32>} : memref<32x256xf32, #tpu.memory_space<vmem>>, vector<32x256xf32>,
    %c0_66 = arith.constant 0 : index
    %c64 = arith.constant 64 : index
    %60 = vector.load %arg11[%c0_66, %c64] : memref<32x384xbf16, #tpu.memory_space<vmem>>, vector<32x256xbf16>
    %c0_67 = arith.constant 0 : index
    %c65 = arith.constant 65 : index
    %61 = vector.load %arg11[%c0_67, %c65] : memref<32x384xbf16, #tpu.memory_space<vmem>>, vector<32x256xbf16>
    %c0_68 = arith.constant 0 : index
    %c66 = arith.constant 66 : index
    %62 = vector.load %arg11[%c0_68, %c66] : memref<32x384xbf16, #tpu.memory_space<vmem>>, vector<32x256xbf16>
    %c0_69 = arith.constant 0 : index
    %c67 = arith.constant 67 : index
    %63 = vector.load %arg11[%c0_69, %c67] : memref<32x384xbf16, #tpu.memory_space<vmem>>, vector<32x256xbf16>
    %c0_70 = arith.constant 0 : index
    %c68 = arith.constant 68 : index
    %64 = vector.load %arg11[%c0_70, %c68] : memref<32x384xbf16, #tpu.memory_space<vmem>>, vector<32x256xbf16>
    %c0_71 = arith.constant 0 : index
    %c69 = arith.constant 69 : index
    %65 = vector.load %arg11[%c0_71, %c69] : memref<32x384xbf16, #tpu.memory_space<vmem>>, vector<32x256xbf16>
    %c0_72 = arith.constant 0 : index
    %c70 = arith.constant 70 : index
    %66 = vector.load %arg11[%c0_72, %c70] : memref<32x384xbf16, #tpu.memory_space<vmem>>, vector<32x256xbf16>
    %67 = tpu.concatenate %60, %61, %62, %63, %64, %65, %66 in 0 : vector<32x256xbf16>, vector<32x256xbf16>, vector<32x256xbf16>, vector<32x256xbf16>, vector<32x256xbf16>, vector<32x256xbf16>, vector<32x256xbf16> -> vector<224x256xbf16>
    %c4_73 = arith.constant 4 : index
    %c0_74 = arith.constant 0 : index
    %c0_75 = arith.constant 0 : index
    %68 = vector.load %arg4[%c4_73, %c0_74, %c0_75] : memref<7x32x224xbf16, #tpu.memory_space<vmem>>, vector<1x32x224xbf16>
    %69 = vector.shape_cast %68 : vector<1x32x224xbf16> to vector<32x224xbf16>
    %cst_76 = arith.constant dense<0.000000e+00> : vector<32x256xf32>
    %70 = tpu.matmul %69, %67, %cst_76 {dimension_numbers = #tpu.dot_dimension_numbers<[1], [0], [0], [1], [0, 0, 1, 1], [], []>} : vector<32x224xbf16>, vector<224x256xbf16>, vector<32x256xf32> -> vector<32x256xf32>
    %c0_77 = arith.constant 0 : index
    %c0_78 = arith.constant 0 : index
    %71 = vector.load %arg10[%c0_77, %c0_78] : memref<32x256xf32, #tpu.memory_space<vmem>>, vector<32x256xf32>
    %72 = arith.addf %71, %70 : vector<32x256xf32>
    %c0_79 = arith.constant 0 : index
    %c0_80 = arith.constant 0 : index
    %73 = vector.load %arg10[%c0_79, %c0_80] : memref<32x256xf32, #tpu.memory_space<vmem>>, vector<32x256xf32>
    tpu.vector_store %arg10[%c0_79, %c0_80], %72 {strides = array<i32>} : memref<32x256xf32, #tpu.memory_space<vmem>>, vector<32x256xf32>,
    %c0_81 = arith.constant 0 : index
    %c80 = arith.constant 80 : index
    %74 = vector.load %arg11[%c0_81, %c80] : memref<32x384xbf16, #tpu.memory_space<vmem>>, vector<32x256xbf16>
    %c0_82 = arith.constant 0 : index
    %c81 = arith.constant 81 : index
    %75 = vector.load %arg11[%c0_82, %c81] : memref<32x384xbf16, #tpu.memory_space<vmem>>, vector<32x256xbf16>
    %c0_83 = arith.constant 0 : index
    %c82 = arith.constant 82 : index
    %76 = vector.load %arg11[%c0_83, %c82] : memref<32x384xbf16, #tpu.memory_space<vmem>>, vector<32x256xbf16>
    %c0_84 = arith.constant 0 : index
    %c83 = arith.constant 83 : index
    %77 = vector.load %arg11[%c0_84, %c83] : memref<32x384xbf16, #tpu.memory_space<vmem>>, vector<32x256xbf16>
    %c0_85 = arith.constant 0 : index
    %c84 = arith.constant 84 : index
    %78 = vector.load %arg11[%c0_85, %c84] : memref<32x384xbf16, #tpu.memory_space<vmem>>, vector<32x256xbf16>
    %c0_86 = arith.constant 0 : index
    %c85 = arith.constant 85 : index
    %79 = vector.load %arg11[%c0_86, %c85] : memref<32x384xbf16, #tpu.memory_space<vmem>>, vector<32x256xbf16>
    %c0_87 = arith.constant 0 : index
    %c86 = arith.constant 86 : index
    %80 = vector.load %arg11[%c0_87, %c86] : memref<32x384xbf16, #tpu.memory_space<vmem>>, vector<32x256xbf16>
    %81 = tpu.concatenate %74, %75, %76, %77, %78, %79, %80 in 0 : vector<32x256xbf16>, vector<32x256xbf16>, vector<32x256xbf16>, vector<32x256xbf16>, vector<32x256xbf16>, vector<32x256xbf16>, vector<32x256xbf16> -> vector<224x256xbf16>
    %c5_88 = arith.constant 5 : index
    %c0_89 = arith.constant 0 : index
    %c0_90 = arith.constant 0 : index
    %82 = vector.load %arg4[%c5_88, %c0_89, %c0_90] : memref<7x32x224xbf16, #tpu.memory_space<vmem>>, vector<1x32x224xbf16>
    %83 = vector.shape_cast %82 : vector<1x32x224xbf16> to vector<32x224xbf16>
    %cst_91 = arith.constant dense<0.000000e+00> : vector<32x256xf32>
    %84 = tpu.matmul %83, %81, %cst_91 {dimension_numbers = #tpu.dot_dimension_numbers<[1], [0], [0], [1], [0, 0, 1, 1], [], []>} : vector<32x224xbf16>, vector<224x256xbf16>, vector<32x256xf32> -> vector<32x256xf32>
    %c0_92 = arith.constant 0 : index
    %c0_93 = arith.constant 0 : index
    %85 = vector.load %arg10[%c0_92, %c0_93] : memref<32x256xf32, #tpu.memory_space<vmem>>, vector<32x256xf32>
    %86 = arith.addf %85, %84 : vector<32x256xf32>
    %c0_94 = arith.constant 0 : index
    %c0_95 = arith.constant 0 : index
    %87 = vector.load %arg10[%c0_94, %c0_95] : memref<32x256xf32, #tpu.memory_space<vmem>>, vector<32x256xf32>
    tpu.vector_store %arg10[%c0_94, %c0_95], %86 {strides = array<i32>} : memref<32x256xf32, #tpu.memory_space<vmem>>, vector<32x256xf32>,
    %c0_96 = arith.constant 0 : index
    %c96 = arith.constant 96 : index
    %88 = vector.load %arg11[%c0_96, %c96] : memref<32x384xbf16, #tpu.memory_space<vmem>>, vector<32x256xbf16>
    %c0_97 = arith.constant 0 : index
    %c97 = arith.constant 97 : index
    %89 = vector.load %arg11[%c0_97, %c97] : memref<32x384xbf16, #tpu.memory_space<vmem>>, vector<32x256xbf16>
    %c0_98 = arith.constant 0 : index
    %c98 = arith.constant 98 : index
    %90 = vector.load %arg11[%c0_98, %c98] : memref<32x384xbf16, #tpu.memory_space<vmem>>, vector<32x256xbf16>
    %c0_99 = arith.constant 0 : index
    %c99 = arith.constant 99 : index
    %91 = vector.load %arg11[%c0_99, %c99] : memref<32x384xbf16, #tpu.memory_space<vmem>>, vector<32x256xbf16>
    %c0_100 = arith.constant 0 : index
    %c100 = arith.constant 100 : index
    %92 = vector.load %arg11[%c0_100, %c100] : memref<32x384xbf16, #tpu.memory_space<vmem>>, vector<32x256xbf16>
    %c0_101 = arith.constant 0 : index
    %c101 = arith.constant 101 : index
    %93 = vector.load %arg11[%c0_101, %c101] : memref<32x384xbf16, #tpu.memory_space<vmem>>, vector<32x256xbf16>
    %c0_102 = arith.constant 0 : index
    %c102 = arith.constant 102 : index
    %94 = vector.load %arg11[%c0_102, %c102] : memref<32x384xbf16, #tpu.memory_space<vmem>>, vector<32x256xbf16>
    %95 = tpu.concatenate %88, %89, %90, %91, %92, %93, %94 in 0 : vector<32x256xbf16>, vector<32x256xbf16>, vector<32x256xbf16>, vector<32x256xbf16>, vector<32x256xbf16>, vector<32x256xbf16>, vector<32x256xbf16> -> vector<224x256xbf16>
    %c6_103 = arith.constant 6 : index
    %c0_104 = arith.constant 0 : index
    %c0_105 = arith.constant 0 : index
    %96 = vector.load %arg4[%c6_103, %c0_104, %c0_105] : memref<7x32x224xbf16, #tpu.memory_space<vmem>>, vector<1x32x224xbf16>
    %97 = vector.shape_cast %96 : vector<1x32x224xbf16> to vector<32x224xbf16>
    %cst_106 = arith.constant dense<0.000000e+00> : vector<32x256xf32>
    %98 = tpu.matmul %97, %95, %cst_106 {dimension_numbers = #tpu.dot_dimension_numbers<[1], [0], [0], [1], [0, 0, 1, 1], [], []>} : vector<32x224xbf16>, vector<224x256xbf16>, vector<32x256xf32> -> vector<32x256xf32>
    %c0_107 = arith.constant 0 : index
    %c0_108 = arith.constant 0 : index
    %99 = vector.load %arg10[%c0_107, %c0_108] : memref<32x256xf32, #tpu.memory_space<vmem>>, vector<32x256xf32>
    %100 = arith.addf %99, %98 : vector<32x256xf32>
    %c0_109 = arith.constant 0 : index
    %c0_110 = arith.constant 0 : index
    %101 = vector.load %arg10[%c0_109, %c0_110] : memref<32x256xf32, #tpu.memory_space<vmem>>, vector<32x256xf32>
    tpu.vector_store %arg10[%c0_109, %c0_110], %100 {strides = array<i32>} : memref<32x256xf32, #tpu.memory_space<vmem>>, vector<32x256xf32>,
    %c0_111 = arith.constant 0 : index
    %c0_112 = arith.constant 0 : index
    %102 = vector.load %arg10[%c0_111, %c0_112] : memref<32x256xf32, #tpu.memory_space<vmem>>, vector<32x256xf32>
    %c0_113 = arith.constant 0 : index
    %c0_114 = arith.constant 0 : index
    %103 = vector.load %arg5[%c0_113, %c0_114] : memref<32x1xf32, #tpu.memory_space<vmem>>, vector<32x1xf32>
    %104 = vector.broadcast %103 : vector<32x1xf32> to vector<32x256xf32>
    %105 = arith.addf %102, %104 : vector<32x256xf32>
    %cst_115 = arith.constant 0.000000e+00 : f32
    %106 = vector.broadcast %cst_115 : f32 to vector<32x256xf32>
    %107 = arith.cmpf ogt, %105, %106 : vector<32x256xf32>
    %c0_116 = arith.constant 0 : index
    %108 = memref.load %arg8[%c0_116] : memref<2xf32, #tpu.memory_space<smem>>
    %109 = vector.broadcast %108 : f32 to vector<32x256xf32>
    %110 = arith.mulf %109, %105 : vector<32x256xf32>
    %111 = arith.select %107, %105, %110 : vector<32x256xi1>, vector<32x256xf32>
    %c0_117 = arith.constant 0 : index
    %c0_118 = arith.constant 0 : index
    %112 = vector.load %arg6[%c0_117, %c0_118] : memref<64x32xbf16, #tpu.memory_space<vmem>>, vector<64x32xbf16>
    %113 = arith.truncf %111 : vector<32x256xf32> to vector<32x256xbf16>
    %cst_119 = arith.constant dense<0.000000e+00> : vector<64x256xf32>
    %114 = tpu.matmul %112, %113, %cst_119 {dimension_numbers = #tpu.dot_dimension_numbers<[1], [0], [0], [1], [0, 0, 1, 1], [], []>} : vector<64x32xbf16>, vector<32x256xbf16>, vector<64x256xf32> -> vector<64x256xf32>
    %c0_120 = arith.constant 0 : index
    %c0_121 = arith.constant 0 : index
    %115 = vector.load %arg7[%c0_120, %c0_121] : memref<64x1xf32, #tpu.memory_space<vmem>>, vector<64x1xf32>
    %116 = vector.broadcast %115 : vector<64x1xf32> to vector<64x256xf32>
    %117 = arith.addf %114, %116 : vector<64x256xf32>
    %cst_122 = arith.constant 0.000000e+00 : f32
    %118 = vector.broadcast %cst_122 : f32 to vector<64x256xf32>
    %119 = arith.cmpf ogt, %117, %118 : vector<64x256xf32>
    %c1_123 = arith.constant 1 : index
    %120 = memref.load %arg8[%c1_123] : memref<2xf32, #tpu.memory_space<smem>>
    %121 = vector.broadcast %120 : f32 to vector<64x256xf32>
    %122 = arith.mulf %121, %117 : vector<64x256xf32>
    %123 = arith.select %119, %117, %122 : vector<64x256xi1>, vector<64x256xf32>
    %124 = arith.truncf %123 : vector<64x256xf32> to vector<64x256xbf16>
    %c0_124 = arith.constant 0 : index
    %c0_125 = arith.constant 0 : index
    %c0_126 = arith.constant 0 : index
    %125 = vector.load %arg9[%c0_124, %c0_125, %c0_126] : memref<1x64x256xbf16, #tpu.memory_space<vmem>>, vector<1x64x256xbf16>
    %126 = vector.shape_cast %125 : vector<1x64x256xbf16> to vector<64x256xbf16>
    %127 = vector.shape_cast %124 : vector<64x256xbf16> to vector<1x64x256xbf16>
    tpu.vector_store %arg9[%c0_124, %c0_125, %c0_126], %127 {strides = array<i32>} : memref<1x64x256xbf16, #tpu.memory_space<vmem>>, vector<1x64x256xbf16>,
    return
  }
  func.func @transform_0(%arg0: i32, %arg1: i32) -> (i32, i32, i32) {
    %c0_i32 = arith.constant 0 : i32
    %c0_i32_0 = arith.constant 0 : i32
    return %arg0, %c0_i32, %arg1 : i32, i32, i32
  }
  func.func @transform_1(%arg0: i32, %arg1: i32) -> (i32, i32, i32) {
    %c1_i32 = arith.constant 1 : i32
    %0 = arith.addi %arg1, %c1_i32 : i32
    %c0_i32 = arith.constant 0 : i32
    %c0_i32_0 = arith.constant 0 : i32
    return %arg0, %c0_i32, %0 : i32, i32, i32
  }
  func.func @transform_2(%arg0: i32, %arg1: i32) -> (i32, i32, i32) {
    %c0_i32 = arith.constant 0 : i32
    %c0_i32_0 = arith.constant 0 : i32
    %c0_i32_1 = arith.constant 0 : i32
    %c0_i32_2 = arith.constant 0 : i32
    return %c0_i32, %c0_i32_0, %c0_i32_1 : i32, i32, i32
  }
  func.func @transform_3(%arg0: i32, %arg1: i32) -> (i32, i32) {
    %c0_i32 = arith.constant 0 : i32
    %c0_i32_0 = arith.constant 0 : i32
    %c0_i32_1 = arith.constant 0 : i32
    return %c0_i32, %c0_i32_0 : i32, i32
  }
  func.func @transform_4(%arg0: i32, %arg1: i32) -> (i32, i32) {
    %c0_i32 = arith.constant 0 : i32
    %c0_i32_0 = arith.constant 0 : i32
    %c0_i32_1 = arith.constant 0 : i32
    return %c0_i32, %c0_i32_0 : i32, i32
  }
  func.func @transform_5(%arg0: i32, %arg1: i32) -> (i32, i32) {
    %c0_i32 = arith.constant 0 : i32
    %c0_i32_0 = arith.constant 0 : i32
    %c0_i32_1 = arith.constant 0 : i32
    return %c0_i32, %c0_i32_0 : i32, i32
  }
  func.func @transform_6(%arg0: i32, %arg1: i32) -> i32 {
    %c0_i32 = arith.constant 0 : i32
    %c0_i32_0 = arith.constant 0 : i32
    return %c0_i32 : i32
  }
  func.func @transform_7(%arg0: i32, %arg1: i32) -> (i32, i32, i32) {
    %c0_i32 = arith.constant 0 : i32
    %c0_i32_0 = arith.constant 0 : i32
    return %arg0, %c0_i32, %arg1 : i32, i32, i32
  }
}

module attributes {stable_mosaic.version = 11 : i64} {
  func.func @_spatial_fused_kernel(%arg0: i32, %arg1: i32, %arg2: memref<1x64x256xbf16, #tpu.memory_space<vmem>>, %arg3: memref<1x64x256xbf16, #tpu.memory_space<vmem>>, %arg4: memref<5x8x320xbf16, #tpu.memory_space<vmem>>, %arg5: memref<8x1xf32, #tpu.memory_space<vmem>>, %arg6: memref<1x8x256xbf16, #tpu.memory_space<vmem>>, %arg7: memref<8x256xf32, #tpu.memory_space<vmem>>, %arg8: memref<64x384xbf16, #tpu.memory_space<vmem>>) attributes {dimension_semantics = [#tpu.dimension_semantics<parallel>, #tpu.dimension_semantics<parallel>], iteration_bounds = array<i64: 2, 1>, scalar_prefetch = 0 : i64, scratch_operands = 2 : i64, tpu.core_type = #tpu.core_type<tc>, window_params = [{transform_indices = @transform_0, window_bounds = array<i64: 1, 64, 256>}, {transform_indices = @transform_1, window_bounds = array<i64: 1, 64, 256>}, {pipeline_mode = #tpu.pipeline_mode<synchronous>, transform_indices = @transform_2, window_bounds = array<i64: 5, 8, 320>}, {pipeline_mode = #tpu.pipeline_mode<synchronous>, transform_indices = @transform_3, window_bounds = array<i64: 8, 1>}, {transform_indices = @transform_4, window_bounds = array<i64: 1, 8, 256>}]} {
    %c0 = arith.constant 0 : index
    %c0_0 = arith.constant 0 : index
    %c0_1 = arith.constant 0 : index
    %0 = vector.load %arg2[%c0, %c0_0, %c0_1] : memref<1x64x256xbf16, #tpu.memory_space<vmem>>, vector<1x64x256xbf16>
    %1 = vector.shape_cast %0 : vector<1x64x256xbf16> to vector<64x256xbf16>
    %c0_2 = arith.constant 0 : index
    %c0_3 = arith.constant 0 : index
    %2 = vector.load %arg8[%c0_2, %c0_3] : memref<64x384xbf16, #tpu.memory_space<vmem>>, vector<64x256xbf16>
    tpu.vector_store %arg8[%c0_2, %c0_3], %1 {strides = array<i32>} : memref<64x384xbf16, #tpu.memory_space<vmem>>, vector<64x256xbf16>,
    %c0_4 = arith.constant 0 : index
    %c0_5 = arith.constant 0 : index
    %c0_6 = arith.constant 0 : index
    %3 = vector.load %arg3[%c0_4, %c0_5, %c0_6] : memref<1x64x256xbf16, #tpu.memory_space<vmem>>, vector<1x64x128xbf16>
    %4 = vector.shape_cast %3 : vector<1x64x128xbf16> to vector<64x128xbf16>
    %c0_7 = arith.constant 0 : index
    %c256 = arith.constant 256 : index
    %5 = vector.load %arg8[%c0_7, %c256] : memref<64x384xbf16, #tpu.memory_space<vmem>>, vector<64x128xbf16>
    tpu.vector_store %arg8[%c0_7, %c256], %4 {strides = array<i32>} : memref<64x384xbf16, #tpu.memory_space<vmem>>, vector<64x128xbf16>,
    %c0_8 = arith.constant 0 : index
    %c0_9 = arith.constant 0 : index
    %6 = vector.load %arg8[%c0_8, %c0_9] : memref<64x384xbf16, #tpu.memory_space<vmem>>, vector<64x256xbf16>
    %c0_10 = arith.constant 0 : index
    %c1 = arith.constant 1 : index
    %7 = vector.load %arg8[%c0_10, %c1] : memref<64x384xbf16, #tpu.memory_space<vmem>>, vector<64x256xbf16>
    %c0_11 = arith.constant 0 : index
    %c2 = arith.constant 2 : index
    %8 = vector.load %arg8[%c0_11, %c2] : memref<64x384xbf16, #tpu.memory_space<vmem>>, vector<64x256xbf16>
    %c0_12 = arith.constant 0 : index
    %c3 = arith.constant 3 : index
    %9 = vector.load %arg8[%c0_12, %c3] : memref<64x384xbf16, #tpu.memory_space<vmem>>, vector<64x256xbf16>
    %c0_13 = arith.constant 0 : index
    %c4 = arith.constant 4 : index
    %10 = vector.load %arg8[%c0_13, %c4] : memref<64x384xbf16, #tpu.memory_space<vmem>>, vector<64x256xbf16>
    %11 = tpu.concatenate %6, %7, %8, %9, %10 in 0 : vector<64x256xbf16>, vector<64x256xbf16>, vector<64x256xbf16>, vector<64x256xbf16>, vector<64x256xbf16> -> vector<320x256xbf16>
    %c0_14 = arith.constant 0 : index
    %c0_15 = arith.constant 0 : index
    %c0_16 = arith.constant 0 : index
    %12 = vector.load %arg4[%c0_14, %c0_15, %c0_16] : memref<5x8x320xbf16, #tpu.memory_space<vmem>>, vector<1x8x320xbf16>
    %13 = vector.shape_cast %12 : vector<1x8x320xbf16> to vector<8x320xbf16>
    %cst = arith.constant dense<0.000000e+00> : vector<8x256xf32>
    %14 = tpu.matmul %13, %11, %cst {dimension_numbers = #tpu.dot_dimension_numbers<[1], [0], [0], [1], [0, 0, 1, 1], [], []>} : vector<8x320xbf16>, vector<320x256xbf16>, vector<8x256xf32> -> vector<8x256xf32>
    %c0_17 = arith.constant 0 : index
    %c0_18 = arith.constant 0 : index
    %15 = vector.load %arg7[%c0_17, %c0_18] : memref<8x256xf32, #tpu.memory_space<vmem>>, vector<8x256xf32>
    tpu.vector_store %arg7[%c0_17, %c0_18], %14 {strides = array<i32>} : memref<8x256xf32, #tpu.memory_space<vmem>>, vector<8x256xf32>,
    %c0_19 = arith.constant 0 : index
    %c16 = arith.constant 16 : index
    %16 = vector.load %arg8[%c0_19, %c16] : memref<64x384xbf16, #tpu.memory_space<vmem>>, vector<64x256xbf16>
    %c0_20 = arith.constant 0 : index
    %c17 = arith.constant 17 : index
    %17 = vector.load %arg8[%c0_20, %c17] : memref<64x384xbf16, #tpu.memory_space<vmem>>, vector<64x256xbf16>
    %c0_21 = arith.constant 0 : index
    %c18 = arith.constant 18 : index
    %18 = vector.load %arg8[%c0_21, %c18] : memref<64x384xbf16, #tpu.memory_space<vmem>>, vector<64x256xbf16>
    %c0_22 = arith.constant 0 : index
    %c19 = arith.constant 19 : index
    %19 = vector.load %arg8[%c0_22, %c19] : memref<64x384xbf16, #tpu.memory_space<vmem>>, vector<64x256xbf16>
    %c0_23 = arith.constant 0 : index
    %c20 = arith.constant 20 : index
    %20 = vector.load %arg8[%c0_23, %c20] : memref<64x384xbf16, #tpu.memory_space<vmem>>, vector<64x256xbf16>
    %21 = tpu.concatenate %16, %17, %18, %19, %20 in 0 : vector<64x256xbf16>, vector<64x256xbf16>, vector<64x256xbf16>, vector<64x256xbf16>, vector<64x256xbf16> -> vector<320x256xbf16>
    %c1_24 = arith.constant 1 : index
    %c0_25 = arith.constant 0 : index
    %c0_26 = arith.constant 0 : index
    %22 = vector.load %arg4[%c1_24, %c0_25, %c0_26] : memref<5x8x320xbf16, #tpu.memory_space<vmem>>, vector<1x8x320xbf16>
    %23 = vector.shape_cast %22 : vector<1x8x320xbf16> to vector<8x320xbf16>
    %cst_27 = arith.constant dense<0.000000e+00> : vector<8x256xf32>
    %24 = tpu.matmul %23, %21, %cst_27 {dimension_numbers = #tpu.dot_dimension_numbers<[1], [0], [0], [1], [0, 0, 1, 1], [], []>} : vector<8x320xbf16>, vector<320x256xbf16>, vector<8x256xf32> -> vector<8x256xf32>
    %c0_28 = arith.constant 0 : index
    %c0_29 = arith.constant 0 : index
    %25 = vector.load %arg7[%c0_28, %c0_29] : memref<8x256xf32, #tpu.memory_space<vmem>>, vector<8x256xf32>
    %26 = arith.addf %25, %24 : vector<8x256xf32>
    %c0_30 = arith.constant 0 : index
    %c0_31 = arith.constant 0 : index
    %27 = vector.load %arg7[%c0_30, %c0_31] : memref<8x256xf32, #tpu.memory_space<vmem>>, vector<8x256xf32>
    tpu.vector_store %arg7[%c0_30, %c0_31], %26 {strides = array<i32>} : memref<8x256xf32, #tpu.memory_space<vmem>>, vector<8x256xf32>,
    %c0_32 = arith.constant 0 : index
    %c32 = arith.constant 32 : index
    %28 = vector.load %arg8[%c0_32, %c32] : memref<64x384xbf16, #tpu.memory_space<vmem>>, vector<64x256xbf16>
    %c0_33 = arith.constant 0 : index
    %c33 = arith.constant 33 : index
    %29 = vector.load %arg8[%c0_33, %c33] : memref<64x384xbf16, #tpu.memory_space<vmem>>, vector<64x256xbf16>
    %c0_34 = arith.constant 0 : index
    %c34 = arith.constant 34 : index
    %30 = vector.load %arg8[%c0_34, %c34] : memref<64x384xbf16, #tpu.memory_space<vmem>>, vector<64x256xbf16>
    %c0_35 = arith.constant 0 : index
    %c35 = arith.constant 35 : index
    %31 = vector.load %arg8[%c0_35, %c35] : memref<64x384xbf16, #tpu.memory_space<vmem>>, vector<64x256xbf16>
    %c0_36 = arith.constant 0 : index
    %c36 = arith.constant 36 : index
    %32 = vector.load %arg8[%c0_36, %c36] : memref<64x384xbf16, #tpu.memory_space<vmem>>, vector<64x256xbf16>
    %33 = tpu.concatenate %28, %29, %30, %31, %32 in 0 : vector<64x256xbf16>, vector<64x256xbf16>, vector<64x256xbf16>, vector<64x256xbf16>, vector<64x256xbf16> -> vector<320x256xbf16>
    %c2_37 = arith.constant 2 : index
    %c0_38 = arith.constant 0 : index
    %c0_39 = arith.constant 0 : index
    %34 = vector.load %arg4[%c2_37, %c0_38, %c0_39] : memref<5x8x320xbf16, #tpu.memory_space<vmem>>, vector<1x8x320xbf16>
    %35 = vector.shape_cast %34 : vector<1x8x320xbf16> to vector<8x320xbf16>
    %cst_40 = arith.constant dense<0.000000e+00> : vector<8x256xf32>
    %36 = tpu.matmul %35, %33, %cst_40 {dimension_numbers = #tpu.dot_dimension_numbers<[1], [0], [0], [1], [0, 0, 1, 1], [], []>} : vector<8x320xbf16>, vector<320x256xbf16>, vector<8x256xf32> -> vector<8x256xf32>
    %c0_41 = arith.constant 0 : index
    %c0_42 = arith.constant 0 : index
    %37 = vector.load %arg7[%c0_41, %c0_42] : memref<8x256xf32, #tpu.memory_space<vmem>>, vector<8x256xf32>
    %38 = arith.addf %37, %36 : vector<8x256xf32>
    %c0_43 = arith.constant 0 : index
    %c0_44 = arith.constant 0 : index
    %39 = vector.load %arg7[%c0_43, %c0_44] : memref<8x256xf32, #tpu.memory_space<vmem>>, vector<8x256xf32>
    tpu.vector_store %arg7[%c0_43, %c0_44], %38 {strides = array<i32>} : memref<8x256xf32, #tpu.memory_space<vmem>>, vector<8x256xf32>,
    %c0_45 = arith.constant 0 : index
    %c48 = arith.constant 48 : index
    %40 = vector.load %arg8[%c0_45, %c48] : memref<64x384xbf16, #tpu.memory_space<vmem>>, vector<64x256xbf16>
    %c0_46 = arith.constant 0 : index
    %c49 = arith.constant 49 : index
    %41 = vector.load %arg8[%c0_46, %c49] : memref<64x384xbf16, #tpu.memory_space<vmem>>, vector<64x256xbf16>
    %c0_47 = arith.constant 0 : index
    %c50 = arith.constant 50 : index
    %42 = vector.load %arg8[%c0_47, %c50] : memref<64x384xbf16, #tpu.memory_space<vmem>>, vector<64x256xbf16>
    %c0_48 = arith.constant 0 : index
    %c51 = arith.constant 51 : index
    %43 = vector.load %arg8[%c0_48, %c51] : memref<64x384xbf16, #tpu.memory_space<vmem>>, vector<64x256xbf16>
    %c0_49 = arith.constant 0 : index
    %c52 = arith.constant 52 : index
    %44 = vector.load %arg8[%c0_49, %c52] : memref<64x384xbf16, #tpu.memory_space<vmem>>, vector<64x256xbf16>
    %45 = tpu.concatenate %40, %41, %42, %43, %44 in 0 : vector<64x256xbf16>, vector<64x256xbf16>, vector<64x256xbf16>, vector<64x256xbf16>, vector<64x256xbf16> -> vector<320x256xbf16>
    %c3_50 = arith.constant 3 : index
    %c0_51 = arith.constant 0 : index
    %c0_52 = arith.constant 0 : index
    %46 = vector.load %arg4[%c3_50, %c0_51, %c0_52] : memref<5x8x320xbf16, #tpu.memory_space<vmem>>, vector<1x8x320xbf16>
    %47 = vector.shape_cast %46 : vector<1x8x320xbf16> to vector<8x320xbf16>
    %cst_53 = arith.constant dense<0.000000e+00> : vector<8x256xf32>
    %48 = tpu.matmul %47, %45, %cst_53 {dimension_numbers = #tpu.dot_dimension_numbers<[1], [0], [0], [1], [0, 0, 1, 1], [], []>} : vector<8x320xbf16>, vector<320x256xbf16>, vector<8x256xf32> -> vector<8x256xf32>
    %c0_54 = arith.constant 0 : index
    %c0_55 = arith.constant 0 : index
    %49 = vector.load %arg7[%c0_54, %c0_55] : memref<8x256xf32, #tpu.memory_space<vmem>>, vector<8x256xf32>
    %50 = arith.addf %49, %48 : vector<8x256xf32>
    %c0_56 = arith.constant 0 : index
    %c0_57 = arith.constant 0 : index
    %51 = vector.load %arg7[%c0_56, %c0_57] : memref<8x256xf32, #tpu.memory_space<vmem>>, vector<8x256xf32>
    tpu.vector_store %arg7[%c0_56, %c0_57], %50 {strides = array<i32>} : memref<8x256xf32, #tpu.memory_space<vmem>>, vector<8x256xf32>,
    %c0_58 = arith.constant 0 : index
    %c64 = arith.constant 64 : index
    %52 = vector.load %arg8[%c0_58, %c64] : memref<64x384xbf16, #tpu.memory_space<vmem>>, vector<64x256xbf16>
    %c0_59 = arith.constant 0 : index
    %c65 = arith.constant 65 : index
    %53 = vector.load %arg8[%c0_59, %c65] : memref<64x384xbf16, #tpu.memory_space<vmem>>, vector<64x256xbf16>
    %c0_60 = arith.constant 0 : index
    %c66 = arith.constant 66 : index
    %54 = vector.load %arg8[%c0_60, %c66] : memref<64x384xbf16, #tpu.memory_space<vmem>>, vector<64x256xbf16>
    %c0_61 = arith.constant 0 : index
    %c67 = arith.constant 67 : index
    %55 = vector.load %arg8[%c0_61, %c67] : memref<64x384xbf16, #tpu.memory_space<vmem>>, vector<64x256xbf16>
    %c0_62 = arith.constant 0 : index
    %c68 = arith.constant 68 : index
    %56 = vector.load %arg8[%c0_62, %c68] : memref<64x384xbf16, #tpu.memory_space<vmem>>, vector<64x256xbf16>
    %57 = tpu.concatenate %52, %53, %54, %55, %56 in 0 : vector<64x256xbf16>, vector<64x256xbf16>, vector<64x256xbf16>, vector<64x256xbf16>, vector<64x256xbf16> -> vector<320x256xbf16>
    %c4_63 = arith.constant 4 : index
    %c0_64 = arith.constant 0 : index
    %c0_65 = arith.constant 0 : index
    %58 = vector.load %arg4[%c4_63, %c0_64, %c0_65] : memref<5x8x320xbf16, #tpu.memory_space<vmem>>, vector<1x8x320xbf16>
    %59 = vector.shape_cast %58 : vector<1x8x320xbf16> to vector<8x320xbf16>
    %cst_66 = arith.constant dense<0.000000e+00> : vector<8x256xf32>
    %60 = tpu.matmul %59, %57, %cst_66 {dimension_numbers = #tpu.dot_dimension_numbers<[1], [0], [0], [1], [0, 0, 1, 1], [], []>} : vector<8x320xbf16>, vector<320x256xbf16>, vector<8x256xf32> -> vector<8x256xf32>
    %c0_67 = arith.constant 0 : index
    %c0_68 = arith.constant 0 : index
    %61 = vector.load %arg7[%c0_67, %c0_68] : memref<8x256xf32, #tpu.memory_space<vmem>>, vector<8x256xf32>
    %62 = arith.addf %61, %60 : vector<8x256xf32>
    %c0_69 = arith.constant 0 : index
    %c0_70 = arith.constant 0 : index
    %63 = vector.load %arg7[%c0_69, %c0_70] : memref<8x256xf32, #tpu.memory_space<vmem>>, vector<8x256xf32>
    tpu.vector_store %arg7[%c0_69, %c0_70], %62 {strides = array<i32>} : memref<8x256xf32, #tpu.memory_space<vmem>>, vector<8x256xf32>,
    %c0_71 = arith.constant 0 : index
    %c0_72 = arith.constant 0 : index
    %64 = vector.load %arg7[%c0_71, %c0_72] : memref<8x256xf32, #tpu.memory_space<vmem>>, vector<8x256xf32>
    %c0_73 = arith.constant 0 : index
    %c0_74 = arith.constant 0 : index
    %65 = vector.load %arg5[%c0_73, %c0_74] : memref<8x1xf32, #tpu.memory_space<vmem>>, vector<8x1xf32>
    %66 = vector.broadcast %65 : vector<8x1xf32> to vector<8x256xf32>
    %67 = arith.addf %64, %66 : vector<8x256xf32>
    %68 = arith.truncf %67 : vector<8x256xf32> to vector<8x256xbf16>
    %c0_75 = arith.constant 0 : index
    %c0_76 = arith.constant 0 : index
    %c0_77 = arith.constant 0 : index
    %69 = vector.load %arg6[%c0_75, %c0_76, %c0_77] : memref<1x8x256xbf16, #tpu.memory_space<vmem>>, vector<1x8x256xbf16>
    %70 = vector.shape_cast %69 : vector<1x8x256xbf16> to vector<8x256xbf16>
    %71 = vector.shape_cast %68 : vector<8x256xbf16> to vector<1x8x256xbf16>
    tpu.vector_store %arg6[%c0_75, %c0_76, %c0_77], %71 {strides = array<i32>} : memref<1x8x256xbf16, #tpu.memory_space<vmem>>, vector<1x8x256xbf16>,
    return
  }
  func.func @transform_0(%arg0: i32, %arg1: i32) -> (i32, i32, i32) {
    %c0_i32 = arith.constant 0 : i32
    %c0_i32_0 = arith.constant 0 : i32
    return %arg0, %c0_i32, %arg1 : i32, i32, i32
  }
  func.func @transform_1(%arg0: i32, %arg1: i32) -> (i32, i32, i32) {
    %c1_i32 = arith.constant 1 : i32
    %0 = arith.addi %arg1, %c1_i32 : i32
    %c0_i32 = arith.constant 0 : i32
    %c0_i32_0 = arith.constant 0 : i32
    return %arg0, %c0_i32, %0 : i32, i32, i32
  }
  func.func @transform_2(%arg0: i32, %arg1: i32) -> (i32, i32, i32) {
    %c0_i32 = arith.constant 0 : i32
    %c0_i32_0 = arith.constant 0 : i32
    %c0_i32_1 = arith.constant 0 : i32
    %c0_i32_2 = arith.constant 0 : i32
    return %c0_i32, %c0_i32_0, %c0_i32_1 : i32, i32, i32
  }
  func.func @transform_3(%arg0: i32, %arg1: i32) -> (i32, i32) {
    %c0_i32 = arith.constant 0 : i32
    %c0_i32_0 = arith.constant 0 : i32
    %c0_i32_1 = arith.constant 0 : i32
    return %c0_i32, %c0_i32_0 : i32, i32
  }
  func.func @transform_4(%arg0: i32, %arg1: i32) -> (i32, i32, i32) {
    %c0_i32 = arith.constant 0 : i32
    %c0_i32_0 = arith.constant 0 : i32
    return %arg0, %c0_i32, %arg1 : i32, i32, i32
  }
}

</mosaic_0001>

<bundles_post_ra>
// kernel: fast_arcnn_forward.3
= control target key start
LH: loop header
LB: loop body
LE: loop exit
PB: predicated region body
PF: predicated region fallthrough
CT: control target
= control target key end

     0   :  { %11 = vsyncpa [#allocation3], 0  ;;  %s998_s21 = smov 0   ;;  %s1000_s22 = smov 0   ;;  %s1127_s0 = inlined_call_operand.vmem [shape: bf16[2,128,128], index: 0, kind: input, shape index: {}]   ;;  %s1128_s1 = inlined_call_operand.vmem [shape: bf16[64,128], index: 1, kind: input, shape index: {}]   ;;  %s1129_s2 = inlined_call_operand.vmem [shape: f32[64,1], index: 2, kind: input, shape index: {}]   ;;  %s1130_s3 = inlined_call_operand.vmem [shape: bf16[32,64], index: 3, kind: input, shape index: {}]   ;;  %s1131_s4 = inlined_call_operand.vmem [shape: f32[32,1], index: 4, kind: input, shape index: {}]   ;;  %s1132_s5 = inlined_call_operand.vmem [shape: f32[2], index: 5, kind: input, shape index: {}]   ;;  %s1133_s6 = inlined_call_operand.vmem [shape: bf16[2,32,128], index: 6, kind: output, shape index: {}]  }
   0x1   :  { %s1002_s23 = smov 0  }
   0x2 LB: > { %s761_s24 = sadd.s32 4294967295, %s959_s23   ;;  %s29_s25 = sadd.s32 1, %s955_s22  ;;  %s959_s23 = sphi %s1002_s23, %s17_s23   ;;  %s955_s22 = sphi %s1000_s22, %s1137_s22   ;;  %s951_s21 = sphi %s998_s21, %s1136_s21  }
   0x3   : > { %p31_p0 = scmp.ge.s32.totalorder %s29_s25, 2  ;;  %p763_p1 = scmp.ge.s32.totalorder %s959_s23, 1 }
   0x4   : > { %p195_p2 = scmp.lt.s32.totalorder %s959_s23, 3  ;;  %p1023_p4 = scmp.eq.s32.totalorder %s761_s24, 0 }
   0x5   : > { %s1139_s25 = smov (%p31_p0, %s29_s25), 0  ;;  %s220_s30 = sshll.u32 %s1132_s5, 4  ;;  %s221_s30 = int_to_ptr.vmem [resolvable:$true] %s220_s30 }
   0x6   : > { %p1019_p3 = pnand %p763_p1, %p195_p2  ;;  %s918_s7 = scalar_lea.vmem %s221_s30, 16 }
   0x7   : > { %p919_p7 = scmp.ne.s32.totalorder %s221_s30, %s918_s7  ;;  %p926_p11 = scmp.lt.s32.totalorder %s221_s30, %s221_s30 }
   0x8   : > { %p870_p5 = pneg %p1019_p3  ;;  %p927_p12 = scmp.lt.s32.totalorder %s918_s7, %s918_s7 }
   0xa   : > { %p871_p6 = pnand %p1023_p4, %p870_p5  ;;  %p928_p13 = por %p927_p12, %p926_p11 }
   0xc   : > { %p920_p8 = pneg %p871_p6 }
   0xe   : > { %p921_p9 = pnand %p920_p8, %p919_p7 }
  0x10   : > { %p922_p10 = pneg %p921_p9 }
  0x12   : > { %p929_p0 = pnand %p928_p13, %p922_p10 }
  0x14   : > { %932 = shalt.err (!%p929_p0)
}
  0x15   : > { %s961_s8 = smov [#allocation2]   ;;  %244 = sbr.rel (%p1019_p3) target bundleno = 530 (0x212), region = 44 }
  0x16   : > { %873 = dma.vmem_to_smem (!%p871_p6), %s221_s30, 16, %s961_s8, [#allocation3]  }
  0x1c   : > { %946 = dma.done.wait (%p1023_p4), [#allocation3], 16  }
  0x1d   : > { %948 = vsyncadd (%p1023_p4), [#allocation3], 4294967280 }
  0x1e   : > { %250 = sfence }
  0x1f   : > { %p281_p1 = scmp.lt.s32.totalorder %s951_s21, 1  ;;  %v912_v0 = vld [vmem:[%s1128_s1] sm:$0xff]   ;;  %v962_v1 = vmov 0   ;;  %v324_v3 = vld [vmem:[%s1129_s2 + $0x10] sm:$0xff]  ;;  %v323_v4 = vld [vmem:[%s1129_s2 + $0x8] sm:$0xff]  ;;  %vm575_vm0 = vcmask 523264  }
  0x20   : > { %846 = vmatprep.mubr.bf16.mxu0 %v912_v0  ;;  %902 = vset.pattern.permute.xlu0 %v962_v1  ;;  %v322_v2 = vld [vmem:[%s1129_s2] sm:$0xff]  ;;  %v325_v5 = vld [vmem:[%s1129_s2 + $0x18] sm:$0xff]  ;;  %v327_v10 = vld [vmem:[%s1129_s2 + $0x28] sm:$0xff]  ;;  %s515_s7 = sld [smem:[#allocation2]]  ;;  %s788_s10 = sld [smem:[#allocation2 + $0x1]] }
  0x21   : > { %s1141_s21 = smov (!%p281_p1, %s951_s21), 1  ;;  %903 = vset.pattern.permute.xlu1 %v962_v1  ;;  %332 = vperm.xlu0 %902, %v322_v2   ;;  %v326_v8 = vld [vmem:[%s1129_s2 + $0x20] sm:$0xff]  ;;  %v328_v12 = vld [vmem:[%s1129_s2 + $0x30] sm:$0xff]  ;;  %v329_v13 = vld [vmem:[%s1129_s2 + $0x38] sm:$0xff] }
  0x22   : > { %s795_s11 = sshll.u32 %s1141_s21, 6  ;;  %342 = vperm.xlu1 %903, %v324_v3   ;;  %v541_v15 = vld [vmem:[%s1131_s4] sm:$0xff]  ;;  %v542_v16 = vld [vmem:[%s1131_s4 + $0x8] sm:$0xff]  ;;  %v543_v18 = vld [vmem:[%s1131_s4 + $0x10] sm:$0xff] }
  0x23   : > { %s1057_s18 = scalar_lea.vmem %s1127_s0, %s795_s11  ;;  %v544_v19 = vld [vmem:[%s1131_s4 + $0x18] sm:$0xff]  ;;  %v913_v22 = vld [vmem:[%s1128_s1 + $0x8] sm:$0xff]   ;;  %v914_v23 = vld [vmem:[%s1128_s1 + $0x10] sm:$0xff]   ;;  %s796_s11 = sshll.u32 %s1141_s21, 4 }
  0x24   : > { %v904_v6 = vld [vmem:[%s1057_s18] sm:$0xff]   ;;  %v905_v7 = vld [vmem:[%s1057_s18 + $0x8] sm:$0xff]   ;;  %v906_v9 = vld [vmem:[%s1057_s18 + $0x10] sm:$0xff]   ;;  %s296_s14 = scalar_lea.vmem %s1133_s6, %s796_s11 }
  0x25   : > { %830 = vmatprep.subr.bf16.mxu0 %v904_v6  ;;  %337 = vperm.xlu0 %902, %v323_v4   ;;  %v907_v11 = vld [vmem:[%s1057_s18 + $0x18] sm:$0xff]   ;;  %v908_v14 = vld [vmem:[%s1057_s18 + $0x20] sm:$0xff]   ;;  %v909_v17 = vld [vmem:[%s1057_s18 + $0x28] sm:$0xff]  }
  0x26   : > { %831 = vmatpush3.bf16.msra.mxu0 %v904_v6  ;;  %347 = vperm.xlu1 %903, %v325_v5   ;;  %v910_v20 = vld [vmem:[%s1057_s18 + $0x30] sm:$0xff]   ;;  %v911_v21 = vld [vmem:[%s1057_s18 + $0x38] sm:$0xff]   ;;  %v916_v25 = vld [vmem:[%s1130_s3] sm:$0xff]   ;;  %v516_v31 = vstv %s515_s7 }
  0x27   : > { %832 = vmatprep.subr.bf16.mxu0 %v905_v7  ;;  %v915_v24 = vld [vmem:[%s1128_s1 + $0x18] sm:$0xff]   ;;  %862 = vmatprep.mubr.msk.bf16.mxu1 %vm575_vm0, %v916_v25 }
  0x29   : > { %352 = vperm.xlu0 %902, %v326_v8  }
  0x2a   : > { %833 = vmatpush3.bf16.msra.mxu0 %v905_v7  ;;  %357 = vperm.xlu1 %903, %v327_v10   ;;  %v917_v7 = vld [vmem:[%s1130_s3 + $0x8] sm:$0xff]  }
  0x2b   : > { %834 = vmatprep.subr.bf16.mxu0 %v906_v9 }
  0x2d   : > { %362 = vperm.xlu0 %902, %v328_v12   ;;  %v636_v12 = vstv %s788_s10 }
  0x2e   : > { %835 = vmatpush3.bf16.msra.mxu0 %v906_v9  ;;  %367 = vperm.xlu1 %903, %v329_v13  }
  0x2f   : > { %836 = vmatprep.subr.bf16.mxu0 %v907_v11 }
  0x31   : > { %547 = vperm.xlu0 %902, %v541_v15  }
  0x32   : > { %837 = vmatpush3.bf16.msra.mxu0 %v907_v11  ;;  %552 = vperm.xlu1 %903, %v542_v16  }
  0x33   : > { %838 = vmatprep.subr.bf16.mxu0 %v908_v14 }
  0x35   : > { %557 = vperm.xlu0 %902, %v543_v18  }
  0x36   : > { %839 = vmatpush3.bf16.msra.mxu0 %v908_v14  ;;  %562 = vperm.xlu1 %903, %v544_v19  }
  0x37   : > { %840 = vmatprep.subr.bf16.mxu0 %v909_v17 }
  0x3a   : > { %841 = vmatpush3.bf16.msra.mxu0 %v909_v17 }
  0x3b   : > { %842 = vmatprep.subr.bf16.mxu0 %v910_v20 }
  0x3e   : > { %843 = vmatpush3.bf16.msra.mxu0 %v910_v20 }
  0x3f   : > { %844 = vmatprep.subr.bf16.mxu0 %v911_v21 }
  0x42   : > { %845 = vmatpush3.bf16.msra.mxu0 %v911_v21 }
  0x45   : > { %847 = vmatmul.mubr.bf16.vlgmr.msra.gmra.mrb[0].mxu0 %v913_v22 }
  0x46   : > { %850 = vmatprep.mubr.bf16.mxu0 %v914_v23 }
  0x4d   : > { %851 = vmatmul.mubr.bf16.gmra.mrb[4].mxu0 %v915_v24 }
  0xa0   : > { %v333_v26 = vpop.permute.xlu0 %332 }
  0xa1   : > { %v343_v27 = vpop.permute.xlu1 %342 }
  0xa4   : > { %v338_v28 = vpop.permute.xlu0 %337 }
  0xa5   : > { %v348_v29 = vpop.permute.xlu1 %347 }
  0xa8   : > { %v353_v34 = vpop.permute.xlu0 %352 }
  0xa9   : > { %v358_v40 = vpop.permute.xlu1 %357 }
  0xac   : > { %v363_v47 = vpop.permute.xlu0 %362 }
  0xad   : > { %v368_v55 = vpop.permute.xlu1 %367 }
  0xb0   : > { %v548_v8 = vpop.permute.xlu0 %547 }
  0xb1   : > { %v553_v9 = vpop.permute.xlu1 %552 }
  0xb4   : > { %v558_v10 = vpop.permute.xlu0 %557 }
  0xb5   : > { %v563_v15 = vpop.permute.xlu1 %562 }
 0x118   : > { %v848_v30 = vpop.f32.mrb[0].mxu0 }
 0x119   : > { %v485_v32 = vadd.f32 %v848_v30, %v343_v27  ;;  %v476_v33 = vpop.f32.mrb[1].mxu0 }
 0x11a   : > { %v477_v35 = vadd.f32 %v476_v33, %v333_v26  ;;  %v849_v36 = vpop.f32.mrb[2].mxu0 }
 0x11b   : > { %v519_v37 = vmul.f32 %v516_v31, %v485_v32  ;;  %v488_v38 = vadd.f32 %v849_v36, %v348_v29  ;;  %v479_v39 = vpop.f32.mrb[3].mxu0  ;;  %vm509_vm1 = vcmp.gt.f32.partialorder %v485_v32, 0.0 }
 0x11c   : > { %v517_v41 = vmul.f32 %v516_v31, %v477_v35  ;;  %v480_v42 = vadd.f32 %v479_v39, %v338_v28  ;;  %vm507_vm3 = vcmp.gt.f32.partialorder %v477_v35, 0.0 }
 0x11d   : > { %vm510_vm2 = vcmp.gt.f32.partialorder %v488_v38, 0.0  ;;  %v520_v43 = vmul.f32 %v516_v31, %v488_v38  ;;  %v527_v45 = vsel %vm509_vm1, %v485_v32, %v519_v37 }
 0x11e   : > { %v518_v44 = vmul.f32 %v516_v31, %v480_v42  ;;  %vm508_vm4 = vcmp.gt.f32.partialorder %v480_v42, 0.0  ;;  %v525_v49 = vsel %vm507_vm3, %v477_v35, %v517_v41 }
 0x11f   : > { %v528_v46 = vsel %vm510_vm2, %v488_v38, %v520_v43 }
 0x120   : > { %v852_v48 = vpop.f32.mrb[4].mxu0  ;;  %v526_v50 = vsel %vm508_vm4, %v480_v42, %v518_v44  ;;  %v538_v51 = vpack.c.bf16 %v528_v46, %v527_v45 }
 0x121   : > { %v501_v52 = vadd.f32 %v852_v48, %v363_v47  ;;  %v492_v53 = vpop.f32.mrb[5].mxu0  ;;  %v537_v54 = vpack.c.bf16 %v526_v50, %v525_v49 }
 0x122   : > { %v493_v56 = vadd.f32 %v492_v53, %v353_v34  ;;  %v853_v57 = vpop.f32.mrb[6].mxu0 }
 0x123   : > { %v523_v58 = vmul.f32 %v516_v31, %v501_v52  ;;  %v504_v59 = vadd.f32 %v853_v57, %v368_v55  ;;  %v495_v60 = vpop.f32.mrb[7].mxu0  ;;  %854 = vmatprep.subr.bf16.mxu1 %v537_v54  ;;  %vm513_vm5 = vcmp.gt.f32.partialorder %v501_v52, 0.0 }
 0x124   : > { %v521_v61 = vmul.f32 %v516_v31, %v493_v56  ;;  %v496_v62 = vadd.f32 %v495_v60, %v358_v40  ;;  %855 = vmatpush3.bf16.msra.mxu1 %v537_v54  ;;  %vm511_vm6 = vcmp.gt.f32.partialorder %v493_v56, 0.0 }
 0x125   : > { %vm514_vm7 = vcmp.gt.f32.partialorder %v504_v59, 0.0  ;;  %v524_v63 = vmul.f32 %v516_v31, %v504_v59  ;;  %856 = vmatprep.subr.bf16.mxu1 %v538_v51  ;;  %v531_v1 = vsel %vm513_vm5, %v501_v52, %v523_v58 }
 0x126   : > { %vm512_vm8 = vcmp.gt.f32.partialorder %v496_v62, 0.0  ;;  %v522_v0 = vmul.f32 %v516_v31, %v496_v62  ;;  %v529_v3 = vsel %vm511_vm6, %v493_v56, %v521_v61 }
 0x127   : > { %v532_v2 = vsel %vm514_vm7, %v504_v59, %v524_v63 }
 0x128   : > { %857 = vmatpush3.bf16.msra.mxu1 %v538_v51  ;;  %v530_v4 = vsel %vm512_vm8, %v496_v62, %v522_v0  ;;  %v540_v5 = vpack.c.bf16 %v532_v2, %v531_v1 }
 0x129   : > { %v539_v6 = vpack.c.bf16 %v530_v4, %v529_v3 }
 0x12b   : > { %858 = vmatprep.subr.bf16.mxu1 %v539_v6 }
 0x12c   : > { %859 = vmatpush3.bf16.msra.mxu1 %v539_v6 }
 0x12d   : > { %860 = vmatprep.subr.bf16.mxu1 %v540_v5 }
 0x130   : > { %861 = vmatpush3.bf16.msra.mxu1 %v540_v5 }
 0x133   : > { %863 = vmatmul.mubr.msk.bf16.vlgmr.msra.gmra.mrb[0].mxu1 %vm575_vm0, %v917_v7 }
 0x206   : > { %v864_v11 = vpop.f32.mrb[0].mxu1 }
 0x207   : > { %v625_v13 = vadd.f32 %v864_v11, %v558_v10  ;;  %v616_v14 = vpop.f32.mrb[1].mxu1 }
 0x208   : > { %v617_v16 = vadd.f32 %v616_v14, %v548_v8  ;;  %v865_v17 = vpop.f32.mrb[2].mxu1 }
 0x209   : > { %v639_v18 = vmul.f32 %v636_v12, %v625_v13  ;;  %v628_v19 = vadd.f32 %v865_v17, %v563_v15  ;;  %v619_v20 = vpop.f32.mrb[3].mxu1  ;;  %vm633_vm9 = vcmp.gt.f32.partialorder %v625_v13, 0.0 }
 0x20a   : > { %v637_v21 = vmul.f32 %v636_v12, %v617_v16  ;;  %v620_v22 = vadd.f32 %v619_v20, %v553_v9  ;;  %vm631_vm10 = vcmp.gt.f32.partialorder %v617_v16, 0.0 }
 0x20b   : > { %vm634_vm11 = vcmp.gt.f32.partialorder %v628_v19, 0.0  ;;  %v640_v23 = vmul.f32 %v636_v12, %v628_v19  ;;  %v643_v25 = vsel %vm633_vm9, %v625_v13, %v639_v18 }
 0x20c   : > { %vm632_vm12 = vcmp.gt.f32.partialorder %v620_v22, 0.0  ;;  %v638_v24 = vmul.f32 %v636_v12, %v620_v22  ;;  %v641_v27 = vsel %vm631_vm10, %v617_v16, %v637_v21 }
 0x20d   : > { %v644_v26 = vsel %vm634_vm11, %v628_v19, %v640_v23 }
 0x20e   : > { %v809_v28 = vpack.c.bf16 %v644_v26, %v643_v25  ;;  %v642_v29 = vsel %vm632_vm12, %v620_v22, %v638_v24 }
 0x20f   : > { %v804_v30 = vpack.c.bf16 %v642_v29, %v641_v27 }
 0x210   : > { %811 = vst [vmem:[%s296_s14 + $0x8] sm:$0xff] %v809_v28  }
 0x211   : > { %805 = vst [vmem:[%s296_s14] sm:$0xff] %v804_v30  }
 0x212 PF: > { %s17_s23 = sadd.s32 1, %s959_s23   ;;  %s1136_s21 = smov %s955_s22 }
 0x213   : > { %p14_p2 = scmp.ge.s32.totalorder %s17_s23, 4   ;;  %s1137_s22 = smov %s1139_s25 }
 0x215   :  { %16 = sbr.rel (!%p14_p2) target bundleno = 2 (0x2), region = 79 }
 0x21c   :  { %692 = vsyncpa [#allocation3], 1 }
 0x21d   :  { %694 = vsyncpa [#allocation3 + $0x1], 1 }

// kernel: fast_arcnn_forward.4
= control target key start
LH: loop header
LB: loop body
LE: loop exit
PB: predicated region body
PF: predicated region fallthrough
CT: control target
= control target key end

     0   :  { %12 = vsyncpa [#allocation7], 0  ;;  %s3731_s24 = smov 0   ;;  %s3733_s25 = smov 0   ;;  %s5771_s0 = inlined_call_operand.vmem [shape: bf16[2,32,512], index: 0, kind: input, shape index: {}, may-alias: {0,1}]   ;;  %s5772_s1 = inlined_call_operand.vmem [shape: bf16[2,32,512], index: 1, kind: input, shape index: {}, may-alias: {0,1}]   ;;  %s5773_s2 = inlined_call_operand.vmem [shape: bf16[7,32,224], index: 2, kind: input, shape index: {}]   ;;  %s5774_s3 = inlined_call_operand.vmem [shape: f32[32,1], index: 3, kind: input, shape index: {}]   ;;  %s5775_s4 = inlined_call_operand.vmem [shape: bf16[64,32], index: 4, kind: input, shape index: {}]   ;;  %s5776_s5 = inlined_call_operand.vmem [shape: f32[64,1], index: 5, kind: input, shape index: {}]   ;;  %s5777_s6 = inlined_call_operand.vmem [shape: f32[2], index: 6, kind: input, shape index: {}]   ;;  %s5778_s7 = inlined_call_operand.vmem [shape: bf16[2,64,256], index: 7, kind: output, shape index: {}]  }
   0x1   :  { %s3735_s26 = smov 0   ;;  %s3737_s27 = smov 0  }
   0x2   :  { %s3739_s28 = smov 0  }
   0x3 LB: > { %s3315_s29 = sadd.s32 4294967295, %s3675_s28   ;;  %s30_s30 = sadd.s32 1, %s3671_s27  ;;  %s3675_s28 = sphi %s3739_s28, %s18_s28   ;;  %s3671_s27 = sphi %s3737_s27, %s5785_s27   ;;  %s3667_s26 = sphi %s3735_s26, %s5784_s26   ;;  %s3663_s25 = sphi %s3733_s25, %s5783_s25   ;;  %s3659_s24 = sphi %s3731_s24, %s5782_s24  }
   0x4   : > { %p32_p0 = scmp.ge.s32.totalorder %s30_s30, 2  ;;  %s39_s8 = sadd.s32 1, %s3663_s25 }
   0x5   : > { %p46_p1 = scmp.ne.s32.totalorder %s3663_s25, %s3659_s24  ;;  %p47_p2 = scmp.eq.s32.totalorder %s3675_s28, 0 }
   0x6   : > { %s5787_s30 = smov (%p32_p0, %s30_s30), 0  ;;  %p3317_p4 = scmp.ge.s32.totalorder %s3675_s28, 1 }
   0x7   : > { %p3764_p3 = por %p47_p2, %p46_p1  ;;  %s34_s10 = ssub.s32 %s3671_s27, %s5787_s30 }
   0x8   : > { %p226_p5 = scmp.lt.s32.totalorder %s3675_s28, 3  ;;  %p37_p6 = scmp.eq.s32.totalorder %s34_s10, 0 }
   0x9   : > { %p3776_p8 = scmp.eq.s32.totalorder %s3315_s29, 0  ;;  %s251_s16 = sshll.u32 %s5777_s6, 4  ;;  %s252_s16 = int_to_ptr.vmem [resolvable:$true] %s251_s16 }
   0xa   : > { %p3772_p7 = pnand %p3317_p4, %p226_p5  ;;  %s3618_s17 = scalar_lea.vmem %s252_s16, 16 }
   0xb   : > { %s3781_s13 = scalar_select %p37_p6, %s3663_s25, %s39_s8  }
   0xc   : > { %p3490_p9 = pneg %p3772_p7  ;;  %p3619_p11 = scmp.ne.s32.totalorder %s252_s16, %s3618_s17 }
   0xd   : > { %p3626_p1 = scmp.lt.s32.totalorder %s252_s16, %s252_s16  ;;  %p3627_p2 = scmp.lt.s32.totalorder %s3618_s17, %s3618_s17 }
   0xe   : > { %p3491_p10 = pnand %p3776_p8, %p3490_p9 }
   0xf   : > { %p3628_p4 = por %p3627_p2, %p3626_p1 }
  0x10   : > { %p3620_p12 = pneg %p3491_p10 }
  0x12   : > { %p3621_p13 = pnand %p3620_p12, %p3619_p11 }
  0x14   : > { %p3622_p0 = pneg %p3621_p13 }
  0x16   : > { %p3629_p5 = pnand %p3628_p4, %p3622_p0 }
  0x18   : > { %3632 = shalt.err (!%p3629_p5)
}
  0x19   : > { %s3677_s18 = smov [#allocation6]   ;;  %p3319_p6 = scmp.ge.s32.totalorder %s3675_s28, 2 }
  0x1a   : > { %3493 = dma.vmem_to_smem (!%p3491_p10), %s252_s16, 16, %s3677_s18, [#allocation7]  }
  0x1b   : > { %258 = sbr.rel (%p3319_p6) target bundleno = 48 (0x30), region = 36 }
  0x22   : > { %261 = sbr.rel (!%p3764_p3) target bundleno = 41 (0x29), region = 40  ;;  %s263_s19 = sand.u32 (%p3764_p3), 1, %s3663_s25  }
  0x23   : > { %s3427_s20 = sshll.u32 (%p3764_p3), %s3671_s27, 6  ;;  %s3320_s21 = sshll.u32 (%p3764_p3), %s263_s19, 5 }
  0x24   : > { %s270_s29 = scalar_lea.vmem (%p3764_p3), %s5771_s0, %s3427_s20  ;;  %s265_s8 = scalar_lea.vmem (%p3764_p3), [#allocation4], %s3320_s21 }
  0x25   : > { %v304_v0 = vld [vmem:[%s270_s29] sm:$0xff] (%p3764_p3)  ;;  %v306_v1 = vld [vmem:[%s270_s29 + $0x10] sm:$0xff] (%p3764_p3) }
  0x26   : > { %v308_v2 = vld [vmem:[%s270_s29 + $0x20] sm:$0xff] (%p3764_p3)  ;;  %305 = vst [vmem:[%s265_s8] sm:$0xff] (%p3764_p3), %v304_v0  ;;  %307 = vst [vmem:[%s265_s8 + $0x8] sm:$0xff] (%p3764_p3), %v306_v1  ;;  %v310_v3 = vld [vmem:[%s270_s29 + $0x30] sm:$0xff] (%p3764_p3) }
  0x27   : > { %309 = vst [vmem:[%s265_s8 + $0x10] sm:$0xff] (%p3764_p3), %v308_v2  ;;  %311 = vst [vmem:[%s265_s8 + $0x18] sm:$0xff] (%p3764_p3), %v310_v3 }
  0x29 PF: > { %317 = sbr.rel (!%p3764_p3) target bundleno = 48 (0x30), region = 78  ;;  %s319_s10 = sand.u32 (%p3764_p3), 1, %s3663_s25  }
  0x2a   : > { %s3428_s14 = sshll.u32 (%p3764_p3), %s3671_s27, 6  ;;  %s3323_s15 = sshll.u32 (%p3764_p3), %s319_s10, 5 }
  0x2b   : > { %s3237_s18 = scalar_lea.vmem (%p3764_p3), %s5772_s1, %s3428_s14  ;;  %s321_s19 = scalar_lea.vmem (%p3764_p3), [#allocation5], %s3323_s15 }
  0x2c   : > { %v3326_v4 = vld [vmem:[%s3237_s18 + $0x8] sm:$0xff] (%p3764_p3)  ;;  %v3327_v5 = vld [vmem:[%s3237_s18 + $0x18] sm:$0xff] (%p3764_p3) }
  0x2d   : > { %v3328_v6 = vld [vmem:[%s3237_s18 + $0x28] sm:$0xff] (%p3764_p3)  ;;  %362 = vst [vmem:[%s321_s19] sm:$0xff] (%p3764_p3), %v3326_v4  ;;  %364 = vst [vmem:[%s321_s19 + $0x8] sm:$0xff] (%p3764_p3), %v3327_v5  ;;  %v3329_v7 = vld [vmem:[%s3237_s18 + $0x38] sm:$0xff] (%p3764_p3) }
  0x2e   : > { %366 = vst [vmem:[%s321_s19 + $0x10] sm:$0xff] (%p3764_p3), %v3328_v6  ;;  %368 = vst [vmem:[%s321_s19 + $0x18] sm:$0xff] (%p3764_p3), %v3329_v7 }
  0x30 PF: > { %377 = sbr.rel (%p3772_p7) target bundleno = 1730 (0x6c2), region = 116  ;;  %s380_s9 = sand.u32 (!%p3772_p7), 1, %s3659_s24  }
  0x31   : > { %s3331_s20 = sshll.u32 (!%p3772_p7), %s380_s9, 5 }
  0x32   : > { %s3808_s21 = scalar_lea.vmem (!%p3772_p7), [#allocation4], %s3331_s20  ;;  %s3810_s22 = scalar_lea.vmem (!%p3772_p7), [#allocation5], %s3331_s20 }
  0x37   : > { %3654 = dma.done.wait (%p3776_p8), [#allocation7], 16  }
  0x38   : > { %3656 = vsyncadd (%p3776_p8), [#allocation7], 4294967280 }
  0x39   : > { %397 = sfence }
  0x3a   : > { %v3817_v8 = vld [vmem:[%s3810_s22] ss:$8 sps:$4 sm:$0xff]   ;;  %s3678_s24 = smov 127   ;;  %v3825_v10 = vld [vmem:[%s3808_s21 + $0x10] ss:$8 sps:$4 sm:$0xff]   ;;  %s3679_s11 = smov 126  }
  0x3b   : > { %v3820_v9 = vld [vmem:[%s3808_s21] ss:$8 sps:$4 sm:$0xff]   ;;  %511 = vrot.lane.b32.xlu1 %v3817_v8, %s3678_s24  ;;  %v3830_v11 = vld [vmem:[%s3808_s21 + $0x4] ss:$8 sps:$4 sm:$0xff]   ;;  %v3833_v12 = vld [vmem:[%s3810_s22 + $0x10] ss:$8 sps:$4 sm:$0xff]  }
  0x3c   : > { %507 = vrot.lane.b32.xlu0 %v3820_v9, %s3678_s24  ;;  %v3836_v13 = vld [vmem:[%s3808_s21 + $0x14] ss:$8 sps:$4 sm:$0xff]   ;;  %662 = vmatprep.subr.bf16.mxu1 %v3830_v11  ;;  %s3680_s12 = smov 125   ;;  %s3681_s23 = smov 124   ;;  %vm519_vm0 = vcmask 1039360   ;;  %vm540_vm1 = vcmask 1031168  }
  0x3d   : > { %663 = vmatpush1.bf16.msra.mxu1 %v3820_v9  ;;  %s3682_s29 = smov 123   ;;  %s3683_s8 = smov 122   ;;  %vm561_vm2 = vcmask 1022976   ;;  %vm582_vm3 = vcmask 1014784   ;;  %v3562_v50 = vld [vmem:[%s5773_s2 + $0x4] ss:$8 sps:$4 sm:$0xff]  }
  0x3e   : > { %664 = vmatprep.subr.bf16.mxu1 %v3836_v13  ;;  %s3684_s10 = smov 112   ;;  %vm655_vm4 = vcmask 785408   ;;  %vm603_vm5 = vcmask 1006592   ;;  %vm624_vm6 = vcmask 998400   ;;  %vm938_vm7 = vcmask 916480   ;;  %s3685_s18 = smov 80  }
  0x3f   : > { %513 = vrot.lane.b32.xlu1 %v3825_v10, %s3678_s24  ;;  %3346 = vmatprep.mubr.msk.bf16.mxu1 %vm655_vm4, %v3562_v50  ;;  %vm1648_vm8 = vcmask 654336   ;;  %s3686_s20 = smov 64   ;;  %vm2003_vm9 = vcmask 523264   ;;  %vm2358_vm10 = vcmask 392192   ;;  %vm2713_vm11 = vcmask 261120   ;;  %s3416_s15 = sld [smem:[#allocation6 + $0x1]] }
  0x40   : > { %509 = vrot.lane.b32.xlu0 %v3830_v11, %s3678_s24  ;;  %p435_p3 = scmp.lt.s32.totalorder %s3667_s26, 1 }
  0x41   : > { %665 = vmatpush1.bf16.msra.mxu1 %v3825_v10 }
  0x42   : > { %s5789_s26 = smov (!%p435_p3, %s3667_s26), 1 }
  0x43   : > { %517 = vrot.lane.b32.xlu1 %v3833_v12, %s3678_s24  ;;  %s3429_s16 = sshll.u32 %s5789_s26, 6 }
  0x44   : > { %515 = vrot.lane.b32.xlu0 %v3836_v13, %s3678_s24  ;;  %s5733_s19 = scalar_lea.vmem %s5778_s7, %s3429_s16 }
  0x47   : > { %530 = vrot.lane.b32.xlu1 %v3830_v11, %s3679_s11 }
  0x48   : > { %528 = vrot.lane.b32.xlu0 %v3820_v9, %s3679_s11 }
  0x4b   : > { %534 = vrot.lane.b32.xlu1 %v3825_v10, %s3679_s11 }
  0x4c   : > { %532 = vrot.lane.b32.xlu0 %v3817_v8, %s3679_s11 }
  0x4f   : > { %538 = vrot.lane.b32.xlu1 %v3833_v12, %s3679_s11 }
  0x50   : > { %536 = vrot.lane.b32.xlu0 %v3836_v13, %s3679_s11 }
  0x53   : > { %551 = vrot.lane.b32.xlu1 %v3830_v11, %s3680_s12 }
  0x54   : > { %549 = vrot.lane.b32.xlu0 %v3820_v9, %s3680_s12 }
  0x57   : > { %555 = vrot.lane.b32.xlu1 %v3825_v10, %s3680_s12 }
  0x58   : > { %553 = vrot.lane.b32.xlu0 %v3817_v8, %s3680_s12 }
  0x5b   : > { %559 = vrot.lane.b32.xlu1 %v3833_v12, %s3680_s12 }
  0x5c   : > { %557 = vrot.lane.b32.xlu0 %v3836_v13, %s3680_s12 }
  0x5f   : > { %572 = vrot.lane.b32.xlu1 %v3830_v11, %s3681_s23 }
  0x60   : > { %570 = vrot.lane.b32.xlu0 %v3820_v9, %s3681_s23 }
  0x63   : > { %576 = vrot.lane.b32.xlu1 %v3825_v10, %s3681_s23 }
  0x64   : > { %574 = vrot.lane.b32.xlu0 %v3817_v8, %s3681_s23 }
  0x67   : > { %580 = vrot.lane.b32.xlu1 %v3833_v12, %s3681_s23 }
  0x68   : > { %578 = vrot.lane.b32.xlu0 %v3836_v13, %s3681_s23 }
  0x6b   : > { %593 = vrot.lane.b32.xlu1 %v3830_v11, %s3682_s29 }
  0x6c   : > { %591 = vrot.lane.b32.xlu0 %v3820_v9, %s3682_s29 }
  0x6f   : > { %597 = vrot.lane.b32.xlu1 %v3825_v10, %s3682_s29 }
  0x70   : > { %595 = vrot.lane.b32.xlu0 %v3817_v8, %s3682_s29 }
  0x73   : > { %601 = vrot.lane.b32.xlu1 %v3833_v12, %s3682_s29 }
  0x74   : > { %599 = vrot.lane.b32.xlu0 %v3836_v13, %s3682_s29 }
  0x77   : > { %614 = vrot.lane.b32.xlu1 %v3830_v11, %s3683_s8 }
  0x78   : > { %612 = vrot.lane.b32.xlu0 %v3820_v9, %s3683_s8 }
  0x7b   : > { %618 = vrot.lane.b32.xlu1 %v3825_v10, %s3683_s8 }
  0x7c   : > { %616 = vrot.lane.b32.xlu0 %v3817_v8, %s3683_s8 }
  0x7f   : > { %622 = vrot.lane.b32.xlu1 %v3833_v12, %s3683_s8 }
  0x80   : > { %620 = vrot.lane.b32.xlu0 %v3836_v13, %s3683_s8 }
  0x83   : > { %737 = vrot.lane.b32.xlu1 %v3830_v11, %s3678_s24 }
  0x84   : > { %735 = vrot.lane.b32.xlu0 %v3820_v9, %s3678_s24 }
  0x87   : > { %741 = vrot.lane.b32.xlu1 %v3825_v10, %s3678_s24 }
  0x88   : > { %739 = vrot.lane.b32.xlu0 %v3817_v8, %s3678_s24 }
  0x8b   : > { %745 = vrot.lane.b32.xlu1 %v3833_v12, %s3678_s24 }
  0x8c   : > { %743 = vrot.lane.b32.xlu0 %v3836_v13, %s3678_s24 }
  0x8f   : > { %753 = vrot.lane.b32.xlu1 %v3830_v11, %s3679_s11 }
  0x90   : > { %751 = vrot.lane.b32.xlu0 %v3820_v9, %s3679_s11 }
  0x93   : > { %757 = vrot.lane.b32.xlu1 %v3825_v10, %s3679_s11 }
  0x94   : > { %755 = vrot.lane.b32.xlu0 %v3817_v8, %s3679_s11 }
  0x97   : > { %761 = vrot.lane.b32.xlu1 %v3833_v12, %s3679_s11 }
  0x98   : > { %759 = vrot.lane.b32.xlu0 %v3836_v13, %s3679_s11 }
  0x9b   : > { %769 = vrot.lane.b32.xlu1 %v3830_v11, %s3680_s12 }
  0x9c   : > { %767 = vrot.lane.b32.xlu0 %v3820_v9, %s3680_s12 }
  0x9f   : > { %773 = vrot.lane.b32.xlu1 %v3825_v10, %s3680_s12 }
  0xa0   : > { %771 = vrot.lane.b32.xlu0 %v3817_v8, %s3680_s12 }
  0xa3   : > { %777 = vrot.lane.b32.xlu1 %v3833_v12, %s3680_s12 }
  0xa4   : > { %775 = vrot.lane.b32.xlu0 %v3836_v13, %s3680_s12 }
  0xa7   : > { %785 = vrot.lane.b32.xlu1 %v3830_v11, %s3681_s23 }
  0xa8   : > { %783 = vrot.lane.b32.xlu0 %v3820_v9, %s3681_s23 }
  0xab   : > { %789 = vrot.lane.b32.xlu1 %v3825_v10, %s3681_s23 }
  0xac   : > { %787 = vrot.lane.b32.xlu0 %v3817_v8, %s3681_s23 }
  0xad   : > { %v512_v14 = vpop.permute.xlu1 %511 }
  0xae   : > { %v508_v15 = vpop.permute.xlu0 %507 }
  0xaf   : > { %793 = vrot.lane.b32.xlu1 %v3833_v12, %s3681_s23 }
  0xb0   : > { %791 = vrot.lane.b32.xlu0 %v3836_v13, %s3681_s23 }
  0xb1   : > { %v514_v16 = vpop.permute.xlu1 %513 }
  0xb2   : > { %v510_v17 = vpop.permute.xlu0 %509 }
  0xb3   : > { %801 = vrot.lane.b32.xlu1 %v3830_v11, %s3682_s29  ;;  %v521_v18 = vsel %vm519_vm0, %v510_v17, %v512_v14  ;;  %v520_v19 = vsel %vm519_vm0, %v508_v15, %v510_v17  ;;  %v3560_v17 = vld [vmem:[%s5773_s2] ss:$8 sps:$4 sm:$0xff]  }
  0xb4   : > { %799 = vrot.lane.b32.xlu0 %v3820_v9, %s3682_s29  ;;  %666 = vmatprep.subr.bf16.mxu1 %v521_v18 }
  0xb5   : > { %667 = vmatpush1.bf16.msra.mxu1 %v520_v19  ;;  %v518_v20 = vpop.permute.xlu1 %517 }
  0xb6   : > { %v516_v21 = vpop.permute.xlu0 %515 }
  0xb7   : > { %805 = vrot.lane.b32.xlu1 %v3825_v10, %s3682_s29  ;;  %v523_v22 = vsel %vm519_vm0, %v516_v21, %v518_v20  ;;  %v522_v23 = vsel %vm519_vm0, %v514_v16, %v516_v21 }
  0xb8   : > { %803 = vrot.lane.b32.xlu0 %v3817_v8, %s3682_s29  ;;  %668 = vmatprep.subr.bf16.mxu1 %v523_v22 }
  0xb9   : > { %669 = vmatpush1.bf16.msra.mxu1 %v522_v23  ;;  %v531_v24 = vpop.permute.xlu1 %530 }
  0xba   : > { %v529_v25 = vpop.permute.xlu0 %528 }
  0xbb   : > { %809 = vrot.lane.b32.xlu1 %v3833_v12, %s3682_s29  ;;  %v541_v29 = vsel %vm540_vm1, %v529_v25, %v531_v24 }
  0xbc   : > { %807 = vrot.lane.b32.xlu0 %v3836_v13, %s3682_s29 }
  0xbd   : > { %v535_v26 = vpop.permute.xlu1 %534 }
  0xbe   : > { %v533_v27 = vpop.permute.xlu0 %532 }
  0xbf   : > { %817 = vrot.lane.b32.xlu1 %v3830_v11, %s3683_s8  ;;  %v542_v28 = vsel %vm540_vm1, %v531_v24, %v533_v27 }
  0xc0   : > { %815 = vrot.lane.b32.xlu0 %v3820_v9, %s3683_s8  ;;  %670 = vmatprep.subr.bf16.mxu1 %v542_v28 }
  0xc1   : > { %671 = vmatpush1.bf16.msra.mxu1 %v541_v29  ;;  %v539_v30 = vpop.permute.xlu1 %538 }
  0xc2   : > { %v537_v31 = vpop.permute.xlu0 %536 }
  0xc3   : > { %821 = vrot.lane.b32.xlu1 %v3825_v10, %s3683_s8  ;;  %v544_v32 = vsel %vm540_vm1, %v537_v31, %v539_v30  ;;  %v543_v33 = vsel %vm540_vm1, %v535_v26, %v537_v31 }
  0xc4   : > { %819 = vrot.lane.b32.xlu0 %v3817_v8, %s3683_s8  ;;  %672 = vmatprep.subr.bf16.mxu1 %v544_v32 }
  0xc5   : > { %673 = vmatpush1.bf16.msra.mxu1 %v543_v33  ;;  %v552_v34 = vpop.permute.xlu1 %551 }
  0xc6   : > { %v550_v35 = vpop.permute.xlu0 %549 }
  0xc7   : > { %825 = vrot.lane.b32.xlu1 %v3833_v12, %s3683_s8  ;;  %v562_v39 = vsel %vm561_vm2, %v550_v35, %v552_v34 }
  0xc8   : > { %823 = vrot.lane.b32.xlu0 %v3836_v13, %s3683_s8 }
  0xc9   : > { %v556_v36 = vpop.permute.xlu1 %555 }
  0xca   : > { %v554_v37 = vpop.permute.xlu0 %553 }
  0xcb   : > { %v563_v38 = vsel %vm561_vm2, %v552_v34, %v554_v37  ;;  %856 = vrot.lane.b32.xlu1 %v3830_v11, %s3684_s10 }
  0xcc   : > { %674 = vmatprep.subr.bf16.mxu1 %v563_v38  ;;  %854 = vrot.lane.b32.xlu0 %v3820_v9, %s3684_s10 }
  0xcd   : > { %675 = vmatpush1.bf16.msra.mxu1 %v562_v39  ;;  %v560_v40 = vpop.permute.xlu1 %559 }
  0xce   : > { %v558_v41 = vpop.permute.xlu0 %557 }
  0xcf   : > { %v565_v42 = vsel %vm561_vm2, %v558_v41, %v560_v40  ;;  %v564_v43 = vsel %vm561_vm2, %v556_v36, %v558_v41  ;;  %860 = vrot.lane.b32.xlu1 %v3825_v10, %s3684_s10 }
  0xd0   : > { %676 = vmatprep.subr.bf16.mxu1 %v565_v42  ;;  %858 = vrot.lane.b32.xlu0 %v3817_v8, %s3684_s10 }
  0xd1   : > { %677 = vmatpush1.bf16.msra.mxu1 %v564_v43  ;;  %v573_v44 = vpop.permute.xlu1 %572 }
  0xd2   : > { %v571_v45 = vpop.permute.xlu0 %570 }
  0xd3   : > { %864 = vrot.lane.b32.xlu1 %v3833_v12, %s3684_s10  ;;  %v583_v49 = vsel %vm582_vm3, %v571_v45, %v573_v44 }
  0xd4   : > { %862 = vrot.lane.b32.xlu0 %v3836_v13, %s3684_s10 }
  0xd5   : > { %v577_v46 = vpop.permute.xlu1 %576 }
  0xd6   : > { %v575_v47 = vpop.permute.xlu0 %574 }
  0xd7   : > { %v584_v48 = vsel %vm582_vm3, %v573_v44, %v575_v47 }
  0xd8   : > { %678 = vmatprep.subr.bf16.mxu1 %v584_v48 }
  0xd9   : > { %679 = vmatpush1.bf16.msra.mxu1 %v583_v49  ;;  %v581_v51 = vpop.permute.xlu1 %580 }
  0xda   : > { %v579_v52 = vpop.permute.xlu0 %578 }
  0xdb   : > { %v586_v53 = vsel %vm582_vm3, %v579_v52, %v581_v51  ;;  %v585_v54 = vsel %vm582_vm3, %v577_v46, %v579_v52 }
  0xdc   : > { %680 = vmatprep.subr.bf16.mxu1 %v586_v53 }
  0xdd   : > { %681 = vmatpush1.bf16.msra.mxu1 %v585_v54  ;;  %v594_v55 = vpop.permute.xlu1 %593 }
  0xde   : > { %v592_v56 = vpop.permute.xlu0 %591 }
  0xdf   : > { %v604_v60 = vsel %vm603_vm5, %v592_v56, %v594_v55 }
  0xe1   : > { %v598_v57 = vpop.permute.xlu1 %597 }
  0xe2   : > { %v596_v58 = vpop.permute.xlu0 %595 }
  0xe3   : > { %v605_v59 = vsel %vm603_vm5, %v594_v55, %v596_v58 }
  0xe4   : > { %682 = vmatprep.subr.bf16.mxu1 %v605_v59 }
  0xe5   : > { %683 = vmatpush1.bf16.msra.mxu1 %v604_v60  ;;  %v602_v61 = vpop.permute.xlu1 %601 }
  0xe6   : > { %v600_v62 = vpop.permute.xlu0 %599 }
  0xe7   : > { %v607_v63 = vsel %vm603_vm5, %v600_v62, %v602_v61  ;;  %v606_v0 = vsel %vm603_vm5, %v598_v57, %v600_v62 }
  0xe8   : > { %684 = vmatprep.subr.bf16.mxu1 %v607_v63 }
  0xe9   : > { %685 = vmatpush1.bf16.msra.mxu1 %v606_v0  ;;  %v615_v1 = vpop.permute.xlu1 %614 }
  0xea   : > { %v613_v2 = vpop.permute.xlu0 %612 }
  0xeb   : > { %v625_v6 = vsel %vm624_vm6, %v613_v2, %v615_v1 }
  0xed   : > { %v619_v3 = vpop.permute.xlu1 %618 }
  0xee   : > { %v617_v4 = vpop.permute.xlu0 %616 }
  0xef   : > { %v626_v5 = vsel %vm624_vm6, %v615_v1, %v617_v4 }
  0xf0   : > { %686 = vmatprep.subr.bf16.mxu1 %v626_v5 }
  0xf1   : > { %687 = vmatpush1.bf16.msra.mxu1 %v625_v6  ;;  %v623_v7 = vpop.permute.xlu1 %622 }
  0xf2   : > { %v621_v14 = vpop.permute.xlu0 %620 }
  0xf3   : > { %v628_v15 = vsel %vm624_vm6, %v621_v14, %v623_v7  ;;  %v627_v16 = vsel %vm624_vm6, %v619_v3, %v621_v14 }
  0xf4   : > { %688 = vmatprep.subr.bf16.mxu1 %v628_v15 }
  0xf5   : > { %689 = vmatpush1.bf16.msra.mxu1 %v627_v16  ;;  %v738_v18 = vpop.permute.xlu1 %737 }
  0xf6   : > { %v736_v19 = vpop.permute.xlu0 %735 }
  0xf7   : > { %v747_v20 = vsel %vm519_vm0, %v736_v19, %v738_v18 }
  0xf8   : > { %866 = vrot.lane.b32.xlu0 %v747_v20, %s3684_s10  ;;  %695 = vmatmul.mubr.bf16.vlgmr.msra.gmra.mrb[0].mxu1 %v3560_v17 }
  0xf9   : > { %v742_v21 = vpop.permute.xlu1 %741 }
  0xfa   : > { %v740_v22 = vpop.permute.xlu0 %739 }
  0xfb   : > { %v748_v23 = vsel %vm519_vm0, %v738_v18, %v740_v22 }
  0xfc   : > { %868 = vrot.lane.b32.xlu1 %v748_v23, %s3684_s10  ;;  %870 = vrot.lane.b32.xlu0 %v740_v22, %s3684_s10 }
  0xfd   : > { %v746_v24 = vpop.permute.xlu1 %745 }
  0xfe   : > { %v744_v25 = vpop.permute.xlu0 %743 }
  0xff   : > { %v750_v26 = vsel %vm519_vm0, %v744_v25, %v746_v24  ;;  %v749_v27 = vsel %vm519_vm0, %v742_v21, %v744_v25 }
 0x100   : > { %874 = vrot.lane.b32.xlu0 %v750_v26, %s3684_s10  ;;  %872 = vrot.lane.b32.xlu1 %v749_v27, %s3684_s10 }
 0x101   : > { %v754_v28 = vpop.permute.xlu1 %753 }
 0x102   : > { %v752_v29 = vpop.permute.xlu0 %751 }
 0x103   : > { %v763_v30 = vsel %vm540_vm1, %v752_v29, %v754_v28 }
 0x104   : > { %876 = vrot.lane.b32.xlu1 %v746_v24, %s3684_s10  ;;  %878 = vrot.lane.b32.xlu0 %v763_v30, %s3684_s10 }
 0x105   : > { %v758_v31 = vpop.permute.xlu1 %757 }
 0x106   : > { %v756_v32 = vpop.permute.xlu0 %755 }
 0x107   : > { %v764_v33 = vsel %vm540_vm1, %v754_v28, %v756_v32 }
 0x108   : > { %880 = vrot.lane.b32.xlu1 %v764_v33, %s3684_s10  ;;  %882 = vrot.lane.b32.xlu0 %v756_v32, %s3684_s10 }
 0x109   : > { %v762_v34 = vpop.permute.xlu1 %761 }
 0x10a   : > { %v760_v35 = vpop.permute.xlu0 %759 }
 0x10b   : > { %v766_v36 = vsel %vm540_vm1, %v760_v35, %v762_v34  ;;  %v765_v37 = vsel %vm540_vm1, %v758_v31, %v760_v35 }
 0x10c   : > { %886 = vrot.lane.b32.xlu0 %v766_v36, %s3684_s10  ;;  %884 = vrot.lane.b32.xlu1 %v765_v37, %s3684_s10 }
 0x10d   : > { %v770_v38 = vpop.permute.xlu1 %769 }
 0x10e   : > { %v768_v39 = vpop.permute.xlu0 %767 }
 0x10f   : > { %v779_v40 = vsel %vm561_vm2, %v768_v39, %v770_v38 }
 0x110   : > { %888 = vrot.lane.b32.xlu1 %v762_v34, %s3684_s10  ;;  %890 = vrot.lane.b32.xlu0 %v779_v40, %s3684_s10 }
 0x111   : > { %v774_v41 = vpop.permute.xlu1 %773 }
 0x112   : > { %v772_v42 = vpop.permute.xlu0 %771 }
 0x113   : > { %v780_v43 = vsel %vm561_vm2, %v770_v38, %v772_v42 }
 0x114   : > { %892 = vrot.lane.b32.xlu1 %v780_v43, %s3684_s10  ;;  %894 = vrot.lane.b32.xlu0 %v772_v42, %s3684_s10 }
 0x115   : > { %v778_v44 = vpop.permute.xlu1 %777 }
 0x116   : > { %v776_v45 = vpop.permute.xlu0 %775 }
 0x117   : > { %v782_v46 = vsel %vm561_vm2, %v776_v45, %v778_v44  ;;  %v781_v47 = vsel %vm561_vm2, %v774_v41, %v776_v45 }
 0x118   : > { %898 = vrot.lane.b32.xlu0 %v782_v46, %s3684_s10  ;;  %896 = vrot.lane.b32.xlu1 %v781_v47, %s3684_s10 }
 0x119   : > { %v786_v48 = vpop.permute.xlu1 %785 }
 0x11a   : > { %v784_v49 = vpop.permute.xlu0 %783 }
 0x11b   : > { %v795_v50 = vsel %vm582_vm3, %v784_v49, %v786_v48 }
 0x11c   : > { %900 = vrot.lane.b32.xlu1 %v778_v44, %s3684_s10  ;;  %902 = vrot.lane.b32.xlu0 %v795_v50, %s3684_s10 }
 0x11d   : > { %v790_v51 = vpop.permute.xlu1 %789 }
 0x11e   : > { %v788_v52 = vpop.permute.xlu0 %787 }
 0x11f   : > { %v796_v53 = vsel %vm582_vm3, %v786_v48, %v788_v52 }
 0x120   : > { %904 = vrot.lane.b32.xlu1 %v796_v53, %s3684_s10  ;;  %906 = vrot.lane.b32.xlu0 %v788_v52, %s3684_s10 }
 0x121   : > { %v794_v54 = vpop.permute.xlu1 %793 }
 0x122   : > { %v792_v55 = vpop.permute.xlu0 %791 }
 0x123   : > { %v798_v56 = vsel %vm582_vm3, %v792_v55, %v794_v54  ;;  %v797_v57 = vsel %vm582_vm3, %v790_v51, %v792_v55 }
 0x124   : > { %910 = vrot.lane.b32.xlu0 %v798_v56, %s3684_s10  ;;  %908 = vrot.lane.b32.xlu1 %v797_v57, %s3684_s10 }
 0x125   : > { %v802_v58 = vpop.permute.xlu1 %801 }
 0x126   : > { %v800_v59 = vpop.permute.xlu0 %799 }
 0x127   : > { %v811_v60 = vsel %vm603_vm5, %v800_v59, %v802_v58 }
 0x128   : > { %912 = vrot.lane.b32.xlu1 %v794_v54, %s3684_s10  ;;  %914 = vrot.lane.b32.xlu0 %v811_v60, %s3684_s10 }
 0x129   : > { %v806_v61 = vpop.permute.xlu1 %805 }
 0x12a   : > { %v804_v62 = vpop.permute.xlu0 %803 }
 0x12b   : > { %v812_v63 = vsel %vm603_vm5, %v802_v58, %v804_v62 }
 0x12c   : > { %916 = vrot.lane.b32.xlu1 %v812_v63, %s3684_s10  ;;  %918 = vrot.lane.b32.xlu0 %v804_v62, %s3684_s10 }
 0x12d   : > { %v810_v0 = vpop.permute.xlu1 %809 }
 0x12e   : > { %v808_v1 = vpop.permute.xlu0 %807 }
 0x12f   : > { %v814_v2 = vsel %vm603_vm5, %v808_v1, %v810_v0  ;;  %v813_v3 = vsel %vm603_vm5, %v806_v61, %v808_v1 }
 0x130   : > { %922 = vrot.lane.b32.xlu0 %v814_v2, %s3684_s10  ;;  %920 = vrot.lane.b32.xlu1 %v813_v3, %s3684_s10 }
 0x131   : > { %v818_v4 = vpop.permute.xlu1 %817 }
 0x132   : > { %v816_v5 = vpop.permute.xlu0 %815 }
 0x133   : > { %v827_v6 = vsel %vm624_vm6, %v816_v5, %v818_v4 }
 0x134   : > { %924 = vrot.lane.b32.xlu1 %v810_v0, %s3684_s10  ;;  %926 = vrot.lane.b32.xlu0 %v827_v6, %s3684_s10 }
 0x135   : > { %v822_v7 = vpop.permute.xlu1 %821 }
 0x136   : > { %v820_v14 = vpop.permute.xlu0 %819 }
 0x137   : > { %v828_v15 = vsel %vm624_vm6, %v818_v4, %v820_v14 }
 0x138   : > { %928 = vrot.lane.b32.xlu1 %v828_v15, %s3684_s10  ;;  %930 = vrot.lane.b32.xlu0 %v820_v14, %s3684_s10 }
 0x139   : > { %v826_v16 = vpop.permute.xlu1 %825 }
 0x13a   : > { %v824_v17 = vpop.permute.xlu0 %823 }
 0x13b   : > { %v830_v18 = vsel %vm624_vm6, %v824_v17, %v826_v16  ;;  %v829_v19 = vsel %vm624_vm6, %v822_v7, %v824_v17 }
 0x13c   : > { %934 = vrot.lane.b32.xlu0 %v830_v18, %s3684_s10  ;;  %932 = vrot.lane.b32.xlu1 %v829_v19, %s3684_s10 }
 0x13d   : > { %v857_v20 = vpop.permute.xlu1 %856 }
 0x13e   : > { %v855_v21 = vpop.permute.xlu0 %854 }
 0x13f   : > { %v939_v24 = vsel %vm938_vm7, %v855_v21, %v857_v20 }
 0x140   : > { %1090 = vrot.lane.b32.xlu0 %v3820_v9, %s3678_s24  ;;  %936 = vrot.lane.b32.xlu1 %v826_v16, %s3684_s10  ;;  %s3687_s10 = smov 48  }
 0x141   : > { %v861_v22 = vpop.permute.xlu1 %860 }
 0x142   : > { %v859_v23 = vpop.permute.xlu0 %858 }
 0x143   : > { %v940_v25 = vsel %vm938_vm7, %v857_v20, %v859_v23 }
 0x144   : > { %1094 = vrot.lane.b32.xlu0 %v3817_v8, %s3678_s24  ;;  %1092 = vrot.lane.b32.xlu1 %v3830_v11, %s3678_s24 }
 0x145   : > { %1001 = vmatprep.subr.bf16.mxu1 %v940_v25  ;;  %v865_v26 = vpop.permute.xlu1 %864 }
 0x146   : > { %1002 = vmatpush1.bf16.msra.mxu1 %v939_v24  ;;  %v863_v27 = vpop.permute.xlu0 %862 }
 0x147   : > { %v942_v28 = vsel %vm938_vm7, %v863_v27, %v865_v26  ;;  %v941_v29 = vsel %vm938_vm7, %v861_v22, %v863_v27 }
 0x148   : > { %1098 = vrot.lane.b32.xlu0 %v3836_v13, %s3678_s24  ;;  %1096 = vrot.lane.b32.xlu1 %v3825_v10, %s3678_s24 }
 0x149   : > { %1003 = vmatprep.subr.bf16.mxu1 %v942_v28 }
 0x14a   : > { %1004 = vmatpush1.bf16.msra.mxu1 %v941_v29 }
 0x14c   : > { %1447 = vrot.lane.b32.xlu0 %v3830_v11, %s3678_s24  ;;  %1100 = vrot.lane.b32.xlu1 %v3833_v12, %s3678_s24 }
 0x150   : > { %1445 = vrot.lane.b32.xlu0 %v3820_v9, %s3678_s24  ;;  %1449 = vrot.lane.b32.xlu1 %v3817_v8, %s3678_s24 }
 0x154   : > { %1453 = vrot.lane.b32.xlu1 %v3836_v13, %s3678_s24  ;;  %1455 = vrot.lane.b32.xlu0 %v3833_v12, %s3678_s24 }
 0x158   : > { %1451 = vrot.lane.b32.xlu1 %v3825_v10, %s3678_s24  ;;  %1463 = vrot.lane.b32.xlu0 %v3830_v11, %s3679_s11 }
 0x15c   : > { %1461 = vrot.lane.b32.xlu0 %v3820_v9, %s3679_s11  ;;  %1465 = vrot.lane.b32.xlu1 %v3817_v8, %s3679_s11 }
 0x160   : > { %1469 = vrot.lane.b32.xlu1 %v3836_v13, %s3679_s11  ;;  %1471 = vrot.lane.b32.xlu0 %v3833_v12, %s3679_s11 }
 0x164   : > { %1467 = vrot.lane.b32.xlu1 %v3825_v10, %s3679_s11  ;;  %1479 = vrot.lane.b32.xlu0 %v3830_v11, %s3680_s12 }
 0x168   : > { %1477 = vrot.lane.b32.xlu0 %v3820_v9, %s3680_s12  ;;  %1481 = vrot.lane.b32.xlu1 %v3817_v8, %s3680_s12 }
 0x16a   : > { %v867_v30 = vpop.permute.xlu0 %866 }
 0x16c   : > { %1485 = vrot.lane.b32.xlu1 %v3836_v13, %s3680_s12  ;;  %1487 = vrot.lane.b32.xlu0 %v3833_v12, %s3680_s12 }
 0x16e   : > { %v869_v31 = vpop.permute.xlu1 %868  ;;  %v871_v32 = vpop.permute.xlu0 %870 }
 0x16f   : > { %v944_v33 = vsel %vm938_vm7, %v869_v31, %v871_v32  ;;  %v943_v34 = vsel %vm938_vm7, %v867_v30, %v869_v31 }
 0x170   : > { %1005 = vmatprep.subr.bf16.mxu1 %v944_v33  ;;  %1483 = vrot.lane.b32.xlu1 %v3825_v10, %s3680_s12 }
 0x171   : > { %1006 = vmatpush1.bf16.msra.mxu1 %v943_v34  ;;  %1495 = vrot.lane.b32.xlu0 %v3830_v11, %s3681_s23 }
 0x172   : > { %v873_v35 = vpop.permute.xlu1 %872  ;;  %v875_v36 = vpop.permute.xlu0 %874 }
 0x173   : > { %v945_v40 = vsel %vm938_vm7, %v873_v35, %v875_v36 }
 0x174   : > { %1497 = vrot.lane.b32.xlu1 %v3817_v8, %s3681_s23 }
 0x175   : > { %1493 = vrot.lane.b32.xlu0 %v3820_v9, %s3681_s23 }
 0x176   : > { %v877_v37 = vpop.permute.xlu1 %876  ;;  %v879_v38 = vpop.permute.xlu0 %878 }
 0x177   : > { %v946_v39 = vsel %vm938_vm7, %v875_v36, %v877_v37 }
 0x178   : > { %1007 = vmatprep.subr.bf16.mxu1 %v946_v39  ;;  %1501 = vrot.lane.b32.xlu1 %v3836_v13, %s3681_s23 }
 0x179   : > { %1008 = vmatpush1.bf16.msra.mxu1 %v945_v40  ;;  %1503 = vrot.lane.b32.xlu0 %v3833_v12, %s3681_s23 }
 0x17a   : > { %v881_v41 = vpop.permute.xlu1 %880  ;;  %v883_v42 = vpop.permute.xlu0 %882 }
 0x17b   : > { %v948_v43 = vsel %vm938_vm7, %v881_v41, %v883_v42  ;;  %v947_v44 = vsel %vm938_vm7, %v879_v38, %v881_v41 }
 0x17c   : > { %1009 = vmatprep.subr.bf16.mxu1 %v948_v43  ;;  %1499 = vrot.lane.b32.xlu1 %v3825_v10, %s3681_s23 }
 0x17d   : > { %1010 = vmatpush1.bf16.msra.mxu1 %v947_v44  ;;  %1511 = vrot.lane.b32.xlu0 %v3830_v11, %s3682_s29 }
 0x17e   : > { %v885_v45 = vpop.permute.xlu1 %884  ;;  %v887_v46 = vpop.permute.xlu0 %886 }
 0x17f   : > { %v949_v50 = vsel %vm938_vm7, %v885_v45, %v887_v46 }
 0x180   : > { %1513 = vrot.lane.b32.xlu1 %v3817_v8, %s3682_s29 }
 0x181   : > { %1509 = vrot.lane.b32.xlu0 %v3820_v9, %s3682_s29 }
 0x182   : > { %v889_v47 = vpop.permute.xlu1 %888  ;;  %v891_v48 = vpop.permute.xlu0 %890 }
 0x183   : > { %v950_v49 = vsel %vm938_vm7, %v887_v46, %v889_v47 }
 0x184   : > { %1011 = vmatprep.subr.bf16.mxu1 %v950_v49  ;;  %1517 = vrot.lane.b32.xlu1 %v3836_v13, %s3682_s29 }
 0x185   : > { %1012 = vmatpush1.bf16.msra.mxu1 %v949_v50  ;;  %1519 = vrot.lane.b32.xlu0 %v3833_v12, %s3682_s29 }
 0x186   : > { %v893_v51 = vpop.permute.xlu1 %892  ;;  %v895_v52 = vpop.permute.xlu0 %894 }
 0x187   : > { %v952_v53 = vsel %vm938_vm7, %v893_v51, %v895_v52  ;;  %v951_v54 = vsel %vm938_vm7, %v891_v48, %v893_v51  ;;  %v4248_v52 = vld [vmem:[%s3810_s22] ss:$8 sps:$4 sm:$0xff]  }
 0x188   : > { %1013 = vmatprep.subr.bf16.mxu1 %v952_v53  ;;  %1515 = vrot.lane.b32.xlu1 %v3825_v10, %s3682_s29 }
 0x189   : > { %1014 = vmatpush1.bf16.msra.mxu1 %v951_v54  ;;  %1527 = vrot.lane.b32.xlu0 %v3830_v11, %s3683_s8 }
 0x18a   : > { %v897_v55 = vpop.permute.xlu1 %896  ;;  %v899_v56 = vpop.permute.xlu0 %898 }
 0x18b   : > { %v953_v60 = vsel %vm938_vm7, %v897_v55, %v899_v56 }
 0x18c   : > { %1529 = vrot.lane.b32.xlu1 %v3817_v8, %s3683_s8 }
 0x18d   : > { %1525 = vrot.lane.b32.xlu0 %v3820_v9, %s3683_s8 }
 0x18e   : > { %v901_v57 = vpop.permute.xlu1 %900  ;;  %v903_v58 = vpop.permute.xlu0 %902 }
 0x18f   : > { %v954_v59 = vsel %vm938_vm7, %v899_v56, %v901_v57 }
 0x190   : > { %1015 = vmatprep.subr.bf16.mxu1 %v954_v59  ;;  %1533 = vrot.lane.b32.xlu1 %v3836_v13, %s3683_s8 }
 0x191   : > { %1016 = vmatpush1.bf16.msra.mxu1 %v953_v60  ;;  %1535 = vrot.lane.b32.xlu0 %v3833_v12, %s3683_s8  ;;  %v4265_v60 = vld [vmem:[%s3810_s22 + $0x10] ss:$8 sps:$4 sm:$0xff]  }
 0x192   : > { %v905_v61 = vpop.permute.xlu1 %904  ;;  %v907_v62 = vpop.permute.xlu0 %906 }
 0x193   : > { %v956_v63 = vsel %vm938_vm7, %v905_v61, %v907_v62  ;;  %v955_v0 = vsel %vm938_vm7, %v903_v58, %v905_v61  ;;  %v4260_v58 = vld [vmem:[%s3808_s21 + $0x10] ss:$8 sps:$4 sm:$0xff]  }
 0x194   : > { %1017 = vmatprep.subr.bf16.mxu1 %v956_v63  ;;  %1531 = vrot.lane.b32.xlu1 %v3825_v10, %s3683_s8 }
 0x195   : > { %1018 = vmatpush1.bf16.msra.mxu1 %v955_v0  ;;  %1566 = vrot.lane.b32.xlu0 %v3830_v11, %s3685_s18 }
 0x196   : > { %v909_v1 = vpop.permute.xlu1 %908  ;;  %v911_v2 = vpop.permute.xlu0 %910 }
 0x197   : > { %v957_v6 = vsel %vm938_vm7, %v909_v1, %v911_v2  ;;  %v4276_v1 = vld [vmem:[%s3808_s21 + $0x4] ss:$8 sps:$4 sm:$0xff]  }
 0x198   : > { %1568 = vrot.lane.b32.xlu1 %v3817_v8, %s3685_s18 }
 0x199   : > { %1564 = vrot.lane.b32.xlu0 %v3820_v9, %s3685_s18 }
 0x19a   : > { %v913_v3 = vpop.permute.xlu1 %912  ;;  %v915_v4 = vpop.permute.xlu0 %914 }
 0x19b   : > { %v958_v5 = vsel %vm938_vm7, %v911_v2, %v913_v3 }
 0x19c   : > { %1019 = vmatprep.subr.bf16.mxu1 %v958_v5  ;;  %1572 = vrot.lane.b32.xlu1 %v3836_v13, %s3685_s18 }
 0x19d   : > { %1020 = vmatpush1.bf16.msra.mxu1 %v957_v6  ;;  %1574 = vrot.lane.b32.xlu0 %v3833_v12, %s3685_s18 }
 0x19e   : > { %v917_v7 = vpop.permute.xlu1 %916  ;;  %v919_v14 = vpop.permute.xlu0 %918 }
 0x19f   : > { %v960_v15 = vsel %vm938_vm7, %v917_v7, %v919_v14  ;;  %v959_v16 = vsel %vm938_vm7, %v915_v4, %v917_v7  ;;  %v4282_v4 = vld [vmem:[%s3808_s21] ss:$8 sps:$4 sm:$0xff]  }
 0x1a0   : > { %1021 = vmatprep.subr.bf16.mxu1 %v960_v15  ;;  %1570 = vrot.lane.b32.xlu1 %v3825_v10, %s3685_s18 }
 0x1a1   : > { %1022 = vmatpush1.bf16.msra.mxu1 %v959_v16  ;;  %1802 = vrot.lane.b32.xlu0 %v3830_v11, %s3678_s24 }
 0x1a2   : > { %v921_v17 = vpop.permute.xlu1 %920  ;;  %v923_v18 = vpop.permute.xlu0 %922 }
 0x1a3   : > { %v961_v22 = vsel %vm938_vm7, %v921_v17, %v923_v18  ;;  %v4297_v17 = vld [vmem:[%s3808_s21 + $0x14] ss:$8 sps:$4 sm:$0xff]  }
 0x1a4   : > { %1804 = vrot.lane.b32.xlu1 %v3817_v8, %s3678_s24 }
 0x1a5   : > { %1800 = vrot.lane.b32.xlu0 %v3820_v9, %s3678_s24 }
 0x1a6   : > { %v925_v19 = vpop.permute.xlu1 %924  ;;  %v927_v20 = vpop.permute.xlu0 %926 }
 0x1a7   : > { %v962_v21 = vsel %vm938_vm7, %v923_v18, %v925_v19 }
 0x1a8   : > { %1023 = vmatprep.subr.bf16.mxu1 %v962_v21 }
 0x1a9   : > { %1024 = vmatpush1.bf16.msra.mxu1 %v961_v22 }
 0x1aa   : > { %v929_v23 = vpop.permute.xlu1 %928  ;;  %v931_v24 = vpop.permute.xlu0 %930 }
 0x1ab   : > { %v964_v25 = vsel %vm938_vm7, %v929_v23, %v931_v24  ;;  %v963_v26 = vsel %vm938_vm7, %v927_v20, %v929_v23 }
 0x1ac   : > { %1025 = vmatprep.subr.bf16.mxu1 %v964_v25 }
 0x1ad   : > { %1026 = vmatpush1.bf16.msra.mxu1 %v963_v26 }
 0x1ae   : > { %v933_v8 = vpop.permute.xlu1 %932  ;;  %v935_v27 = vpop.permute.xlu0 %934 }
 0x1af   : > { %v965_v31 = vsel %vm938_vm7, %v933_v8, %v935_v27 }
 0x1b2   : > { %v937_v28 = vpop.permute.xlu1 %936  ;;  %v4213_v29 = vpop.permute.xlu0 %1090 }
 0x1b3   : > { %v966_v30 = vsel %vm938_vm7, %v935_v27, %v937_v28 }
 0x1b4   : > { %1027 = vmatprep.subr.bf16.mxu1 %v966_v30 }
 0x1b5   : > { %1028 = vmatpush1.bf16.msra.mxu1 %v965_v31 }
 0x1b6   : > { %v4217_v32 = vpop.permute.xlu1 %1092  ;;  %v4219_v33 = vpop.permute.xlu0 %1094 }
 0x1ba   : > { %v4221_v34 = vpop.permute.xlu1 %1096  ;;  %v4223_v35 = vpop.permute.xlu0 %1098 }
 0x1be   : > { %v4225_v36 = vpop.permute.xlu1 %1100  ;;  %v1448_v37 = vpop.permute.xlu0 %1447 }
 0x1c2   : > { %v1450_v38 = vpop.permute.xlu1 %1449  ;;  %v1446_v39 = vpop.permute.xlu0 %1445 }
 0x1c3   : > { %1580 = vrot.lane.b32.xlu0 %v1450_v38, %s3685_s18  ;;  %v1458_v40 = vsel %vm519_vm0, %v1448_v37, %v1450_v38  ;;  %v1457_v43 = vsel %vm519_vm0, %v1446_v39, %v1448_v37 }
 0x1c4   : > { %1578 = vrot.lane.b32.xlu1 %v1458_v40, %s3685_s18 }
 0x1c6   : > { %v1454_v41 = vpop.permute.xlu1 %1453  ;;  %v1456_v42 = vpop.permute.xlu0 %1455 }
 0x1c7   : > { %1808 = vrot.lane.b32.xlu0 %v3836_v13, %s3678_s24  ;;  %v1460_v46 = vsel %vm519_vm0, %v1454_v41, %v1456_v42 }
 0x1c8   : > { %1576 = vrot.lane.b32.xlu1 %v1457_v43, %s3685_s18 }
 0x1ca   : > { %v1452_v44 = vpop.permute.xlu1 %1451  ;;  %v1464_v45 = vpop.permute.xlu0 %1463 }
 0x1cb   : > { %1806 = vrot.lane.b32.xlu0 %v3825_v10, %s3678_s24  ;;  %v1459_v51 = vsel %vm519_vm0, %v1452_v44, %v1454_v41 }
 0x1cc   : > { %1810 = vrot.lane.b32.xlu1 %v3833_v12, %s3678_s24 }
 0x1ce   : > { %v1466_v47 = vpop.permute.xlu1 %1465  ;;  %v1462_v48 = vpop.permute.xlu0 %1461 }
 0x1cf   : > { %1586 = vrot.lane.b32.xlu0 %v1456_v42, %s3685_s18  ;;  %v1474_v53 = vsel %vm540_vm1, %v1464_v45, %v1466_v47  ;;  %v1473_v57 = vsel %vm540_vm1, %v1462_v48, %v1464_v45 }
 0x1d0   : > { %1584 = vrot.lane.b32.xlu1 %v1460_v46, %s3685_s18 }
 0x1d2   : > { %v1470_v49 = vpop.permute.xlu1 %1469  ;;  %v1472_v50 = vpop.permute.xlu0 %1471 }
 0x1d3   : > { %1818 = vrot.lane.b32.xlu0 %v3830_v11, %s3679_s11  ;;  %v1476_v61 = vsel %vm540_vm1, %v1470_v49, %v1472_v50 }
 0x1d4   : > { %1582 = vrot.lane.b32.xlu1 %v1459_v51, %s3685_s18 }
 0x1d6   : > { %v1468_v10 = vpop.permute.xlu1 %1467  ;;  %v1480_v12 = vpop.permute.xlu0 %1479 }
 0x1d7   : > { %1816 = vrot.lane.b32.xlu0 %v3820_v9, %s3679_s11  ;;  %v1475_v0 = vsel %vm540_vm1, %v1468_v10, %v1470_v49 }
 0x1d8   : > { %1820 = vrot.lane.b32.xlu1 %v4248_v52, %s3679_s11 }
 0x1da   : > { %v1482_v54 = vpop.permute.xlu1 %1481  ;;  %v1478_v55 = vpop.permute.xlu0 %1477 }
 0x1db   : > { %1592 = vrot.lane.b32.xlu0 %v1466_v47, %s3685_s18  ;;  %v1490_v6 = vsel %vm561_vm2, %v1480_v12, %v1482_v54  ;;  %v1489_v16 = vsel %vm561_vm2, %v1478_v55, %v1480_v12 }
 0x1dc   : > { %1590 = vrot.lane.b32.xlu1 %v1474_v53, %s3685_s18 }
 0x1de   : > { %v1486_v11 = vpop.permute.xlu1 %1485  ;;  %v1488_v56 = vpop.permute.xlu0 %1487 }
 0x1df   : > { %1824 = vrot.lane.b32.xlu0 %v3836_v13, %s3679_s11  ;;  %v1492_v22 = vsel %vm561_vm2, %v1486_v11, %v1488_v56 }
 0x1e0   : > { %1588 = vrot.lane.b32.xlu1 %v1473_v57, %s3685_s18 }
 0x1e2   : > { %v1484_v9 = vpop.permute.xlu1 %1483 }
 0x1e3   : > { %1822 = vrot.lane.b32.xlu0 %v4260_v58, %s3679_s11  ;;  %v1496_v59 = vpop.permute.xlu0 %1495  ;;  %v1491_v25 = vsel %vm561_vm2, %v1484_v9, %v1486_v11 }
 0x1e4   : > { %1826 = vrot.lane.b32.xlu1 %v4265_v60, %s3679_s11 }
 0x1e6   : > { %v1498_v62 = vpop.permute.xlu1 %1497 }
 0x1e7   : > { %1598 = vrot.lane.b32.xlu0 %v1472_v50, %s3685_s18  ;;  %v1494_v13 = vpop.permute.xlu0 %1493  ;;  %v1506_v30 = vsel %vm582_vm3, %v1496_v59, %v1498_v62 }
 0x1e8   : > { %1596 = vrot.lane.b32.xlu1 %v1476_v61, %s3685_s18  ;;  %v1505_v40 = vsel %vm582_vm3, %v1494_v13, %v1496_v59 }
 0x1ea   : > { %v4272_v63 = vpop.permute.xlu1 %1501 }
 0x1eb   : > { %1834 = vrot.lane.b32.xlu0 %v4276_v1, %s3680_s12  ;;  %v1504_v2 = vpop.permute.xlu0 %1503 }
 0x1ec   : > { %1594 = vrot.lane.b32.xlu1 %v1475_v0, %s3685_s18  ;;  %v1508_v45 = vsel %vm582_vm3, %v4272_v63, %v1504_v2  ;;  %v3565_v0 = vld [vmem:[%s5773_s2 + $0x64] ss:$8 sps:$4 sm:$0xff]  }
 0x1ed   : > { %3376 = vmatprep.mubr.msk.bf16.mxu0 %vm655_vm4, %v3565_v0 }
 0x1ee   : > { %v1500_v3 = vpop.permute.xlu1 %1499 }
 0x1ef   : > { %1832 = vrot.lane.b32.xlu0 %v4282_v4, %s3680_s12  ;;  %v4286_v5 = vpop.permute.xlu0 %1511  ;;  %v1507_v46 = vsel %vm582_vm3, %v1500_v3, %v4272_v63 }
 0x1f0   : > { %1836 = vrot.lane.b32.xlu1 %v4248_v52, %s3680_s12 }
 0x1f2   : > { %v1514_v7 = vpop.permute.xlu1 %1513 }
 0x1f3   : > { %1604 = vrot.lane.b32.xlu0 %v1482_v54, %s3685_s18  ;;  %v1510_v14 = vpop.permute.xlu0 %1509  ;;  %v1522_v47 = vsel %vm603_vm5, %v4286_v5, %v1514_v7 }
 0x1f4   : > { %1602 = vrot.lane.b32.xlu1 %v1490_v6, %s3685_s18  ;;  %v1521_v48 = vsel %vm603_vm5, %v1510_v14, %v4286_v5 }
 0x1f6   : > { %v4293_v15 = vpop.permute.xlu1 %1517 }
 0x1f7   : > { %1840 = vrot.lane.b32.xlu0 %v4297_v17, %s3680_s12  ;;  %v1520_v18 = vpop.permute.xlu0 %1519 }
 0x1f8   : > { %1600 = vrot.lane.b32.xlu1 %v1489_v16, %s3685_s18  ;;  %v1524_v50 = vsel %vm603_vm5, %v4293_v15, %v1520_v18 }
 0x1fa   : > { %v4302_v19 = vpop.permute.xlu1 %1515 }
 0x1fb   : > { %1838 = vrot.lane.b32.xlu0 %v4260_v58, %s3680_s12  ;;  %v4306_v20 = vpop.permute.xlu0 %1527  ;;  %v1523_v12 = vsel %vm603_vm5, %v4302_v19, %v4293_v15 }
 0x1fc   : > { %1842 = vrot.lane.b32.xlu1 %v4265_v60, %s3680_s12 }
 0x1fe   : > { %v4310_v21 = vpop.permute.xlu1 %1529 }
 0x1ff   : > { %1610 = vrot.lane.b32.xlu0 %v1488_v56, %s3685_s18  ;;  %v4314_v23 = vpop.permute.xlu0 %1525  ;;  %v1538_v57 = vsel %vm624_vm6, %v4306_v20, %v4310_v21 }
 0x200   : > { %1608 = vrot.lane.b32.xlu1 %v1492_v22, %s3685_s18 }
 0x202   : > { %v4317_v24 = vpop.permute.xlu1 %1533 }
 0x203   : > { %1850 = vrot.lane.b32.xlu0 %v4276_v1, %s3681_s23  ;;  %v4322_v26 = vpop.permute.xlu0 %1535 }
 0x204   : > { %1606 = vrot.lane.b32.xlu1 %v1491_v25, %s3685_s18  ;;  %v1540_v6 = vsel %vm624_vm6, %v4317_v24, %v4322_v26 }
 0x206   : > { %v4325_v8 = vpop.permute.xlu1 %1531 }
 0x207   : > { %1848 = vrot.lane.b32.xlu0 %v4282_v4, %s3681_s23  ;;  %v1567_v27 = vpop.permute.xlu0 %1566  ;;  %v1539_v16 = vsel %vm624_vm6, %v4325_v8, %v4317_v24 }
 0x208   : > { %1852 = vrot.lane.b32.xlu1 %v4248_v52, %s3681_s23 }
 0x20a   : > { %v1569_v28 = vpop.permute.xlu1 %1568 }
 0x20b   : > { %1616 = vrot.lane.b32.xlu0 %v1498_v62, %s3685_s18  ;;  %v1565_v31 = vpop.permute.xlu0 %1564  ;;  %v1650_v37 = vsel %vm1648_vm8, %v1567_v27, %v1569_v28  ;;  %v1537_v62 = vsel %vm624_vm6, %v4314_v23, %v4306_v20 }
 0x20c   : > { %1614 = vrot.lane.b32.xlu1 %v1506_v30, %s3685_s18  ;;  %1711 = vmatprep.subr.bf16.mxu0 %v1650_v37  ;;  %v1649_v38 = vsel %vm1648_vm8, %v1565_v31, %v1567_v27 }
 0x20d   : > { %1712 = vmatpush1.bf16.msra.mxu0 %v1649_v38 }
 0x20e   : > { %v1573_v39 = vpop.permute.xlu1 %1572 }
 0x20f   : > { %1856 = vrot.lane.b32.xlu0 %v4297_v17, %s3681_s23  ;;  %v1575_v41 = vpop.permute.xlu0 %1574 }
 0x210   : > { %1612 = vrot.lane.b32.xlu1 %v1505_v40, %s3685_s18  ;;  %v1652_v42 = vsel %vm1648_vm8, %v1573_v39, %v1575_v41 }
 0x211   : > { %1713 = vmatprep.subr.bf16.mxu0 %v1652_v42 }
 0x212   : > { %v1571_v43 = vpop.permute.xlu1 %1570 }
 0x213   : > { %1854 = vrot.lane.b32.xlu0 %v4260_v58, %s3681_s23  ;;  %v1651_v44 = vsel %vm1648_vm8, %v1571_v43, %v1573_v39  ;;  %v4368_v49 = vpop.permute.xlu0 %1802 }
 0x214   : > { %1858 = vrot.lane.b32.xlu1 %v4265_v60, %s3681_s23  ;;  %1714 = vmatpush1.bf16.msra.mxu0 %v1651_v44 }
 0x216   : > { %v4380_v10 = vpop.permute.xlu1 %1804 }
 0x217   : > { %1622 = vrot.lane.b32.xlu0 %v1504_v2, %s3685_s18  ;;  %v4377_v51 = vpop.permute.xlu0 %1800  ;;  %v1813_v31 = vsel %vm519_vm0, %v4368_v49, %v4380_v10 }
 0x218   : > { %1620 = vrot.lane.b32.xlu1 %v1508_v45, %s3685_s18  ;;  %v1812_v40 = vsel %vm519_vm0, %v4377_v51, %v4368_v49 }
 0x21b   : > { %1866 = vrot.lane.b32.xlu0 %v4276_v1, %s3682_s29 }
 0x21c   : > { %1618 = vrot.lane.b32.xlu1 %v1507_v46, %s3685_s18 }
 0x21f   : > { %1864 = vrot.lane.b32.xlu0 %v4282_v4, %s3682_s29 }
 0x220   : > { %1868 = vrot.lane.b32.xlu1 %v4248_v52, %s3682_s29 }
 0x223   : > { %1628 = vrot.lane.b32.xlu0 %v1514_v7, %s3685_s18 }
 0x224   : > { %1626 = vrot.lane.b32.xlu1 %v1522_v47, %s3685_s18 }
 0x227   : > { %1872 = vrot.lane.b32.xlu0 %v4297_v17, %s3682_s29 }
 0x228   : > { %1624 = vrot.lane.b32.xlu1 %v1521_v48, %s3685_s18 }
 0x22b   : > { %1870 = vrot.lane.b32.xlu0 %v4260_v58, %s3682_s29 }
 0x22c   : > { %1874 = vrot.lane.b32.xlu1 %v4265_v60, %s3682_s29 }
 0x22f   : > { %1634 = vrot.lane.b32.xlu0 %v1520_v18, %s3685_s18 }
 0x230   : > { %1632 = vrot.lane.b32.xlu1 %v1524_v50, %s3685_s18 }
 0x233   : > { %1882 = vrot.lane.b32.xlu0 %v4276_v1, %s3683_s8 }
 0x234   : > { %1630 = vrot.lane.b32.xlu1 %v1523_v12, %s3685_s18 }
 0x235   : > { %v1581_v53 = vpop.permute.xlu0 %1580 }
 0x236   : > { %v1579_v54 = vpop.permute.xlu1 %1578 }
 0x237   : > { %1880 = vrot.lane.b32.xlu0 %v4282_v4, %s3683_s8  ;;  %v1654_v55 = vsel %vm1648_vm8, %v1579_v54, %v1581_v53 }
 0x238   : > { %1884 = vrot.lane.b32.xlu1 %v4248_v52, %s3683_s8  ;;  %1715 = vmatprep.subr.bf16.mxu0 %v1654_v55 }
 0x239   : > { %v4393_v11 = vpop.permute.xlu0 %1808 }
 0x23a   : > { %v1577_v56 = vpop.permute.xlu1 %1576 }
 0x23b   : > { %1640 = vrot.lane.b32.xlu0 %v4310_v21, %s3685_s18  ;;  %v1653_v9 = vsel %vm1648_vm8, %v1577_v56, %v1579_v54 }
 0x23c   : > { %1638 = vrot.lane.b32.xlu1 %v1538_v57, %s3685_s18  ;;  %1716 = vmatpush1.bf16.msra.mxu0 %v1653_v9 }
 0x23d   : > { %v4402_v59 = vpop.permute.xlu0 %1806 }
 0x23e   : > { %v4404_v61 = vpop.permute.xlu1 %1810  ;;  %v1814_v50 = vsel %vm519_vm0, %v4402_v59, %v4393_v11 }
 0x23f   : > { %1888 = vrot.lane.b32.xlu0 %v4297_v17, %s3683_s8  ;;  %v1815_v46 = vsel %vm519_vm0, %v4393_v11, %v4404_v61 }
 0x240   : > { %1636 = vrot.lane.b32.xlu1 %v1537_v62, %s3685_s18 }
 0x241   : > { %v1587_v13 = vpop.permute.xlu0 %1586 }
 0x242   : > { %v1585_v63 = vpop.permute.xlu1 %1584 }
 0x243   : > { %1886 = vrot.lane.b32.xlu0 %v4260_v58, %s3683_s8  ;;  %v1656_v2 = vsel %vm1648_vm8, %v1585_v63, %v1587_v13 }
 0x244   : > { %1890 = vrot.lane.b32.xlu1 %v4265_v60, %s3683_s8  ;;  %1717 = vmatprep.subr.bf16.mxu0 %v1656_v2 }
 0x245   : > { %v4420_v3 = vpop.permute.xlu0 %1818 }
 0x246   : > { %v1583_v5 = vpop.permute.xlu1 %1582 }
 0x247   : > { %1646 = vrot.lane.b32.xlu0 %v4322_v26, %s3685_s18  ;;  %v1655_v7 = vsel %vm1648_vm8, %v1583_v5, %v1585_v63 }
 0x248   : > { %1644 = vrot.lane.b32.xlu1 %v1540_v6, %s3685_s18  ;;  %1718 = vmatpush1.bf16.msra.mxu0 %v1655_v7 }
 0x249   : > { %v4430_v14 = vpop.permute.xlu0 %1816 }
 0x24a   : > { %v4432_v15 = vpop.permute.xlu1 %1820  ;;  %v1828_v9 = vsel %vm540_vm1, %v4430_v14, %v4420_v3 }
 0x24b   : > { %1921 = vrot.lane.b32.xlu0 %v4276_v1, %s3686_s20  ;;  %v1829_v55 = vsel %vm540_vm1, %v4420_v3, %v4432_v15 }
 0x24c   : > { %1642 = vrot.lane.b32.xlu1 %v1539_v16, %s3685_s18 }
 0x24d   : > { %v1593_v18 = vpop.permute.xlu0 %1592 }
 0x24e   : > { %v1591_v19 = vpop.permute.xlu1 %1590 }
 0x24f   : > { %1919 = vrot.lane.b32.xlu0 %v4282_v4, %s3686_s20  ;;  %v1658_v20 = vsel %vm1648_vm8, %v1591_v19, %v1593_v18 }
 0x250   : > { %1923 = vrot.lane.b32.xlu1 %v4248_v52, %s3686_s20  ;;  %1719 = vmatprep.subr.bf16.mxu0 %v1658_v20 }
 0x251   : > { %v4445_v21 = vpop.permute.xlu0 %1824 }
 0x252   : > { %v1589_v22 = vpop.permute.xlu1 %1588 }
 0x253   : > { %1929 = vrot.lane.b32.xlu0 %v4265_v60, %s3686_s20  ;;  %v1657_v23 = vsel %vm1648_vm8, %v1589_v22, %v1591_v19 }
 0x254   : > { %1927 = vrot.lane.b32.xlu1 %v4297_v17, %s3686_s20  ;;  %1720 = vmatpush1.bf16.msra.mxu0 %v1657_v23 }
 0x255   : > { %v4452_v24 = vpop.permute.xlu0 %1822 }
 0x256   : > { %v4454_v25 = vpop.permute.xlu1 %1826  ;;  %v1830_v6 = vsel %vm540_vm1, %v4452_v24, %v4445_v21 }
 0x257   : > { %2157 = vrot.lane.b32.xlu0 %v4276_v1, %s3678_s24  ;;  %v1831_v0 = vsel %vm540_vm1, %v4445_v21, %v4454_v25 }
 0x258   : > { %1925 = vrot.lane.b32.xlu1 %v4260_v58, %s3686_s20 }
 0x259   : > { %v1599_v26 = vpop.permute.xlu0 %1598 }
 0x25a   : > { %v1597_v8 = vpop.permute.xlu1 %1596 }
 0x25b   : > { %2155 = vrot.lane.b32.xlu0 %v4282_v4, %s3678_s24  ;;  %v1660_v27 = vsel %vm1648_vm8, %v1597_v8, %v1599_v26 }
 0x25c   : > { %2159 = vrot.lane.b32.xlu1 %v4248_v52, %s3678_s24  ;;  %1721 = vmatprep.subr.bf16.mxu0 %v1660_v27 }
 0x25d   : > { %v4465_v28 = vpop.permute.xlu0 %1834 }
 0x25e   : > { %v1595_v30 = vpop.permute.xlu1 %1594 }
 0x25f   : > { %1935 = vrot.lane.b32.xlu0 %v4380_v10, %s3686_s20  ;;  %v1659_v37 = vsel %vm1648_vm8, %v1595_v30, %v1597_v8 }
 0x260   : > { %1933 = vrot.lane.b32.xlu1 %v1813_v31, %s3686_s20  ;;  %1722 = vmatpush1.bf16.msra.mxu0 %v1659_v37 }
 0x261   : > { %v4474_v38 = vpop.permute.xlu0 %1832 }
 0x262   : > { %v4476_v39 = vpop.permute.xlu1 %1836  ;;  %v1844_v23 = vsel %vm561_vm2, %v4474_v38, %v4465_v28 }
 0x263   : > { %2163 = vrot.lane.b32.xlu0 %v4297_v17, %s3678_s24  ;;  %v1845_v19 = vsel %vm561_vm2, %v4465_v28, %v4476_v39 }
 0x264   : > { %1931 = vrot.lane.b32.xlu1 %v1812_v40, %s3686_s20 }
 0x265   : > { %v1605_v41 = vpop.permute.xlu0 %1604 }
 0x266   : > { %v1603_v42 = vpop.permute.xlu1 %1602 }
 0x267   : > { %2161 = vrot.lane.b32.xlu0 %v4260_v58, %s3678_s24  ;;  %v1662_v43 = vsel %vm1648_vm8, %v1603_v42, %v1605_v41 }
 0x268   : > { %2165 = vrot.lane.b32.xlu1 %v4265_v60, %s3678_s24  ;;  %1723 = vmatprep.subr.bf16.mxu0 %v1662_v43 }
 0x269   : > { %v4489_v44 = vpop.permute.xlu0 %1840 }
 0x26a   : > { %v1601_v45 = vpop.permute.xlu1 %1600 }
 0x26b   : > { %1941 = vrot.lane.b32.xlu0 %v4404_v61, %s3686_s20  ;;  %v1661_v47 = vsel %vm1648_vm8, %v1601_v45, %v1603_v42 }
 0x26c   : > { %1939 = vrot.lane.b32.xlu1 %v1815_v46, %s3686_s20  ;;  %1724 = vmatpush1.bf16.msra.mxu0 %v1661_v47 }
 0x26d   : > { %v4498_v48 = vpop.permute.xlu0 %1838 }
 0x26e   : > { %v4500_v49 = vpop.permute.xlu1 %1842  ;;  %v1846_v38 = vsel %vm561_vm2, %v4498_v48, %v4489_v44 }
 0x26f   : > { %2173 = vrot.lane.b32.xlu0 %v4276_v1, %s3679_s11  ;;  %v1847_v28 = vsel %vm561_vm2, %v4489_v44, %v4500_v49 }
 0x270   : > { %1937 = vrot.lane.b32.xlu1 %v1814_v50, %s3686_s20 }
 0x271   : > { %v1611_v51 = vpop.permute.xlu0 %1610 }
 0x272   : > { %v1609_v10 = vpop.permute.xlu1 %1608 }
 0x273   : > { %2171 = vrot.lane.b32.xlu0 %v4282_v4, %s3679_s11  ;;  %v1664_v12 = vsel %vm1648_vm8, %v1609_v10, %v1611_v51 }
 0x274   : > { %2175 = vrot.lane.b32.xlu1 %v4248_v52, %s3679_s11  ;;  %1725 = vmatprep.subr.bf16.mxu0 %v1664_v12 }
 0x275   : > { %v4513_v53 = vpop.permute.xlu0 %1850 }
 0x276   : > { %v1607_v54 = vpop.permute.xlu1 %1606 }
 0x277   : > { %1947 = vrot.lane.b32.xlu0 %v4432_v15, %s3686_s20  ;;  %v1663_v11 = vsel %vm1648_vm8, %v1607_v54, %v1609_v10 }
 0x278   : > { %1945 = vrot.lane.b32.xlu1 %v1829_v55, %s3686_s20  ;;  %1726 = vmatpush1.bf16.msra.mxu0 %v1663_v11 }
 0x279   : > { %v4522_v56 = vpop.permute.xlu0 %1848 }
 0x27a   : > { %v4524_v57 = vpop.permute.xlu1 %1852  ;;  %v1860_v48 = vsel %vm582_vm3, %v4522_v56, %v4513_v53 }
 0x27b   : > { %2179 = vrot.lane.b32.xlu0 %v4297_v17, %s3679_s11  ;;  %v1861_v44 = vsel %vm582_vm3, %v4513_v53, %v4524_v57 }
 0x27c   : > { %1943 = vrot.lane.b32.xlu1 %v1828_v9, %s3686_s20 }
 0x27d   : > { %v1617_v59 = vpop.permute.xlu0 %1616 }
 0x27e   : > { %v1615_v61 = vpop.permute.xlu1 %1614 }
 0x27f   : > { %2177 = vrot.lane.b32.xlu0 %v4260_v58, %s3679_s11  ;;  %v1666_v62 = vsel %vm1648_vm8, %v1615_v61, %v1617_v59 }
 0x280   : > { %2181 = vrot.lane.b32.xlu1 %v4265_v60, %s3679_s11  ;;  %1727 = vmatprep.subr.bf16.mxu0 %v1666_v62 }
 0x281   : > { %v4537_v13 = vpop.permute.xlu0 %1856 }
 0x282   : > { %v1613_v63 = vpop.permute.xlu1 %1612 }
 0x283   : > { %1953 = vrot.lane.b32.xlu0 %v4454_v25, %s3686_s20  ;;  %v1665_v2 = vsel %vm1648_vm8, %v1613_v63, %v1615_v61 }
 0x284   : > { %1951 = vrot.lane.b32.xlu1 %v1831_v0, %s3686_s20  ;;  %1728 = vmatpush1.bf16.msra.mxu0 %v1665_v2  ;;  %v3563_v0 = vld [vmem:[%s5773_s2 + $0x60] ss:$8 sps:$4 sm:$0xff]  }
 0x285   : > { %v4546_v3 = vpop.permute.xlu0 %1854 }
 0x286   : > { %v4548_v5 = vpop.permute.xlu1 %1858  ;;  %v1862_v56 = vsel %vm582_vm3, %v4546_v3, %v4537_v13 }
 0x287   : > { %2189 = vrot.lane.b32.xlu0 %v4276_v1, %s3680_s12  ;;  %v1863_v53 = vsel %vm582_vm3, %v4537_v13, %v4548_v5 }
 0x288   : > { %1949 = vrot.lane.b32.xlu1 %v1830_v6, %s3686_s20 }
 0x289   : > { %v1623_v7 = vpop.permute.xlu0 %1622 }
 0x28a   : > { %v1621_v14 = vpop.permute.xlu1 %1620 }
 0x28b   : > { %2187 = vrot.lane.b32.xlu0 %v4282_v4, %s3680_s12  ;;  %v1668_v15 = vsel %vm1648_vm8, %v1621_v14, %v1623_v7 }
 0x28c   : > { %2191 = vrot.lane.b32.xlu1 %v4248_v52, %s3680_s12  ;;  %1729 = vmatprep.subr.bf16.mxu0 %v1668_v15 }
 0x28d   : > { %v4561_v16 = vpop.permute.xlu0 %1866 }
 0x28e   : > { %v1619_v18 = vpop.permute.xlu1 %1618 }
 0x28f   : > { %1959 = vrot.lane.b32.xlu0 %v4476_v39, %s3686_s20  ;;  %v1667_v20 = vsel %vm1648_vm8, %v1619_v18, %v1621_v14 }
 0x290   : > { %1957 = vrot.lane.b32.xlu1 %v1845_v19, %s3686_s20  ;;  %1730 = vmatpush1.bf16.msra.mxu0 %v1667_v20 }
 0x291   : > { %v4570_v21 = vpop.permute.xlu0 %1864 }
 0x292   : > { %v4572_v22 = vpop.permute.xlu1 %1868  ;;  %v1876_v6 = vsel %vm603_vm5, %v4570_v21, %v4561_v16 }
 0x293   : > { %2195 = vrot.lane.b32.xlu0 %v4297_v17, %s3680_s12  ;;  %v1877_v13 = vsel %vm603_vm5, %v4561_v16, %v4572_v22 }
 0x294   : > { %1955 = vrot.lane.b32.xlu1 %v1844_v23, %s3686_s20 }
 0x295   : > { %v1629_v24 = vpop.permute.xlu0 %1628 }
 0x296   : > { %v1627_v25 = vpop.permute.xlu1 %1626 }
 0x297   : > { %2193 = vrot.lane.b32.xlu0 %v4260_v58, %s3680_s12  ;;  %v1670_v26 = vsel %vm1648_vm8, %v1627_v25, %v1629_v24 }
 0x298   : > { %2197 = vrot.lane.b32.xlu1 %v4265_v60, %s3680_s12  ;;  %1731 = vmatprep.subr.bf16.mxu0 %v1670_v26 }
 0x299   : > { %v4585_v8 = vpop.permute.xlu0 %1872 }
 0x29a   : > { %v1625_v27 = vpop.permute.xlu1 %1624 }
 0x29b   : > { %1965 = vrot.lane.b32.xlu0 %v4500_v49, %s3686_s20  ;;  %v1669_v30 = vsel %vm1648_vm8, %v1625_v27, %v1627_v25 }
 0x29c   : > { %1963 = vrot.lane.b32.xlu1 %v1847_v28, %s3686_s20  ;;  %1732 = vmatpush1.bf16.msra.mxu0 %v1669_v30 }
 0x29d   : > { %v4594_v31 = vpop.permute.xlu0 %1870 }
 0x29e   : > { %v4596_v37 = vpop.permute.xlu1 %1874  ;;  %v1878_v24 = vsel %vm603_vm5, %v4594_v31, %v4585_v8 }
 0x29f   : > { %2205 = vrot.lane.b32.xlu0 %v4276_v1, %s3681_s23  ;;  %v1879_v21 = vsel %vm603_vm5, %v4585_v8, %v4596_v37  ;;  %v3566_v8 = vld [vmem:[%s5773_s2 + $0x74] ss:$8 sps:$4 sm:$0xff]  }
 0x2a0   : > { %1961 = vrot.lane.b32.xlu1 %v1846_v38, %s3686_s20  ;;  %v3568_v38 = vld [vmem:[%s5773_s2 + $0x70] ss:$8 sps:$4 sm:$0xff]  }
 0x2a1   : > { %v1635_v39 = vpop.permute.xlu0 %1634 }
 0x2a2   : > { %v1633_v40 = vpop.permute.xlu1 %1632 }
 0x2a3   : > { %2203 = vrot.lane.b32.xlu0 %v4282_v4, %s3681_s23  ;;  %v1672_v41 = vsel %vm1648_vm8, %v1633_v40, %v1635_v39 }
 0x2a4   : > { %2207 = vrot.lane.b32.xlu1 %v4248_v52, %s3681_s23  ;;  %1733 = vmatprep.subr.bf16.mxu0 %v1672_v41 }
 0x2a5   : > { %v4609_v42 = vpop.permute.xlu0 %1882 }
 0x2a6   : > { %v1631_v43 = vpop.permute.xlu1 %1630 }
 0x2a7   : > { %1971 = vrot.lane.b32.xlu0 %v4524_v57, %s3686_s20  ;;  %v1671_v45 = vsel %vm1648_vm8, %v1631_v43, %v1633_v40 }
 0x2a8   : > { %1969 = vrot.lane.b32.xlu1 %v1861_v44, %s3686_s20  ;;  %1734 = vmatpush1.bf16.msra.mxu0 %v1671_v45  ;;  %v3571_v45 = vld [vmem:[%s5773_s2 + $0x84] ss:$8 sps:$4 sm:$0xff]  }
 0x2a9   : > { %v4618_v46 = vpop.permute.xlu0 %1880 }
 0x2aa   : > { %v4620_v47 = vpop.permute.xlu1 %1884  ;;  %v1892_v41 = vsel %vm624_vm6, %v4618_v46, %v4609_v42 }
 0x2ab   : > { %2211 = vrot.lane.b32.xlu0 %v4297_v17, %s3681_s23 }
 0x2ac   : > { %1967 = vrot.lane.b32.xlu1 %v1860_v48, %s3686_s20 }
 0x2ad   : > { %v1641_v49 = vpop.permute.xlu0 %1640 }
 0x2ae   : > { %v1639_v50 = vpop.permute.xlu1 %1638 }
 0x2af   : > { %2209 = vrot.lane.b32.xlu0 %v4260_v58, %s3681_s23  ;;  %v1674_v51 = vsel %vm1648_vm8, %v1639_v50, %v1641_v49 }
 0x2b0   : > { %2213 = vrot.lane.b32.xlu1 %v4265_v60, %s3681_s23  ;;  %1735 = vmatprep.subr.bf16.mxu0 %v1674_v51 }
 0x2b1   : > { %v4633_v10 = vpop.permute.xlu0 %1888 }
 0x2b2   : > { %v1637_v12 = vpop.permute.xlu1 %1636 }
 0x2b3   : > { %1977 = vrot.lane.b32.xlu0 %v4548_v5, %s3686_s20  ;;  %v1673_v54 = vsel %vm1648_vm8, %v1637_v12, %v1639_v50 }
 0x2b4   : > { %1975 = vrot.lane.b32.xlu1 %v1863_v53, %s3686_s20  ;;  %1736 = vmatpush1.bf16.msra.mxu0 %v1673_v54 }
 0x2b5   : > { %v4642_v55 = vpop.permute.xlu0 %1886 }
 0x2b6   : > { %v4644_v11 = vpop.permute.xlu1 %1890  ;;  %v1894_v12 = vsel %vm624_vm6, %v4642_v55, %v4633_v10 }
 0x2b7   : > { %2221 = vrot.lane.b32.xlu0 %v4276_v1, %s3682_s29  ;;  %v1895_v49 = vsel %vm624_vm6, %v4633_v10, %v4644_v11 }
 0x2b8   : > { %1973 = vrot.lane.b32.xlu1 %v1862_v56, %s3686_s20 }
 0x2b9   : > { %v1647_v57 = vpop.permute.xlu0 %1646 }
 0x2ba   : > { %v1645_v9 = vpop.permute.xlu1 %1644 }
 0x2bb   : > { %2219 = vrot.lane.b32.xlu0 %v4282_v4, %s3682_s29  ;;  %v1676_v59 = vsel %vm1648_vm8, %v1645_v9, %v1647_v57 }
 0x2bc   : > { %2223 = vrot.lane.b32.xlu1 %v4248_v52, %s3682_s29  ;;  %1737 = vmatprep.subr.bf16.mxu0 %v1676_v59 }
 0x2bd   : > { %v1922_v61 = vpop.permute.xlu0 %1921 }
 0x2be   : > { %v1643_v62 = vpop.permute.xlu1 %1642 }
 0x2bf   : > { %1983 = vrot.lane.b32.xlu0 %v4572_v22, %s3686_s20  ;;  %v1675_v63 = vsel %vm1648_vm8, %v1643_v62, %v1645_v9 }
 0x2c0   : > { %1981 = vrot.lane.b32.xlu1 %v1877_v13, %s3686_s20  ;;  %1738 = vmatpush1.bf16.msra.mxu0 %v1675_v63 }
 0x2c1   : > { %v1920_v2 = vpop.permute.xlu0 %1919 }
 0x2c2   : > { %v2004_v3 = vsel %vm2003_vm9, %v1920_v2, %v1922_v61  ;;  %v1924_v5 = vpop.permute.xlu1 %1923 }
 0x2c3   : > { %2227 = vrot.lane.b32.xlu0 %v4297_v17, %s3682_s29  ;;  %v2005_v7 = vsel %vm2003_vm9, %v1922_v61, %v1924_v5  ;;  %1744 = vmatmul.mubr.bf16.vlgmr.msra.gmra.mrb[0].mxu0 %v3563_v0 }
 0x2c4   : > { %1979 = vrot.lane.b32.xlu1 %v1876_v6, %s3686_s20  ;;  %2066 = vmatprep.subr.bf16.mxu0 %v2005_v7 }
 0x2c5   : > { %2067 = vmatpush1.bf16.msra.mxu0 %v2004_v3  ;;  %v1930_v14 = vpop.permute.xlu0 %1929  ;;  %3377 = vmatprep.mubr.msk.bf16.mxu0 %vm655_vm4, %v3566_v8 }
 0x2c6   : > { %v1928_v15 = vpop.permute.xlu1 %1927 }
 0x2c7   : > { %2225 = vrot.lane.b32.xlu0 %v4260_v58, %s3682_s29  ;;  %v2007_v18 = vsel %vm2003_vm9, %v1928_v15, %v1930_v14 }
 0x2c8   : > { %2229 = vrot.lane.b32.xlu1 %v4265_v60, %s3682_s29  ;;  %2068 = vmatprep.subr.bf16.mxu0 %v2007_v18 }
 0x2c9   : > { %v4680_v16 = vpop.permute.xlu0 %2157 }
 0x2ca   : > { %v1926_v19 = vpop.permute.xlu1 %1925 }
 0x2cb   : > { %v2006_v20 = vsel %vm2003_vm9, %v1926_v19, %v1928_v15  ;;  %1989 = vrot.lane.b32.xlu0 %v4596_v37, %s3686_s20  ;;  %v1893_v37 = vsel %vm624_vm6, %v4609_v42, %v4620_v47  ;;  %1754 = vmatmul.mubr.bf16.gmra.mrb[4].mxu0 %v3568_v38 }
 0x2cc   : > { %1987 = vrot.lane.b32.xlu1 %v1879_v21, %s3686_s20  ;;  %2069 = vmatpush1.bf16.msra.mxu0 %v2006_v20 }
 0x2cd   : > { %v4689_v22 = vpop.permute.xlu0 %2155  ;;  %3386 = vmatprep.mubr.msk.bf16.mxu0 %vm655_vm4, %v3571_v45 }
 0x2ce   : > { %v4691_v23 = vpop.permute.xlu1 %2159  ;;  %v2167_v6 = vsel %vm519_vm0, %v4689_v22, %v4680_v16 }
 0x2cf   : > { %2237 = vrot.lane.b32.xlu0 %v4276_v1, %s3683_s8  ;;  %v2168_v2 = vsel %vm519_vm0, %v4680_v16, %v4691_v23 }
 0x2d0   : > { %1985 = vrot.lane.b32.xlu1 %v1878_v24, %s3686_s20 }
 0x2d1   : > { %v1936_v25 = vpop.permute.xlu0 %1935 }
 0x2d2   : > { %v1934_v26 = vpop.permute.xlu1 %1933 }
 0x2d3   : > { %2235 = vrot.lane.b32.xlu0 %v4282_v4, %s3683_s8  ;;  %v2009_v27 = vsel %vm2003_vm9, %v1934_v26, %v1936_v25 }
 0x2d4   : > { %2239 = vrot.lane.b32.xlu1 %v4248_v52, %s3683_s8  ;;  %2070 = vmatprep.subr.bf16.mxu0 %v2009_v27 }
 0x2d5   : > { %v4704_v28 = vpop.permute.xlu0 %2163 }
 0x2d6   : > { %v1932_v30 = vpop.permute.xlu1 %1931 }
 0x2d7   : > { %v2008_v31 = vsel %vm2003_vm9, %v1932_v30, %v1934_v26  ;;  %1995 = vrot.lane.b32.xlu0 %v4620_v47, %s3686_s20 }
 0x2d8   : > { %1993 = vrot.lane.b32.xlu1 %v1893_v37, %s3686_s20  ;;  %2071 = vmatpush1.bf16.msra.mxu0 %v2008_v31 }
 0x2d9   : > { %v4719_v39 = vpop.permute.xlu0 %2161 }
 0x2da   : > { %v4722_v40 = vpop.permute.xlu1 %2165  ;;  %v2169_v25 = vsel %vm519_vm0, %v4719_v39, %v4704_v28 }
 0x2db   : > { %2243 = vrot.lane.b32.xlu0 %v4297_v17, %s3683_s8  ;;  %v2170_v20 = vsel %vm519_vm0, %v4704_v28, %v4722_v40 }
 0x2dc   : > { %1991 = vrot.lane.b32.xlu1 %v1892_v41, %s3686_s20 }
 0x2dd   : > { %v1942_v43 = vpop.permute.xlu0 %1941 }
 0x2de   : > { %v1940_v44 = vpop.permute.xlu1 %1939 }
 0x2df   : > { %2241 = vrot.lane.b32.xlu0 %v4260_v58, %s3683_s8  ;;  %v2011_v47 = vsel %vm2003_vm9, %v1940_v44, %v1942_v43 }
 0x2e0   : > { %2245 = vrot.lane.b32.xlu1 %v4265_v60, %s3683_s8  ;;  %2072 = vmatprep.subr.bf16.mxu0 %v2011_v47 }
 0x2e1   : > { %v4738_v42 = vpop.permute.xlu0 %2173 }
 0x2e2   : > { %v1938_v46 = vpop.permute.xlu1 %1937 }
 0x2e3   : > { %v2010_v48 = vsel %vm2003_vm9, %v1938_v46, %v1940_v44  ;;  %2001 = vrot.lane.b32.xlu0 %v4644_v11, %s3686_s20 }
 0x2e4   : > { %1999 = vrot.lane.b32.xlu1 %v1895_v49, %s3686_s20  ;;  %2073 = vmatpush1.bf16.msra.mxu0 %v2010_v48 }
 0x2e5   : > { %v4748_v50 = vpop.permute.xlu0 %2171 }
 0x2e6   : > { %v4750_v51 = vpop.permute.xlu1 %2175  ;;  %v2183_v43 = vsel %vm540_vm1, %v4748_v50, %v4738_v42 }
 0x2e7   : > { %2276 = vrot.lane.b32.xlu0 %v4276_v1, %s3687_s10  ;;  %v2184_v37 = vsel %vm540_vm1, %v4738_v42, %v4750_v51 }
 0x2e8   : > { %1997 = vrot.lane.b32.xlu1 %v1894_v12, %s3686_s20 }
 0x2e9   : > { %v1948_v53 = vpop.permute.xlu0 %1947 }
 0x2ea   : > { %v1946_v54 = vpop.permute.xlu1 %1945 }
 0x2eb   : > { %2274 = vrot.lane.b32.xlu0 %v4282_v4, %s3687_s10  ;;  %v2013_v11 = vsel %vm2003_vm9, %v1946_v54, %v1948_v53 }
 0x2ec   : > { %2278 = vrot.lane.b32.xlu1 %v4248_v52, %s3687_s10  ;;  %2074 = vmatprep.subr.bf16.mxu0 %v2013_v11 }
 0x2ed   : > { %v4763_v56 = vpop.permute.xlu0 %2179 }
 0x2ee   : > { %v1944_v10 = vpop.permute.xlu1 %1943 }
 0x2ef   : > { %v2012_v55 = vsel %vm2003_vm9, %v1944_v10, %v1946_v54  ;;  %2284 = vrot.lane.b32.xlu0 %v4265_v60, %s3687_s10 }
 0x2f0   : > { %2282 = vrot.lane.b32.xlu1 %v4297_v17, %s3687_s10  ;;  %2075 = vmatpush1.bf16.msra.mxu0 %v2012_v55 }
 0x2f1   : > { %v4770_v57 = vpop.permute.xlu0 %2177 }
 0x2f2   : > { %v4772_v9 = vpop.permute.xlu1 %2181  ;;  %v2185_v55 = vsel %vm540_vm1, %v4770_v57, %v4763_v56 }
 0x2f3   : > { %2512 = vrot.lane.b32.xlu0 %v4276_v1, %s3678_s24  ;;  %v2186_v53 = vsel %vm540_vm1, %v4763_v56, %v4772_v9 }
 0x2f4   : > { %2280 = vrot.lane.b32.xlu1 %v4260_v58, %s3687_s10 }
 0x2f5   : > { %v1954_v59 = vpop.permute.xlu0 %1953 }
 0x2f6   : > { %v1952_v61 = vpop.permute.xlu1 %1951 }
 0x2f7   : > { %2510 = vrot.lane.b32.xlu0 %v4282_v4, %s3678_s24  ;;  %v2015_v62 = vsel %vm2003_vm9, %v1952_v61, %v1954_v59 }
 0x2f8   : > { %2514 = vrot.lane.b32.xlu1 %v4248_v52, %s3678_s24  ;;  %2076 = vmatprep.subr.bf16.mxu0 %v2015_v62 }
 0x2f9   : > { %v4783_v13 = vpop.permute.xlu0 %2189 }
 0x2fa   : > { %v1950_v63 = vpop.permute.xlu1 %1949 }
 0x2fb   : > { %v2014_v0 = vsel %vm2003_vm9, %v1950_v63, %v1952_v61  ;;  %2290 = vrot.lane.b32.xlu0 %v4691_v23, %s3687_s10 }
 0x2fc   : > { %2288 = vrot.lane.b32.xlu1 %v2168_v2, %s3687_s10  ;;  %2077 = vmatpush1.bf16.msra.mxu0 %v2014_v0 }
 0x2fd   : > { %v4792_v3 = vpop.permute.xlu0 %2187 }
 0x2fe   : > { %v4794_v5 = vpop.permute.xlu1 %2191 }
 0x2ff   : > { %2518 = vrot.lane.b32.xlu0 %v4297_v17, %s3678_s24  ;;  %v2200_v57 = vsel %vm561_vm2, %v4783_v13, %v4794_v5 }
 0x300   : > { %2286 = vrot.lane.b32.xlu1 %v2167_v6, %s3687_s10  ;;  %v2199_v6 = vsel %vm561_vm2, %v4792_v3, %v4783_v13 }
 0x301   : > { %v1960_v7 = vpop.permute.xlu0 %1959 }
 0x302   : > { %v1958_v14 = vpop.permute.xlu1 %1957 }
 0x303   : > { %2516 = vrot.lane.b32.xlu0 %v4260_v58, %s3678_s24  ;;  %v2017_v15 = vsel %vm2003_vm9, %v1958_v14, %v1960_v7 }
 0x304   : > { %2520 = vrot.lane.b32.xlu1 %v4265_v60, %s3678_s24  ;;  %2078 = vmatprep.subr.bf16.mxu0 %v2017_v15  ;;  %s3688_s24 = smov 96  }
 0x305   : > { %v4807_v18 = vpop.permute.xlu0 %2195 }
 0x306   : > { %v1956_v19 = vpop.permute.xlu1 %1955 }
 0x307   : > { %v2016_v16 = vsel %vm2003_vm9, %v1956_v19, %v1958_v14  ;;  %2296 = vrot.lane.b32.xlu0 %v4722_v40, %s3687_s10 }
 0x308   : > { %2294 = vrot.lane.b32.xlu1 %v2170_v20, %s3687_s10  ;;  %2079 = vmatpush1.bf16.msra.mxu0 %v2016_v16 }
 0x309   : > { %v4816_v21 = vpop.permute.xlu0 %2193 }
 0x30a   : > { %v4818_v22 = vpop.permute.xlu1 %2197 }
 0x30b   : > { %1110 = vrot.lane.b32.xlu0 %v4248_v52, %s3679_s11  ;;  %v2202_v20 = vsel %vm561_vm2, %v4807_v18, %v4818_v22 }
 0x30c   : > { %1108 = vrot.lane.b32.xlu1 %v4276_v1, %s3679_s11 }
 0x30d   : > { %v1966_v23 = vpop.permute.xlu0 %1965 }
 0x30e   : > { %v1964_v24 = vpop.permute.xlu1 %1963 }
 0x30f   : > { %2528 = vrot.lane.b32.xlu0 %v4276_v1, %s3679_s11  ;;  %v2019_v26 = vsel %vm2003_vm9, %v1964_v24, %v1966_v23 }
 0x310   : > { %2292 = vrot.lane.b32.xlu1 %v2169_v25, %s3687_s10  ;;  %2080 = vmatprep.subr.bf16.mxu0 %v2019_v26  ;;  %v4960_v25 = vld [vmem:[%s3810_s22] ss:$8 sps:$4 sm:$0xff]   ;;  %v4965_v26 = vld [vmem:[%s3808_s21 + $0x4] ss:$8 sps:$4 sm:$0xff]  }
 0x311   : > { %v4831_v27 = vpop.permute.xlu0 %2205 }
 0x312   : > { %v1962_v30 = vpop.permute.xlu1 %1961 }
 0x313   : > { %v2018_v8 = vsel %vm2003_vm9, %v1962_v30, %v1964_v24  ;;  %1106 = vrot.lane.b32.xlu0 %v4282_v4, %s3679_s11 }
 0x314   : > { %2530 = vrot.lane.b32.xlu1 %v4248_v52, %s3679_s11  ;;  %2081 = vmatpush1.bf16.msra.mxu0 %v2018_v8  ;;  %v2201_v8 = vsel %vm561_vm2, %v4816_v21, %v4807_v18  ;;  %v3569_v18 = vld [vmem:[%s5773_s2 + $0x80] ss:$8 sps:$4 sm:$0xff]  }
 0x315   : > { %v4838_v28 = vpop.permute.xlu0 %2203 }
 0x316   : > { %v4840_v31 = vpop.permute.xlu1 %2207 }
 0x317   : > { %2300 = vrot.lane.b32.xlu0 %v2184_v37, %s3687_s10 }
 0x318   : > { %2526 = vrot.lane.b32.xlu1 %v4282_v4, %s3679_s11 }
 0x319   : > { %v1972_v38 = vpop.permute.xlu0 %1971 }
 0x31a   : > { %v1970_v39 = vpop.permute.xlu1 %1969 }
 0x31b   : > { %1114 = vrot.lane.b32.xlu0 %v4297_v17, %s3679_s11  ;;  %v2021_v40 = vsel %vm2003_vm9, %v1970_v39, %v1972_v38 }
 0x31c   : > { %2302 = vrot.lane.b32.xlu1 %v4750_v51, %s3687_s10  ;;  %2082 = vmatprep.subr.bf16.mxu0 %v2021_v40 }
 0x31d   : > { %v4853_v41 = vpop.permute.xlu0 %2211 }
 0x31e   : > { %v1968_v44 = vpop.permute.xlu1 %1967 }
 0x31f   : > { %v2020_v45 = vsel %vm2003_vm9, %v1968_v44, %v1970_v39  ;;  %2298 = vrot.lane.b32.xlu0 %v2183_v43, %s3687_s10  ;;  %v4978_v43 = vld [vmem:[%s3808_s21] ss:$8 sps:$4 sm:$0xff]  }
 0x320   : > { %1116 = vrot.lane.b32.xlu1 %v4265_v60, %s3679_s11  ;;  %2083 = vmatpush1.bf16.msra.mxu0 %v2020_v45 }
 0x321   : > { %v4862_v47 = vpop.permute.xlu0 %2209 }
 0x322   : > { %v4864_v46 = vpop.permute.xlu1 %2213 }
 0x323   : > { %2536 = vrot.lane.b32.xlu0 %v4265_v60, %s3679_s11 }
 0x324   : > { %2534 = vrot.lane.b32.xlu1 %v4297_v17, %s3679_s11 }
 0x325   : > { %v1978_v42 = vpop.permute.xlu0 %1977 }
 0x326   : > { %v1976_v48 = vpop.permute.xlu1 %1975 }
 0x327   : > { %2532 = vrot.lane.b32.xlu0 %v4260_v58, %s3679_s11  ;;  %v2023_v49 = vsel %vm2003_vm9, %v1976_v48, %v1978_v42  ;;  %v2216_v42 = vsel %vm582_vm3, %v4831_v27, %v4840_v31 }
 0x328   : > { %1112 = vrot.lane.b32.xlu1 %v4260_v58, %s3679_s11  ;;  %2084 = vmatprep.subr.bf16.mxu0 %v2023_v49  ;;  %s3689_s11 = smov 32  }
 0x329   : > { %v4875_v50 = vpop.permute.xlu0 %2221 }
 0x32a   : > { %v1974_v51 = vpop.permute.xlu1 %1973 }
 0x32b   : > { %v2022_v12 = vsel %vm2003_vm9, %v1974_v51, %v1976_v48  ;;  %2308 = vrot.lane.b32.xlu0 %v4772_v9, %s3687_s10 }
 0x32c   : > { %2306 = vrot.lane.b32.xlu1 %v2186_v53, %s3687_s10  ;;  %2085 = vmatpush1.bf16.msra.mxu0 %v2022_v12  ;;  %v4996_v12 = vld [vmem:[%s3808_s21 + $0x14] ss:$8 sps:$4 sm:$0xff]  }
 0x32d   : > { %v4884_v54 = vpop.permute.xlu0 %2219 }
 0x32e   : > { %v4886_v11 = vpop.permute.xlu1 %2223 }
 0x32f   : > { %1126 = vrot.lane.b32.xlu0 %v4248_v52, %s3680_s12 }
 0x330   : > { %1124 = vrot.lane.b32.xlu1 %v4276_v1, %s3680_s12 }
 0x331   : > { %v1984_v58 = vpop.permute.xlu0 %1983 }
 0x332   : > { %v1982_v10 = vpop.permute.xlu1 %1981 }
 0x333   : > { %2544 = vrot.lane.b32.xlu0 %v4276_v1, %s3680_s12  ;;  %v2025_v9 = vsel %vm2003_vm9, %v1982_v10, %v1984_v58 }
 0x334   : > { %2304 = vrot.lane.b32.xlu1 %v2185_v55, %s3687_s10  ;;  %2086 = vmatprep.subr.bf16.mxu0 %v2025_v9 }
 0x335   : > { %v4899_v59 = vpop.permute.xlu0 %2227 }
 0x336   : > { %v1980_v61 = vpop.permute.xlu1 %1979 }
 0x337   : > { %v2024_v62 = vsel %vm2003_vm9, %v1980_v61, %v1982_v10  ;;  %1122 = vrot.lane.b32.xlu0 %v4282_v4, %s3680_s12  ;;  %v2215_v10 = vsel %vm582_vm3, %v4838_v28, %v4831_v27  ;;  %v5011_v61 = vld [vmem:[%s3810_s22 + $0x10] ss:$8 sps:$4 sm:$0xff]  }
 0x338   : > { %2546 = vrot.lane.b32.xlu1 %v4248_v52, %s3680_s12  ;;  %2087 = vmatpush1.bf16.msra.mxu0 %v2024_v62 }
 0x339   : > { %v4906_v56 = vpop.permute.xlu0 %2225 }
 0x33a   : > { %v4908_v1 = vpop.permute.xlu1 %2229 }
 0x33b   : > { %2312 = vrot.lane.b32.xlu0 %v2200_v57, %s3687_s10 }
 0x33c   : > { %2542 = vrot.lane.b32.xlu1 %v4282_v4, %s3680_s12 }
 0x33d   : > { %v1990_v63 = vpop.permute.xlu0 %1989 }
 0x33e   : > { %v1988_v0 = vpop.permute.xlu1 %1987 }
 0x33f   : > { %1130 = vrot.lane.b32.xlu0 %v4297_v17, %s3680_s12  ;;  %v2027_v52 = vsel %vm2003_vm9, %v1988_v0, %v1990_v63 }
 0x340   : > { %2314 = vrot.lane.b32.xlu1 %v4794_v5, %s3687_s10  ;;  %2088 = vmatprep.subr.bf16.mxu0 %v2027_v52  ;;  %v4939_v5 = vld [vmem:[%s3808_s21 + $0x10] ss:$8 sps:$4 sm:$0xff]  }
 0x341   : > { %v4921_v2 = vpop.permute.xlu0 %2237 }
 0x342   : > { %v1986_v7 = vpop.permute.xlu1 %1985 }
 0x343   : > { %v2026_v4 = vsel %vm2003_vm9, %v1986_v7, %v1988_v0  ;;  %2310 = vrot.lane.b32.xlu0 %v2199_v6, %s3687_s10  ;;  %v2218_v6 = vsel %vm582_vm3, %v4853_v41, %v4864_v46 }
 0x344   : > { %1132 = vrot.lane.b32.xlu1 %v4265_v60, %s3680_s12  ;;  %2089 = vmatpush1.bf16.msra.mxu0 %v2026_v4 }
 0x345   : > { %v4930_v14 = vpop.permute.xlu0 %2235 }
 0x346   : > { %v4932_v15 = vpop.permute.xlu1 %2239 }
 0x347   : > { %2552 = vrot.lane.b32.xlu0 %v4265_v60, %s3680_s12 }
 0x348   : > { %2550 = vrot.lane.b32.xlu1 %v4297_v17, %s3680_s12 }
 0x349   : > { %v1996_v13 = vpop.permute.xlu0 %1995 }
 0x34a   : > { %v1994_v3 = vpop.permute.xlu1 %1993 }
 0x34b   : > { %2548 = vrot.lane.b32.xlu0 %v4939_v5, %s3680_s12  ;;  %v2029_v19 = vsel %vm2003_vm9, %v1994_v3, %v1996_v13 }
 0x34c   : > { %1128 = vrot.lane.b32.xlu1 %v4939_v5, %s3680_s12  ;;  %2090 = vmatprep.subr.bf16.mxu0 %v2029_v19  ;;  %v2217_v19 = vsel %vm582_vm3, %v4862_v47, %v4853_v41  ;;  %v2232_v47 = vsel %vm603_vm5, %v4875_v50, %v4886_v11 }
 0x34d   : > { %v4946_v16 = vpop.permute.xlu0 %2243 }
 0x34e   : > { %v1992_v60 = vpop.permute.xlu1 %1991 }
 0x34f   : > { %v2028_v17 = vsel %vm2003_vm9, %v1992_v60, %v1994_v3  ;;  %2320 = vrot.lane.b32.xlu0 %v4818_v22, %s3687_s10 }
 0x350   : > { %2318 = vrot.lane.b32.xlu1 %v2202_v20, %s3687_s10  ;;  %2091 = vmatpush1.bf16.msra.mxu0 %v2028_v17 }
 0x351   : > { %v4955_v23 = vpop.permute.xlu0 %2241 }
 0x352   : > { %v4957_v24 = vpop.permute.xlu1 %2245 }
 0x353   : > { %1142 = vrot.lane.b32.xlu0 %v4960_v25, %s3681_s23 }
 0x354   : > { %1140 = vrot.lane.b32.xlu1 %v4965_v26, %s3681_s23 }
 0x355   : > { %v2002_v30 = vpop.permute.xlu0 %2001 }
 0x356   : > { %v2000_v22 = vpop.permute.xlu1 %1999 }
 0x357   : > { %2560 = vrot.lane.b32.xlu0 %v4965_v26, %s3681_s23  ;;  %v2031_v37 = vsel %vm2003_vm9, %v2000_v22, %v2002_v30 }
 0x358   : > { %2316 = vrot.lane.b32.xlu1 %v2201_v8, %s3687_s10  ;;  %2092 = vmatprep.subr.bf16.mxu0 %v2031_v37 }
 0x359   : > { %v2277_v38 = vpop.permute.xlu0 %2276 }
 0x35a   : > { %v1998_v39 = vpop.permute.xlu1 %1997 }
 0x35b   : > { %v2030_v40 = vsel %vm2003_vm9, %v1998_v39, %v2000_v22  ;;  %1138 = vrot.lane.b32.xlu0 %v4978_v43, %s3681_s23 }
 0x35c   : > { %2562 = vrot.lane.b32.xlu1 %v4960_v25, %s3681_s23  ;;  %2093 = vmatpush1.bf16.msra.mxu0 %v2030_v40 }
 0x35d   : > { %v2275_v21 = vpop.permute.xlu0 %2274 }
 0x35e   : > { %v2359_v44 = vsel %vm2358_vm10, %v2275_v21, %v2277_v38  ;;  %v2279_v45 = vpop.permute.xlu1 %2278 }
 0x35f   : > { %2324 = vrot.lane.b32.xlu0 %v2216_v42, %s3687_s10  ;;  %v2360_v48 = vsel %vm2358_vm10, %v2277_v38, %v2279_v45  ;;  %2099 = vmatmul.mubr.bf16.vlgmr.msra.gmra.mrb[0].mxu0 %v3569_v18  ;;  %v2231_v38 = vsel %vm603_vm5, %v4884_v54, %v4875_v50  ;;  %v2234_v42 = vsel %vm603_vm5, %v4899_v59, %v4908_v1 }
 0x360   : > { %2558 = vrot.lane.b32.xlu1 %v4978_v43, %s3681_s23  ;;  %2421 = vmatprep.subr.bf16.mxu0 %v2360_v48 }
 0x361   : > { %2422 = vmatpush1.bf16.msra.mxu0 %v2359_v44  ;;  %v2285_v49 = vpop.permute.xlu0 %2284 }
 0x362   : > { %v2283_v51 = vpop.permute.xlu1 %2282 }
 0x363   : > { %1146 = vrot.lane.b32.xlu0 %v4996_v12, %s3681_s23  ;;  %v2362_v53 = vsel %vm2358_vm10, %v2283_v51, %v2285_v49 }
 0x364   : > { %2326 = vrot.lane.b32.xlu1 %v4840_v31, %s3687_s10  ;;  %2423 = vmatprep.subr.bf16.mxu0 %v2362_v53 }
 0x365   : > { %v5003_v58 = vpop.permute.xlu0 %2512 }
 0x366   : > { %v2281_v55 = vpop.permute.xlu1 %2280 }
 0x367   : > { %v2361_v9 = vsel %vm2358_vm10, %v2281_v55, %v2283_v51  ;;  %2322 = vrot.lane.b32.xlu0 %v2215_v10, %s3687_s10  ;;  %v2233_v10 = vsel %vm603_vm5, %v4906_v56, %v4899_v59  ;;  %v2248_v56 = vsel %vm624_vm6, %v4921_v2, %v4932_v15 }
 0x368   : > { %1148 = vrot.lane.b32.xlu1 %v5011_v61, %s3681_s23  ;;  %2424 = vmatpush1.bf16.msra.mxu0 %v2361_v9 }
 0x369   : > { %v5015_v62 = vpop.permute.xlu0 %2510 }
 0x36a   : > { %v5017_v31 = vpop.permute.xlu1 %2514 }
 0x36b   : > { %2568 = vrot.lane.b32.xlu0 %v5011_v61, %s3681_s23 }
 0x36c   : > { %2566 = vrot.lane.b32.xlu1 %v4996_v12, %s3681_s23 }
 0x36d   : > { %v2291_v27 = vpop.permute.xlu0 %2290 }
 0x36e   : > { %v2289_v28 = vpop.permute.xlu1 %2288 }
 0x36f   : > { %2564 = vrot.lane.b32.xlu0 %v4939_v5, %s3681_s23  ;;  %v2364_v57 = vsel %vm2358_vm10, %v2289_v28, %v2291_v27 }
 0x370   : > { %1144 = vrot.lane.b32.xlu1 %v4939_v5, %s3681_s23  ;;  %2425 = vmatprep.subr.bf16.mxu0 %v2364_v57 }
 0x371   : > { %v5028_v63 = vpop.permute.xlu0 %2518 }
 0x372   : > { %v2287_v0 = vpop.permute.xlu1 %2286 }
 0x373   : > { %v2363_v52 = vsel %vm2358_vm10, %v2287_v0, %v2289_v28  ;;  %2332 = vrot.lane.b32.xlu0 %v4864_v46, %s3687_s10 }
 0x374   : > { %2330 = vrot.lane.b32.xlu1 %v2218_v6, %s3687_s10  ;;  %2426 = vmatpush1.bf16.msra.mxu0 %v2363_v52  ;;  %v2247_v6 = vsel %vm624_vm6, %v4930_v14, %v4921_v2 }
 0x375   : > { %v5037_v7 = vpop.permute.xlu0 %2516 }
 0x376   : > { %v5039_v4 = vpop.permute.xlu1 %2520 }
 0x377   : > { %1158 = vrot.lane.b32.xlu0 %v4960_v25, %s3682_s29 }
 0x378   : > { %1156 = vrot.lane.b32.xlu1 %v4965_v26, %s3682_s29 }
 0x379   : > { %v2297_v13 = vpop.permute.xlu0 %2296 }
 0x37a   : > { %v2295_v3 = vpop.permute.xlu1 %2294 }
 0x37b   : > { %2576 = vrot.lane.b32.xlu0 %v4965_v26, %s3682_s29  ;;  %v2366_v46 = vsel %vm2358_vm10, %v2295_v3, %v2297_v13 }
 0x37c   : > { %2328 = vrot.lane.b32.xlu1 %v2217_v19, %s3687_s10  ;;  %2427 = vmatprep.subr.bf16.mxu0 %v2366_v46 }
 0x37d   : > { %v5052_v60 = vpop.permute.xlu0 %1110 }
 0x37e   : > { %v5054_v17 = vpop.permute.xlu1 %1108 }
 0x37f   : > { %1154 = vrot.lane.b32.xlu0 %v4978_v43, %s3682_s29 }
 0x380   : > { %2578 = vrot.lane.b32.xlu1 %v4960_v25, %s3682_s29 }
 0x381   : > { %v5060_v20 = vpop.permute.xlu0 %2528 }
 0x382   : > { %v2293_v41 = vpop.permute.xlu1 %2292 }
 0x383   : > { %v2365_v30 = vsel %vm2358_vm10, %v2293_v41, %v2295_v3  ;;  %2336 = vrot.lane.b32.xlu0 %v2232_v47, %s3687_s10  ;;  %v3572_v3 = vld [vmem:[%s5773_s2 + $0x14] ss:$8 sps:$4 sm:$0xff]  }
 0x384   : > { %2574 = vrot.lane.b32.xlu1 %v4978_v43, %s3682_s29  ;;  %2428 = vmatpush1.bf16.msra.mxu0 %v2365_v30  ;;  %v3575_v41 = vld [vmem:[%s5773_s2 + $0x94] ss:$8 sps:$4 sm:$0xff]  }
 0x385   : > { %v5069_v22 = vpop.permute.xlu0 %1106  ;;  %3347 = vmatprep.mubr.msk.bf16.mxu1 %vm655_vm4, %v3572_v3  ;;  %3387 = vmatprep.mubr.msk.bf16.mxu0 %vm655_vm4, %v3575_v41 }
 0x386   : > { %v5071_v8 = vpop.permute.xlu1 %2530 }
 0x387   : > { %1162 = vrot.lane.b32.xlu0 %v4996_v12, %s3682_s29 }
 0x388   : > { %2338 = vrot.lane.b32.xlu1 %v4886_v11, %s3687_s10 }
 0x389   : > { %v2301_v37 = vpop.permute.xlu0 %2300 }
 0x38a   : > { %v5080_v39 = vpop.permute.xlu1 %2526 }
 0x38b   : > { %2334 = vrot.lane.b32.xlu0 %v2231_v38, %s3687_s10  ;;  %v3580_v38 = vld [vmem:[%s5773_s2 + $0x24] ss:$8 sps:$4 sm:$0xff]  }
 0x38c   : > { %1164 = vrot.lane.b32.xlu1 %v5011_v61, %s3682_s29 }
 0x38d   : > { %v5085_v40 = vpop.permute.xlu0 %1114 }
 0x38e   : > { %v2303_v18 = vpop.permute.xlu1 %2302 }
 0x38f   : > { %2584 = vrot.lane.b32.xlu0 %v5011_v61, %s3682_s29  ;;  %v2368_v11 = vsel %vm2358_vm10, %v2301_v37, %v2303_v18 }
 0x390   : > { %2582 = vrot.lane.b32.xlu1 %v4996_v12, %s3682_s29  ;;  %2429 = vmatprep.subr.bf16.mxu0 %v2368_v11  ;;  %v3578_v11 = vld [vmem:[%s5773_s2 + $0x20] ss:$8 sps:$4 sm:$0xff]  }
 0x391   : > { %v2299_v50 = vpop.permute.xlu0 %2298 }
 0x392   : > { %v2367_v54 = vsel %vm2358_vm10, %v2299_v50, %v2301_v37  ;;  %v5093_v21 = vpop.permute.xlu1 %1116  ;;  %v3577_v37 = vld [vmem:[%s5773_s2 + $0x90] ss:$8 sps:$4 sm:$0xff]  }
 0x393   : > { %2580 = vrot.lane.b32.xlu0 %v4939_v5, %s3682_s29  ;;  %2430 = vmatpush1.bf16.msra.mxu0 %v2367_v54  ;;  %v2250_v54 = vsel %vm624_vm6, %v4946_v16, %v4957_v24 }
 0x394   : > { %1160 = vrot.lane.b32.xlu1 %v4939_v5, %s3682_s29  ;;  %2109 = vmatmul.mubr.bf16.gmra.mrb[4].mxu0 %v3577_v37 }
 0x395   : > { %v5099_v44 = vpop.permute.xlu0 %2536 }
 0x396   : > { %v5101_v45 = vpop.permute.xlu1 %2534 }
 0x397   : > { %2344 = vrot.lane.b32.xlu0 %v4908_v1, %s3687_s10 }
 0x398   : > { %2342 = vrot.lane.b32.xlu1 %v2234_v42, %s3687_s10 }
 0x399   : > { %v5109_v48 = vpop.permute.xlu0 %2532 }
 0x39a   : > { %v5111_v49 = vpop.permute.xlu1 %1112 }
 0x39b   : > { %1174 = vrot.lane.b32.xlu0 %v4960_v25, %s3683_s8 }
 0x39c   : > { %1172 = vrot.lane.b32.xlu1 %v4965_v26, %s3683_s8 }
 0x39d   : > { %v2309_v51 = vpop.permute.xlu0 %2308 }
 0x39e   : > { %v2307_v53 = vpop.permute.xlu1 %2306 }
 0x39f   : > { %2592 = vrot.lane.b32.xlu0 %v4965_v26, %s3683_s8  ;;  %v2370_v1 = vsel %vm2358_vm10, %v2307_v53, %v2309_v51  ;;  %v3583_v51 = vld [vmem:[%s5773_s2 + $0xa4] ss:$8 sps:$4 sm:$0xff]  }
 0x3a0   : > { %2340 = vrot.lane.b32.xlu1 %v2233_v10, %s3687_s10  ;;  %2431 = vmatprep.subr.bf16.mxu0 %v2370_v1  ;;  %v2249_v10 = vsel %vm624_vm6, %v4955_v23, %v4946_v16 }
 0x3a1   : > { %v5124_v55 = vpop.permute.xlu0 %1126  ;;  %3396 = vmatprep.mubr.msk.bf16.mxu0 %vm655_vm4, %v3583_v51 }
 0x3a2   : > { %v5126_v9 = vpop.permute.xlu1 %1124 }
 0x3a3   : > { %1170 = vrot.lane.b32.xlu0 %v4978_v43, %s3683_s8 }
 0x3a4   : > { %2594 = vrot.lane.b32.xlu1 %v4960_v25, %s3683_s8 }
 0x3a5   : > { %v5132_v27 = vpop.permute.xlu0 %2544 }
 0x3a6   : > { %v2305_v59 = vpop.permute.xlu1 %2304 }
 0x3a7   : > { %v2369_v28 = vsel %vm2358_vm10, %v2305_v59, %v2307_v53  ;;  %2348 = vrot.lane.b32.xlu0 %v2248_v56, %s3687_s10 }
 0x3a8   : > { %2590 = vrot.lane.b32.xlu1 %v4978_v43, %s3683_s8  ;;  %2432 = vmatpush1.bf16.msra.mxu0 %v2369_v28 }
 0x3a9   : > { %v5141_v57 = vpop.permute.xlu0 %1122 }
 0x3aa   : > { %v5143_v0 = vpop.permute.xlu1 %2546 }
 0x3ab   : > { %1178 = vrot.lane.b32.xlu0 %v4996_v12, %s3683_s8 }
 0x3ac   : > { %2350 = vrot.lane.b32.xlu1 %v4932_v15, %s3687_s10  ;;  %v3574_v15 = vld [vmem:[%s5773_s2 + $0x10] ss:$8 sps:$4 sm:$0xff]  }
 0x3ad   : > { %v2313_v52 = vpop.permute.xlu0 %2312  ;;  %705 = vmatmul.mubr.bf16.gmra.mrb[4].mxu1 %v3574_v15 }
 0x3ae   : > { %v5152_v13 = vpop.permute.xlu1 %2542  ;;  %3356 = vmatprep.mubr.msk.bf16.mxu1 %vm655_vm4, %v3580_v38 }
 0x3af   : > { %2346 = vrot.lane.b32.xlu0 %v2247_v6, %s3687_s10 }
 0x3b0   : > { %1180 = vrot.lane.b32.xlu1 %v5011_v61, %s3683_s8 }
 0x3b1   : > { %v5160_v19 = vpop.permute.xlu0 %1130 }
 0x3b2   : > { %v2315_v46 = vpop.permute.xlu1 %2314 }
 0x3b3   : > { %2600 = vrot.lane.b32.xlu0 %v5011_v61, %s3683_s8  ;;  %v2372_v2 = vsel %vm2358_vm10, %v2313_v52, %v2315_v46  ;;  %v1103_v46 = vsel %vm519_vm0, %v4217_v32, %v4219_v33 }
 0x3b4   : > { %2598 = vrot.lane.b32.xlu1 %v4996_v12, %s3683_s8  ;;  %2433 = vmatprep.subr.bf16.mxu0 %v2372_v2 }
 0x3b5   : > { %v2311_v14 = vpop.permute.xlu0 %2310  ;;  %1034 = vmatmul.mubr.bf16.vlgmr.msra.gmra.mrb[0].mxu1 %v3578_v11 }
 0x3b6   : > { %v2371_v47 = vsel %vm2358_vm10, %v2311_v14, %v2313_v52  ;;  %v5175_v30 = vpop.permute.xlu1 %1132 }
 0x3b7   : > { %2596 = vrot.lane.b32.xlu0 %v4939_v5, %s3683_s8  ;;  %2434 = vmatpush1.bf16.msra.mxu0 %v2371_v47 }
 0x3b8   : > { %1176 = vrot.lane.b32.xlu1 %v4939_v5, %s3683_s8 }
 0x3b9   : > { %v5188_v18 = vpop.permute.xlu0 %2552 }
 0x3ba   : > { %v5193_v50 = vpop.permute.xlu1 %2550 }
 0x3bb   : > { %2356 = vrot.lane.b32.xlu0 %v4957_v24, %s3687_s10 }
 0x3bc   : > { %2354 = vrot.lane.b32.xlu1 %v2250_v54, %s3687_s10  ;;  %v2522_v54 = vsel %vm519_vm0, %v5015_v62, %v5003_v58  ;;  %v1104_v62 = vsel %vm519_vm0, %v4221_v34, %v4223_v35 }
 0x3bd   : > { %v5202_v42 = vpop.permute.xlu0 %2548 }
 0x3be   : > { %v5207_v53 = vpop.permute.xlu1 %1128 }
 0x3bf   : > { %1211 = vrot.lane.b32.xlu0 %v4965_v26, %s3688_s24 }
 0x3c0   : > { %2352 = vrot.lane.b32.xlu1 %v2249_v10, %s3687_s10 }
 0x3c1   : > { %v2321_v24 = vpop.permute.xlu0 %2320 }
 0x3c2   : > { %v2319_v1 = vpop.permute.xlu1 %2318 }
 0x3c3   : > { %2631 = vrot.lane.b32.xlu0 %v4965_v26, %s3689_s11  ;;  %v2374_v59 = vsel %vm2358_vm10, %v2319_v1, %v2321_v24 }
 0x3c4   : > { %1213 = vrot.lane.b32.xlu1 %v4960_v25, %s3688_s24  ;;  %2435 = vmatprep.subr.bf16.mxu0 %v2374_v59  ;;  %v2524_v59 = vsel %vm519_vm0, %v5037_v7, %v5028_v63  ;;  %v1118_v7 = vsel %vm540_vm1, %v5069_v22, %v5054_v17 }
 0x3c5   : > { %v5221_v16 = vpop.permute.xlu0 %1142 }
 0x3c6   : > { %v5223_v23 = vpop.permute.xlu1 %1140 }
 0x3c7   : > { %1209 = vrot.lane.b32.xlu0 %v4978_v43, %s3688_s24 }
 0x3c8   : > { %2633 = vrot.lane.b32.xlu1 %v4960_v25, %s3689_s11 }
 0x3c9   : > { %v5229_v56 = vpop.permute.xlu0 %2560 }
 0x3ca   : > { %v2317_v28 = vpop.permute.xlu1 %2316 }
 0x3cb   : > { %v2373_v26 = vsel %vm2358_vm10, %v2317_v28, %v2319_v1  ;;  %1217 = vrot.lane.b32.xlu0 %v4996_v12, %s3688_s24 }
 0x3cc   : > { %2629 = vrot.lane.b32.xlu1 %v4978_v43, %s3689_s11  ;;  %2436 = vmatpush1.bf16.msra.mxu0 %v2373_v26 }
 0x3cd   : > { %v5236_v52 = vpop.permute.xlu0 %1138 }
 0x3ce   : > { %v5238_v6 = vpop.permute.xlu1 %2562 }
 0x3cf   : > { %2637 = vrot.lane.b32.xlu0 %v4996_v12, %s3689_s11 }
 0x3d0   : > { %1219 = vrot.lane.b32.xlu1 %v5011_v61, %s3688_s24 }
 0x3d1   : > { %v2325_v25 = vpop.permute.xlu0 %2324 }
 0x3d2   : > { %v5244_v3 = vpop.permute.xlu1 %2558 }
 0x3d3   : > { %1215 = vrot.lane.b32.xlu0 %v4939_v5, %s3688_s24 }
 0x3d4   : > { %2639 = vrot.lane.b32.xlu1 %v5011_v61, %s3689_s11  ;;  %v2523_v61 = vsel %vm519_vm0, %v5003_v58, %v5017_v31 }
 0x3d5   : > { %v5250_v43 = vpop.permute.xlu0 %1146 }
 0x3d6   : > { %v2327_v15 = vpop.permute.xlu1 %2326 }
 0x3d7   : > { %1223 = vrot.lane.b32.xlu0 %v1103_v46, %s3688_s24  ;;  %v2376_v12 = vsel %vm2358_vm10, %v2325_v25, %v2327_v15  ;;  %v1121_v46 = vsel %vm540_vm1, %v5085_v40, %v5093_v21 }
 0x3d8   : > { %2635 = vrot.lane.b32.xlu1 %v4939_v5, %s3689_s11  ;;  %2437 = vmatprep.subr.bf16.mxu0 %v2376_v12  ;;  %v1102_v5 = vsel %vm519_vm0, %v4213_v29, %v4217_v32 }
 0x3d9   : > { %v2323_v2 = vpop.permute.xlu0 %2322 }
 0x3da   : > { %v2375_v14 = vsel %vm2358_vm10, %v2323_v2, %v2325_v25  ;;  %v5260_v41 = vpop.permute.xlu1 %1148  ;;  %v2541_v2 = vsel %vm540_vm1, %v5101_v45, %v5099_v44 }
 0x3db   : > { %2643 = vrot.lane.b32.xlu0 %v2523_v61, %s3689_s11  ;;  %2438 = vmatpush1.bf16.msra.mxu0 %v2375_v14 }
 0x3dc   : > { %1225 = vrot.lane.b32.xlu1 %v4219_v33, %s3688_s24  ;;  %v1105_v33 = vsel %vm519_vm0, %v4223_v35, %v4225_v36 }
 0x3dd   : > { %v5268_v47 = vpop.permute.xlu0 %2568 }
 0x3de   : > { %v5270_v37 = vpop.permute.xlu1 %2566 }
 0x3df   : > { %1221 = vrot.lane.b32.xlu0 %v1102_v5, %s3688_s24 }
 0x3e0   : > { %2645 = vrot.lane.b32.xlu1 %v5017_v31, %s3689_s11  ;;  %v2525_v31 = vsel %vm519_vm0, %v5028_v63, %v5039_v4 }
 0x3e1   : > { %v5278_v38 = vpop.permute.xlu0 %2564 }
 0x3e2   : > { %v5280_v11 = vpop.permute.xlu1 %1144 }
 0x3e3   : > { %1229 = vrot.lane.b32.xlu0 %v1105_v33, %s3688_s24  ;;  %v2540_v33 = vsel %vm540_vm1, %v5109_v48, %v5101_v45  ;;  %v1134_v45 = vsel %vm561_vm2, %v5141_v57, %v5126_v9 }
 0x3e4   : > { %2641 = vrot.lane.b32.xlu1 %v2522_v54, %s3689_s11 }
 0x3e5   : > { %v2333_v29 = vpop.permute.xlu0 %2332 }
 0x3e6   : > { %v2331_v32 = vpop.permute.xlu1 %2330 }
 0x3e7   : > { %2649 = vrot.lane.b32.xlu0 %v2525_v31, %s3689_s11  ;;  %v2378_v51 = vsel %vm2358_vm10, %v2331_v32, %v2333_v29 }
 0x3e8   : > { %1231 = vrot.lane.b32.xlu1 %v4225_v36, %s3688_s24  ;;  %2439 = vmatprep.subr.bf16.mxu0 %v2378_v51  ;;  %v1119_v36 = vsel %vm540_vm1, %v5054_v17, %v5052_v60  ;;  %v2554_v51 = vsel %vm561_vm2, %v5152_v13, %v5132_v27  ;;  %v1136_v13 = vsel %vm561_vm2, %v5207_v53, %v5160_v19 }
 0x3e9   : > { %v5297_v10 = vpop.permute.xlu0 %1158 }
 0x3ea   : > { %v5299_v58 = vpop.permute.xlu1 %1156 }
 0x3eb   : > { %1227 = vrot.lane.b32.xlu0 %v1104_v62, %s3688_s24  ;;  %v2557_v62 = vsel %vm561_vm2, %v5193_v50, %v5188_v18 }
 0x3ec   : > { %2651 = vrot.lane.b32.xlu1 %v5039_v4, %s3689_s11  ;;  %v2539_v4 = vsel %vm540_vm1, %v5060_v20, %v5071_v8 }
 0x3ed   : > { %v5307_v24 = vpop.permute.xlu0 %2576 }
 0x3ee   : > { %v2329_v1 = vpop.permute.xlu1 %2328 }
 0x3ef   : > { %v2377_v28 = vsel %vm2358_vm10, %v2329_v1, %v2331_v32  ;;  %1235 = vrot.lane.b32.xlu0 %v1119_v36, %s3688_s24 }
 0x3f0   : > { %2647 = vrot.lane.b32.xlu1 %v2524_v59, %s3689_s11  ;;  %2440 = vmatpush1.bf16.msra.mxu0 %v2377_v28  ;;  %v1151_v28 = vsel %vm582_vm3, %v5223_v23, %v5221_v16 }
 0x3f1   : > { %v5318_v34 = vpop.permute.xlu0 %1154 }
 0x3f2   : > { %v5320_v35 = vpop.permute.xlu1 %2578 }
 0x3f3   : > { %2655 = vrot.lane.b32.xlu0 %v2539_v4, %s3689_s11 }
 0x3f4   : > { %1237 = vrot.lane.b32.xlu1 %v5052_v60, %s3688_s24  ;;  %v2538_v60 = vsel %vm540_vm1, %v5080_v39, %v5060_v20  ;;  %v1120_v39 = vsel %vm540_vm1, %v5111_v49, %v5085_v40 }
 0x3f5   : > { %v2337_v63 = vpop.permute.xlu0 %2336 }
 0x3f6   : > { %v5331_v26 = vpop.permute.xlu1 %2574 }
 0x3f7   : > { %1233 = vrot.lane.b32.xlu0 %v1118_v7, %s3688_s24 }
 0x3f8   : > { %2657 = vrot.lane.b32.xlu1 %v5071_v8, %s3689_s11 }
 0x3f9   : > { %v5336_v25 = vpop.permute.xlu0 %1162 }
 0x3fa   : > { %v2339_v15 = vpop.permute.xlu1 %2338 }
 0x3fb   : > { %1241 = vrot.lane.b32.xlu0 %v1121_v46, %s3688_s24  ;;  %v2380_v17 = vsel %vm2358_vm10, %v2337_v63, %v2339_v15 }
 0x3fc   : > { %2653 = vrot.lane.b32.xlu1 %v2538_v60, %s3689_s11  ;;  %2441 = vmatprep.subr.bf16.mxu0 %v2380_v17  ;;  %v2570_v60 = vsel %vm582_vm3, %v5244_v3, %v5229_v56 }
 0x3fd   : > { %v2335_v22 = vpop.permute.xlu0 %2334 }
 0x3fe   : > { %v2379_v8 = vsel %vm2358_vm10, %v2335_v22, %v2337_v63  ;;  %v5348_v12 = vpop.permute.xlu1 %1164  ;;  %v2571_v63 = vsel %vm582_vm3, %v5229_v56, %v5238_v6  ;;  %v1152_v56 = vsel %vm582_vm3, %v5280_v11, %v5250_v43 }
 0x3ff   : > { %2661 = vrot.lane.b32.xlu0 %v2541_v2, %s3689_s11  ;;  %2442 = vmatpush1.bf16.msra.mxu0 %v2379_v8  ;;  %v3581_v2 = vld [vmem:[%s5773_s2 + $0xa0] ss:$8 sps:$4 sm:$0xff]  }
 0x400   : > { %1243 = vrot.lane.b32.xlu1 %v5093_v21, %s3688_s24  ;;  %v1135_v21 = vsel %vm561_vm2, %v5126_v9, %v5124_v55 }
 0x401   : > { %v5356_v20 = vpop.permute.xlu0 %2584 }
 0x402   : > { %v5361_v14 = vpop.permute.xlu1 %2582 }
 0x403   : > { %1239 = vrot.lane.b32.xlu0 %v1120_v39, %s3688_s24 }
 0x404   : > { %2663 = vrot.lane.b32.xlu1 %v5099_v44, %s3689_s11  ;;  %v2555_v44 = vsel %vm561_vm2, %v5132_v27, %v5143_v0 }
 0x405   : > { %v5366_v61 = vpop.permute.xlu0 %2580 }
 0x406   : > { %v5368_v5 = vpop.permute.xlu1 %1160 }
 0x407   : > { %1247 = vrot.lane.b32.xlu0 %v1135_v21, %s3688_s24  ;;  %v1167_v21 = vsel %vm603_vm5, %v5299_v58, %v5297_v10 }
 0x408   : > { %2659 = vrot.lane.b32.xlu1 %v2540_v33, %s3689_s11 }
 0x409   : > { %v2345_v40 = vpop.permute.xlu0 %2344 }
 0x40a   : > { %v2343_v49 = vpop.permute.xlu1 %2342 }
 0x40b   : > { %2667 = vrot.lane.b32.xlu0 %v2555_v44, %s3689_s11  ;;  %v2382_v54 = vsel %vm2358_vm10, %v2343_v49, %v2345_v40  ;;  %v1166_v44 = vsel %vm603_vm5, %v5318_v34, %v5299_v58 }
 0x40c   : > { %1249 = vrot.lane.b32.xlu1 %v5124_v55, %s3688_s24  ;;  %2443 = vmatprep.subr.bf16.mxu0 %v2382_v54  ;;  %v1137_v55 = vsel %vm561_vm2, %v5160_v19, %v5175_v30 }
 0x40d   : > { %v5385_v29 = vpop.permute.xlu0 %1174 }
 0x40e   : > { %v5390_v48 = vpop.permute.xlu1 %1172 }
 0x40f   : > { %1245 = vrot.lane.b32.xlu0 %v1134_v45, %s3688_s24 }
 0x410   : > { %2669 = vrot.lane.b32.xlu1 %v5143_v0, %s3689_s11 }
 0x411   : > { %v5395_v32 = vpop.permute.xlu0 %2592 }
 0x412   : > { %v2341_v31 = vpop.permute.xlu1 %2340 }
 0x413   : > { %v2381_v9 = vsel %vm2358_vm10, %v2341_v31, %v2343_v49  ;;  %1253 = vrot.lane.b32.xlu0 %v1137_v55, %s3688_s24  ;;  %v2587_v49 = vsel %vm603_vm5, %v5307_v24, %v5320_v35 }
 0x414   : > { %2665 = vrot.lane.b32.xlu1 %v2554_v51, %s3689_s11  ;;  %2444 = vmatpush1.bf16.msra.mxu0 %v2381_v9  ;;  %v2586_v51 = vsel %vm603_vm5, %v5331_v26, %v5307_v24 }
 0x415   : > { %v5406_v57 = vpop.permute.xlu0 %1170 }
 0x416   : > { %v5408_v0 = vpop.permute.xlu1 %2594 }
 0x417   : > { %2673 = vrot.lane.b32.xlu0 %v2557_v62, %s3689_s11  ;;  %v2589_v62 = vsel %vm603_vm5, %v5361_v14, %v5356_v20 }
 0x418   : > { %1255 = vrot.lane.b32.xlu1 %v5175_v30, %s3688_s24  ;;  %v2556_v30 = vsel %vm561_vm2, %v5202_v42, %v5193_v50  ;;  %v1150_v42 = vsel %vm582_vm3, %v5236_v52, %v5223_v23 }
 0x419   : > { %v2349_v27 = vpop.permute.xlu0 %2348 }
 0x41a   : > { %v5419_v1 = vpop.permute.xlu1 %2590 }
 0x41b   : > { %1251 = vrot.lane.b32.xlu0 %v1136_v13, %s3688_s24 }
 0x41c   : > { %2675 = vrot.lane.b32.xlu1 %v5188_v18, %s3689_s11 }
 0x41d   : > { %v5424_v36 = vpop.permute.xlu0 %1178 }
 0x41e   : > { %v2351_v59 = vpop.permute.xlu1 %2350 }
 0x41f   : > { %1259 = vrot.lane.b32.xlu0 %v1151_v28, %s3688_s24  ;;  %v2384_v19 = vsel %vm2358_vm10, %v2349_v27, %v2351_v59 }
 0x420   : > { %2671 = vrot.lane.b32.xlu1 %v2556_v30, %s3689_s11  ;;  %2445 = vmatprep.subr.bf16.mxu0 %v2384_v19  ;;  %v2588_v19 = vsel %vm603_vm5, %v5366_v61, %v5361_v14 }
 0x421   : > { %v2347_v53 = vpop.permute.xlu0 %2346 }
 0x422   : > { %v2383_v18 = vsel %vm2358_vm10, %v2347_v53, %v2349_v27  ;;  %v5436_v4 = vpop.permute.xlu1 %1180  ;;  %v1168_v27 = vsel %vm603_vm5, %v5368_v5, %v5336_v25  ;;  %v3584_v5 = vld [vmem:[%s5773_s2 + $0x34] ss:$8 sps:$4 sm:$0xff]  }
 0x423   : > { %2679 = vrot.lane.b32.xlu0 %v2571_v63, %s3689_s11  ;;  %2446 = vmatpush1.bf16.msra.mxu0 %v2383_v18  ;;  %v2603_v18 = vsel %vm624_vm6, %v5395_v32, %v5408_v0 }
 0x424   : > { %1261 = vrot.lane.b32.xlu1 %v5221_v16, %s3688_s24  ;;  %v1153_v16 = vsel %vm582_vm3, %v5250_v43, %v5260_v41  ;;  %v2572_v43 = vsel %vm582_vm3, %v5278_v38, %v5270_v37  ;;  %3357 = vmatprep.mubr.msk.bf16.mxu1 %vm655_vm4, %v3584_v5 }
 0x425   : > { %v5444_v50 = vpop.permute.xlu0 %2600 }
 0x426   : > { %v5449_v7 = vpop.permute.xlu1 %2598 }
 0x427   : > { %1257 = vrot.lane.b32.xlu0 %v1150_v42, %s3688_s24  ;;  %v3587_v42 = vld [vmem:[%s5773_s2 + $0xb4] ss:$8 sps:$4 sm:$0xff]  }
 0x428   : > { %2681 = vrot.lane.b32.xlu1 %v5238_v6, %s3689_s11  ;;  %v2573_v6 = vsel %vm582_vm3, %v5270_v37, %v5268_v47 }
 0x429   : > { %v5454_v15 = vpop.permute.xlu0 %2596 }
 0x42a   : > { %v5456_v46 = vpop.permute.xlu1 %1176 }
 0x42b   : > { %1265 = vrot.lane.b32.xlu0 %v1153_v16, %s3688_s24 }
 0x42c   : > { %2677 = vrot.lane.b32.xlu1 %v2570_v60, %s3689_s11  ;;  %v3589_v60 = vld [vmem:[%s5773_s2 + $0xb0] ss:$8 sps:$4 sm:$0xff]  }
 0x42d   : > { %v2357_v23 = vpop.permute.xlu0 %2356 }
 0x42e   : > { %v2355_v52 = vpop.permute.xlu1 %2354 }
 0x42f   : > { %2685 = vrot.lane.b32.xlu0 %v2573_v6, %s3689_s11  ;;  %v2386_v17 = vsel %vm2358_vm10, %v2355_v52, %v2357_v23  ;;  %v1182_v23 = vsel %vm624_vm6, %v5406_v57, %v5390_v48  ;;  %v1185_v57 = vsel %vm624_vm6, %v5424_v36, %v5436_v4 }
 0x430   : > { %1267 = vrot.lane.b32.xlu1 %v5260_v41, %s3688_s24  ;;  %2447 = vmatprep.subr.bf16.mxu0 %v2386_v17 }
 0x431   : > { %v1212_v22 = vpop.permute.xlu0 %1211 }
 0x432   : > { %v2353_v3 = vpop.permute.xlu1 %2352 }
 0x433   : > { %v2385_v8 = vsel %vm2358_vm10, %v2353_v3, %v2355_v52  ;;  %1263 = vrot.lane.b32.xlu0 %v1152_v56, %s3688_s24 }
 0x434   : > { %2687 = vrot.lane.b32.xlu1 %v5268_v47, %s3689_s11  ;;  %2448 = vmatpush1.bf16.msra.mxu0 %v2385_v8 }
 0x435   : > { %v2632_v41 = vpop.permute.xlu0 %2631 }
 0x436   : > { %v1214_v39 = vpop.permute.xlu1 %1213 }
 0x437   : > { %1271 = vrot.lane.b32.xlu0 %v1167_v21, %s3688_s24  ;;  %v1295_v11 = vsel %vm655_vm4, %v1212_v22, %v1214_v39  ;;  %2454 = vmatmul.mubr.bf16.vlgmr.msra.gmra.mrb[0].mxu0 %v3581_v2  ;;  %v1184_v39 = vsel %vm624_vm6, %v5456_v46, %v5424_v36  ;;  %v2861_v36 = vld [vmem:[%s5774_s3] sm:$0xff] }
 0x438   : > { %2683 = vrot.lane.b32.xlu1 %v2572_v43, %s3689_s11  ;;  %1356 = vmatprep.subr.bf16.mxu1 %v1295_v11 }
 0x439   : > { %v1210_v47 = vpop.permute.xlu0 %1209  ;;  %3397 = vmatprep.mubr.msk.bf16.mxu0 %vm655_vm4, %v3587_v42 }
 0x43a   : > { %v1294_v33 = vsel %vm655_vm4, %v1210_v47, %v1212_v22  ;;  %v2634_v40 = vpop.permute.xlu1 %2633  ;;  %v2602_v22 = vsel %vm624_vm6, %v5419_v1, %v5395_v32 }
 0x43b   : > { %2691 = vrot.lane.b32.xlu0 %v2587_v49, %s3689_s11  ;;  %1357 = vmatpush1.bf16.msra.mxu1 %v1294_v33  ;;  %v2715_v37 = vsel %vm2713_vm11, %v2632_v41, %v2634_v40  ;;  %v3690_v40 = vmov 0  }
 0x43c   : > { %1273 = vrot.lane.b32.xlu1 %v5297_v10, %s3688_s24  ;;  %2776 = vmatprep.subr.bf16.mxu0 %v2715_v37  ;;  %v1169_v10 = vsel %vm603_vm5, %v5336_v25, %v5348_v12  ;;  %v2864_v37 = vld [vmem:[%s5774_s3 + $0x18] sm:$0xff] }
 0x43d   : > { %v1218_v38 = vpop.permute.xlu0 %1217  ;;  %3551 = vset.pattern.permute.xlu1 %v3690_v40  ;;  %3550 = vset.pattern.permute.xlu0 %v3690_v40 }
 0x43e   : > { %v2630_v54 = vpop.permute.xlu1 %2629 }
 0x43f   : > { %v2714_v45 = vsel %vm2713_vm11, %v2630_v54, %v2632_v41  ;;  %1269 = vrot.lane.b32.xlu0 %v1166_v44, %s3688_s24  ;;  %2464 = vmatmul.mubr.bf16.gmra.mrb[4].mxu0 %v3589_v60  ;;  %v2605_v41 = vsel %vm624_vm6, %v5449_v7, %v5444_v50  ;;  %v2863_v44 = vld [vmem:[%s5774_s3 + $0x10] sm:$0xff] }
 0x440   : > { %2693 = vrot.lane.b32.xlu1 %v5320_v35, %s3689_s11  ;;  %2777 = vmatpush1.bf16.msra.mxu0 %v2714_v45 }
 0x441   : > { %v2638_v31 = vpop.permute.xlu0 %2637 }
 0x442   : > { %v1220_v55 = vpop.permute.xlu1 %1219 }
 0x443   : > { %1277 = vrot.lane.b32.xlu0 %v1169_v10, %s3688_s24  ;;  %v1297_v58 = vsel %vm655_vm4, %v1218_v38, %v1220_v55  ;;  %v2931_v10 = vld [vmem:[%s5776_s5] sm:$0xff] }
 0x444   : > { %2689 = vrot.lane.b32.xlu1 %v2586_v51, %s3689_s11  ;;  %1358 = vmatprep.subr.bf16.mxu1 %v1297_v58 }
 0x445   : > { %v1216_v34 = vpop.permute.xlu0 %1215 }
 0x446   : > { %v1296_v35 = vsel %vm655_vm4, %v1216_v34, %v1218_v38  ;;  %v2640_v9 = vpop.permute.xlu1 %2639  ;;  %v2934_v34 = vld [vmem:[%s5776_s5 + $0x18] sm:$0xff] }
 0x447   : > { %2697 = vrot.lane.b32.xlu0 %v2589_v62, %s3689_s11  ;;  %1359 = vmatpush1.bf16.msra.mxu1 %v1296_v35  ;;  %v2717_v24 = vsel %vm2713_vm11, %v2638_v31, %v2640_v9  ;;  %v2933_v9 = vld [vmem:[%s5776_s5 + $0x10] sm:$0xff] }
 0x448   : > { %1279 = vrot.lane.b32.xlu1 %v5348_v12, %s3688_s24  ;;  %2778 = vmatprep.subr.bf16.mxu0 %v2717_v24  ;;  %v1183_v12 = vsel %vm624_vm6, %v5390_v48, %v5385_v29 }
 0x449   : > { %v1224_v26 = vpop.permute.xlu0 %1223 }
 0x44a   : > { %v2636_v13 = vpop.permute.xlu1 %2635 }
 0x44b   : > { %v2716_v59 = vsel %vm2713_vm11, %v2636_v13, %v2638_v31  ;;  %1275 = vrot.lane.b32.xlu0 %v1168_v27, %s3688_s24  ;;  %v2932_v31 = vld [vmem:[%s5776_s5 + $0x8] sm:$0xff] }
 0x44c   : > { %2699 = vrot.lane.b32.xlu1 %v5356_v20, %s3689_s11  ;;  %2779 = vmatpush1.bf16.msra.mxu0 %v2716_v59  ;;  %v3586_v20 = vld [vmem:[%s5773_s2 + $0x30] ss:$8 sps:$4 sm:$0xff]   ;;  %v2936_v27 = vld [vmem:[%s5776_s5 + $0x28] sm:$0xff]  ;;  %v2935_v59 = vld [vmem:[%s5776_s5 + $0x20] sm:$0xff] }
 0x44d   : > { %v2644_v28 = vpop.permute.xlu0 %2643  ;;  %1044 = vmatmul.mubr.bf16.gmra.mrb[4].mxu1 %v3586_v20 }
 0x44e   : > { %v1226_v30 = vpop.permute.xlu1 %1225 }
 0x44f   : > { %1283 = vrot.lane.b32.xlu0 %v1183_v12, %s3688_s24  ;;  %v1299_v25 = vsel %vm655_vm4, %v1224_v26, %v1226_v30  ;;  %v2938_v12 = vld [vmem:[%s5776_s5 + $0x38] sm:$0xff] }
 0x450   : > { %2695 = vrot.lane.b32.xlu1 %v2588_v19, %s3689_s11  ;;  %1360 = vmatprep.subr.bf16.mxu1 %v1299_v25  ;;  %v2937_v25 = vld [vmem:[%s5776_s5 + $0x30] sm:$0xff] }
 0x451   : > { %v1222_v53 = vpop.permute.xlu0 %1221 }
 0x452   : > { %v1298_v14 = vsel %vm655_vm4, %v1222_v53, %v1224_v26  ;;  %v2646_v61 = vpop.permute.xlu1 %2645 }
 0x453   : > { %2703 = vrot.lane.b32.xlu0 %v2603_v18, %s3689_s11  ;;  %1361 = vmatpush1.bf16.msra.mxu1 %v1298_v14  ;;  %v2719_v63 = vsel %vm2713_vm11, %v2644_v28, %v2646_v61 }
 0x454   : > { %1285 = vrot.lane.b32.xlu1 %v5385_v29, %s3688_s24  ;;  %2780 = vmatprep.subr.bf16.mxu0 %v2719_v63  ;;  %v3592_v29 = vld [vmem:[%s5773_s2 + $0x44] ss:$8 sps:$4 sm:$0xff]  }
 0x455   : > { %v1230_v16 = vpop.permute.xlu0 %1229  ;;  %3366 = vmatprep.mubr.msk.bf16.mxu1 %vm655_vm4, %v3592_v29 }
 0x456   : > { %v2642_v52 = vpop.permute.xlu1 %2641 }
 0x457   : > { %v2718_v6 = vsel %vm2713_vm11, %v2642_v52, %v2644_v28  ;;  %1281 = vrot.lane.b32.xlu0 %v1182_v23, %s3688_s24 }
 0x458   : > { %2705 = vrot.lane.b32.xlu1 %v5408_v0, %s3689_s11  ;;  %2781 = vmatpush1.bf16.msra.mxu0 %v2718_v6  ;;  %v3595_v0 = vld [vmem:[%s5773_s2 + $0xc4] ss:$8 sps:$4 sm:$0xff]  }
 0x459   : > { %v2650_v17 = vpop.permute.xlu0 %2649  ;;  %3406 = vmatprep.mubr.msk.bf16.mxu0 %vm655_vm4, %v3595_v0 }
 0x45a   : > { %v1232_v48 = vpop.permute.xlu1 %1231 }
 0x45b   : > { %1289 = vrot.lane.b32.xlu0 %v1185_v57, %s3688_s24  ;;  %v1301_v56 = vsel %vm655_vm4, %v1230_v16, %v1232_v48 }
 0x45c   : > { %2701 = vrot.lane.b32.xlu1 %v2602_v22, %s3689_s11  ;;  %1362 = vmatprep.subr.bf16.mxu1 %v1301_v56 }
 0x45d   : > { %v1228_v3 = vpop.permute.xlu0 %1227 }
 0x45e   : > { %v1300_v8 = vsel %vm655_vm4, %v1228_v3, %v1230_v16  ;;  %v2652_v2 = vpop.permute.xlu1 %2651 }
 0x45f   : > { %2709 = vrot.lane.b32.xlu0 %v2605_v41, %s3689_s11  ;;  %1363 = vmatpush1.bf16.msra.mxu1 %v1300_v8  ;;  %v2721_v32 = vsel %vm2713_vm11, %v2650_v17, %v2652_v2 }
 0x460   : > { %1291 = vrot.lane.b32.xlu1 %v5436_v4, %s3688_s24  ;;  %2782 = vmatprep.subr.bf16.mxu0 %v2721_v32  ;;  %v2604_v4 = vsel %vm624_vm6, %v5454_v15, %v5449_v7 }
 0x461   : > { %v1236_v1 = vpop.permute.xlu0 %1235 }
 0x462   : > { %v2648_v21 = vpop.permute.xlu1 %2647 }
 0x463   : > { %v2720_v43 = vsel %vm2713_vm11, %v2648_v21, %v2650_v17  ;;  %1287 = vrot.lane.b32.xlu0 %v1184_v39, %s3688_s24  ;;  %s2901_s24 = sld [smem:[#allocation6]] }
 0x464   : > { %2711 = vrot.lane.b32.xlu1 %v5444_v50, %s3689_s11  ;;  %2783 = vmatpush1.bf16.msra.mxu0 %v2720_v43  ;;  %v2862_v50 = vld [vmem:[%s5774_s3 + $0x8] sm:$0xff] }
 0x465   : > { %v2656_v11 = vpop.permute.xlu0 %2655 }
 0x466   : > { %v1238_v47 = vpop.permute.xlu1 %1237 }
 0x467   : > { %v1303_v33 = vsel %vm655_vm4, %v1236_v1, %v1238_v47  ;;  %2867 = vperm.xlu0 %3550, %v2861_v36  }
 0x468   : > { %2707 = vrot.lane.b32.xlu1 %v2604_v4, %s3689_s11  ;;  %1364 = vmatprep.subr.bf16.mxu1 %v1303_v33 }
 0x469   : > { %v1234_v46 = vpop.permute.xlu0 %1233 }
 0x46a   : > { %v1302_v7 = vsel %vm655_vm4, %v1234_v46, %v1236_v1  ;;  %v2658_v15 = vpop.permute.xlu1 %2657 }
 0x46b   : > { %1365 = vmatpush1.bf16.msra.mxu1 %v1302_v7  ;;  %v2723_v49 = vsel %vm2713_vm11, %v2656_v11, %v2658_v15  ;;  %2882 = vperm.xlu0 %3550, %v2864_v37  }
 0x46c   : > { %2784 = vmatprep.subr.bf16.mxu0 %v2723_v49  ;;  %2872 = vperm.xlu1 %3551, %v2862_v50  }
 0x46d   : > { %v1242_v38 = vpop.permute.xlu0 %1241 }
 0x46e   : > { %v2654_v54 = vpop.permute.xlu1 %2653 }
 0x46f   : > { %v2722_v45 = vsel %vm2713_vm11, %v2654_v54, %v2656_v11  ;;  %2946 = vperm.xlu0 %3550, %v2932_v31  }
 0x470   : > { %2785 = vmatpush1.bf16.msra.mxu0 %v2722_v45  ;;  %2877 = vperm.xlu1 %3551, %v2863_v44  }
 0x471   : > { %v2662_v55 = vpop.permute.xlu0 %2661 }
 0x472   : > { %v1244_v51 = vpop.permute.xlu1 %1243 }
 0x473   : > { %v1305_v58 = vsel %vm655_vm4, %v1242_v38, %v1244_v51  ;;  %2956 = vperm.xlu0 %3550, %v2934_v34  }
 0x474   : > { %1366 = vmatprep.subr.bf16.mxu1 %v1305_v58  ;;  %2941 = vperm.xlu1 %3551, %v2931_v10  }
 0x475   : > { %v1240_v35 = vpop.permute.xlu0 %1239 }
 0x476   : > { %v1304_v62 = vsel %vm655_vm4, %v1240_v35, %v1242_v38  ;;  %v2664_v24 = vpop.permute.xlu1 %2663 }
 0x477   : > { %1367 = vmatpush1.bf16.msra.mxu1 %v1304_v62  ;;  %v2725_v26 = vsel %vm2713_vm11, %v2662_v55, %v2664_v24  ;;  %2966 = vperm.xlu0 %3550, %v2936_v27  }
 0x478   : > { %2786 = vmatprep.subr.bf16.mxu0 %v2725_v26  ;;  %2951 = vperm.xlu1 %3551, %v2933_v9  }
 0x479   : > { %v1248_v13 = vpop.permute.xlu0 %1247 }
 0x47a   : > { %v2660_v28 = vpop.permute.xlu1 %2659 }
 0x47b   : > { %v2724_v30 = vsel %vm2713_vm11, %v2660_v28, %v2662_v55  ;;  %2976 = vperm.xlu0 %3550, %v2938_v12  }
 0x47c   : > { %2787 = vmatpush1.bf16.msra.mxu0 %v2724_v30  ;;  %2961 = vperm.xlu1 %3551, %v2935_v59  }
 0x47d   : > { %v2668_v19 = vpop.permute.xlu0 %2667 }
 0x47e   : > { %v1250_v5 = vpop.permute.xlu1 %1249 }
 0x47f   : > { %v1307_v20 = vsel %vm655_vm4, %v1248_v13, %v1250_v5 }
 0x480   : > { %1368 = vmatprep.subr.bf16.mxu1 %v1307_v20  ;;  %2971 = vperm.xlu1 %3551, %v2937_v25  }
 0x481   : > { %v1246_v53 = vpop.permute.xlu0 %1245 }
 0x482   : > { %v1306_v14 = vsel %vm655_vm4, %v1246_v53, %v1248_v13  ;;  %v2670_v61 = vpop.permute.xlu1 %2669 }
 0x483   : > { %1369 = vmatpush1.bf16.msra.mxu1 %v1306_v14  ;;  %v2727_v18 = vsel %vm2713_vm11, %v2668_v19, %v2670_v61 }
 0x484   : > { %2788 = vmatprep.subr.bf16.mxu0 %v2727_v18 }
 0x485   : > { %v1254_v63 = vpop.permute.xlu0 %1253 }
 0x486   : > { %v2666_v42 = vpop.permute.xlu1 %2665 }
 0x487   : > { %v2726_v16 = vsel %vm2713_vm11, %v2666_v42, %v2668_v19 }
 0x488   : > { %2789 = vmatpush1.bf16.msra.mxu0 %v2726_v16 }
 0x489   : > { %v2674_v60 = vpop.permute.xlu0 %2673 }
 0x48a   : > { %v1256_v23 = vpop.permute.xlu1 %1255 }
 0x48b   : > { %v1309_v52 = vsel %vm655_vm4, %v1254_v63, %v1256_v23 }
 0x48c   : > { %1370 = vmatprep.subr.bf16.mxu1 %v1309_v52 }
 0x48d   : > { %v1252_v6 = vpop.permute.xlu0 %1251 }
 0x48e   : > { %v1308_v29 = vsel %vm655_vm4, %v1252_v6, %v1254_v63  ;;  %v2676_v17 = vpop.permute.xlu1 %2675  ;;  %v3590_v6 = vld [vmem:[%s5773_s2 + $0x40] ss:$8 sps:$4 sm:$0xff]  }
 0x48f   : > { %1371 = vmatpush1.bf16.msra.mxu1 %v1308_v29  ;;  %v2729_v48 = vsel %vm2713_vm11, %v2674_v60, %v2676_v17  ;;  %v3596_v17 = vld [vmem:[%s5773_s2 + $0x54] ss:$8 sps:$4 sm:$0xff]  }
 0x490   : > { %2790 = vmatprep.subr.bf16.mxu0 %v2729_v48 }
 0x491   : > { %v1260_v57 = vpop.permute.xlu0 %1259 }
 0x492   : > { %v2672_v22 = vpop.permute.xlu1 %2671 }
 0x493   : > { %v2728_v56 = vsel %vm2713_vm11, %v2672_v22, %v2674_v60  ;;  %v3593_v22 = vld [vmem:[%s5773_s2 + $0xc0] ss:$8 sps:$4 sm:$0xff]  }
 0x494   : > { %2791 = vmatpush1.bf16.msra.mxu0 %v2728_v56  ;;  %v3599_v56 = vld [vmem:[%s5773_s2 + $0xd4] ss:$8 sps:$4 sm:$0xff]  }
 0x495   : > { %v2680_v0 = vpop.permute.xlu0 %2679 }
 0x496   : > { %v1262_v3 = vpop.permute.xlu1 %1261 }
 0x497   : > { %v1311_v8 = vsel %vm655_vm4, %v1260_v57, %v1262_v3  ;;  %v3601_v3 = vld [vmem:[%s5773_s2 + $0xd0] ss:$8 sps:$4 sm:$0xff]  }
 0x498   : > { %1372 = vmatprep.subr.bf16.mxu1 %v1311_v8 }
 0x499   : > { %v1258_v2 = vpop.permute.xlu0 %1257 }
 0x49a   : > { %v1310_v41 = vsel %vm655_vm4, %v1258_v2, %v1260_v57  ;;  %v2682_v32 = vpop.permute.xlu1 %2681 }
 0x49b   : > { %1373 = vmatpush1.bf16.msra.mxu1 %v1310_v41  ;;  %v2731_v1 = vsel %vm2713_vm11, %v2680_v0, %v2682_v32 }
 0x49c   : > { %2792 = vmatprep.subr.bf16.mxu0 %v2731_v1 }
 0x49d   : > { %v1266_v39 = vpop.permute.xlu0 %1265 }
 0x49e   : > { %v2678_v21 = vpop.permute.xlu1 %2677 }
 0x49f   : > { %v2730_v43 = vsel %vm2713_vm11, %v2678_v21, %v2680_v0  ;;  %v3598_v0 = vld [vmem:[%s5773_s2 + $0x50] ss:$8 sps:$4 sm:$0xff]  }
 0x4a0   : > { %2793 = vmatpush1.bf16.msra.mxu0 %v2730_v43 }
 0x4a1   : > { %v2686_v11 = vpop.permute.xlu0 %2685 }
 0x4a2   : > { %v1268_v47 = vpop.permute.xlu1 %1267 }
 0x4a3   : > { %v1313_v4 = vsel %vm655_vm4, %v1266_v39, %v1268_v47 }
 0x4a4   : > { %1374 = vmatprep.subr.bf16.mxu1 %v1313_v4 }
 0x4a5   : > { %v1264_v33 = vpop.permute.xlu0 %1263 }
 0x4a6   : > { %v1312_v36 = vsel %vm655_vm4, %v1264_v33, %v1266_v39  ;;  %v2688_v46 = vpop.permute.xlu1 %2687 }
 0x4a7   : > { %1375 = vmatpush1.bf16.msra.mxu1 %v1312_v36  ;;  %v2733_v50 = vsel %vm2713_vm11, %v2686_v11, %v2688_v46 }
 0x4a8   : > { %2794 = vmatprep.subr.bf16.mxu0 %v2733_v50 }
 0x4a9   : > { %v1272_v7 = vpop.permute.xlu0 %1271 }
 0x4aa   : > { %v2684_v15 = vpop.permute.xlu1 %2683 }
 0x4ab   : > { %v2732_v49 = vsel %vm2713_vm11, %v2684_v15, %v2686_v11  ;;  %v2902_v11 = vstv %s2901_s24 }
 0x4ac   : > { %2795 = vmatpush1.bf16.msra.mxu0 %v2732_v49 }
 0x4ad   : > { %v2692_v37 = vpop.permute.xlu0 %2691 }
 0x4ae   : > { %v1274_v38 = vpop.permute.xlu1 %1273 }
 0x4af   : > { %v1315_v44 = vsel %vm655_vm4, %v1272_v7, %v1274_v38 }
 0x4b0   : > { %1376 = vmatprep.subr.bf16.mxu1 %v1315_v44 }
 0x4b1   : > { %v1270_v54 = vpop.permute.xlu0 %1269 }
 0x4b2   : > { %v1314_v45 = vsel %vm655_vm4, %v1270_v54, %v1272_v7  ;;  %v2694_v31 = vpop.permute.xlu1 %2693 }
 0x4b3   : > { %1377 = vmatpush1.bf16.msra.mxu1 %v1314_v45  ;;  %v2735_v55 = vsel %vm2713_vm11, %v2692_v37, %v2694_v31 }
 0x4b4   : > { %2796 = vmatprep.subr.bf16.mxu0 %v2735_v55 }
 0x4b5   : > { %v1278_v10 = vpop.permute.xlu0 %1277 }
 0x4b6   : > { %v2690_v51 = vpop.permute.xlu1 %2689 }
 0x4b7   : > { %v2734_v58 = vsel %vm2713_vm11, %v2690_v51, %v2692_v37 }
 0x4b8   : > { %2797 = vmatpush1.bf16.msra.mxu0 %v2734_v58 }
 0x4b9   : > { %v2698_v34 = vpop.permute.xlu0 %2697 }
 0x4ba   : > { %v1280_v35 = vpop.permute.xlu1 %1279 }
 0x4bb   : > { %v1317_v9 = vsel %vm655_vm4, %v1278_v10, %v1280_v35 }
 0x4bc   : > { %1378 = vmatprep.subr.bf16.mxu1 %v1317_v9 }
 0x4bd   : > { %v1276_v62 = vpop.permute.xlu0 %1275 }
 0x4be   : > { %v1316_v24 = vsel %vm655_vm4, %v1276_v62, %v1278_v10  ;;  %v2700_v26 = vpop.permute.xlu1 %2699 }
 0x4bf   : > { %1379 = vmatpush1.bf16.msra.mxu1 %v1316_v24  ;;  %v2737_v27 = vsel %vm2713_vm11, %v2698_v34, %v2700_v26 }
 0x4c0   : > { %2798 = vmatprep.subr.bf16.mxu0 %v2737_v27 }
 0x4c1   : > { %v1284_v13 = vpop.permute.xlu0 %1283 }
 0x4c2   : > { %v2696_v59 = vpop.permute.xlu1 %2695 }
 0x4c3   : > { %v2736_v28 = vsel %vm2713_vm11, %v2696_v59, %v2698_v34 }
 0x4c4   : > { %2799 = vmatpush1.bf16.msra.mxu0 %v2736_v28 }
 0x4c5   : > { %v2704_v30 = vpop.permute.xlu0 %2703 }
 0x4c6   : > { %v1286_v12 = vpop.permute.xlu1 %1285 }
 0x4c7   : > { %v1319_v19 = vsel %vm655_vm4, %v1284_v13, %v1286_v12 }
 0x4c8   : > { %1380 = vmatprep.subr.bf16.mxu1 %v1319_v19 }
 0x4c9   : > { %v1282_v25 = vpop.permute.xlu0 %1281 }
 0x4ca   : > { %v1318_v5 = vsel %vm655_vm4, %v1282_v25, %v1284_v13  ;;  %v2706_v20 = vpop.permute.xlu1 %2705 }
 0x4cb   : > { %1381 = vmatpush1.bf16.msra.mxu1 %v1318_v5  ;;  %v2739_v53 = vsel %vm2713_vm11, %v2704_v30, %v2706_v20 }
 0x4cc   : > { %2800 = vmatprep.subr.bf16.mxu0 %v2739_v53 }
 0x4cd   : > { %v1290_v14 = vpop.permute.xlu0 %1289 }
 0x4ce   : > { %v2702_v61 = vpop.permute.xlu1 %2701 }
 0x4cf   : > { %v2738_v18 = vsel %vm2713_vm11, %v2702_v61, %v2704_v30 }
 0x4d0   : > { %2801 = vmatpush1.bf16.msra.mxu0 %v2738_v18 }
 0x4d1   : > { %v2710_v63 = vpop.permute.xlu0 %2709 }
 0x4d2   : > { %v1292_v42 = vpop.permute.xlu1 %1291 }
 0x4d3   : > { %v1321_v16 = vsel %vm655_vm4, %v1290_v14, %v1292_v42 }
 0x4d4   : > { %1382 = vmatprep.subr.bf16.mxu1 %v1321_v16 }
 0x4d5   : > { %v1288_v60 = vpop.permute.xlu0 %1287 }
 0x4d6   : > { %v1320_v23 = vsel %vm655_vm4, %v1288_v60, %v1290_v14  ;;  %v2712_v52 = vpop.permute.xlu1 %2711 }
 0x4d7   : > { %1383 = vmatpush1.bf16.msra.mxu1 %v1320_v23  ;;  %v2741_v29 = vsel %vm2713_vm11, %v2710_v63, %v2712_v52 }
 0x4d8   : > { %2802 = vmatprep.subr.bf16.mxu0 %v2741_v29 }
 0x4da   : > { %v2708_v48 = vpop.permute.xlu1 %2707  ;;  %1389 = vmatmul.mubr.bf16.vlgmr.msra.gmra.mrb[0].mxu1 %v3590_v6 }
 0x4db   : > { %v2740_v57 = vsel %vm2713_vm11, %v2708_v48, %v2710_v63  ;;  %3367 = vmatprep.mubr.msk.bf16.mxu1 %vm655_vm4, %v3596_v17  ;;  %v3602_v48 = vld [vmem:[%s5775_s4] sm:$0xff]  }
 0x4dc   : > { %2803 = vmatpush1.bf16.msra.mxu0 %v2740_v57  ;;  %v3603_v57 = vld [vmem:[%s5775_s4 + $0x8] sm:$0xff]  }
 0x4df   : > { %2809 = vmatmul.mubr.bf16.vlgmr.msra.gmra.mrb[0].mxu0 %v3593_v22  ;;  %v3604_v22 = vld [vmem:[%s5775_s4 + $0x10] sm:$0xff]  }
 0x4e0   : > { %3407 = vmatprep.mubr.msk.bf16.mxu0 %vm655_vm4, %v3599_v56  ;;  %v3605_v56 = vld [vmem:[%s5775_s4 + $0x18] sm:$0xff]  }
 0x4e2   : > { %1399 = vmatmul.mubr.bf16.gmra.mrb[4].mxu1 %v3598_v0 }
 0x4e3   : > { %3044 = vmatprep.mubr.bf16.mxu1 %v3690_v40 }
 0x4e6   : > { %v2868_v43 = vpop.permute.xlu0 %2867 }
 0x4e7   : > { %2819 = vmatmul.mubr.bf16.gmra.mrb[4].mxu0 %v3601_v3 }
 0x4ea   : > { %v2883_v5 = vpop.permute.xlu0 %2882 }
 0x4eb   : > { %v2873_v7 = vpop.permute.xlu1 %2872 }
 0x4ef   : > { %v2878_v24 = vpop.permute.xlu1 %2877 }
 0x4f3   : > { %v2942_v0 = vpop.permute.xlu1 %2941 }
 0x5ad   : > { %v1390_v8 = vpop.f32.mrb[0].mxu1 }
 0x5ae   : > { %v1392_v2 = vpop.f32.mrb[1].mxu1 }
 0x5af   : > { %v1394_v41 = vpop.f32.mrb[2].mxu1 }
 0x5b0   : > { %v1396_v32 = vpop.f32.mrb[3].mxu1 }
 0x5b2   : > { %v2810_v1 = vpop.f32.mrb[0].mxu0 }
 0x5b3   : > { %v3438_v39 = vadd.f32 %v2810_v1, %v1390_v8  ;;  %v2812_v21 = vpop.f32.mrb[1].mxu0  ;;  %v5725_v8 = vstv %s3416_s15 }
 0x5b4   : > { %v3439_v47 = vadd.f32 %v2812_v21, %v1392_v2  ;;  %v2814_v4 = vpop.f32.mrb[2].mxu0 }
 0x5b5   : > { %v2885_v33 = vadd.f32 %v3438_v39, %v2868_v43  ;;  %v3440_v36 = vadd.f32 %v2814_v4, %v1394_v41  ;;  %v1400_v46 = vpop.f32.mrb[4].mxu1  ;;  %v2816_v50 = vpop.f32.mrb[3].mxu0 }
 0x5b6   : > { %v2886_v15 = vadd.f32 %v3439_v47, %v2868_v43  ;;  %v3441_v49 = vadd.f32 %v2816_v50, %v1396_v32  ;;  %v1402_v37 = vpop.f32.mrb[5].mxu1  ;;  %v2947_v32 = vpop.permute.xlu0 %2946 }
 0x5b7   : > { %v2903_v38 = vmul.f32 %v2902_v11, %v2885_v33  ;;  %v2887_v44 = vadd.f32 %v3440_v36, %v2873_v7  ;;  %v1404_v54 = vpop.f32.mrb[6].mxu1  ;;  %vm2893_vm12 = vcmp.gt.f32.partialorder %v2885_v33, 0.0 }
 0x5b8   : > { %v2904_v45 = vmul.f32 %v2902_v11, %v2886_v15  ;;  %v2888_v31 = vadd.f32 %v3441_v49, %v2873_v7  ;;  %v1406_v55 = vpop.f32.mrb[7].mxu1  ;;  %vm2894_vm13 = vcmp.gt.f32.partialorder %v2886_v15, 0.0 }
 0x5b9   : > { %vm2895_vm14 = vcmp.gt.f32.partialorder %v2887_v44, 0.0  ;;  %v2905_v10 = vmul.f32 %v2902_v11, %v2887_v44  ;;  %v2911_v34 = vsel %vm2893_vm12, %v2885_v33, %v2903_v38 }
 0x5ba   : > { %vm2896_vm15 = vcmp.gt.f32.partialorder %v2888_v31, 0.0  ;;  %v2906_v51 = vmul.f32 %v2902_v11, %v2888_v31  ;;  %v2820_v58 = vpop.f32.mrb[4].mxu0  ;;  %v2912_v13 = vsel %vm2894_vm13, %v2886_v15, %v2904_v45  ;;  %v2952_v15 = vpop.permute.xlu1 %2951 }
 0x5bb   : > { %v2913_v35 = vsel %vm2895_vm14, %v2887_v44, %v2905_v10  ;;  %v3442_v9 = vadd.f32 %v2820_v58, %v1400_v46  ;;  %v2822_v62 = vpop.f32.mrb[5].mxu0  ;;  %v2957_v45 = vpop.permute.xlu0 %2956 }
 0x5bc   : > { %v3443_v26 = vadd.f32 %v2822_v62, %v1402_v37  ;;  %v2824_v27 = vpop.f32.mrb[6].mxu0  ;;  %v2914_v59 = vsel %vm2896_vm15, %v2888_v31, %v2906_v51  ;;  %v2927_v28 = vpack.c.bf16 %v2913_v35, %v2911_v34 }
 0x5bd   : > { %v2889_v30 = vadd.f32 %v3442_v9, %v2878_v24  ;;  %v3444_v12 = vadd.f32 %v2824_v27, %v1404_v54  ;;  %v2826_v19 = vpop.f32.mrb[7].mxu0  ;;  %v2928_v25 = vpack.c.bf16 %v2914_v59, %v2912_v13 }
 0x5be   : > { %v2890_v20 = vadd.f32 %v3443_v26, %v2878_v24  ;;  %v3445_v53 = vadd.f32 %v2826_v19, %v1406_v55  ;;  %v2962_v59 = vpop.permute.xlu1 %2961 }
 0x5bf   : > { %v2907_v14 = vmul.f32 %v2902_v11, %v2889_v30  ;;  %v2891_v61 = vadd.f32 %v3444_v12, %v2883_v5  ;;  %3012 = vmatprep.subr.bf16.mxu1 %v2928_v25  ;;  %vm2897_vm0 = vcmp.gt.f32.partialorder %v2889_v30, 0.0 }
 0x5c0   : > { %v2908_v18 = vmul.f32 %v2902_v11, %v2890_v20  ;;  %v2892_v63 = vadd.f32 %v3445_v53, %v2883_v5  ;;  %3013 = vmatpush1.bf16.msra.mxu1 %v2927_v28  ;;  %vm2898_vm1 = vcmp.gt.f32.partialorder %v2890_v20, 0.0  ;;  %v2967_v5 = vpop.permute.xlu0 %2966 }
 0x5c1   : > { %vm2899_vm2 = vcmp.gt.f32.partialorder %v2891_v61, 0.0  ;;  %v2909_v42 = vmul.f32 %v2902_v11, %v2891_v61  ;;  %v2915_v60 = vsel %vm2897_vm0, %v2889_v30, %v2907_v14 }
 0x5c2   : > { %vm2900_vm3 = vcmp.gt.f32.partialorder %v2892_v63, 0.0  ;;  %v2910_v16 = vmul.f32 %v2902_v11, %v2892_v63  ;;  %v2916_v52 = vsel %vm2898_vm1, %v2890_v20, %v2908_v18 }
 0x5c3   : > { %v2917_v23 = vsel %vm2899_vm2, %v2891_v61, %v2909_v42 }
 0x5c4   : > { %v2918_v6 = vsel %vm2900_vm3, %v2892_v63, %v2910_v16  ;;  %v2929_v29 = vpack.c.bf16 %v2917_v23, %v2915_v60 }
 0x5c5   : > { %v2930_v17 = vpack.c.bf16 %v2918_v6, %v2916_v52 }
 0x5c7   : > { %3014 = vmatprep.subr.bf16.mxu1 %v2930_v17  ;;  %v2972_v17 = vpop.permute.xlu1 %2971 }
 0x5c8   : > { %3015 = vmatpush1.bf16.msra.mxu1 %v2929_v29 }
 0x5cb   : > { %3412 = vmatmul.mubr.msk.bf16.vlgmr.msra.gmra.mrb[8].mxu1 %vm2713_vm11, %v3602_v48 }
 0x5cc   : > { %3054 = vmatprep.mubr.bf16.mxu1 %v3690_v40 }
 0x5d3   : > { %3413 = vmatmul.mubr.msk.bf16.gmra.mrb[12].mxu1 %vm2713_vm11, %v3603_v57 }
 0x5d4   : > { %3064 = vmatprep.mubr.bf16.mxu1 %v3690_v40 }
 0x5db   : > { %3414 = vmatmul.mubr.msk.bf16.gmra.mrb[16].mxu1 %vm2713_vm11, %v3604_v22 }
 0x5dc   : > { %3074 = vmatprep.mubr.bf16.mxu1 %v3690_v40 }
 0x5e3   : > { %3415 = vmatmul.mubr.msk.bf16.gmra.mrb[20].mxu1 %vm2713_vm11, %v3605_v56 }
 0x69e   : > { %v3046_v3 = vpop.f32.mrb[8].mxu1 }
 0x69f   : > { %v3047_v2 = vadd.f32 %v3046_v3, %v2942_v0  ;;  %v3048_v41 = vpop.f32.mrb[9].mxu1  ;;  %v2977_v3 = vpop.permute.xlu0 %2976 }
 0x6a0   : > { %v3049_v1 = vadd.f32 %v3048_v41, %v2942_v0  ;;  %v3050_v39 = vpop.f32.mrb[10].mxu1 }
 0x6a1   : > { %vm3085_vm4 = vcmp.gt.f32.partialorder %v3047_v2, 0.0  ;;  %v3103_v40 = vmul.f32 %v5725_v8, %v3047_v2  ;;  %v3051_v21 = vadd.f32 %v3050_v39, %v2947_v32  ;;  %v3052_v43 = vpop.f32.mrb[11].mxu1 }
 0x6a2   : > { %vm3086_vm5 = vcmp.gt.f32.partialorder %v3049_v1, 0.0  ;;  %v3104_v11 = vmul.f32 %v5725_v8, %v3049_v1  ;;  %v3053_v47 = vadd.f32 %v3052_v43, %v2947_v32 }
 0x6a3   : > { %v3119_v4 = vsel %vm3085_vm4, %v3047_v2, %v3103_v40  ;;  %vm3087_vm6 = vcmp.gt.f32.partialorder %v3051_v21, 0.0  ;;  %v3105_v33 = vmul.f32 %v5725_v8, %v3051_v21 }
 0x6a4   : > { %v3120_v36 = vsel %vm3086_vm5, %v3049_v1, %v3104_v11  ;;  %vm3088_vm7 = vcmp.gt.f32.partialorder %v3053_v47, 0.0  ;;  %v3106_v46 = vmul.f32 %v5725_v8, %v3053_v47 }
 0x6a5   : > { %v3430_v50 = vpack.c.bf16 %v3120_v36, %v3119_v4  ;;  %v3121_v7 = vsel %vm3087_vm6, %v3051_v21, %v3105_v33 }
 0x6a6   : > { %v3122_v49 = vsel %vm3088_vm7, %v3053_v47, %v3106_v46  ;;  %v3056_v37 = vpop.f32.mrb[12].mxu1 }
 0x6a7   : > { %3183 = vst [vmem:[%s5733_s19] sm:$0xff] %v3430_v50  ;;  %v3431_v38 = vpack.c.bf16 %v3122_v49, %v3121_v7  ;;  %v3057_v44 = vadd.f32 %v3056_v37, %v2952_v15  ;;  %v3058_v54 = vpop.f32.mrb[13].mxu1 }
 0x6a8   : > { %v3059_v31 = vadd.f32 %v3058_v54, %v2952_v15  ;;  %v3060_v55 = vpop.f32.mrb[14].mxu1 }
 0x6a9   : > { %3184 = vst [vmem:[%s5733_s19 + $0x8] sm:$0xff] %v3431_v38  ;;  %vm3089_vm8 = vcmp.gt.f32.partialorder %v3057_v44, 0.0  ;;  %v3107_v10 = vmul.f32 %v5725_v8, %v3057_v44  ;;  %v3061_v51 = vadd.f32 %v3060_v55, %v2957_v45  ;;  %v3062_v58 = vpop.f32.mrb[15].mxu1 }
 0x6aa   : > { %vm3090_vm9 = vcmp.gt.f32.partialorder %v3059_v31, 0.0  ;;  %v3108_v34 = vmul.f32 %v5725_v8, %v3059_v31  ;;  %v3063_v35 = vadd.f32 %v3062_v58, %v2957_v45 }
 0x6ab   : > { %v3123_v9 = vsel %vm3089_vm8, %v3057_v44, %v3107_v10  ;;  %vm3091_vm10 = vcmp.gt.f32.partialorder %v3061_v51, 0.0  ;;  %v3109_v62 = vmul.f32 %v5725_v8, %v3061_v51 }
 0x6ac   : > { %v3124_v24 = vsel %vm3090_vm9, %v3059_v31, %v3108_v34  ;;  %vm3092_vm11 = vcmp.gt.f32.partialorder %v3063_v35, 0.0  ;;  %v3110_v26 = vmul.f32 %v5725_v8, %v3063_v35 }
 0x6ad   : > { %v3432_v27 = vpack.c.bf16 %v3124_v24, %v3123_v9  ;;  %v3125_v13 = vsel %vm3091_vm10, %v3061_v51, %v3109_v62 }
 0x6ae   : > { %v3126_v28 = vsel %vm3092_vm11, %v3063_v35, %v3110_v26  ;;  %v3066_v30 = vpop.f32.mrb[16].mxu1 }
 0x6af   : > { %3185 = vst [vmem:[%s5733_s19 + $0x10] sm:$0xff] %v3432_v27  ;;  %v3433_v12 = vpack.c.bf16 %v3126_v28, %v3125_v13  ;;  %v3067_v19 = vadd.f32 %v3066_v30, %v2962_v59  ;;  %v3068_v25 = vpop.f32.mrb[17].mxu1 }
 0x6b0   : > { %v3069_v20 = vadd.f32 %v3068_v25, %v2962_v59  ;;  %v3070_v53 = vpop.f32.mrb[18].mxu1 }
 0x6b1   : > { %3186 = vst [vmem:[%s5733_s19 + $0x18] sm:$0xff] %v3433_v12  ;;  %vm3093_vm12 = vcmp.gt.f32.partialorder %v3067_v19, 0.0  ;;  %v3111_v14 = vmul.f32 %v5725_v8, %v3067_v19  ;;  %v3071_v61 = vadd.f32 %v3070_v53, %v2967_v5  ;;  %v3072_v18 = vpop.f32.mrb[19].mxu1 }
 0x6b2   : > { %vm3094_vm13 = vcmp.gt.f32.partialorder %v3069_v20, 0.0  ;;  %v3112_v63 = vmul.f32 %v5725_v8, %v3069_v20  ;;  %v3073_v42 = vadd.f32 %v3072_v18, %v2967_v5 }
 0x6b3   : > { %v3127_v16 = vsel %vm3093_vm12, %v3067_v19, %v3111_v14  ;;  %vm3095_vm14 = vcmp.gt.f32.partialorder %v3071_v61, 0.0  ;;  %v3113_v60 = vmul.f32 %v5725_v8, %v3071_v61 }
 0x6b4   : > { %v3128_v23 = vsel %vm3094_vm13, %v3069_v20, %v3112_v63  ;;  %vm3096_vm15 = vcmp.gt.f32.partialorder %v3073_v42, 0.0  ;;  %v3114_v52 = vmul.f32 %v5725_v8, %v3073_v42 }
 0x6b5   : > { %v3434_v6 = vpack.c.bf16 %v3128_v23, %v3127_v16  ;;  %v3129_v29 = vsel %vm3095_vm14, %v3071_v61, %v3113_v60 }
 0x6b6   : > { %v3130_v48 = vsel %vm3096_vm15, %v3073_v42, %v3114_v52  ;;  %v3076_v57 = vpop.f32.mrb[20].mxu1 }
 0x6b7   : > { %3187 = vst [vmem:[%s5733_s19 + $0x20] sm:$0xff] %v3434_v6  ;;  %v3435_v22 = vpack.c.bf16 %v3130_v48, %v3129_v29  ;;  %v3077_v56 = vadd.f32 %v3076_v57, %v2972_v17  ;;  %v3078_v0 = vpop.f32.mrb[21].mxu1 }
 0x6b8   : > { %v3079_v2 = vadd.f32 %v3078_v0, %v2972_v17  ;;  %v3080_v41 = vpop.f32.mrb[22].mxu1 }
 0x6b9   : > { %3188 = vst [vmem:[%s5733_s19 + $0x28] sm:$0xff] %v3435_v22  ;;  %vm3097_vm0 = vcmp.gt.f32.partialorder %v3077_v56, 0.0  ;;  %v3115_v32 = vmul.f32 %v5725_v8, %v3077_v56  ;;  %v3081_v1 = vadd.f32 %v3080_v41, %v2977_v3  ;;  %v3082_v39 = vpop.f32.mrb[23].mxu1 }
 0x6ba   : > { %vm3098_vm1 = vcmp.gt.f32.partialorder %v3079_v2, 0.0  ;;  %v3116_v40 = vmul.f32 %v5725_v8, %v3079_v2  ;;  %v3083_v21 = vadd.f32 %v3082_v39, %v2977_v3 }
 0x6bb   : > { %v3131_v43 = vsel %vm3097_vm0, %v3077_v56, %v3115_v32  ;;  %vm3099_vm2 = vcmp.gt.f32.partialorder %v3081_v1, 0.0  ;;  %v3117_v11 = vmul.f32 %v5725_v8, %v3081_v1 }
 0x6bc   : > { %v3132_v47 = vsel %vm3098_vm1, %v3079_v2, %v3116_v40  ;;  %vm3100_vm3 = vcmp.gt.f32.partialorder %v3083_v21, 0.0  ;;  %v3118_v4 = vmul.f32 %v5725_v8, %v3083_v21 }
 0x6bd   : > { %v3436_v33 = vpack.c.bf16 %v3132_v47, %v3131_v43  ;;  %v3133_v36 = vsel %vm3099_vm2, %v3081_v1, %v3117_v11 }
 0x6be   : > { %v3134_v46 = vsel %vm3100_vm3, %v3083_v21, %v3118_v4 }
 0x6bf   : > { %3189 = vst [vmem:[%s5733_s19 + $0x30] sm:$0xff] %v3436_v33  ;;  %v3437_v50 = vpack.c.bf16 %v3134_v46, %v3133_v36 }
 0x6c1   : > { %3190 = vst [vmem:[%s5733_s19 + $0x38] sm:$0xff] %v3437_v50 }
 0x6c2 PF: > { %s18_s28 = sadd.s32 1, %s3675_s28   ;;  %s5782_s24 = smov %s3663_s25 }
 0x6c3   : > { %p15_p7 = scmp.ge.s32.totalorder %s18_s28, 4   ;;  %s5783_s25 = smov %s3781_s13 }
 0x6c4   : > { %s5784_s26 = smov %s3671_s27  ;;  %s5785_s27 = smov %s5787_s30 }
 0x6c5   :  { %17 = sbr.rel (!%p15_p7) target bundleno = 3 (0x3), region = 178 }
 0x6cc   :  { %3221 = vsyncpa [#allocation7], 1 }
 0x6cd   :  { %3223 = vsyncpa [#allocation7 + $0x1], 1 }

// kernel: fast_arcnn_forward.5
= control target key start
LH: loop header
LB: loop body
LE: loop exit
PB: predicated region body
PF: predicated region fallthrough
CT: control target
= control target key end

     0   :  { %s2978_s15 = smov 0   ;;  %s2980_s16 = smov 0   ;;  %s4629_s0 = inlined_call_operand.vmem [shape: bf16[2,64,512], index: 0, kind: input, shape index: {}, may-alias: {0,1}]   ;;  %s4630_s1 = inlined_call_operand.vmem [shape: bf16[2,64,512], index: 1, kind: input, shape index: {}, may-alias: {0,1}]   ;;  %s4631_s2 = inlined_call_operand.vmem [shape: bf16[5,8,320], index: 2, kind: input, shape index: {}]   ;;  %s4632_s3 = inlined_call_operand.vmem [shape: f32[8,1], index: 3, kind: input, shape index: {}]   ;;  %s4633_s4 = inlined_call_operand.vmem [shape: bf16[2,8,256], index: 4, kind: output, shape index: {}]  }
   0x1   :  { %s2982_s17 = smov 0   ;;  %s2984_s18 = smov 0  }
   0x2   :  { %s2986_s19 = smov 0  }
   0x3 LB: > { %s26_s20 = sadd.s32 1, %s2938_s18  ;;  %p42_p1 = scmp.ne.s32.totalorder %s2930_s16, %s2926_s15  ;;  %s2942_s19 = sphi %s2986_s19, %s14_s19   ;;  %s2938_s18 = sphi %s2984_s18, %s4647_s18   ;;  %s2934_s17 = sphi %s2982_s17, %s4646_s17   ;;  %s2930_s16 = sphi %s2980_s16, %s4645_s16   ;;  %s2926_s15 = sphi %s2978_s15, %s4644_s15  }
   0x4   : > { %p28_p0 = scmp.ge.s32.totalorder %s26_s20, 2  ;;  %p43_p2 = scmp.eq.s32.totalorder %s2942_s19, 0 }
   0x5   : > { %s35_s23 = sadd.s32 1, %s2930_s16  ;;  %p2732_p5 = scmp.ge.s32.totalorder %s2942_s19, 2 }
   0x6   : > { %s4649_s20 = smov (%p28_p0, %s26_s20), 0  ;;  %p3009_p3 = por %p43_p2, %p42_p1 }
   0x7   : > { %s30_s22 = ssub.s32 %s2938_s18, %s4649_s20  ;;  %174 = sbr.rel (%p2732_p5) target bundleno = 30 (0x1e), region = 24 }
   0x8   : > { %p33_p4 = scmp.eq.s32.totalorder %s30_s22, 0 }
   0xa   : > { %s3017_s24 = scalar_select %p33_p4, %s2930_s16, %s35_s23  }
   0xe   : > { %177 = sbr.rel (!%p3009_p3) target bundleno = 22 (0x16), region = 28  ;;  %s179_s25 = sand.u32 (%p3009_p3), 1, %s2930_s16  }
   0xf   : > { %s2795_s26 = sshll.u32 (%p3009_p3), %s2938_s18, 7  ;;  %s2733_s27 = sshll.u32 (%p3009_p3), %s179_s25, 6 }
  0x10   : > { %s186_s30 = scalar_lea.vmem (%p3009_p3), %s4629_s0, %s2795_s26  ;;  %s181_s5 = scalar_lea.vmem (%p3009_p3), [#allocation4], %s2733_s27 }
  0x11   : > { %v228_v0 = vld [vmem:[%s186_s30] sm:$0xff] (%p3009_p3)  ;;  %v230_v1 = vld [vmem:[%s186_s30 + $0x10] sm:$0xff] (%p3009_p3) }
  0x12   : > { %v232_v2 = vld [vmem:[%s186_s30 + $0x20] sm:$0xff] (%p3009_p3)  ;;  %229 = vst [vmem:[%s181_s5] sm:$0xff] (%p3009_p3), %v228_v0  ;;  %231 = vst [vmem:[%s181_s5 + $0x8] sm:$0xff] (%p3009_p3), %v230_v1  ;;  %v234_v3 = vld [vmem:[%s186_s30 + $0x30] sm:$0xff] (%p3009_p3) }
  0x13   : > { %233 = vst [vmem:[%s181_s5 + $0x10] sm:$0xff] (%p3009_p3), %v232_v2  ;;  %v236_v4 = vld [vmem:[%s186_s30 + $0x40] sm:$0xff] (%p3009_p3)  ;;  %v238_v5 = vld [vmem:[%s186_s30 + $0x50] sm:$0xff] (%p3009_p3)  ;;  %235 = vst [vmem:[%s181_s5 + $0x18] sm:$0xff] (%p3009_p3), %v234_v3 }
  0x14   : > { %237 = vst [vmem:[%s181_s5 + $0x20] sm:$0xff] (%p3009_p3), %v236_v4  ;;  %239 = vst [vmem:[%s181_s5 + $0x28] sm:$0xff] (%p3009_p3), %v238_v5  ;;  %v240_v6 = vld [vmem:[%s186_s30 + $0x60] sm:$0xff] (%p3009_p3)  ;;  %v242_v7 = vld [vmem:[%s186_s30 + $0x70] sm:$0xff] (%p3009_p3) }
  0x15   : > { %241 = vst [vmem:[%s181_s5 + $0x30] sm:$0xff] %v240_v6  ;;  %243 = vst [vmem:[%s181_s5 + $0x38] sm:$0xff] %v242_v7 }
  0x16 PF: > { %249 = sbr.rel (!%p3009_p3) target bundleno = 30 (0x1e), region = 66  ;;  %s251_s6 = sand.u32 (%p3009_p3), 1, %s2930_s16  }
  0x17   : > { %s2796_s7 = sshll.u32 (%p3009_p3), %s2938_s18, 7  ;;  %s2736_s8 = sshll.u32 (%p3009_p3), %s251_s6, 6 }
  0x18   : > { %s2660_s11 = scalar_lea.vmem (%p3009_p3), %s4630_s1, %s2796_s7  ;;  %s253_s12 = scalar_lea.vmem (%p3009_p3), [#allocation5], %s2736_s8 }
  0x19   : > { %v2739_v8 = vld [vmem:[%s2660_s11 + $0x8] sm:$0xff] (%p3009_p3)  ;;  %v2740_v9 = vld [vmem:[%s2660_s11 + $0x18] sm:$0xff] (%p3009_p3) }
  0x1a   : > { %v2741_v10 = vld [vmem:[%s2660_s11 + $0x28] sm:$0xff] (%p3009_p3)  ;;  %302 = vst [vmem:[%s253_s12] sm:$0xff] (%p3009_p3), %v2739_v8  ;;  %304 = vst [vmem:[%s253_s12 + $0x8] sm:$0xff] (%p3009_p3), %v2740_v9  ;;  %v2742_v11 = vld [vmem:[%s2660_s11 + $0x38] sm:$0xff] (%p3009_p3) }
  0x1b   : > { %306 = vst [vmem:[%s253_s12 + $0x10] sm:$0xff] (%p3009_p3), %v2741_v10  ;;  %v2743_v12 = vld [vmem:[%s2660_s11 + $0x48] sm:$0xff] (%p3009_p3)  ;;  %v2744_v13 = vld [vmem:[%s2660_s11 + $0x58] sm:$0xff] (%p3009_p3)  ;;  %308 = vst [vmem:[%s253_s12 + $0x18] sm:$0xff] (%p3009_p3), %v2742_v11 }
  0x1c   : > { %310 = vst [vmem:[%s253_s12 + $0x20] sm:$0xff] (%p3009_p3), %v2743_v12  ;;  %312 = vst [vmem:[%s253_s12 + $0x28] sm:$0xff] (%p3009_p3), %v2744_v13  ;;  %v2745_v14 = vld [vmem:[%s2660_s11 + $0x68] sm:$0xff] (%p3009_p3)  ;;  %v2746_v15 = vld [vmem:[%s2660_s11 + $0x78] sm:$0xff] (%p3009_p3) }
  0x1d   : > { %314 = vst [vmem:[%s253_s12 + $0x30] sm:$0xff] %v2745_v14  ;;  %316 = vst [vmem:[%s253_s12 + $0x38] sm:$0xff] %v2746_v15 }
  0x1e PF: > { %p2747_p6 = scmp.ge.s32.totalorder %s2942_s19, 1  ;;  %p321_p7 = scmp.lt.s32.totalorder %s2942_s19, 3 }
  0x20   : > { %p322_p8 = pnand %p2747_p6, %p321_p7 }
  0x22   : > { %325 = sbr.rel (%p322_p8) target bundleno = 1343 (0x53f), region = 104 }
  0x29   : > { %s328_s13 = sand.u32 1, %s2926_s15   ;;  %s2944_s23 = smov 127   ;;  %vm530_vm0 = vcmask 1039360   ;;  %vm571_vm1 = vcmask 1031168   ;;  %vm612_vm2 = vcmask 1022976   ;;  %vm653_vm3 = vcmask 1014784  }
  0x2a   : > { %s2748_s14 = sshll.u32 %s328_s13, 6  ;;  %s2945_s15 = smov 126   ;;  %vm682_vm4 = vcmask 523264   ;;  %vm1055_vm5 = vcmask 916480   ;;  %vm1512_vm6 = vcmask 785408   ;;  %vm1969_vm7 = vcmask 654336  }
  0x2b   : > { %s3037_s21 = scalar_lea.vmem [#allocation5], %s2748_s14  ;;  %s3042_s22 = scalar_lea.vmem [#allocation4], %s2748_s14 }
  0x2c   : > { %v3040_v16 = vld [vmem:[%s3037_s21] ss:$8 sps:$4 sm:$0xff]   ;;  %v3050_v18 = vld [vmem:[%s3042_s22 + $0x10] ss:$8 sps:$4 sm:$0xff]   ;;  %v3055_v19 = vld [vmem:[%s3042_s22 + $0x4] ss:$8 sps:$4 sm:$0xff]  }
  0x2d   : > { %v3045_v17 = vld [vmem:[%s3042_s22] ss:$8 sps:$4 sm:$0xff]   ;;  %510 = vrot.lane.b32.xlu1 %v3040_v16, %s2944_s23  ;;  %v3058_v20 = vld [vmem:[%s3042_s22 + $0x14] ss:$8 sps:$4 sm:$0xff]   ;;  %686 = vmatprep.subr.bf16.mxu0 %v3055_v19  ;;  %v3064_v21 = vld [vmem:[%s3037_s21 + $0x10] ss:$8 sps:$4 sm:$0xff]  }
  0x2e   : > { %506 = vrot.lane.b32.xlu0 %v3045_v17, %s2944_s23  ;;  %687 = vmatpush1.bf16.msra.mxu0 %v3045_v17  ;;  %v3071_v22 = vld [vmem:[%s3042_s22 + $0x24] ss:$8 sps:$4 sm:$0xff]   ;;  %v3079_v23 = vld [vmem:[%s3042_s22 + $0x20] ss:$8 sps:$4 sm:$0xff]   ;;  %v3083_v24 = vld [vmem:[%s3042_s22 + $0x34] ss:$8 sps:$4 sm:$0xff]  }
  0x2f   : > { %688 = vmatprep.subr.bf16.mxu0 %v3058_v20  ;;  %v3088_v25 = vld [vmem:[%s3042_s22 + $0x30] ss:$8 sps:$4 sm:$0xff]   ;;  %v3094_v26 = vld [vmem:[%s3037_s21 + $0x20] ss:$8 sps:$4 sm:$0xff]   ;;  %s2946_s25 = smov 125   ;;  %s2947_s26 = smov 124  }
  0x30   : > { %v3100_v27 = vld [vmem:[%s3037_s21 + $0x30] ss:$8 sps:$4 sm:$0xff]   ;;  %s2949_s27 = smov 112   ;;  %s2950_s8 = smov 96  }
  0x31   : > { %512 = vrot.lane.b32.xlu1 %v3050_v18, %s2944_s23  ;;  %p372_p9 = scmp.lt.s32.totalorder %s2934_s17, 1 }
  0x32   : > { %508 = vrot.lane.b32.xlu0 %v3055_v19, %s2944_s23  ;;  %689 = vmatpush1.bf16.msra.mxu0 %v3050_v18 }
  0x33   : > { %690 = vmatprep.subr.bf16.mxu0 %v3071_v22  ;;  %s4651_s17 = smov (!%p372_p9, %s2934_s17), 1 }
  0x34   : > { %s2797_s7 = sshll.u32 %s4651_s17, 3 }
  0x35   : > { %516 = vrot.lane.b32.xlu1 %v3064_v21, %s2944_s23  ;;  %s379_s10 = scalar_lea.vmem %s4633_s4, %s2797_s7 }
  0x36   : > { %514 = vrot.lane.b32.xlu0 %v3058_v20, %s2944_s23  ;;  %691 = vmatpush1.bf16.msra.mxu0 %v3079_v23 }
  0x37   : > { %692 = vmatprep.subr.bf16.mxu0 %v3083_v24 }
  0x39   : > { %520 = vrot.lane.b32.xlu1 %v3071_v22, %s2944_s23 }
  0x3a   : > { %518 = vrot.lane.b32.xlu0 %v3079_v23, %s2944_s23  ;;  %693 = vmatpush1.bf16.msra.mxu0 %v3088_v25 }
  0x3d   : > { %524 = vrot.lane.b32.xlu1 %v3088_v25, %s2944_s23 }
  0x3e   : > { %522 = vrot.lane.b32.xlu0 %v3094_v26, %s2944_s23 }
  0x41   : > { %528 = vrot.lane.b32.xlu1 %v3100_v27, %s2944_s23 }
  0x42   : > { %526 = vrot.lane.b32.xlu0 %v3083_v24, %s2944_s23 }
  0x45   : > { %549 = vrot.lane.b32.xlu1 %v3055_v19, %s2945_s15 }
  0x46   : > { %547 = vrot.lane.b32.xlu0 %v3045_v17, %s2945_s15 }
  0x49   : > { %553 = vrot.lane.b32.xlu1 %v3050_v18, %s2945_s15 }
  0x4a   : > { %551 = vrot.lane.b32.xlu0 %v3040_v16, %s2945_s15 }
  0x4d   : > { %557 = vrot.lane.b32.xlu1 %v3064_v21, %s2945_s15 }
  0x4e   : > { %555 = vrot.lane.b32.xlu0 %v3058_v20, %s2945_s15 }
  0x51   : > { %561 = vrot.lane.b32.xlu1 %v3071_v22, %s2945_s15 }
  0x52   : > { %559 = vrot.lane.b32.xlu0 %v3079_v23, %s2945_s15 }
  0x55   : > { %565 = vrot.lane.b32.xlu1 %v3088_v25, %s2945_s15 }
  0x56   : > { %563 = vrot.lane.b32.xlu0 %v3094_v26, %s2945_s15 }
  0x59   : > { %569 = vrot.lane.b32.xlu1 %v3100_v27, %s2945_s15 }
  0x5a   : > { %567 = vrot.lane.b32.xlu0 %v3083_v24, %s2945_s15 }
  0x5d   : > { %590 = vrot.lane.b32.xlu1 %v3055_v19, %s2946_s25 }
  0x5e   : > { %588 = vrot.lane.b32.xlu0 %v3045_v17, %s2946_s25 }
  0x61   : > { %594 = vrot.lane.b32.xlu1 %v3050_v18, %s2946_s25 }
  0x62   : > { %592 = vrot.lane.b32.xlu0 %v3040_v16, %s2946_s25 }
  0x65   : > { %598 = vrot.lane.b32.xlu1 %v3064_v21, %s2946_s25 }
  0x66   : > { %596 = vrot.lane.b32.xlu0 %v3058_v20, %s2946_s25 }
  0x69   : > { %602 = vrot.lane.b32.xlu1 %v3071_v22, %s2946_s25 }
  0x6a   : > { %600 = vrot.lane.b32.xlu0 %v3079_v23, %s2946_s25 }
  0x6d   : > { %606 = vrot.lane.b32.xlu1 %v3088_v25, %s2946_s25 }
  0x6e   : > { %604 = vrot.lane.b32.xlu0 %v3094_v26, %s2946_s25 }
  0x71   : > { %610 = vrot.lane.b32.xlu1 %v3100_v27, %s2946_s25 }
  0x72   : > { %608 = vrot.lane.b32.xlu0 %v3083_v24, %s2946_s25 }
  0x75   : > { %631 = vrot.lane.b32.xlu1 %v3055_v19, %s2947_s26 }
  0x76   : > { %629 = vrot.lane.b32.xlu0 %v3045_v17, %s2947_s26 }
  0x79   : > { %635 = vrot.lane.b32.xlu1 %v3050_v18, %s2947_s26 }
  0x7a   : > { %633 = vrot.lane.b32.xlu0 %v3040_v16, %s2947_s26 }
  0x7d   : > { %639 = vrot.lane.b32.xlu1 %v3064_v21, %s2947_s26 }
  0x7e   : > { %637 = vrot.lane.b32.xlu0 %v3058_v20, %s2947_s26 }
  0x81   : > { %643 = vrot.lane.b32.xlu1 %v3071_v22, %s2947_s26 }
  0x82   : > { %641 = vrot.lane.b32.xlu0 %v3079_v23, %s2947_s26 }
  0x85   : > { %647 = vrot.lane.b32.xlu1 %v3088_v25, %s2947_s26 }
  0x86   : > { %645 = vrot.lane.b32.xlu0 %v3094_v26, %s2947_s26 }
  0x89   : > { %651 = vrot.lane.b32.xlu1 %v3100_v27, %s2947_s26 }
  0x8a   : > { %649 = vrot.lane.b32.xlu0 %v3083_v24, %s2947_s26 }
  0x8d   : > { %796 = vrot.lane.b32.xlu1 %v3055_v19, %s2944_s23 }
  0x8e   : > { %794 = vrot.lane.b32.xlu0 %v3045_v17, %s2944_s23 }
  0x91   : > { %800 = vrot.lane.b32.xlu1 %v3050_v18, %s2944_s23 }
  0x92   : > { %798 = vrot.lane.b32.xlu0 %v3040_v16, %s2944_s23 }
  0x95   : > { %804 = vrot.lane.b32.xlu1 %v3064_v21, %s2944_s23 }
  0x96   : > { %802 = vrot.lane.b32.xlu0 %v3058_v20, %s2944_s23 }
  0x99   : > { %808 = vrot.lane.b32.xlu1 %v3071_v22, %s2944_s23 }
  0x9a   : > { %806 = vrot.lane.b32.xlu0 %v3079_v23, %s2944_s23 }
  0x9d   : > { %812 = vrot.lane.b32.xlu1 %v3088_v25, %s2944_s23 }
  0x9e   : > { %810 = vrot.lane.b32.xlu0 %v3094_v26, %s2944_s23 }
  0x9f   : > { %v511_v28 = vpop.permute.xlu1 %510 }
  0xa0   : > { %v507_v29 = vpop.permute.xlu0 %506 }
  0xa1   : > { %816 = vrot.lane.b32.xlu1 %v3100_v27, %s2944_s23 }
  0xa2   : > { %814 = vrot.lane.b32.xlu0 %v3083_v24, %s2944_s23 }
  0xa3   : > { %v513_v30 = vpop.permute.xlu1 %512 }
  0xa4   : > { %v509_v31 = vpop.permute.xlu0 %508 }
  0xa5   : > { %828 = vrot.lane.b32.xlu1 %v3055_v19, %s2945_s15  ;;  %v532_v32 = vsel %vm530_vm0, %v509_v31, %v511_v28  ;;  %v531_v33 = vsel %vm530_vm0, %v507_v29, %v509_v31 }
  0xa6   : > { %826 = vrot.lane.b32.xlu0 %v3045_v17, %s2945_s15  ;;  %694 = vmatprep.subr.bf16.mxu0 %v532_v32 }
  0xa7   : > { %695 = vmatpush1.bf16.msra.mxu0 %v531_v33  ;;  %v517_v34 = vpop.permute.xlu1 %516 }
  0xa8   : > { %v515_v35 = vpop.permute.xlu0 %514 }
  0xa9   : > { %832 = vrot.lane.b32.xlu1 %v3050_v18, %s2945_s15  ;;  %v534_v36 = vsel %vm530_vm0, %v515_v35, %v517_v34  ;;  %v533_v37 = vsel %vm530_vm0, %v513_v30, %v515_v35 }
  0xaa   : > { %830 = vrot.lane.b32.xlu0 %v3040_v16, %s2945_s15  ;;  %696 = vmatprep.subr.bf16.mxu0 %v534_v36  ;;  %v4634_v36 = vmov 0  }
  0xab   : > { %697 = vmatpush1.bf16.msra.mxu0 %v533_v37  ;;  %v521_v38 = vpop.permute.xlu1 %520  ;;  %759 = vmatprep.mubr.bf16.mxu1 %v4634_v36 }
  0xac   : > { %v519_v39 = vpop.permute.xlu0 %518  ;;  %2848 = vset.pattern.permute.xlu0 %v4634_v36 }
  0xad   : > { %836 = vrot.lane.b32.xlu1 %v3064_v21, %s2945_s15  ;;  %v535_v43 = vsel %vm530_vm0, %v519_v39, %v521_v38 }
  0xae   : > { %834 = vrot.lane.b32.xlu0 %v3058_v20, %s2945_s15 }
  0xaf   : > { %v525_v40 = vpop.permute.xlu1 %524 }
  0xb0   : > { %v523_v41 = vpop.permute.xlu0 %522 }
  0xb1   : > { %840 = vrot.lane.b32.xlu1 %v3071_v22, %s2945_s15  ;;  %v536_v42 = vsel %vm530_vm0, %v521_v38, %v523_v41 }
  0xb2   : > { %838 = vrot.lane.b32.xlu0 %v3079_v23, %s2945_s15  ;;  %698 = vmatprep.subr.bf16.mxu0 %v536_v42 }
  0xb3   : > { %699 = vmatpush1.bf16.msra.mxu0 %v535_v43  ;;  %v529_v44 = vpop.permute.xlu1 %528 }
  0xb4   : > { %v527_v45 = vpop.permute.xlu0 %526 }
  0xb5   : > { %844 = vrot.lane.b32.xlu1 %v3088_v25, %s2945_s15  ;;  %v538_v46 = vsel %vm530_vm0, %v527_v45, %v529_v44  ;;  %v537_v47 = vsel %vm530_vm0, %v525_v40, %v527_v45 }
  0xb6   : > { %842 = vrot.lane.b32.xlu0 %v3094_v26, %s2945_s15  ;;  %700 = vmatprep.subr.bf16.mxu0 %v538_v46 }
  0xb7   : > { %701 = vmatpush1.bf16.msra.mxu0 %v537_v47  ;;  %v550_v48 = vpop.permute.xlu1 %549 }
  0xb8   : > { %v548_v49 = vpop.permute.xlu0 %547 }
  0xb9   : > { %848 = vrot.lane.b32.xlu1 %v3100_v27, %s2945_s15  ;;  %v572_v53 = vsel %vm571_vm1, %v548_v49, %v550_v48 }
  0xba   : > { %846 = vrot.lane.b32.xlu0 %v3083_v24, %s2945_s15 }
  0xbb   : > { %v554_v50 = vpop.permute.xlu1 %553 }
  0xbc   : > { %v552_v51 = vpop.permute.xlu0 %551 }
  0xbd   : > { %860 = vrot.lane.b32.xlu1 %v3055_v19, %s2946_s25  ;;  %v573_v52 = vsel %vm571_vm1, %v550_v48, %v552_v51 }
  0xbe   : > { %858 = vrot.lane.b32.xlu0 %v3045_v17, %s2946_s25  ;;  %702 = vmatprep.subr.bf16.mxu0 %v573_v52 }
  0xbf   : > { %703 = vmatpush1.bf16.msra.mxu0 %v572_v53  ;;  %v558_v54 = vpop.permute.xlu1 %557 }
  0xc0   : > { %v556_v55 = vpop.permute.xlu0 %555 }
  0xc1   : > { %864 = vrot.lane.b32.xlu1 %v3050_v18, %s2946_s25  ;;  %v575_v56 = vsel %vm571_vm1, %v556_v55, %v558_v54  ;;  %v574_v57 = vsel %vm571_vm1, %v554_v50, %v556_v55 }
  0xc2   : > { %862 = vrot.lane.b32.xlu0 %v3040_v16, %s2946_s25  ;;  %704 = vmatprep.subr.bf16.mxu0 %v575_v56 }
  0xc3   : > { %705 = vmatpush1.bf16.msra.mxu0 %v574_v57  ;;  %v562_v58 = vpop.permute.xlu1 %561  ;;  %v2865_v57 = vld [vmem:[%s4631_s2 + $0x8] ss:$0 sps:$4 sm:$0xff]  }
  0xc4   : > { %v560_v59 = vpop.permute.xlu0 %559 }
  0xc5   : > { %868 = vrot.lane.b32.xlu1 %v3064_v21, %s2946_s25  ;;  %v576_v63 = vsel %vm571_vm1, %v560_v59, %v562_v58 }
  0xc6   : > { %866 = vrot.lane.b32.xlu0 %v3058_v20, %s2946_s25 }
  0xc7   : > { %v566_v60 = vpop.permute.xlu1 %565 }
  0xc8   : > { %v564_v61 = vpop.permute.xlu0 %563 }
  0xc9   : > { %872 = vrot.lane.b32.xlu1 %v3071_v22, %s2946_s25  ;;  %v577_v62 = vsel %vm571_vm1, %v562_v58, %v564_v61 }
  0xca   : > { %870 = vrot.lane.b32.xlu0 %v3079_v23, %s2946_s25  ;;  %706 = vmatprep.subr.bf16.mxu0 %v577_v62 }
  0xcb   : > { %707 = vmatpush1.bf16.msra.mxu0 %v576_v63  ;;  %v570_v0 = vpop.permute.xlu1 %569 }
  0xcc   : > { %v568_v1 = vpop.permute.xlu0 %567 }
  0xcd   : > { %876 = vrot.lane.b32.xlu1 %v3088_v25, %s2946_s25  ;;  %v579_v2 = vsel %vm571_vm1, %v568_v1, %v570_v0  ;;  %v578_v3 = vsel %vm571_vm1, %v566_v60, %v568_v1 }
  0xce   : > { %874 = vrot.lane.b32.xlu0 %v3094_v26, %s2946_s25  ;;  %708 = vmatprep.subr.bf16.mxu0 %v579_v2 }
  0xcf   : > { %709 = vmatpush1.bf16.msra.mxu0 %v578_v3  ;;  %v591_v4 = vpop.permute.xlu1 %590 }
  0xd0   : > { %v589_v5 = vpop.permute.xlu0 %588 }
  0xd1   : > { %880 = vrot.lane.b32.xlu1 %v3100_v27, %s2946_s25  ;;  %v613_v9 = vsel %vm612_vm2, %v589_v5, %v591_v4 }
  0xd2   : > { %878 = vrot.lane.b32.xlu0 %v3083_v24, %s2946_s25 }
  0xd3   : > { %v595_v6 = vpop.permute.xlu1 %594 }
  0xd4   : > { %v593_v7 = vpop.permute.xlu0 %592 }
  0xd5   : > { %892 = vrot.lane.b32.xlu1 %v3055_v19, %s2947_s26  ;;  %v614_v8 = vsel %vm612_vm2, %v591_v4, %v593_v7 }
  0xd6   : > { %890 = vrot.lane.b32.xlu0 %v3045_v17, %s2947_s26  ;;  %710 = vmatprep.subr.bf16.mxu0 %v614_v8 }
  0xd7   : > { %711 = vmatpush1.bf16.msra.mxu0 %v613_v9  ;;  %v599_v10 = vpop.permute.xlu1 %598 }
  0xd8   : > { %v597_v11 = vpop.permute.xlu0 %596 }
  0xd9   : > { %896 = vrot.lane.b32.xlu1 %v3050_v18, %s2947_s26  ;;  %v616_v12 = vsel %vm612_vm2, %v597_v11, %v599_v10  ;;  %v615_v13 = vsel %vm612_vm2, %v595_v6, %v597_v11 }
  0xda   : > { %894 = vrot.lane.b32.xlu0 %v3040_v16, %s2947_s26  ;;  %712 = vmatprep.subr.bf16.mxu0 %v616_v12 }
  0xdb   : > { %713 = vmatpush1.bf16.msra.mxu0 %v615_v13  ;;  %v603_v14 = vpop.permute.xlu1 %602 }
  0xdc   : > { %v601_v15 = vpop.permute.xlu0 %600 }
  0xdd   : > { %900 = vrot.lane.b32.xlu1 %v3064_v21, %s2947_s26  ;;  %v617_v31 = vsel %vm612_vm2, %v601_v15, %v603_v14 }
  0xde   : > { %898 = vrot.lane.b32.xlu0 %v3058_v20, %s2947_s26 }
  0xdf   : > { %v607_v28 = vpop.permute.xlu1 %606 }
  0xe0   : > { %v605_v29 = vpop.permute.xlu0 %604 }
  0xe1   : > { %904 = vrot.lane.b32.xlu1 %v3071_v22, %s2947_s26  ;;  %v618_v30 = vsel %vm612_vm2, %v603_v14, %v605_v29 }
  0xe2   : > { %902 = vrot.lane.b32.xlu0 %v3079_v23, %s2947_s26  ;;  %714 = vmatprep.subr.bf16.mxu0 %v618_v30 }
  0xe3   : > { %715 = vmatpush1.bf16.msra.mxu0 %v617_v31  ;;  %v611_v32 = vpop.permute.xlu1 %610 }
  0xe4   : > { %v609_v33 = vpop.permute.xlu0 %608 }
  0xe5   : > { %908 = vrot.lane.b32.xlu1 %v3088_v25, %s2947_s26  ;;  %v620_v34 = vsel %vm612_vm2, %v609_v33, %v611_v32  ;;  %v619_v35 = vsel %vm612_vm2, %v607_v28, %v609_v33 }
  0xe6   : > { %906 = vrot.lane.b32.xlu0 %v3094_v26, %s2947_s26  ;;  %716 = vmatprep.subr.bf16.mxu0 %v620_v34 }
  0xe7   : > { %717 = vmatpush1.bf16.msra.mxu0 %v619_v35  ;;  %v632_v37 = vpop.permute.xlu1 %631 }
  0xe8   : > { %v630_v38 = vpop.permute.xlu0 %629 }
  0xe9   : > { %912 = vrot.lane.b32.xlu1 %v3100_v27, %s2947_s26  ;;  %v654_v42 = vsel %vm653_vm3, %v630_v38, %v632_v37 }
  0xea   : > { %910 = vrot.lane.b32.xlu0 %v3083_v24, %s2947_s26 }
  0xeb   : > { %v636_v39 = vpop.permute.xlu1 %635 }
  0xec   : > { %v634_v40 = vpop.permute.xlu0 %633 }
  0xed   : > { %937 = vrot.lane.b32.xlu1 %v3055_v19, %s2949_s27  ;;  %v655_v41 = vsel %vm653_vm3, %v632_v37, %v634_v40 }
  0xee   : > { %935 = vrot.lane.b32.xlu0 %v3045_v17, %s2949_s27  ;;  %727 = vmatprep.subr.bf16.mxu1 %v655_v41 }
  0xef   : > { %728 = vmatpush1.bf16.msra.mxu1 %v654_v42  ;;  %v640_v43 = vpop.permute.xlu1 %639 }
  0xf0   : > { %v638_v44 = vpop.permute.xlu0 %637 }
  0xf1   : > { %941 = vrot.lane.b32.xlu1 %v3050_v18, %s2949_s27  ;;  %v657_v45 = vsel %vm653_vm3, %v638_v44, %v640_v43  ;;  %v656_v46 = vsel %vm653_vm3, %v636_v39, %v638_v44 }
  0xf2   : > { %939 = vrot.lane.b32.xlu0 %v3040_v16, %s2949_s27  ;;  %729 = vmatprep.subr.bf16.mxu1 %v657_v45 }
  0xf3   : > { %730 = vmatpush1.bf16.msra.mxu1 %v656_v46  ;;  %v644_v47 = vpop.permute.xlu1 %643 }
  0xf4   : > { %v642_v48 = vpop.permute.xlu0 %641 }
  0xf5   : > { %945 = vrot.lane.b32.xlu1 %v3064_v21, %s2949_s27  ;;  %v658_v52 = vsel %vm653_vm3, %v642_v48, %v644_v47 }
  0xf6   : > { %943 = vrot.lane.b32.xlu0 %v3058_v20, %s2949_s27 }
  0xf7   : > { %v648_v49 = vpop.permute.xlu1 %647 }
  0xf8   : > { %v646_v50 = vpop.permute.xlu0 %645 }
  0xf9   : > { %949 = vrot.lane.b32.xlu1 %v3071_v22, %s2949_s27  ;;  %v659_v51 = vsel %vm653_vm3, %v644_v47, %v646_v50 }
  0xfa   : > { %947 = vrot.lane.b32.xlu0 %v3079_v23, %s2949_s27  ;;  %731 = vmatprep.subr.bf16.mxu1 %v659_v51 }
  0xfb   : > { %732 = vmatpush1.bf16.msra.mxu1 %v658_v52  ;;  %v652_v53 = vpop.permute.xlu1 %651 }
  0xfc   : > { %v650_v54 = vpop.permute.xlu0 %649 }
  0xfd   : > { %953 = vrot.lane.b32.xlu1 %v3088_v25, %s2949_s27  ;;  %v661_v55 = vsel %vm653_vm3, %v650_v54, %v652_v53  ;;  %v660_v56 = vsel %vm653_vm3, %v648_v49, %v650_v54 }
  0xfe   : > { %951 = vrot.lane.b32.xlu0 %v3094_v26, %s2949_s27  ;;  %733 = vmatprep.subr.bf16.mxu1 %v661_v55 }
  0xff   : > { %734 = vmatpush1.bf16.msra.mxu1 %v660_v56  ;;  %v797_v58 = vpop.permute.xlu1 %796 }
 0x100   : > { %v795_v59 = vpop.permute.xlu0 %794 }
 0x101   : > { %957 = vrot.lane.b32.xlu1 %v3100_v27, %s2949_s27  ;;  %v818_v62 = vsel %vm530_vm0, %v795_v59, %v797_v58 }
 0x102   : > { %955 = vrot.lane.b32.xlu0 %v3083_v24, %s2949_s27  ;;  %2767 = vmatmul.mubr.msk.bf16.vlgmr.msra.gmra.mrb[0].mxu1 %vm682_vm4, %v2865_v57 }
 0x103   : > { %v801_v60 = vpop.permute.xlu1 %800 }
 0x104   : > { %v799_v61 = vpop.permute.xlu0 %798 }
 0x105   : > { %v819_v63 = vsel %vm530_vm0, %v797_v58, %v799_v61 }
 0x106   : > { %959 = vrot.lane.b32.xlu0 %v818_v62, %s2949_s27  ;;  %961 = vrot.lane.b32.xlu1 %v819_v63, %s2949_s27 }
 0x107   : > { %v805_v0 = vpop.permute.xlu1 %804 }
 0x108   : > { %v803_v1 = vpop.permute.xlu0 %802 }
 0x109   : > { %v820_v2 = vsel %vm530_vm0, %v801_v60, %v803_v1  ;;  %v821_v5 = vsel %vm530_vm0, %v803_v1, %v805_v0  ;;  %v3396_v1 = vld [vmem:[%s4631_s2 + $0xc] sm:$0xff] }
 0x10a   : > { %963 = vrot.lane.b32.xlu0 %v799_v61, %s2949_s27  ;;  %965 = vrot.lane.b32.xlu1 %v820_v2, %s2949_s27 }
 0x10b   : > { %v809_v3 = vpop.permute.xlu1 %808 }
 0x10c   : > { %v807_v4 = vpop.permute.xlu0 %806 }
 0x10d   : > { %v822_v8 = vsel %vm530_vm0, %v807_v4, %v809_v3 }
 0x10e   : > { %967 = vrot.lane.b32.xlu0 %v821_v5, %s2949_s27  ;;  %969 = vrot.lane.b32.xlu1 %v805_v0, %s2949_s27 }
 0x10f   : > { %v813_v6 = vpop.permute.xlu1 %812 }
 0x110   : > { %v811_v7 = vpop.permute.xlu0 %810 }
 0x111   : > { %v823_v9 = vsel %vm530_vm0, %v809_v3, %v811_v7  ;;  %v2771_v3 = vcombine.high %v3396_v1, %v3396_v1 }
 0x112   : > { %971 = vrot.lane.b32.xlu0 %v822_v8, %s2949_s27  ;;  %973 = vrot.lane.b32.xlu1 %v823_v9, %s2949_s27 }
 0x113   : > { %v817_v10 = vpop.permute.xlu1 %816  ;;  %1171 = vmatprep.mubr.bf16.mxu1 %v2771_v3 }
 0x114   : > { %v815_v11 = vpop.permute.xlu0 %814 }
 0x115   : > { %v824_v12 = vsel %vm530_vm0, %v813_v6, %v815_v11  ;;  %v825_v15 = vsel %vm530_vm0, %v815_v11, %v817_v10 }
 0x116   : > { %975 = vrot.lane.b32.xlu0 %v811_v7, %s2949_s27  ;;  %977 = vrot.lane.b32.xlu1 %v824_v12, %s2949_s27 }
 0x117   : > { %v829_v13 = vpop.permute.xlu1 %828 }
 0x118   : > { %v827_v14 = vpop.permute.xlu0 %826 }
 0x119   : > { %v850_v30 = vsel %vm571_vm1, %v827_v14, %v829_v13 }
 0x11a   : > { %979 = vrot.lane.b32.xlu0 %v825_v15, %s2949_s27  ;;  %981 = vrot.lane.b32.xlu1 %v817_v10, %s2949_s27 }
 0x11b   : > { %v833_v28 = vpop.permute.xlu1 %832 }
 0x11c   : > { %v831_v29 = vpop.permute.xlu0 %830 }
 0x11d   : > { %v851_v31 = vsel %vm571_vm1, %v829_v13, %v831_v29 }
 0x11e   : > { %983 = vrot.lane.b32.xlu0 %v850_v30, %s2949_s27  ;;  %985 = vrot.lane.b32.xlu1 %v851_v31, %s2949_s27 }
 0x11f   : > { %v837_v32 = vpop.permute.xlu1 %836 }
 0x120   : > { %v835_v33 = vpop.permute.xlu0 %834 }
 0x121   : > { %v852_v34 = vsel %vm571_vm1, %v833_v28, %v835_v33  ;;  %v853_v38 = vsel %vm571_vm1, %v835_v33, %v837_v32 }
 0x122   : > { %987 = vrot.lane.b32.xlu0 %v831_v29, %s2949_s27  ;;  %989 = vrot.lane.b32.xlu1 %v852_v34, %s2949_s27 }
 0x123   : > { %v841_v35 = vpop.permute.xlu1 %840 }
 0x124   : > { %v839_v37 = vpop.permute.xlu0 %838 }
 0x125   : > { %v854_v41 = vsel %vm571_vm1, %v839_v37, %v841_v35 }
 0x126   : > { %991 = vrot.lane.b32.xlu0 %v853_v38, %s2949_s27  ;;  %993 = vrot.lane.b32.xlu1 %v837_v32, %s2949_s27 }
 0x127   : > { %v845_v39 = vpop.permute.xlu1 %844 }
 0x128   : > { %v843_v40 = vpop.permute.xlu0 %842 }
 0x129   : > { %v855_v42 = vsel %vm571_vm1, %v841_v35, %v843_v40 }
 0x12a   : > { %995 = vrot.lane.b32.xlu0 %v854_v41, %s2949_s27  ;;  %997 = vrot.lane.b32.xlu1 %v855_v42, %s2949_s27 }
 0x12b   : > { %v849_v43 = vpop.permute.xlu1 %848 }
 0x12c   : > { %v847_v44 = vpop.permute.xlu0 %846 }
 0x12d   : > { %v856_v45 = vsel %vm571_vm1, %v845_v39, %v847_v44  ;;  %v857_v48 = vsel %vm571_vm1, %v847_v44, %v849_v43 }
 0x12e   : > { %999 = vrot.lane.b32.xlu0 %v843_v40, %s2949_s27  ;;  %1001 = vrot.lane.b32.xlu1 %v856_v45, %s2949_s27 }
 0x12f   : > { %v861_v46 = vpop.permute.xlu1 %860 }
 0x130   : > { %v859_v47 = vpop.permute.xlu0 %858 }
 0x131   : > { %v882_v51 = vsel %vm612_vm2, %v859_v47, %v861_v46 }
 0x132   : > { %1003 = vrot.lane.b32.xlu0 %v857_v48, %s2949_s27  ;;  %1005 = vrot.lane.b32.xlu1 %v849_v43, %s2949_s27 }
 0x133   : > { %v865_v49 = vpop.permute.xlu1 %864 }
 0x134   : > { %v863_v50 = vpop.permute.xlu0 %862 }
 0x135   : > { %v883_v52 = vsel %vm612_vm2, %v861_v46, %v863_v50 }
 0x136   : > { %1007 = vrot.lane.b32.xlu0 %v882_v51, %s2949_s27  ;;  %1009 = vrot.lane.b32.xlu1 %v883_v52, %s2949_s27 }
 0x137   : > { %v869_v53 = vpop.permute.xlu1 %868 }
 0x138   : > { %v867_v54 = vpop.permute.xlu0 %866 }
 0x139   : > { %v884_v55 = vsel %vm612_vm2, %v865_v49, %v867_v54  ;;  %v885_v58 = vsel %vm612_vm2, %v867_v54, %v869_v53 }
 0x13a   : > { %1011 = vrot.lane.b32.xlu0 %v863_v50, %s2949_s27  ;;  %1013 = vrot.lane.b32.xlu1 %v884_v55, %s2949_s27 }
 0x13b   : > { %v873_v56 = vpop.permute.xlu1 %872 }
 0x13c   : > { %v871_v57 = vpop.permute.xlu0 %870 }
 0x13d   : > { %v886_v61 = vsel %vm612_vm2, %v871_v57, %v873_v56 }
 0x13e   : > { %1015 = vrot.lane.b32.xlu0 %v885_v58, %s2949_s27  ;;  %1017 = vrot.lane.b32.xlu1 %v869_v53, %s2949_s27 }
 0x13f   : > { %v877_v59 = vpop.permute.xlu1 %876 }
 0x140   : > { %v875_v60 = vpop.permute.xlu0 %874 }
 0x141   : > { %v887_v62 = vsel %vm612_vm2, %v873_v56, %v875_v60 }
 0x142   : > { %1019 = vrot.lane.b32.xlu0 %v886_v61, %s2949_s27  ;;  %1021 = vrot.lane.b32.xlu1 %v887_v62, %s2949_s27 }
 0x143   : > { %v881_v63 = vpop.permute.xlu1 %880 }
 0x144   : > { %v879_v0 = vpop.permute.xlu0 %878 }
 0x145   : > { %v888_v2 = vsel %vm612_vm2, %v877_v59, %v879_v0  ;;  %v889_v6 = vsel %vm612_vm2, %v879_v0, %v881_v63 }
 0x146   : > { %1023 = vrot.lane.b32.xlu0 %v875_v60, %s2949_s27  ;;  %1025 = vrot.lane.b32.xlu1 %v888_v2, %s2949_s27 }
 0x147   : > { %v893_v4 = vpop.permute.xlu1 %892 }
 0x148   : > { %v891_v5 = vpop.permute.xlu0 %890 }
 0x149   : > { %v914_v9 = vsel %vm653_vm3, %v891_v5, %v893_v4 }
 0x14a   : > { %1027 = vrot.lane.b32.xlu0 %v889_v6, %s2949_s27  ;;  %1029 = vrot.lane.b32.xlu1 %v881_v63, %s2949_s27 }
 0x14b   : > { %v897_v7 = vpop.permute.xlu1 %896 }
 0x14c   : > { %v895_v8 = vpop.permute.xlu0 %894 }
 0x14d   : > { %v915_v10 = vsel %vm653_vm3, %v893_v4, %v895_v8 }
 0x14e   : > { %1031 = vrot.lane.b32.xlu0 %v914_v9, %s2949_s27  ;;  %1033 = vrot.lane.b32.xlu1 %v915_v10, %s2949_s27 }
 0x14f   : > { %v901_v11 = vpop.permute.xlu1 %900 }
 0x150   : > { %v899_v12 = vpop.permute.xlu0 %898 }
 0x151   : > { %v916_v13 = vsel %vm653_vm3, %v897_v7, %v899_v12  ;;  %v917_v28 = vsel %vm653_vm3, %v899_v12, %v901_v11 }
 0x152   : > { %1035 = vrot.lane.b32.xlu0 %v895_v8, %s2949_s27  ;;  %1037 = vrot.lane.b32.xlu1 %v916_v13, %s2949_s27 }
 0x153   : > { %v905_v14 = vpop.permute.xlu1 %904 }
 0x154   : > { %v903_v15 = vpop.permute.xlu0 %902 }
 0x155   : > { %v918_v31 = vsel %vm653_vm3, %v903_v15, %v905_v14 }
 0x156   : > { %1039 = vrot.lane.b32.xlu0 %v917_v28, %s2949_s27  ;;  %1041 = vrot.lane.b32.xlu1 %v901_v11, %s2949_s27 }
 0x157   : > { %v909_v29 = vpop.permute.xlu1 %908 }
 0x158   : > { %v907_v30 = vpop.permute.xlu0 %906 }
 0x159   : > { %v919_v32 = vsel %vm653_vm3, %v905_v14, %v907_v30 }
 0x15a   : > { %1043 = vrot.lane.b32.xlu0 %v918_v31, %s2949_s27  ;;  %1045 = vrot.lane.b32.xlu1 %v919_v32, %s2949_s27 }
 0x15b   : > { %v913_v33 = vpop.permute.xlu1 %912 }
 0x15c   : > { %v911_v34 = vpop.permute.xlu0 %910 }
 0x15d   : > { %v920_v35 = vsel %vm653_vm3, %v909_v29, %v911_v34  ;;  %v921_v39 = vsel %vm653_vm3, %v911_v34, %v913_v33 }
 0x15e   : > { %1047 = vrot.lane.b32.xlu0 %v907_v30, %s2949_s27  ;;  %1049 = vrot.lane.b32.xlu1 %v920_v35, %s2949_s27 }
 0x15f   : > { %v938_v37 = vpop.permute.xlu1 %937 }
 0x160   : > { %v936_v38 = vpop.permute.xlu0 %935 }
 0x161   : > { %v1056_v43 = vsel %vm1055_vm5, %v936_v38, %v938_v37 }
 0x162   : > { %1051 = vrot.lane.b32.xlu0 %v921_v39, %s2949_s27  ;;  %1053 = vrot.lane.b32.xlu1 %v913_v33, %s2949_s27 }
 0x163   : > { %v942_v40 = vpop.permute.xlu1 %941 }
 0x164   : > { %v940_v41 = vpop.permute.xlu0 %939 }
 0x165   : > { %v1057_v42 = vsel %vm1055_vm5, %v938_v37, %v940_v41 }
 0x166   : > { %1251 = vrot.lane.b32.xlu0 %v3045_v17, %s2944_s23  ;;  %1253 = vrot.lane.b32.xlu1 %v3055_v19, %s2944_s23 }
 0x167   : > { %1139 = vmatprep.subr.bf16.mxu1 %v1057_v42  ;;  %v946_v44 = vpop.permute.xlu1 %945 }
 0x168   : > { %1140 = vmatpush1.bf16.msra.mxu1 %v1056_v43  ;;  %v944_v45 = vpop.permute.xlu0 %943 }
 0x169   : > { %v1059_v46 = vsel %vm1055_vm5, %v944_v45, %v946_v44  ;;  %v1058_v47 = vsel %vm1055_vm5, %v942_v40, %v944_v45 }
 0x16a   : > { %1255 = vrot.lane.b32.xlu0 %v3040_v16, %s2944_s23  ;;  %1257 = vrot.lane.b32.xlu1 %v3050_v18, %s2944_s23 }
 0x16b   : > { %1141 = vmatprep.subr.bf16.mxu1 %v1059_v46  ;;  %v950_v48 = vpop.permute.xlu1 %949 }
 0x16c   : > { %1142 = vmatpush1.bf16.msra.mxu1 %v1058_v47  ;;  %v948_v49 = vpop.permute.xlu0 %947 }
 0x16d   : > { %v1060_v53 = vsel %vm1055_vm5, %v948_v49, %v950_v48  ;;  %v3542_v49 = vld [vmem:[%s3037_s21] ss:$8 sps:$4 sm:$0xff]  }
 0x16e   : > { %1259 = vrot.lane.b32.xlu0 %v3058_v20, %s2944_s23  ;;  %1261 = vrot.lane.b32.xlu1 %v3064_v21, %s2944_s23 }
 0x16f   : > { %v954_v50 = vpop.permute.xlu1 %953 }
 0x170   : > { %v952_v51 = vpop.permute.xlu0 %951 }
 0x171   : > { %v1061_v52 = vsel %vm1055_vm5, %v950_v48, %v952_v51  ;;  %v3537_v48 = vld [vmem:[%s3042_s22 + $0x10] ss:$8 sps:$4 sm:$0xff]  }
 0x172   : > { %1263 = vrot.lane.b32.xlu0 %v3079_v23, %s2944_s23  ;;  %1265 = vrot.lane.b32.xlu1 %v3071_v22, %s2944_s23 }
 0x173   : > { %1143 = vmatprep.subr.bf16.mxu1 %v1061_v52  ;;  %v958_v54 = vpop.permute.xlu1 %957  ;;  %v3547_v52 = vld [vmem:[%s3037_s21 + $0x10] ss:$8 sps:$4 sm:$0xff]  }
 0x174   : > { %1144 = vmatpush1.bf16.msra.mxu1 %v1060_v53  ;;  %v956_v55 = vpop.permute.xlu0 %955  ;;  %v3552_v53 = vld [vmem:[%s3042_s22 + $0x14] ss:$8 sps:$4 sm:$0xff]  }
 0x175   : > { %v1063_v56 = vsel %vm1055_vm5, %v956_v55, %v958_v54  ;;  %v1062_v57 = vsel %vm1055_vm5, %v954_v50, %v956_v55 }
 0x176   : > { %1267 = vrot.lane.b32.xlu0 %v3094_v26, %s2944_s23  ;;  %1269 = vrot.lane.b32.xlu1 %v3088_v25, %s2944_s23 }
 0x177   : > { %1145 = vmatprep.subr.bf16.mxu1 %v1063_v56 }
 0x178   : > { %1146 = vmatpush1.bf16.msra.mxu1 %v1062_v57  ;;  %v962_v58 = vpop.permute.xlu1 %961  ;;  %v960_v59 = vpop.permute.xlu0 %959  ;;  %v3558_v57 = vld [vmem:[%s3042_s22 + $0x24] ss:$8 sps:$4 sm:$0xff]  }
 0x179   : > { %v1064_v63 = vsel %vm1055_vm5, %v960_v59, %v962_v58 }
 0x17a   : > { %1271 = vrot.lane.b32.xlu0 %v3083_v24, %s2944_s23  ;;  %1273 = vrot.lane.b32.xlu1 %v3100_v27, %s2944_s23 }
 0x17c   : > { %v966_v60 = vpop.permute.xlu1 %965  ;;  %v964_v61 = vpop.permute.xlu0 %963 }
 0x17d   : > { %v1065_v62 = vsel %vm1055_vm5, %v962_v58, %v964_v61  ;;  %v3563_v58 = vld [vmem:[%s3042_s22 + $0x20] ss:$8 sps:$4 sm:$0xff]  }
 0x17e   : > { %1283 = vrot.lane.b32.xlu0 %v3045_v17, %s2945_s15  ;;  %1285 = vrot.lane.b32.xlu1 %v3055_v19, %s2945_s15 }
 0x17f   : > { %1147 = vmatprep.subr.bf16.mxu1 %v1065_v62  ;;  %v670_v62 = vld [vmem:[%s4631_s2] sm:$0xff] }
 0x180   : > { %1148 = vmatpush1.bf16.msra.mxu1 %v1064_v63  ;;  %v970_v0 = vpop.permute.xlu1 %969  ;;  %v968_v2 = vpop.permute.xlu0 %967 }
 0x181   : > { %v1067_v3 = vsel %vm1055_vm5, %v968_v2, %v970_v0  ;;  %v1066_v4 = vsel %vm1055_vm5, %v966_v60, %v968_v2  ;;  %v2764_v2 = vcombine.low %v670_v62, %v670_v62 }
 0x182   : > { %1287 = vrot.lane.b32.xlu0 %v3040_v16, %s2945_s15  ;;  %1289 = vrot.lane.b32.xlu1 %v3050_v18, %s2945_s15 }
 0x183   : > { %1149 = vmatprep.subr.bf16.mxu1 %v1067_v3  ;;  %v2765_v3 = vcombine.high %v670_v62, %v670_v62 }
 0x184   : > { %1150 = vmatpush1.bf16.msra.mxu1 %v1066_v4  ;;  %v974_v5 = vpop.permute.xlu1 %973  ;;  %v972_v6 = vpop.permute.xlu0 %971  ;;  %v3574_v4 = vld [vmem:[%s3042_s22 + $0x30] ss:$8 sps:$4 sm:$0xff]  }
 0x185   : > { %v1068_v10 = vsel %vm1055_vm5, %v972_v6, %v974_v5  ;;  %v2770_v6 = vcombine.low %v3396_v1, %v3396_v1  ;;  %718 = vmatprep.mubr.bf16.mxu0 %v2765_v3 }
 0x186   : > { %1291 = vrot.lane.b32.xlu0 %v3058_v20, %s2945_s15  ;;  %1293 = vrot.lane.b32.xlu1 %v3064_v21, %s2945_s15 }
 0x187   : > { %719 = vmatmul.mubr.bf16.vlgmr.msra.gmra.mrb[0].mxu0 %v2764_v2 }
 0x188   : > { %v978_v7 = vpop.permute.xlu1 %977  ;;  %v976_v8 = vpop.permute.xlu0 %975 }
 0x189   : > { %v1069_v9 = vsel %vm1055_vm5, %v974_v5, %v976_v8  ;;  %v3579_v5 = vld [vmem:[%s3037_s21 + $0x20] ss:$8 sps:$4 sm:$0xff]  }
 0x18a   : > { %1295 = vrot.lane.b32.xlu0 %v3079_v23, %s2945_s15  ;;  %1297 = vrot.lane.b32.xlu1 %v3071_v22, %s2945_s15 }
 0x18b   : > { %1151 = vmatprep.subr.bf16.mxu1 %v1069_v9  ;;  %v3586_v9 = vld [vmem:[%s3037_s21 + $0x30] ss:$8 sps:$4 sm:$0xff]  }
 0x18c   : > { %1152 = vmatpush1.bf16.msra.mxu1 %v1068_v10  ;;  %v982_v11 = vpop.permute.xlu1 %981  ;;  %v980_v12 = vpop.permute.xlu0 %979  ;;  %v3591_v10 = vld [vmem:[%s3042_s22 + $0x34] ss:$8 sps:$4 sm:$0xff]  }
 0x18d   : > { %v1071_v13 = vsel %vm1055_vm5, %v980_v12, %v982_v11  ;;  %v1070_v14 = vsel %vm1055_vm5, %v978_v7, %v980_v12 }
 0x18e   : > { %1299 = vrot.lane.b32.xlu0 %v3094_v26, %s2945_s15  ;;  %1301 = vrot.lane.b32.xlu1 %v3088_v25, %s2945_s15 }
 0x18f   : > { %1153 = vmatprep.subr.bf16.mxu1 %v1071_v13 }
 0x190   : > { %1154 = vmatpush1.bf16.msra.mxu1 %v1070_v14  ;;  %v986_v15 = vpop.permute.xlu1 %985  ;;  %v984_v28 = vpop.permute.xlu0 %983 }
 0x191   : > { %v1072_v32 = vsel %vm1055_vm5, %v984_v28, %v986_v15 }
 0x192   : > { %1303 = vrot.lane.b32.xlu0 %v3083_v24, %s2945_s15  ;;  %1305 = vrot.lane.b32.xlu1 %v3100_v27, %s2945_s15 }
 0x194   : > { %v990_v29 = vpop.permute.xlu1 %989  ;;  %v988_v30 = vpop.permute.xlu0 %987 }
 0x195   : > { %v1073_v31 = vsel %vm1055_vm5, %v986_v15, %v988_v30 }
 0x196   : > { %1315 = vrot.lane.b32.xlu0 %v3045_v17, %s2946_s25  ;;  %1317 = vrot.lane.b32.xlu1 %v3055_v19, %s2946_s25 }
 0x197   : > { %1155 = vmatprep.subr.bf16.mxu1 %v1073_v31 }
 0x198   : > { %1156 = vmatpush1.bf16.msra.mxu1 %v1072_v32  ;;  %v994_v33 = vpop.permute.xlu1 %993  ;;  %v992_v34 = vpop.permute.xlu0 %991 }
 0x199   : > { %v1075_v35 = vsel %vm1055_vm5, %v992_v34, %v994_v33  ;;  %v1074_v37 = vsel %vm1055_vm5, %v990_v29, %v992_v34 }
 0x19a   : > { %1319 = vrot.lane.b32.xlu0 %v3040_v16, %s2946_s25  ;;  %1321 = vrot.lane.b32.xlu1 %v3050_v18, %s2946_s25 }
 0x19b   : > { %1157 = vmatprep.subr.bf16.mxu1 %v1075_v35 }
 0x19c   : > { %1158 = vmatpush1.bf16.msra.mxu1 %v1074_v37  ;;  %v998_v17 = vpop.permute.xlu1 %997  ;;  %v996_v19 = vpop.permute.xlu0 %995 }
 0x19d   : > { %v1076_v16 = vsel %vm1055_vm5, %v996_v19, %v998_v17 }
 0x19e   : > { %1323 = vrot.lane.b32.xlu0 %v3058_v20, %s2946_s25  ;;  %1325 = vrot.lane.b32.xlu1 %v3064_v21, %s2946_s25 }
 0x1a0   : > { %v1002_v38 = vpop.permute.xlu1 %1001  ;;  %v1000_v39 = vpop.permute.xlu0 %999 }
 0x1a1   : > { %v1077_v40 = vsel %vm1055_vm5, %v998_v17, %v1000_v39 }
 0x1a2   : > { %1327 = vrot.lane.b32.xlu0 %v3079_v23, %s2946_s25  ;;  %1329 = vrot.lane.b32.xlu1 %v3071_v22, %s2946_s25 }
 0x1a3   : > { %1159 = vmatprep.subr.bf16.mxu1 %v1077_v40 }
 0x1a4   : > { %1160 = vmatpush1.bf16.msra.mxu1 %v1076_v16  ;;  %v1006_v18 = vpop.permute.xlu1 %1005  ;;  %v1004_v20 = vpop.permute.xlu0 %1003 }
 0x1a5   : > { %v1079_v21 = vsel %vm1055_vm5, %v1004_v20, %v1006_v18  ;;  %v1078_v41 = vsel %vm1055_vm5, %v1002_v38, %v1004_v20 }
 0x1a6   : > { %1331 = vrot.lane.b32.xlu0 %v3094_v26, %s2946_s25  ;;  %1333 = vrot.lane.b32.xlu1 %v3088_v25, %s2946_s25  ;;  %v3524_v26 = vld [vmem:[%s3042_s22] ss:$8 sps:$4 sm:$0xff]   ;;  %v3529_v25 = vld [vmem:[%s3042_s22 + $0x4] ss:$8 sps:$4 sm:$0xff]  }
 0x1a7   : > { %1161 = vmatprep.subr.bf16.mxu1 %v1079_v21 }
 0x1a8   : > { %1162 = vmatpush1.bf16.msra.mxu1 %v1078_v41  ;;  %v1010_v22 = vpop.permute.xlu1 %1009  ;;  %v1008_v23 = vpop.permute.xlu0 %1007 }
 0x1aa   : > { %1335 = vrot.lane.b32.xlu0 %v3083_v24, %s2946_s25  ;;  %1337 = vrot.lane.b32.xlu1 %v3100_v27, %s2946_s25  ;;  %v1080_v24 = vsel %vm1055_vm5, %v1008_v23, %v1010_v22 }
 0x1ac   : > { %v1014_v42 = vpop.permute.xlu1 %1013  ;;  %v1012_v43 = vpop.permute.xlu0 %1011 }
 0x1ad   : > { %v1081_v44 = vsel %vm1055_vm5, %v1010_v22, %v1012_v43 }
 0x1ae   : > { %1347 = vrot.lane.b32.xlu0 %v3524_v26, %s2947_s26  ;;  %1349 = vrot.lane.b32.xlu1 %v3529_v25, %s2947_s26 }
 0x1af   : > { %1163 = vmatprep.subr.bf16.mxu1 %v1081_v44 }
 0x1b0   : > { %1164 = vmatpush1.bf16.msra.mxu1 %v1080_v24  ;;  %v1018_v27 = vpop.permute.xlu1 %1017  ;;  %v1016_v45 = vpop.permute.xlu0 %1015 }
 0x1b1   : > { %v1083_v46 = vsel %vm1055_vm5, %v1016_v45, %v1018_v27  ;;  %v1082_v47 = vsel %vm1055_vm5, %v1014_v42, %v1016_v45 }
 0x1b2   : > { %1353 = vrot.lane.b32.xlu1 %v3537_v48, %s2947_s26  ;;  %1351 = vrot.lane.b32.xlu0 %v3542_v49, %s2947_s26 }
 0x1b3   : > { %1165 = vmatprep.subr.bf16.mxu1 %v1083_v46 }
 0x1b4   : > { %1166 = vmatpush1.bf16.msra.mxu1 %v1082_v47  ;;  %v1022_v50 = vpop.permute.xlu1 %1021  ;;  %v1020_v51 = vpop.permute.xlu0 %1019 }
 0x1b5   : > { %v1084_v59 = vsel %vm1055_vm5, %v1020_v51, %v1022_v50 }
 0x1b6   : > { %1357 = vrot.lane.b32.xlu1 %v3547_v52, %s2947_s26  ;;  %1355 = vrot.lane.b32.xlu0 %v3552_v53, %s2947_s26 }
 0x1b8   : > { %v1026_v54 = vpop.permute.xlu1 %1025  ;;  %v1024_v55 = vpop.permute.xlu0 %1023 }
 0x1b9   : > { %v1085_v56 = vsel %vm1055_vm5, %v1022_v50, %v1024_v55 }
 0x1ba   : > { %1361 = vrot.lane.b32.xlu1 %v3558_v57, %s2947_s26  ;;  %1359 = vrot.lane.b32.xlu0 %v3563_v58, %s2947_s26 }
 0x1bb   : > { %1167 = vmatprep.subr.bf16.mxu1 %v1085_v56 }
 0x1bc   : > { %1168 = vmatpush1.bf16.msra.mxu1 %v1084_v59  ;;  %v1030_v60 = vpop.permute.xlu1 %1029  ;;  %v1028_v61 = vpop.permute.xlu0 %1027 }
 0x1bd   : > { %v1087_v63 = vsel %vm1055_vm5, %v1028_v61, %v1030_v60  ;;  %v1086_v0 = vsel %vm1055_vm5, %v1026_v54, %v1028_v61 }
 0x1be   : > { %1365 = vrot.lane.b32.xlu1 %v3574_v4, %s2947_s26  ;;  %1363 = vrot.lane.b32.xlu0 %v3579_v5, %s2947_s26 }
 0x1bf   : > { %1169 = vmatprep.subr.bf16.mxu1 %v1087_v63 }
 0x1c0   : > { %1170 = vmatpush1.bf16.msra.mxu1 %v1086_v0  ;;  %v1034_v7 = vpop.permute.xlu1 %1033  ;;  %v1032_v8 = vpop.permute.xlu0 %1031 }
 0x1c1   : > { %v1088_v13 = vsel %vm1055_vm5, %v1032_v8, %v1034_v7 }
 0x1c2   : > { %1369 = vrot.lane.b32.xlu1 %v3586_v9, %s2947_s26  ;;  %1367 = vrot.lane.b32.xlu0 %v3591_v10, %s2947_s26 }
 0x1c3   : > { %1172 = vmatmul.mubr.bf16.vlgmr.msra.gmra.mrb[4].mxu1 %v2770_v6 }
 0x1c4   : > { %v1038_v11 = vpop.permute.xlu1 %1037  ;;  %v1036_v12 = vpop.permute.xlu0 %1035  ;;  %1212 = vmatprep.mubr.bf16.mxu1 %v4634_v36 }
 0x1c5   : > { %v1089_v1 = vsel %vm1055_vm5, %v1034_v7, %v1036_v12 }
 0x1c6   : > { %1394 = vrot.lane.b32.xlu1 %v3529_v25, %s2950_s8  ;;  %1392 = vrot.lane.b32.xlu0 %v3524_v26, %s2950_s8 }
 0x1c7   : > { %1180 = vmatprep.subr.bf16.mxu1 %v1089_v1 }
 0x1c8   : > { %1181 = vmatpush1.bf16.msra.mxu1 %v1088_v13  ;;  %v1042_v14 = vpop.permute.xlu1 %1041  ;;  %v1040_v15 = vpop.permute.xlu0 %1039 }
 0x1c9   : > { %v1091_v28 = vsel %vm1055_vm5, %v1040_v15, %v1042_v14  ;;  %v1090_v29 = vsel %vm1055_vm5, %v1038_v11, %v1040_v15 }
 0x1ca   : > { %1398 = vrot.lane.b32.xlu1 %v3537_v48, %s2950_s8  ;;  %1396 = vrot.lane.b32.xlu0 %v3542_v49, %s2950_s8 }
 0x1cb   : > { %1182 = vmatprep.subr.bf16.mxu1 %v1091_v28 }
 0x1cc   : > { %1183 = vmatpush1.bf16.msra.mxu1 %v1090_v29  ;;  %v1046_v30 = vpop.permute.xlu1 %1045  ;;  %v1044_v31 = vpop.permute.xlu0 %1043 }
 0x1cd   : > { %v1092_v35 = vsel %vm1055_vm5, %v1044_v31, %v1046_v30 }
 0x1ce   : > { %1402 = vrot.lane.b32.xlu1 %v3547_v52, %s2950_s8  ;;  %1400 = vrot.lane.b32.xlu0 %v3552_v53, %s2950_s8 }
 0x1d0   : > { %v1050_v32 = vpop.permute.xlu1 %1049  ;;  %v1048_v33 = vpop.permute.xlu0 %1047 }
 0x1d1   : > { %v1093_v34 = vsel %vm1055_vm5, %v1046_v30, %v1048_v33 }
 0x1d2   : > { %1406 = vrot.lane.b32.xlu1 %v3558_v57, %s2950_s8  ;;  %1404 = vrot.lane.b32.xlu0 %v3563_v58, %s2950_s8 }
 0x1d3   : > { %1184 = vmatprep.subr.bf16.mxu1 %v1093_v34 }
 0x1d4   : > { %1185 = vmatpush1.bf16.msra.mxu1 %v1092_v35  ;;  %v1054_v37 = vpop.permute.xlu1 %1053  ;;  %v1052_v17 = vpop.permute.xlu0 %1051 }
 0x1d5   : > { %v1095_v19 = vsel %vm1055_vm5, %v1052_v17, %v1054_v37  ;;  %v1094_v38 = vsel %vm1055_vm5, %v1050_v32, %v1052_v17 }
 0x1d6   : > { %1410 = vrot.lane.b32.xlu1 %v3574_v4, %s2950_s8  ;;  %1408 = vrot.lane.b32.xlu0 %v3579_v5, %s2950_s8 }
 0x1d7   : > { %1186 = vmatprep.subr.bf16.mxu1 %v1095_v19 }
 0x1d8   : > { %1187 = vmatpush1.bf16.msra.mxu1 %v1094_v38  ;;  %v1254_v39 = vpop.permute.xlu1 %1253  ;;  %v1252_v40 = vpop.permute.xlu0 %1251 }
 0x1d9   : > { %v1275_v20 = vsel %vm530_vm0, %v1252_v40, %v1254_v39 }
 0x1da   : > { %1414 = vrot.lane.b32.xlu1 %v3586_v9, %s2950_s8  ;;  %1412 = vrot.lane.b32.xlu0 %v3591_v10, %s2950_s8 }
 0x1dc   : > { %v1258_v16 = vpop.permute.xlu1 %1257  ;;  %v1256_v18 = vpop.permute.xlu0 %1255 }
 0x1dd   : > { %v1276_v21 = vsel %vm530_vm0, %v1254_v39, %v1256_v18 }
 0x1de   : > { %1416 = vrot.lane.b32.xlu0 %v1275_v20, %s2950_s8  ;;  %1418 = vrot.lane.b32.xlu1 %v1276_v21, %s2950_s8 }
 0x1e0   : > { %v1262_v41 = vpop.permute.xlu1 %1261  ;;  %v1260_v22 = vpop.permute.xlu0 %1259 }
 0x1e1   : > { %v1277_v23 = vsel %vm530_vm0, %v1258_v16, %v1260_v22  ;;  %v1278_v44 = vsel %vm530_vm0, %v1260_v22, %v1262_v41 }
 0x1e2   : > { %1420 = vrot.lane.b32.xlu0 %v1256_v18, %s2950_s8  ;;  %1422 = vrot.lane.b32.xlu1 %v1277_v23, %s2950_s8  ;;  %v2870_v23 = vld [vmem:[%s4631_s2 + $0x14] ss:$0 sps:$4 sm:$0xff]  }
 0x1e3   : > { %2773 = vmatmul.mubr.msk.bf16.vlgmr.msra.gmra.mrb[8].mxu1 %vm682_vm4, %v2870_v23 }
 0x1e4   : > { %v1266_v42 = vpop.permute.xlu1 %1265  ;;  %v1264_v43 = vpop.permute.xlu0 %1263  ;;  %1669 = vmatprep.mubr.bf16.mxu1 %v4634_v36 }
 0x1e5   : > { %v1279_v45 = vsel %vm530_vm0, %v1264_v43, %v1266_v42 }
 0x1e6   : > { %1424 = vrot.lane.b32.xlu0 %v1278_v44, %s2950_s8  ;;  %1426 = vrot.lane.b32.xlu1 %v1262_v41, %s2950_s8 }
 0x1e8   : > { %v1270_v24 = vpop.permute.xlu1 %1269  ;;  %v1268_v27 = vpop.permute.xlu0 %1267 }
 0x1e9   : > { %v1280_v46 = vsel %vm530_vm0, %v1266_v42, %v1268_v27 }
 0x1ea   : > { %1428 = vrot.lane.b32.xlu0 %v1279_v45, %s2950_s8  ;;  %1430 = vrot.lane.b32.xlu1 %v1280_v46, %s2950_s8 }
 0x1ec   : > { %v1274_v47 = vpop.permute.xlu1 %1273  ;;  %v1272_v50 = vpop.permute.xlu0 %1271 }
 0x1ed   : > { %v1281_v51 = vsel %vm530_vm0, %v1270_v24, %v1272_v50  ;;  %v1282_v56 = vsel %vm530_vm0, %v1272_v50, %v1274_v47 }
 0x1ee   : > { %1432 = vrot.lane.b32.xlu0 %v1268_v27, %s2950_s8  ;;  %1434 = vrot.lane.b32.xlu1 %v1281_v51, %s2950_s8 }
 0x1f0   : > { %v1286_v54 = vpop.permute.xlu1 %1285  ;;  %v1284_v55 = vpop.permute.xlu0 %1283 }
 0x1f1   : > { %v1307_v61 = vsel %vm571_vm1, %v1284_v55, %v1286_v54 }
 0x1f2   : > { %1436 = vrot.lane.b32.xlu0 %v1282_v56, %s2950_s8  ;;  %1438 = vrot.lane.b32.xlu1 %v1274_v47, %s2950_s8 }
 0x1f4   : > { %v1290_v59 = vpop.permute.xlu1 %1289  ;;  %v1288_v60 = vpop.permute.xlu0 %1287 }
 0x1f5   : > { %v1308_v62 = vsel %vm571_vm1, %v1286_v54, %v1288_v60 }
 0x1f6   : > { %1440 = vrot.lane.b32.xlu0 %v1307_v61, %s2950_s8  ;;  %1442 = vrot.lane.b32.xlu1 %v1308_v62, %s2950_s8 }
 0x1f8   : > { %v1294_v63 = vpop.permute.xlu1 %1293  ;;  %v1292_v0 = vpop.permute.xlu0 %1291 }
 0x1f9   : > { %v1309_v2 = vsel %vm571_vm1, %v1290_v59, %v1292_v0  ;;  %v1310_v7 = vsel %vm571_vm1, %v1292_v0, %v1294_v63 }
 0x1fa   : > { %1444 = vrot.lane.b32.xlu0 %v1288_v60, %s2950_s8  ;;  %1446 = vrot.lane.b32.xlu1 %v1309_v2, %s2950_s8 }
 0x1fc   : > { %v1298_v3 = vpop.permute.xlu1 %1297  ;;  %v1296_v6 = vpop.permute.xlu0 %1295 }
 0x1fd   : > { %v1311_v12 = vsel %vm571_vm1, %v1296_v6, %v1298_v3 }
 0x1fe   : > { %1448 = vrot.lane.b32.xlu0 %v1310_v7, %s2950_s8  ;;  %1450 = vrot.lane.b32.xlu1 %v1294_v63, %s2950_s8 }
 0x200   : > { %v1302_v8 = vpop.permute.xlu1 %1301  ;;  %v1300_v11 = vpop.permute.xlu0 %1299 }
 0x201   : > { %v1312_v1 = vsel %vm571_vm1, %v1298_v3, %v1300_v11 }
 0x202   : > { %1452 = vrot.lane.b32.xlu0 %v1311_v12, %s2950_s8  ;;  %1454 = vrot.lane.b32.xlu1 %v1312_v1, %s2950_s8 }
 0x204   : > { %v1306_v13 = vpop.permute.xlu1 %1305  ;;  %v1304_v14 = vpop.permute.xlu0 %1303 }
 0x205   : > { %v1313_v15 = vsel %vm571_vm1, %v1302_v8, %v1304_v14  ;;  %v1314_v30 = vsel %vm571_vm1, %v1304_v14, %v1306_v13 }
 0x206   : > { %1456 = vrot.lane.b32.xlu0 %v1300_v11, %s2950_s8  ;;  %1458 = vrot.lane.b32.xlu1 %v1313_v15, %s2950_s8 }
 0x208   : > { %v1318_v28 = vpop.permute.xlu1 %1317  ;;  %v1316_v29 = vpop.permute.xlu0 %1315 }
 0x209   : > { %v1339_v33 = vsel %vm612_vm2, %v1316_v29, %v1318_v28 }
 0x20a   : > { %1460 = vrot.lane.b32.xlu0 %v1314_v30, %s2950_s8  ;;  %1462 = vrot.lane.b32.xlu1 %v1306_v13, %s2950_s8 }
 0x20c   : > { %v1322_v31 = vpop.permute.xlu1 %1321  ;;  %v1320_v32 = vpop.permute.xlu0 %1319 }
 0x20d   : > { %v1340_v34 = vsel %vm612_vm2, %v1318_v28, %v1320_v32 }
 0x20e   : > { %1464 = vrot.lane.b32.xlu0 %v1339_v33, %s2950_s8  ;;  %1466 = vrot.lane.b32.xlu1 %v1340_v34, %s2950_s8 }
 0x210   : > { %v1326_v35 = vpop.permute.xlu1 %1325  ;;  %v1324_v37 = vpop.permute.xlu0 %1323 }
 0x211   : > { %v1341_v17 = vsel %vm612_vm2, %v1322_v31, %v1324_v37  ;;  %v1342_v39 = vsel %vm612_vm2, %v1324_v37, %v1326_v35 }
 0x212   : > { %1468 = vrot.lane.b32.xlu0 %v1320_v32, %s2950_s8  ;;  %1470 = vrot.lane.b32.xlu1 %v1341_v17, %s2950_s8 }
 0x214   : > { %v1330_v19 = vpop.permute.xlu1 %1329  ;;  %v1328_v38 = vpop.permute.xlu0 %1327 }
 0x215   : > { %v1343_v18 = vsel %vm612_vm2, %v1328_v38, %v1330_v19 }
 0x216   : > { %1472 = vrot.lane.b32.xlu0 %v1342_v39, %s2950_s8  ;;  %1474 = vrot.lane.b32.xlu1 %v1326_v35, %s2950_s8 }
 0x218   : > { %v1334_v40 = vpop.permute.xlu1 %1333  ;;  %v1332_v16 = vpop.permute.xlu0 %1331 }
 0x219   : > { %v1344_v20 = vsel %vm612_vm2, %v1330_v19, %v1332_v16 }
 0x21a   : > { %1476 = vrot.lane.b32.xlu0 %v1343_v18, %s2950_s8  ;;  %1478 = vrot.lane.b32.xlu1 %v1344_v20, %s2950_s8 }
 0x21c   : > { %v1338_v21 = vpop.permute.xlu1 %1337  ;;  %v1336_v41 = vpop.permute.xlu0 %1335 }
 0x21d   : > { %v1345_v22 = vsel %vm612_vm2, %v1334_v40, %v1336_v41  ;;  %v1346_v44 = vsel %vm612_vm2, %v1336_v41, %v1338_v21 }
 0x21e   : > { %1480 = vrot.lane.b32.xlu0 %v1332_v16, %s2950_s8  ;;  %1482 = vrot.lane.b32.xlu1 %v1345_v22, %s2950_s8 }
 0x220   : > { %v1350_v42 = vpop.permute.xlu1 %1349  ;;  %v1348_v43 = vpop.permute.xlu0 %1347 }
 0x221   : > { %v1371_v45 = vsel %vm653_vm3, %v1348_v43, %v1350_v42 }
 0x222   : > { %1484 = vrot.lane.b32.xlu0 %v1346_v44, %s2950_s8  ;;  %1486 = vrot.lane.b32.xlu1 %v1338_v21, %s2950_s8 }
 0x224   : > { %v1354_v24 = vpop.permute.xlu1 %1353  ;;  %v1352_v27 = vpop.permute.xlu0 %1351 }
 0x225   : > { %v1372_v46 = vsel %vm653_vm3, %v1350_v42, %v1352_v27 }
 0x226   : > { %1488 = vrot.lane.b32.xlu0 %v1371_v45, %s2950_s8  ;;  %1490 = vrot.lane.b32.xlu1 %v1372_v46, %s2950_s8 }
 0x228   : > { %v1358_v47 = vpop.permute.xlu1 %1357  ;;  %v1356_v50 = vpop.permute.xlu0 %1355 }
 0x229   : > { %v1373_v51 = vsel %vm653_vm3, %v1354_v24, %v1356_v50  ;;  %v1374_v56 = vsel %vm653_vm3, %v1356_v50, %v1358_v47 }
 0x22a   : > { %1492 = vrot.lane.b32.xlu0 %v1352_v27, %s2950_s8  ;;  %1494 = vrot.lane.b32.xlu1 %v1373_v51, %s2950_s8 }
 0x22c   : > { %v1362_v54 = vpop.permute.xlu1 %1361  ;;  %v1360_v55 = vpop.permute.xlu0 %1359 }
 0x22d   : > { %v1375_v61 = vsel %vm653_vm3, %v1360_v55, %v1362_v54 }
 0x22e   : > { %1496 = vrot.lane.b32.xlu0 %v1374_v56, %s2950_s8  ;;  %1498 = vrot.lane.b32.xlu1 %v1358_v47, %s2950_s8 }
 0x230   : > { %v1366_v59 = vpop.permute.xlu1 %1365  ;;  %v1364_v60 = vpop.permute.xlu0 %1363 }
 0x231   : > { %v1376_v62 = vsel %vm653_vm3, %v1362_v54, %v1364_v60 }
 0x232   : > { %1500 = vrot.lane.b32.xlu0 %v1375_v61, %s2950_s8  ;;  %1502 = vrot.lane.b32.xlu1 %v1376_v62, %s2950_s8 }
 0x234   : > { %v1370_v63 = vpop.permute.xlu1 %1369  ;;  %v1368_v0 = vpop.permute.xlu0 %1367 }
 0x235   : > { %v1377_v2 = vsel %vm653_vm3, %v1366_v59, %v1368_v0  ;;  %v1378_v7 = vsel %vm653_vm3, %v1368_v0, %v1370_v63 }
 0x236   : > { %1504 = vrot.lane.b32.xlu0 %v1364_v60, %s2950_s8  ;;  %1506 = vrot.lane.b32.xlu1 %v1377_v2, %s2950_s8 }
 0x238   : > { %v1395_v3 = vpop.permute.xlu1 %1394  ;;  %v1393_v6 = vpop.permute.xlu0 %1392 }
 0x239   : > { %v1513_v1 = vsel %vm1512_vm6, %v1393_v6, %v1395_v3 }
 0x23a   : > { %1508 = vrot.lane.b32.xlu0 %v1378_v7, %s2950_s8  ;;  %1510 = vrot.lane.b32.xlu1 %v1370_v63, %s2950_s8 }
 0x23c   : > { %v1399_v8 = vpop.permute.xlu1 %1398  ;;  %v1397_v11 = vpop.permute.xlu0 %1396 }
 0x23d   : > { %v1514_v12 = vsel %vm1512_vm6, %v1395_v3, %v1397_v11 }
 0x23e   : > { %1708 = vrot.lane.b32.xlu0 %v3524_v26, %s2944_s23  ;;  %1710 = vrot.lane.b32.xlu1 %v3529_v25, %s2944_s23 }
 0x23f   : > { %1596 = vmatprep.subr.bf16.mxu0 %v1514_v12 }
 0x240   : > { %1597 = vmatpush1.bf16.msra.mxu0 %v1513_v1  ;;  %v1403_v13 = vpop.permute.xlu1 %1402  ;;  %v1401_v14 = vpop.permute.xlu0 %1400 }
 0x241   : > { %v1516_v15 = vsel %vm1512_vm6, %v1401_v14, %v1403_v13  ;;  %v1515_v28 = vsel %vm1512_vm6, %v1399_v8, %v1401_v14 }
 0x242   : > { %1712 = vrot.lane.b32.xlu0 %v3542_v49, %s2944_s23  ;;  %1714 = vrot.lane.b32.xlu1 %v3537_v48, %s2944_s23 }
 0x243   : > { %1598 = vmatprep.subr.bf16.mxu0 %v1516_v15 }
 0x244   : > { %1599 = vmatpush1.bf16.msra.mxu0 %v1515_v28  ;;  %v1407_v29 = vpop.permute.xlu1 %1406  ;;  %v1405_v30 = vpop.permute.xlu0 %1404 }
 0x245   : > { %v1517_v34 = vsel %vm1512_vm6, %v1405_v30, %v1407_v29 }
 0x246   : > { %1716 = vrot.lane.b32.xlu0 %v3552_v53, %s2944_s23  ;;  %1718 = vrot.lane.b32.xlu1 %v3547_v52, %s2944_s23 }
 0x248   : > { %v1411_v31 = vpop.permute.xlu1 %1410  ;;  %v1409_v32 = vpop.permute.xlu0 %1408 }
 0x249   : > { %v1518_v33 = vsel %vm1512_vm6, %v1407_v29, %v1409_v32 }
 0x24a   : > { %1720 = vrot.lane.b32.xlu0 %v3563_v58, %s2944_s23  ;;  %1722 = vrot.lane.b32.xlu1 %v3558_v57, %s2944_s23 }
 0x24b   : > { %1600 = vmatprep.subr.bf16.mxu0 %v1518_v33 }
 0x24c   : > { %1601 = vmatpush1.bf16.msra.mxu0 %v1517_v34  ;;  %v1415_v35 = vpop.permute.xlu1 %1414  ;;  %v1413_v37 = vpop.permute.xlu0 %1412 }
 0x24d   : > { %v1520_v17 = vsel %vm1512_vm6, %v1413_v37, %v1415_v35  ;;  %v1519_v19 = vsel %vm1512_vm6, %v1411_v31, %v1413_v37 }
 0x24e   : > { %1724 = vrot.lane.b32.xlu0 %v3579_v5, %s2944_s23  ;;  %1806 = vrot.lane.b32.xlu1 %v3529_v25, %s2947_s26 }
 0x24f   : > { %1602 = vmatprep.subr.bf16.mxu0 %v1520_v17 }
 0x250   : > { %1603 = vmatpush1.bf16.msra.mxu0 %v1519_v19  ;;  %v1419_v38 = vpop.permute.xlu1 %1418  ;;  %v1417_v39 = vpop.permute.xlu0 %1416 }
 0x251   : > { %v1521_v20 = vsel %vm1512_vm6, %v1417_v39, %v1419_v38 }
 0x252   : > { %1808 = vrot.lane.b32.xlu0 %v3542_v49, %s2947_s26  ;;  %1804 = vrot.lane.b32.xlu1 %v3524_v26, %s2947_s26 }
 0x254   : > { %v1423_v40 = vpop.permute.xlu1 %1422  ;;  %v1421_v16 = vpop.permute.xlu0 %1420 }
 0x255   : > { %v1522_v18 = vsel %vm1512_vm6, %v1419_v38, %v1421_v16 }
 0x256   : > { %1812 = vrot.lane.b32.xlu0 %v3552_v53, %s2947_s26  ;;  %1814 = vrot.lane.b32.xlu1 %v3547_v52, %s2947_s26 }
 0x257   : > { %1604 = vmatprep.subr.bf16.mxu0 %v1522_v18 }
 0x258   : > { %1605 = vmatpush1.bf16.msra.mxu0 %v1521_v20  ;;  %v1427_v21 = vpop.permute.xlu1 %1426  ;;  %v1425_v41 = vpop.permute.xlu0 %1424 }
 0x259   : > { %v1524_v22 = vsel %vm1512_vm6, %v1425_v41, %v1427_v21  ;;  %v1523_v23 = vsel %vm1512_vm6, %v1423_v40, %v1425_v41 }
 0x25a   : > { %1810 = vrot.lane.b32.xlu0 %v3537_v48, %s2947_s26  ;;  %1818 = vrot.lane.b32.xlu1 %v3558_v57, %s2947_s26 }
 0x25b   : > { %1606 = vmatprep.subr.bf16.mxu0 %v1524_v22 }
 0x25c   : > { %1607 = vmatpush1.bf16.msra.mxu0 %v1523_v23  ;;  %v1431_v42 = vpop.permute.xlu1 %1430  ;;  %v1429_v43 = vpop.permute.xlu0 %1428 }
 0x25d   : > { %v1525_v45 = vsel %vm1512_vm6, %v1429_v43, %v1431_v42 }
 0x25e   : > { %1820 = vrot.lane.b32.xlu0 %v3579_v5, %s2947_s26  ;;  %1816 = vrot.lane.b32.xlu1 %v3563_v58, %s2947_s26 }
 0x260   : > { %v1435_v44 = vpop.permute.xlu1 %1434  ;;  %v1433_v24 = vpop.permute.xlu0 %1432 }
 0x261   : > { %v1526_v27 = vsel %vm1512_vm6, %v1431_v42, %v1433_v24 }
 0x262   : > { %1824 = vrot.lane.b32.xlu0 %v3591_v10, %s2947_s26  ;;  %1826 = vrot.lane.b32.xlu1 %v3586_v9, %s2947_s26 }
 0x263   : > { %1608 = vmatprep.subr.bf16.mxu0 %v1526_v27 }
 0x264   : > { %1609 = vmatpush1.bf16.msra.mxu0 %v1525_v45  ;;  %v1439_v46 = vpop.permute.xlu1 %1438  ;;  %v1437_v47 = vpop.permute.xlu0 %1436 }
 0x265   : > { %v1528_v50 = vsel %vm1512_vm6, %v1437_v47, %v1439_v46  ;;  %v1527_v51 = vsel %vm1512_vm6, %v1435_v44, %v1437_v47 }
 0x266   : > { %1822 = vrot.lane.b32.xlu0 %v3574_v4, %s2947_s26  ;;  %1726 = vrot.lane.b32.xlu1 %v3574_v4, %s2944_s23 }
 0x267   : > { %1610 = vmatprep.subr.bf16.mxu0 %v1528_v50 }
 0x268   : > { %1611 = vmatpush1.bf16.msra.mxu0 %v1527_v51  ;;  %v1443_v54 = vpop.permute.xlu1 %1442  ;;  %v1441_v55 = vpop.permute.xlu0 %1440 }
 0x269   : > { %v1529_v61 = vsel %vm1512_vm6, %v1441_v55, %v1443_v54 }
 0x26a   : > { %1728 = vrot.lane.b32.xlu0 %v3591_v10, %s2944_s23  ;;  %1730 = vrot.lane.b32.xlu1 %v3586_v9, %s2944_s23 }
 0x26c   : > { %v1447_v56 = vpop.permute.xlu1 %1446  ;;  %v1445_v59 = vpop.permute.xlu0 %1444 }
 0x26d   : > { %v1530_v60 = vsel %vm1512_vm6, %v1443_v54, %v1445_v59 }
 0x26e   : > { %1740 = vrot.lane.b32.xlu0 %v3524_v26, %s2945_s15  ;;  %1742 = vrot.lane.b32.xlu1 %v3529_v25, %s2945_s15 }
 0x26f   : > { %1612 = vmatprep.subr.bf16.mxu0 %v1530_v60 }
 0x270   : > { %1613 = vmatpush1.bf16.msra.mxu0 %v1529_v61  ;;  %v1451_v62 = vpop.permute.xlu1 %1450  ;;  %v1449_v63 = vpop.permute.xlu0 %1448 }
 0x271   : > { %v1532_v0 = vsel %vm1512_vm6, %v1449_v63, %v1451_v62  ;;  %v1531_v2 = vsel %vm1512_vm6, %v1447_v56, %v1449_v63 }
 0x272   : > { %1744 = vrot.lane.b32.xlu0 %v3542_v49, %s2945_s15  ;;  %2167 = vrot.lane.b32.xlu1 %v3529_v25, %s2944_s23 }
 0x273   : > { %1614 = vmatprep.subr.bf16.mxu0 %v1532_v0 }
 0x274   : > { %1615 = vmatpush1.bf16.msra.mxu0 %v1531_v2  ;;  %v1455_v3 = vpop.permute.xlu1 %1454  ;;  %v1453_v6 = vpop.permute.xlu0 %1452 }
 0x275   : > { %v1533_v12 = vsel %vm1512_vm6, %v1453_v6, %v1455_v3 }
 0x276   : > { %2169 = vrot.lane.b32.xlu0 %v3542_v49, %s2944_s23  ;;  %2165 = vrot.lane.b32.xlu1 %v3524_v26, %s2944_s23 }
 0x278   : > { %v1459_v7 = vpop.permute.xlu1 %1458  ;;  %v1457_v8 = vpop.permute.xlu0 %1456 }
 0x279   : > { %v1534_v11 = vsel %vm1512_vm6, %v1455_v3, %v1457_v8 }
 0x27a   : > { %1748 = vrot.lane.b32.xlu0 %v3552_v53, %s2945_s15  ;;  %1750 = vrot.lane.b32.xlu1 %v3547_v52, %s2945_s15 }
 0x27b   : > { %1616 = vmatprep.subr.bf16.mxu0 %v1534_v11 }
 0x27c   : > { %1617 = vmatpush1.bf16.msra.mxu0 %v1533_v12  ;;  %v1463_v1 = vpop.permute.xlu1 %1462  ;;  %v1461_v13 = vpop.permute.xlu0 %1460 }
 0x27d   : > { %v1536_v14 = vsel %vm1512_vm6, %v1461_v13, %v1463_v1  ;;  %v1535_v15 = vsel %vm1512_vm6, %v1459_v7, %v1461_v13  ;;  %v2774_v13 = vld [vmem:[%s4631_s2 + $0x18] sm:$0xff] }
 0x27e   : > { %2173 = vrot.lane.b32.xlu0 %v3552_v53, %s2944_s23  ;;  %2175 = vrot.lane.b32.xlu1 %v3547_v52, %s2944_s23 }
 0x27f   : > { %1618 = vmatprep.subr.bf16.mxu0 %v1536_v14 }
 0x280   : > { %1619 = vmatpush1.bf16.msra.mxu0 %v1535_v15  ;;  %v1467_v28 = vpop.permute.xlu1 %1466  ;;  %v1465_v29 = vpop.permute.xlu0 %1464 }
 0x281   : > { %v1537_v33 = vsel %vm1512_vm6, %v1465_v29, %v1467_v28  ;;  %v2776_v29 = vcombine.low %v2774_v13, %v2774_v13 }
 0x282   : > { %1746 = vrot.lane.b32.xlu0 %v3537_v48, %s2945_s15  ;;  %2171 = vrot.lane.b32.xlu1 %v3537_v48, %s2944_s23 }
 0x284   : > { %v1471_v30 = vpop.permute.xlu1 %1470  ;;  %v1469_v31 = vpop.permute.xlu0 %1468 }
 0x285   : > { %v1538_v32 = vsel %vm1512_vm6, %v1467_v28, %v1469_v31  ;;  %v2777_v28 = vcombine.high %v2774_v13, %v2774_v13 }
 0x286   : > { %1754 = vrot.lane.b32.xlu0 %v3558_v57, %s2945_s15  ;;  %1756 = vrot.lane.b32.xlu1 %v3579_v5, %s2945_s15 }
 0x287   : > { %1620 = vmatprep.subr.bf16.mxu0 %v1538_v32  ;;  %1628 = vmatprep.mubr.bf16.mxu0 %v2777_v28 }
 0x288   : > { %1621 = vmatpush1.bf16.msra.mxu0 %v1537_v33  ;;  %v1475_v34 = vpop.permute.xlu1 %1474  ;;  %v1473_v35 = vpop.permute.xlu0 %1472 }
 0x289   : > { %v1540_v37 = vsel %vm1512_vm6, %v1473_v35, %v1475_v34  ;;  %v1539_v17 = vsel %vm1512_vm6, %v1471_v30, %v1473_v35  ;;  %v2873_v30 = vld [vmem:[%s4631_s2 + $0x20] ss:$0 sps:$4 sm:$0xff]  }
 0x28a   : > { %2181 = vrot.lane.b32.xlu1 %v3579_v5, %s2944_s23  ;;  %2179 = vrot.lane.b32.xlu0 %v3558_v57, %s2944_s23 }
 0x28b   : > { %1622 = vmatprep.subr.bf16.mxu0 %v1540_v37 }
 0x28c   : > { %1623 = vmatpush1.bf16.msra.mxu0 %v1539_v17  ;;  %v1479_v19 = vpop.permute.xlu1 %1478  ;;  %v1477_v38 = vpop.permute.xlu0 %1476 }
 0x28d   : > { %v1541_v18 = vsel %vm1512_vm6, %v1477_v38, %v1479_v19 }
 0x28e   : > { %2177 = vrot.lane.b32.xlu1 %v3563_v58, %s2944_s23  ;;  %1752 = vrot.lane.b32.xlu0 %v3563_v58, %s2945_s15 }
 0x290   : > { %v1483_v39 = vpop.permute.xlu1 %1482  ;;  %v1481_v40 = vpop.permute.xlu0 %1480 }
 0x291   : > { %v1542_v16 = vsel %vm1512_vm6, %v1479_v19, %v1481_v40 }
 0x292   : > { %1762 = vrot.lane.b32.xlu1 %v3586_v9, %s2945_s15  ;;  %1760 = vrot.lane.b32.xlu0 %v3591_v10, %s2945_s15 }
 0x293   : > { %1624 = vmatprep.subr.bf16.mxu0 %v1542_v16 }
 0x294   : > { %1625 = vmatpush1.bf16.msra.mxu0 %v1541_v18  ;;  %v1487_v20 = vpop.permute.xlu1 %1486  ;;  %v1485_v21 = vpop.permute.xlu0 %1484 }
 0x295   : > { %v1544_v41 = vsel %vm1512_vm6, %v1485_v21, %v1487_v20  ;;  %v1543_v22 = vsel %vm1512_vm6, %v1483_v39, %v1485_v21 }
 0x296   : > { %2187 = vrot.lane.b32.xlu1 %v3586_v9, %s2944_s23  ;;  %2185 = vrot.lane.b32.xlu0 %v3591_v10, %s2944_s23 }
 0x297   : > { %1626 = vmatprep.subr.bf16.mxu0 %v1544_v41 }
 0x298   : > { %1627 = vmatpush1.bf16.msra.mxu0 %v1543_v22  ;;  %v1491_v23 = vpop.permute.xlu1 %1490  ;;  %v1489_v42 = vpop.permute.xlu0 %1488 }
 0x299   : > { %v1545_v27 = vsel %vm1512_vm6, %v1489_v42, %v1491_v23 }
 0x29a   : > { %2183 = vrot.lane.b32.xlu1 %v3574_v4, %s2944_s23  ;;  %1758 = vrot.lane.b32.xlu0 %v3574_v4, %s2945_s15  ;;  %s2951_s23 = smov 80  }
 0x29b   : > { %1629 = vmatmul.mubr.bf16.vlgmr.msra.gmra.mrb[4].mxu0 %v2776_v29  ;;  %v4065_v29 = vld [vmem:[%s3042_s22 + $0x24] ss:$8 sps:$4 sm:$0xff]  }
 0x29c   : > { %v1495_v43 = vpop.permute.xlu1 %1494  ;;  %v1493_v44 = vpop.permute.xlu0 %1492  ;;  %2126 = vmatprep.mubr.bf16.mxu0 %v4634_v36 }
 0x29d   : > { %v1546_v24 = vsel %vm1512_vm6, %v1491_v23, %v1493_v44 }
 0x29e   : > { %1776 = vrot.lane.b32.xlu1 %v3542_v49, %s2946_s25  ;;  %1774 = vrot.lane.b32.xlu0 %v3529_v25, %s2946_s25 }
 0x29f   : > { %1637 = vmatprep.subr.bf16.mxu1 %v1546_v24 }
 0x2a0   : > { %1638 = vmatpush1.bf16.msra.mxu1 %v1545_v27  ;;  %v1499_v45 = vpop.permute.xlu1 %1498  ;;  %v1497_v46 = vpop.permute.xlu0 %1496 }
 0x2a1   : > { %v1548_v47 = vsel %vm1512_vm6, %v1497_v46, %v1499_v45  ;;  %v1547_v50 = vsel %vm1512_vm6, %v1495_v43, %v1497_v46 }
 0x2a2   : > { %2201 = vrot.lane.b32.xlu1 %v3542_v49, %s2945_s15  ;;  %2199 = vrot.lane.b32.xlu0 %v3529_v25, %s2945_s15 }
 0x2a3   : > { %1639 = vmatprep.subr.bf16.mxu1 %v1548_v47 }
 0x2a4   : > { %1640 = vmatpush1.bf16.msra.mxu1 %v1547_v50  ;;  %v1503_v51 = vpop.permute.xlu1 %1502  ;;  %v1501_v54 = vpop.permute.xlu0 %1500 }
 0x2a5   : > { %v1549_v60 = vsel %vm1512_vm6, %v1501_v54, %v1503_v51 }
 0x2a6   : > { %2197 = vrot.lane.b32.xlu1 %v3524_v26, %s2945_s15  ;;  %1772 = vrot.lane.b32.xlu0 %v3524_v26, %s2946_s25 }
 0x2a8   : > { %v1507_v55 = vpop.permute.xlu1 %1506  ;;  %v1505_v56 = vpop.permute.xlu0 %1504 }
 0x2a9   : > { %v1550_v59 = vsel %vm1512_vm6, %v1503_v51, %v1505_v56 }
 0x2aa   : > { %1782 = vrot.lane.b32.xlu1 %v3547_v52, %s2946_s25  ;;  %1780 = vrot.lane.b32.xlu0 %v3552_v53, %s2946_s25 }
 0x2ab   : > { %1641 = vmatprep.subr.bf16.mxu1 %v1550_v59 }
 0x2ac   : > { %1642 = vmatpush1.bf16.msra.mxu1 %v1549_v60  ;;  %v1511_v61 = vpop.permute.xlu1 %1510  ;;  %v1509_v62 = vpop.permute.xlu0 %1508 }
 0x2ad   : > { %v1552_v63 = vsel %vm1512_vm6, %v1509_v62, %v1511_v61  ;;  %v1551_v0 = vsel %vm1512_vm6, %v1507_v55, %v1509_v62 }
 0x2ae   : > { %2207 = vrot.lane.b32.xlu1 %v3547_v52, %s2945_s15  ;;  %2205 = vrot.lane.b32.xlu0 %v3552_v53, %s2945_s15 }
 0x2af   : > { %1643 = vmatprep.subr.bf16.mxu1 %v1552_v63 }
 0x2b0   : > { %1644 = vmatpush1.bf16.msra.mxu1 %v1551_v0  ;;  %v3869_v2 = vpop.permute.xlu1 %1710  ;;  %v3871_v3 = vpop.permute.xlu0 %1708 }
 0x2b2   : > { %2203 = vrot.lane.b32.xlu1 %v3537_v48, %s2945_s15  ;;  %1778 = vrot.lane.b32.xlu0 %v3537_v48, %s2946_s25 }
 0x2b3   : > { %2779 = vmatmul.mubr.msk.bf16.vlgmr.msra.gmra.mrb[12].mxu1 %vm682_vm4, %v2873_v30 }
 0x2b4   : > { %v3877_v6 = vpop.permute.xlu1 %1714  ;;  %v3879_v7 = vpop.permute.xlu0 %1712 }
 0x2b6   : > { %1788 = vrot.lane.b32.xlu1 %v3579_v5, %s2946_s25  ;;  %1786 = vrot.lane.b32.xlu0 %v3558_v57, %s2946_s25 }
 0x2b8   : > { %v3885_v8 = vpop.permute.xlu1 %1718  ;;  %v3887_v11 = vpop.permute.xlu0 %1716 }
 0x2ba   : > { %2213 = vrot.lane.b32.xlu1 %v3579_v5, %s2945_s15  ;;  %2211 = vrot.lane.b32.xlu0 %v3558_v57, %s2945_s15 }
 0x2bc   : > { %v3893_v12 = vpop.permute.xlu1 %1722  ;;  %v3895_v1 = vpop.permute.xlu0 %1720 }
 0x2be   : > { %2209 = vrot.lane.b32.xlu1 %v3563_v58, %s2945_s15  ;;  %1784 = vrot.lane.b32.xlu0 %v3563_v58, %s2946_s25 }
 0x2c0   : > { %v1807_v14 = vpop.permute.xlu1 %1806  ;;  %v3904_v15 = vpop.permute.xlu0 %1724 }
 0x2c2   : > { %1853 = vrot.lane.b32.xlu1 %v3542_v49, %s2951_s23  ;;  %1851 = vrot.lane.b32.xlu0 %v3529_v25, %s2951_s23 }
 0x2c4   : > { %v1805_v31 = vpop.permute.xlu1 %1804  ;;  %v1809_v32 = vpop.permute.xlu0 %1808 }
 0x2c5   : > { %v1829_v33 = vsel %vm653_vm3, %v1807_v14, %v1809_v32  ;;  %v1828_v19 = vsel %vm653_vm3, %v1805_v31, %v1807_v14 }
 0x2c6   : > { %1947 = vrot.lane.b32.xlu0 %v1829_v33, %s2951_s23  ;;  %1949 = vrot.lane.b32.xlu1 %v1809_v32, %s2951_s23  ;;  %v4084_v33 = vld [vmem:[%s3042_s22 + $0x20] ss:$8 sps:$4 sm:$0xff]  }
 0x2c8   : > { %v1815_v34 = vpop.permute.xlu1 %1814  ;;  %v1813_v35 = vpop.permute.xlu0 %1812 }
 0x2c9   : > { %v1831_v22 = vsel %vm653_vm3, %v1813_v35, %v1815_v34 }
 0x2ca   : > { %1792 = vrot.lane.b32.xlu0 %v3591_v10, %s2946_s25  ;;  %1794 = vrot.lane.b32.xlu1 %v3586_v9, %s2946_s25 }
 0x2cc   : > { %v1819_v37 = vpop.permute.xlu1 %1818  ;;  %v1811_v17 = vpop.permute.xlu0 %1810 }
 0x2cd   : > { %v1830_v43 = vsel %vm653_vm3, %v1811_v17, %v1813_v35 }
 0x2ce   : > { %1849 = vrot.lane.b32.xlu0 %v3524_v26, %s2951_s23  ;;  %1945 = vrot.lane.b32.xlu1 %v1828_v19, %s2951_s23  ;;  %v2894_v19 = vld [vmem:[%s3042_s22 + $0x4] ss:$8 sps:$4 sm:$0xff]  }
 0x2d0   : > { %v1817_v38 = vpop.permute.xlu1 %1816  ;;  %v1821_v39 = vpop.permute.xlu0 %1820 }
 0x2d1   : > { %v1833_v54 = vsel %vm653_vm3, %v1819_v37, %v1821_v39  ;;  %v1832_v56 = vsel %vm653_vm3, %v1817_v38, %v1819_v37  ;;  %v2895_v38 = vld [vmem:[%s3037_s21] ss:$8 sps:$4 sm:$0xff]  }
 0x2d2   : > { %2217 = vrot.lane.b32.xlu0 %v3591_v10, %s2945_s15  ;;  %2219 = vrot.lane.b32.xlu1 %v3586_v9, %s2945_s15 }
 0x2d4   : > { %v3930_v40 = vpop.permute.xlu1 %1826  ;;  %v3932_v16 = vpop.permute.xlu0 %1824 }
 0x2d5   : > { %v1835_v13 = vsel %vm653_vm3, %v3932_v16, %v3930_v40 }
 0x2d6   : > { %1790 = vrot.lane.b32.xlu0 %v3574_v4, %s2946_s25  ;;  %2215 = vrot.lane.b32.xlu1 %v3574_v4, %s2945_s15  ;;  %s2952_s15 = smov 64  }
 0x2d8   : > { %v3938_v18 = vpop.permute.xlu1 %1726  ;;  %v3940_v20 = vpop.permute.xlu0 %1822 }
 0x2da   : > { %1857 = vrot.lane.b32.xlu0 %v3552_v53, %s2951_s23  ;;  %1859 = vrot.lane.b32.xlu1 %v3547_v52, %s2951_s23 }
 0x2dc   : > { %v3946_v21 = vpop.permute.xlu1 %1730  ;;  %v3948_v41 = vpop.permute.xlu0 %1728 }
 0x2de   : > { %1955 = vrot.lane.b32.xlu1 %v1815_v34, %s2951_s23  ;;  %1953 = vrot.lane.b32.xlu0 %v1831_v22, %s2951_s23 }
 0x2e0   : > { %v3953_v23 = vpop.permute.xlu1 %1742  ;;  %v3955_v42 = vpop.permute.xlu0 %1740 }
 0x2e2   : > { %1855 = vrot.lane.b32.xlu0 %v3537_v48, %s2951_s23  ;;  %1951 = vrot.lane.b32.xlu1 %v1830_v43, %s2951_s23  ;;  %v4128_v43 = vld [vmem:[%s3037_s21 + $0x30] ss:$8 sps:$4 sm:$0xff]  }
 0x2e4   : > { %v3961_v44 = vpop.permute.xlu1 %2167  ;;  %v3963_v24 = vpop.permute.xlu0 %1744 }
 0x2e6   : > { %2231 = vrot.lane.b32.xlu0 %v3529_v25, %s2946_s25  ;;  %2233 = vrot.lane.b32.xlu1 %v3542_v49, %s2946_s25 }
 0x2e8   : > { %v3969_v27 = vpop.permute.xlu1 %2165  ;;  %v3971_v45 = vpop.permute.xlu0 %2169 }
 0x2ea   : > { %2263 = vrot.lane.b32.xlu0 %v3529_v25, %s2947_s26  ;;  %2265 = vrot.lane.b32.xlu1 %v3542_v49, %s2947_s26 }
 0x2ec   : > { %v3977_v46 = vpop.permute.xlu1 %1750  ;;  %v3979_v47 = vpop.permute.xlu0 %1748 }
 0x2ee   : > { %2229 = vrot.lane.b32.xlu0 %v3524_v26, %s2946_s25  ;;  %2261 = vrot.lane.b32.xlu1 %v3524_v26, %s2947_s26 }
 0x2f0   : > { %v3985_v50 = vpop.permute.xlu1 %2175  ;;  %v3987_v51 = vpop.permute.xlu0 %2173 }
 0x2f2   : > { %1863 = vrot.lane.b32.xlu0 %v3558_v57, %s2951_s23  ;;  %1865 = vrot.lane.b32.xlu1 %v3579_v5, %s2951_s23 }
 0x2f4   : > { %v3993_v25 = vpop.permute.xlu1 %2171  ;;  %v3995_v49 = vpop.permute.xlu0 %1746 }
 0x2f6   : > { %1959 = vrot.lane.b32.xlu0 %v1833_v54, %s2951_s23  ;;  %1961 = vrot.lane.b32.xlu1 %v1821_v39, %s2951_s23  ;;  %v2898_v54 = vld [vmem:[%s3042_s22] ss:$8 sps:$4 sm:$0xff]  }
 0x2f8   : > { %v4000_v26 = vpop.permute.xlu1 %1756  ;;  %v4002_v55 = vpop.permute.xlu0 %1754 }
 0x2fa   : > { %1861 = vrot.lane.b32.xlu0 %v3563_v58, %s2951_s23  ;;  %1957 = vrot.lane.b32.xlu1 %v1832_v56, %s2951_s23 }
 0x2fc   : > { %v4008_v57 = vpop.permute.xlu1 %2181  ;;  %v4010_v59 = vpop.permute.xlu0 %2179 }
 0x2fe   : > { %2237 = vrot.lane.b32.xlu0 %v3552_v53, %s2946_s25  ;;  %2239 = vrot.lane.b32.xlu1 %v3547_v52, %s2946_s25 }
 0x300   : > { %v4016_v60 = vpop.permute.xlu1 %2177  ;;  %v4018_v61 = vpop.permute.xlu0 %1752 }
 0x302   : > { %2269 = vrot.lane.b32.xlu0 %v3552_v53, %s2947_s26  ;;  %2271 = vrot.lane.b32.xlu1 %v3547_v52, %s2947_s26 }
 0x304   : > { %v4024_v58 = vpop.permute.xlu1 %1762  ;;  %v4026_v62 = vpop.permute.xlu0 %1760 }
 0x306   : > { %2235 = vrot.lane.b32.xlu0 %v3537_v48, %s2946_s25  ;;  %2267 = vrot.lane.b32.xlu1 %v3537_v48, %s2947_s26 }
 0x308   : > { %v4032_v63 = vpop.permute.xlu1 %2187  ;;  %v4034_v0 = vpop.permute.xlu0 %2185 }
 0x30a   : > { %1869 = vrot.lane.b32.xlu0 %v3591_v10, %s2951_s23  ;;  %1871 = vrot.lane.b32.xlu1 %v3586_v9, %s2951_s23  ;;  %v1834_v9 = vsel %vm653_vm3, %v3940_v20, %v3932_v16  ;;  %v4116_v16 = vld [vmem:[%s3042_s22 + $0x34] ss:$8 sps:$4 sm:$0xff]  }
 0x30c   : > { %v4040_v52 = vpop.permute.xlu1 %2183  ;;  %v4042_v53 = vpop.permute.xlu0 %1758 }
 0x30e   : > { %1967 = vrot.lane.b32.xlu1 %v3930_v40, %s2951_s23  ;;  %1965 = vrot.lane.b32.xlu0 %v1835_v13, %s2951_s23 }
 0x310   : > { %v4050_v48 = vpop.permute.xlu1 %1776  ;;  %v4052_v10 = vpop.permute.xlu0 %1774 }
 0x312   : > { %1867 = vrot.lane.b32.xlu0 %v3574_v4, %s2951_s23  ;;  %1963 = vrot.lane.b32.xlu1 %v1834_v9, %s2951_s23 }
 0x314   : > { %v4060_v14 = vpop.permute.xlu1 %2201  ;;  %v4062_v28 = vpop.permute.xlu0 %2199 }
 0x316   : > { %2243 = vrot.lane.b32.xlu0 %v4065_v29, %s2946_s25  ;;  %2245 = vrot.lane.b32.xlu1 %v3579_v5, %s2946_s25 }
 0x318   : > { %v4071_v30 = vpop.permute.xlu1 %2197  ;;  %v4073_v31 = vpop.permute.xlu0 %1772 }
 0x31a   : > { %2275 = vrot.lane.b32.xlu0 %v4065_v29, %s2947_s26  ;;  %2277 = vrot.lane.b32.xlu1 %v3579_v5, %s2947_s26  ;;  %v1733_v5 = vsel %vm530_vm0, %v3869_v2, %v3879_v7 }
 0x31c   : > { %v4079_v4 = vpop.permute.xlu1 %1782  ;;  %v4081_v32 = vpop.permute.xlu0 %1780 }
 0x31e   : > { %2241 = vrot.lane.b32.xlu0 %v4084_v33, %s2946_s25  ;;  %2273 = vrot.lane.b32.xlu1 %v4084_v33, %s2947_s26 }
 0x320   : > { %v4090_v34 = vpop.permute.xlu1 %2207  ;;  %v4092_v35 = vpop.permute.xlu0 %2205 }
 0x322   : > { %1875 = vrot.lane.b32.xlu0 %v1733_v5, %s2951_s23  ;;  %1877 = vrot.lane.b32.xlu1 %v3879_v7, %s2951_s23  ;;  %v1732_v7 = vsel %vm530_vm0, %v3871_v3, %v3869_v2  ;;  %v4142_v5 = vld [vmem:[%s3042_s22 + $0x30] ss:$8 sps:$4 sm:$0xff]  }
 0x324   : > { %v4100_v37 = vpop.permute.xlu1 %2203  ;;  %v4102_v17 = vpop.permute.xlu0 %1778 }
 0x326   : > { %2308 = vrot.lane.b32.xlu0 %v2894_v19, %s2952_s15  ;;  %2310 = vrot.lane.b32.xlu1 %v2895_v38, %s2952_s15 }
 0x328   : > { %v4108_v39 = vpop.permute.xlu1 %1788  ;;  %v4110_v40 = vpop.permute.xlu0 %1786 }
 0x32a   : > { %2249 = vrot.lane.b32.xlu1 %v4116_v16, %s2946_s25  ;;  %1873 = vrot.lane.b32.xlu0 %v1732_v7, %s2951_s23  ;;  %v1735_v7 = vsel %vm530_vm0, %v3887_v11, %v3885_v8 }
 0x32c   : > { %v4121_v20 = vpop.permute.xlu1 %2213  ;;  %v4123_v22 = vpop.permute.xlu0 %2211 }
 0x32d   : > { %4637 = vst [vmem:[#allocation6_spill] sm:$0xff] %v4123_v22 }
 0x32e   : > { %2281 = vrot.lane.b32.xlu1 %v4116_v16, %s2947_s26  ;;  %2251 = vrot.lane.b32.xlu0 %v4128_v43, %s2946_s25 }
 0x330   : > { %v4132_v2 = vpop.permute.xlu1 %2209  ;;  %v4134_v3 = vpop.permute.xlu0 %1784 }
 0x331   : > { %4638 = vst [vmem:[#allocation7_spill] sm:$0xff] %v4132_v2  ;;  %4639 = vst [vmem:[#allocation8_spill] sm:$0xff] %v4134_v3  ;;  %v2901_v3 = vld [vmem:[%s3042_s22 + $0x14] ss:$8 sps:$4 sm:$0xff]  }
 0x332   : > { %2306 = vrot.lane.b32.xlu1 %v2898_v54, %s2952_s15  ;;  %2283 = vrot.lane.b32.xlu0 %v4128_v43, %s2947_s26 }
 0x334   : > { %v1854_v56 = vpop.permute.xlu1 %1853  ;;  %v1852_v13 = vpop.permute.xlu0 %1851 }
 0x335   : > { %v1971_v9 = vsel %vm1969_vm7, %v1852_v13, %v1854_v56 }
 0x336   : > { %2279 = vrot.lane.b32.xlu1 %v4142_v5, %s2947_s26  ;;  %2247 = vrot.lane.b32.xlu0 %v4142_v5, %s2946_s25 }
 0x337   : > { %2053 = vmatprep.subr.bf16.mxu1 %v1971_v9  ;;  %v2900_v9 = vld [vmem:[%s3037_s21 + $0x10] ss:$8 sps:$4 sm:$0xff]  }
 0x338   : > { %v1950_v19 = vpop.permute.xlu1 %1949  ;;  %v1948_v38 = vpop.permute.xlu0 %1947 }
 0x339   : > { %v2003_v54 = vsel %vm1969_vm7, %v1948_v38, %v1950_v19 }
 0x33a   : > { %1883 = vrot.lane.b32.xlu1 %v3885_v8, %s2951_s23  ;;  %1881 = vrot.lane.b32.xlu0 %v1735_v7, %s2951_s23  ;;  %v1734_v7 = vsel %vm530_vm0, %v3877_v6, %v3887_v11 }
 0x33b   : > { %2094 = vmatprep.subr.bf16.mxu0 %v2003_v54  ;;  %v2902_v54 = vld [vmem:[%s3042_s22 + $0x10] ss:$8 sps:$4 sm:$0xff]  }
 0x33c   : > { %v4155_v56 = vpop.permute.xlu1 %1794  ;;  %v4157_v36 = vpop.permute.xlu0 %1792 }
 0x33e   : > { %2316 = vrot.lane.b32.xlu1 %v2900_v9, %s2952_s15  ;;  %2314 = vrot.lane.b32.xlu0 %v2901_v3, %s2952_s15 }
 0x340   : > { %v1946_v2 = vpop.permute.xlu1 %1945  ;;  %v1850_v22 = vpop.permute.xlu0 %1849 }
 0x341   : > { %v2002_v19 = vsel %vm1969_vm7, %v1946_v2, %v1948_v38  ;;  %v1970_v8 = vsel %vm1969_vm7, %v1850_v22, %v1852_v13  ;;  %v1737_v2 = vsel %vm530_vm0, %v3893_v12, %v3904_v15  ;;  %v2903_v22 = vld [vmem:[%s3037_s21 + $0x20] ss:$8 sps:$4 sm:$0xff]  }
 0x342   : > { %2312 = vrot.lane.b32.xlu1 %v2902_v54, %s2952_s15  ;;  %1879 = vrot.lane.b32.xlu0 %v1734_v7, %s2951_s23 }
 0x343   : > { %2054 = vmatpush1.bf16.msra.mxu1 %v1970_v8  ;;  %2095 = vmatpush1.bf16.msra.mxu0 %v2002_v19  ;;  %v1736_v19 = vsel %vm530_vm0, %v3895_v1, %v3893_v12 }
 0x344   : > { %v4171_v9 = vpop.permute.xlu1 %2219  ;;  %v4173_v3 = vpop.permute.xlu0 %2217 }
 0x346   : > { %1889 = vrot.lane.b32.xlu1 %v3904_v15, %s2951_s23  ;;  %1887 = vrot.lane.b32.xlu0 %v1737_v2, %s2951_s23 }
 0x348   : > { %v4181_v6 = vpop.permute.xlu1 %2215  ;;  %v4183_v11 = vpop.permute.xlu0 %1790 }
 0x34a   : > { %2322 = vrot.lane.b32.xlu1 %v2903_v22, %s2952_s15  ;;  %2320 = vrot.lane.b32.xlu0 %v4065_v29, %s2952_s15  ;;  %v1739_v29 = vsel %vm530_vm0, %v3948_v41, %v3946_v21 }
 0x34c   : > { %v1860_v13 = vpop.permute.xlu1 %1859  ;;  %v1858_v38 = vpop.permute.xlu0 %1857 }
 0x34d   : > { %v1973_v15 = vsel %vm1969_vm7, %v1858_v38, %v1860_v13  ;;  %v1738_v13 = vsel %vm530_vm0, %v3938_v18, %v3948_v41  ;;  %v2190_v41 = vsel %vm530_vm0, %v3961_v44, %v3971_v45 }
 0x34e   : > { %2318 = vrot.lane.b32.xlu1 %v4084_v33, %s2952_s15  ;;  %1885 = vrot.lane.b32.xlu0 %v1736_v19, %s2951_s23 }
 0x34f   : > { %2055 = vmatprep.subr.bf16.mxu1 %v1973_v15 }
 0x350   : > { %v1956_v8 = vpop.permute.xlu1 %1955  ;;  %v1954_v7 = vpop.permute.xlu0 %1953 }
 0x351   : > { %v2005_v54 = vsel %vm1969_vm7, %v1954_v7, %v1956_v8  ;;  %v2189_v8 = vsel %vm530_vm0, %v3969_v27, %v3961_v44 }
 0x352   : > { %1895 = vrot.lane.b32.xlu1 %v3946_v21, %s2951_s23  ;;  %1893 = vrot.lane.b32.xlu0 %v1739_v29, %s2951_s23 }
 0x353   : > { %2096 = vmatprep.subr.bf16.mxu0 %v2005_v54  ;;  %v1767_v54 = vsel %vm571_vm1, %v3979_v47, %v3977_v46 }
 0x354   : > { %v1952_v12 = vpop.permute.xlu1 %1951  ;;  %v1856_v1 = vpop.permute.xlu0 %1855 }
 0x355   : > { %v2004_v33 = vsel %vm1969_vm7, %v1952_v12, %v1954_v7  ;;  %v1972_v2 = vsel %vm1969_vm7, %v1856_v1, %v1858_v38  ;;  %v2192_v1 = vsel %vm530_vm0, %v3987_v51, %v3985_v50 }
 0x356   : > { %2328 = vrot.lane.b32.xlu1 %v4128_v43, %s2952_s15  ;;  %2326 = vrot.lane.b32.xlu0 %v4116_v16, %s2952_s15  ;;  %v1765_v16 = vsel %vm571_vm1, %v3953_v23, %v3963_v24 }
 0x357   : > { %2056 = vmatpush1.bf16.msra.mxu1 %v1972_v2  ;;  %2097 = vmatpush1.bf16.msra.mxu0 %v2004_v33  ;;  %v2191_v2 = vsel %vm530_vm0, %v3993_v25, %v3987_v51  ;;  %v2194_v25 = vsel %vm530_vm0, %v4010_v59, %v4008_v57 }
 0x358   : > { %v4209_v22 = vpop.permute.xlu1 %2233  ;;  %v4211_v21 = vpop.permute.xlu0 %2231 }
 0x35a   : > { %2324 = vrot.lane.b32.xlu1 %v4142_v5, %s2952_s15  ;;  %1891 = vrot.lane.b32.xlu0 %v1738_v13, %s2951_s23  ;;  %v1766_v13 = vsel %vm571_vm1, %v3995_v49, %v3979_v47 }
 0x35c   : > { %v4219_v38 = vpop.permute.xlu1 %2265  ;;  %v4221_v43 = vpop.permute.xlu0 %2263 }
 0x35e   : > { %1901 = vrot.lane.b32.xlu1 %v3963_v24, %s2951_s23  ;;  %1899 = vrot.lane.b32.xlu0 %v1765_v16, %s2951_s23  ;;  %v1764_v24 = vsel %vm571_vm1, %v3955_v42, %v3953_v23 }
 0x360   : > { %v4229_v19 = vpop.permute.xlu1 %2261  ;;  %v4231_v18 = vpop.permute.xlu0 %2229 }
 0x362   : > { %2334 = vrot.lane.b32.xlu1 %v3971_v45, %s2952_s15  ;;  %2332 = vrot.lane.b32.xlu0 %v2190_v41, %s2952_s15  ;;  %v1769_v41 = vsel %vm571_vm1, %v4002_v55, %v4000_v26 }
 0x364   : > { %v1866_v5 = vpop.permute.xlu1 %1865  ;;  %v1864_v15 = vpop.permute.xlu0 %1863 }
 0x365   : > { %v1975_v7 = vsel %vm1969_vm7, %v1864_v15, %v1866_v5 }
 0x366   : > { %2330 = vrot.lane.b32.xlu1 %v2189_v8, %s2952_s15  ;;  %1897 = vrot.lane.b32.xlu0 %v1764_v24, %s2951_s23 }
 0x367   : > { %2057 = vmatprep.subr.bf16.mxu1 %v1975_v7  ;;  %v1771_v7 = vsel %vm571_vm1, %v4026_v62, %v4024_v58 }
 0x368   : > { %v1962_v45 = vpop.permute.xlu1 %1961  ;;  %v1960_v29 = vpop.permute.xlu0 %1959 }
 0x369   : > { %v2007_v12 = vsel %vm1969_vm7, %v1960_v29, %v1962_v45 }
 0x36a   : > { %1907 = vrot.lane.b32.xlu1 %v3977_v46, %s2951_s23  ;;  %1905 = vrot.lane.b32.xlu0 %v1767_v54, %s2951_s23 }
 0x36b   : > { %2098 = vmatprep.subr.bf16.mxu0 %v2007_v12 }
 0x36c   : > { %v1958_v23 = vpop.permute.xlu1 %1957  ;;  %v1862_v42 = vpop.permute.xlu0 %1861 }
 0x36d   : > { %v2006_v44 = vsel %vm1969_vm7, %v1958_v23, %v1960_v29  ;;  %v1974_v27 = vsel %vm1969_vm7, %v1862_v42, %v1864_v15  ;;  %v1768_v15 = vsel %vm571_vm1, %v4018_v61, %v4002_v55  ;;  %v2196_v29 = vsel %vm530_vm0, %v4034_v0, %v4032_v63 }
 0x36e   : > { %2340 = vrot.lane.b32.xlu1 %v3985_v50, %s2952_s15  ;;  %2338 = vrot.lane.b32.xlu0 %v2192_v1, %s2952_s15  ;;  %v2195_v23 = vsel %vm530_vm0, %v4040_v52, %v4034_v0  ;;  %v2222_v52 = vsel %vm571_vm1, %v4062_v28, %v4060_v14 }
 0x36f   : > { %2058 = vmatpush1.bf16.msra.mxu1 %v1974_v27  ;;  %2099 = vmatpush1.bf16.msra.mxu0 %v2006_v44  ;;  %v1797_v27 = vsel %vm612_vm2, %v4052_v10, %v4050_v48 }
 0x370   : > { %v4263_v46 = vpop.permute.xlu1 %2239  ;;  %v4265_v33 = vpop.permute.xlu0 %2237 }
 0x372   : > { %2336 = vrot.lane.b32.xlu1 %v2191_v2, %s2952_s15  ;;  %1903 = vrot.lane.b32.xlu0 %v1766_v13, %s2951_s23  ;;  %v1796_v2 = vsel %vm612_vm2, %v4073_v31, %v4052_v10  ;;  %v2224_v31 = vsel %vm571_vm1, %v4092_v35, %v4090_v34 }
 0x374   : > { %v4275_v50 = vpop.permute.xlu1 %2271  ;;  %v4277_v16 = vpop.permute.xlu0 %2269 }
 0x376   : > { %1913 = vrot.lane.b32.xlu1 %v4000_v26, %s2951_s23  ;;  %1911 = vrot.lane.b32.xlu0 %v1769_v41, %s2951_s23  ;;  %v2193_v26 = vsel %vm530_vm0, %v4016_v60, %v4010_v59 }
 0x378   : > { %v4285_v51 = vpop.permute.xlu1 %2267  ;;  %v4287_v47 = vpop.permute.xlu0 %2235 }
 0x37a   : > { %2346 = vrot.lane.b32.xlu1 %v4008_v57, %s2952_s15  ;;  %2344 = vrot.lane.b32.xlu0 %v2194_v25, %s2952_s15  ;;  %v1799_v25 = vsel %vm612_vm2, %v4081_v32, %v4079_v4 }
 0x37c   : > { %v1872_v49 = vpop.permute.xlu1 %1871  ;;  %v1870_v5 = vpop.permute.xlu0 %1869 }
 0x37d   : > { %v1977_v24 = vsel %vm1969_vm7, %v1870_v5, %v1872_v49 }
 0x37e   : > { %2342 = vrot.lane.b32.xlu1 %v2193_v26, %s2952_s15  ;;  %1909 = vrot.lane.b32.xlu0 %v1768_v15, %s2951_s23  ;;  %v1798_v15 = vsel %vm612_vm2, %v4102_v17, %v4081_v32  ;;  %v1801_v32 = vsel %vm612_vm2, %v4110_v40, %v4108_v39 }
 0x37f   : > { %2059 = vmatprep.subr.bf16.mxu1 %v1977_v24 }
 0x380   : > { %v1968_v57 = vpop.permute.xlu1 %1967  ;;  %v1966_v8 = vpop.permute.xlu0 %1965 }
 0x381   : > { %v2009_v45 = vsel %vm1969_vm7, %v1966_v8, %v1968_v57 }
 0x382   : > { %1919 = vrot.lane.b32.xlu1 %v4024_v58, %s2951_s23  ;;  %1917 = vrot.lane.b32.xlu0 %v1771_v7, %s2951_s23  ;;  %v2874_v58 = vld [vmem:[%s4631_s2 + $0x2c] ss:$0 sps:$4 sm:$0xff]  }
 0x383   : > { %2100 = vmatprep.subr.bf16.mxu0 %v2009_v45 }
 0x384   : > { %v1964_v55 = vpop.permute.xlu1 %1963  ;;  %v1868_v59 = vpop.permute.xlu0 %1867 }
 0x385   : > { %v2008_v60 = vsel %vm1969_vm7, %v1964_v55, %v1966_v8  ;;  %v1976_v61 = vsel %vm1969_vm7, %v1868_v59, %v1870_v5  ;;  %v4640_v55 = vld [vmem:[#allocation6_spill] sm:$0xff] }
 0x386   : > { %2352 = vrot.lane.b32.xlu1 %v4032_v63, %s2952_s15  ;;  %2350 = vrot.lane.b32.xlu0 %v2196_v29, %s2952_s15  ;;  %v1770_v63 = vsel %vm571_vm1, %v4042_v53, %v4026_v62  ;;  %v2226_v59 = vsel %vm571_vm1, %v4640_v55, %v4121_v20 }
 0x387   : > { %2060 = vmatpush1.bf16.msra.mxu1 %v1976_v61  ;;  %2101 = vmatpush1.bf16.msra.mxu0 %v2008_v60  ;;  %v4641_v61 = vld [vmem:[#allocation7_spill] sm:$0xff] }
 0x388   : > { %v4322_v54 = vpop.permute.xlu1 %2245  ;;  %v4324_v12 = vpop.permute.xlu0 %2243  ;;  %v2225_v29 = vsel %vm571_vm1, %v4641_v61, %v4640_v55  ;;  %v2255_v61 = vsel %vm612_vm2, %v4287_v47, %v4265_v33 }
 0x38a   : > { %2348 = vrot.lane.b32.xlu1 %v2195_v23, %s2952_s15  ;;  %1915 = vrot.lane.b32.xlu0 %v1770_v63, %s2951_s23 }
 0x38b   : > { %2785 = vmatmul.mubr.msk.bf16.vlgmr.msra.gmra.mrb[8].mxu0 %vm682_vm4, %v2874_v58  ;;  %v4642_v58 = vld [vmem:[#allocation8_spill] sm:$0xff] }
 0x38c   : > { %v4335_v42 = vpop.permute.xlu1 %2277  ;;  %v4337_v44 = vpop.permute.xlu0 %2275  ;;  %v1800_v23 = vsel %vm612_vm2, %v4642_v58, %v4110_v40  ;;  %v1803_v40 = vsel %vm612_vm2, %v4157_v36, %v4155_v56 }
 0x38e   : > { %1925 = vrot.lane.b32.xlu1 %v4050_v48, %s2951_s23  ;;  %1923 = vrot.lane.b32.xlu0 %v1797_v27, %s2951_s23  ;;  %v2221_v48 = vsel %vm571_vm1, %v4071_v30, %v4062_v28 }
 0x390   : > { %v4345_v62 = vpop.permute.xlu1 %2273  ;;  %v4347_v0 = vpop.permute.xlu0 %2241 }
 0x392   : > { %2358 = vrot.lane.b32.xlu1 %v4060_v14, %s2952_s15  ;;  %2356 = vrot.lane.b32.xlu0 %v2222_v52, %s2952_s15 }
 0x394   : > { %v1878_v53 = vpop.permute.xlu1 %1877  ;;  %v1876_v1 = vpop.permute.xlu0 %1875 }
 0x395   : > { %v1979_v13 = vsel %vm1969_vm7, %v1876_v1, %v1878_v53 }
 0x396   : > { %2354 = vrot.lane.b32.xlu1 %v2221_v48, %s2952_s15  ;;  %1921 = vrot.lane.b32.xlu0 %v1796_v2, %s2951_s23 }
 0x397   : > { %2061 = vmatprep.subr.bf16.mxu1 %v1979_v13 }
 0x398   : > { %v2311_v14 = vpop.permute.xlu1 %2310  ;;  %v2309_v41 = vpop.permute.xlu0 %2308 }
 0x399   : > { %v2428_v49 = vsel %vm682_vm4, %v2309_v41, %v2311_v14 }
 0x39a   : > { %1931 = vrot.lane.b32.xlu1 %v4079_v4, %s2951_s23  ;;  %1929 = vrot.lane.b32.xlu0 %v1799_v25, %s2951_s23  ;;  %v2223_v4 = vsel %vm571_vm1, %v4100_v37, %v4092_v35 }
 0x39b   : > { %2510 = vmatprep.subr.bf16.mxu0 %v2428_v49  ;;  %v2227_v49 = vsel %vm571_vm1, %v4181_v6, %v4173_v3 }
 0x39c   : > { %v2250_v10 = vpop.permute.xlu1 %2249  ;;  %v1874_v28 = vpop.permute.xlu0 %1873 }
 0x39d   : > { %v1978_v30 = vsel %vm1969_vm7, %v1874_v28, %v1876_v1 }
 0x39e   : > { %2364 = vrot.lane.b32.xlu1 %v4090_v34, %s2952_s15  ;;  %2362 = vrot.lane.b32.xlu0 %v2224_v31, %s2952_s15  ;;  %v2254_v31 = vsel %vm612_vm2, %v4211_v21, %v4209_v22 }
 0x39f   : > { %2062 = vmatpush1.bf16.msra.mxu1 %v1978_v30 }
 0x3a0   : > { %v2282_v5 = vpop.permute.xlu1 %2281  ;;  %v4378_v26 = vpop.permute.xlu0 %2251 }
 0x3a1   : > { %v4388_v24 = vsel %vm612_vm2, %v2250_v10, %v4378_v26 }
 0x3a2   : > { %2360 = vrot.lane.b32.xlu1 %v2223_v4, %s2952_s15  ;;  %1927 = vrot.lane.b32.xlu0 %v1798_v15, %s2951_s23  ;;  %v2286_v4 = vsel %vm653_vm3, %v4221_v43, %v4219_v38 }
 0x3a4   : > { %v2307_v34 = vpop.permute.xlu1 %2306  ;;  %v4392_v57 = vpop.permute.xlu0 %2283 }
 0x3a5   : > { %v2427_v8 = vsel %vm682_vm4, %v2307_v34, %v2309_v41  ;;  %v4397_v35 = vsel %vm653_vm3, %v2282_v5, %v4392_v57  ;;  %v2228_v41 = vsel %vm571_vm1, %v4173_v3, %v4171_v9  ;;  %v2285_v34 = vsel %vm653_vm3, %v4229_v19, %v4221_v43 }
 0x3a6   : > { %1937 = vrot.lane.b32.xlu1 %v4108_v39, %s2951_s23  ;;  %1935 = vrot.lane.b32.xlu0 %v1801_v32, %s2951_s23 }
 0x3a7   : > { %2511 = vmatpush1.bf16.msra.mxu0 %v2427_v8  ;;  %v2253_v8 = vsel %vm612_vm2, %v4231_v18, %v4211_v21 }
 0x3a8   : > { %v2280_v37 = vpop.permute.xlu1 %2279  ;;  %v2248_v17 = vpop.permute.xlu0 %2247 }
 0x3a9   : > { %v4406_v7 = vsel %vm653_vm3, %v2280_v37, %v2282_v5  ;;  %v4409_v45 = vsel %vm612_vm2, %v2248_v17, %v2250_v10  ;;  %v1802_v10 = vsel %vm612_vm2, %v4183_v11, %v4157_v36  ;;  %v2256_v17 = vsel %vm612_vm2, %v4265_v33, %v4263_v46 }
 0x3aa   : > { %2370 = vrot.lane.b32.xlu1 %v4121_v20, %s2952_s15  ;;  %2368 = vrot.lane.b32.xlu0 %v2226_v59, %s2952_s15  ;;  %v4429_v20 = vld [vmem:[%s4631_s2 + $0x24] sm:$0xff]  ;;  %v2288_v59 = vsel %vm653_vm3, %v4277_v16, %v4275_v50 }
 0x3ab   : > { %v2783_v27 = vcombine.high %v4429_v20, %v4429_v20 }
 0x3ac   : > { %v1884_v39 = vpop.permute.xlu1 %1883  ;;  %v1882_v60 = vpop.permute.xlu0 %1881 }
 0x3ad   : > { %v1981_v63 = vsel %vm1969_vm7, %v1882_v60, %v1884_v39  ;;  %2085 = vmatprep.mubr.bf16.mxu1 %v2783_v27  ;;  %v2290_v27 = vsel %vm653_vm3, %v4337_v44, %v4335_v42 }
 0x3ae   : > { %2366 = vrot.lane.b32.xlu1 %v2225_v29, %s2952_s15  ;;  %1933 = vrot.lane.b32.xlu0 %v1800_v23, %s2951_s23  ;;  %v2258_v23 = vsel %vm612_vm2, %v4324_v12, %v4322_v54 }
 0x3af   : > { %2063 = vmatprep.subr.bf16.mxu1 %v1981_v63 }
 0x3b0   : > { %v2317_v52 = vpop.permute.xlu1 %2316  ;;  %v2315_v53 = vpop.permute.xlu0 %2314 }
 0x3b1   : > { %v2430_v1 = vsel %vm682_vm4, %v2315_v53, %v2317_v52 }
 0x3b2   : > { %1943 = vrot.lane.b32.xlu1 %v4155_v56, %s2951_s23  ;;  %1941 = vrot.lane.b32.xlu0 %v1803_v40, %s2951_s23  ;;  %v2257_v40 = vsel %vm612_vm2, %v4347_v0, %v4324_v12  ;;  %v761_v12 = vpop.f32.mrb[0].mxu1  ;;  %v720_v0 = vpop.f32.mrb[0].mxu0 }
 0x3b3   : > { %2512 = vmatprep.subr.bf16.mxu0 %v2430_v1 }
 0x3b4   : > { %v2313_v48 = vpop.permute.xlu1 %2312  ;;  %v1880_v2 = vpop.permute.xlu0 %1879 }
 0x3b5   : > { %v2429_v13 = vsel %vm682_vm4, %v2313_v48, %v2315_v53  ;;  %v1980_v14 = vsel %vm1969_vm7, %v1880_v2, %v1882_v60  ;;  %v2287_v60 = vsel %vm653_vm3, %v4285_v51, %v4277_v16  ;;  %v2289_v53 = vsel %vm653_vm3, %v4345_v62, %v4337_v44 }
 0x3b6   : > { %2376 = vrot.lane.b32.xlu1 %v4171_v9, %s2952_s15  ;;  %2374 = vrot.lane.b32.xlu0 %v2228_v41, %s2952_s15  ;;  %v722_v41 = vpop.f32.mrb[1].mxu0 }
 0x3b7   : > { %2064 = vmatpush1.bf16.msra.mxu1 %v1980_v14  ;;  %2513 = vmatpush1.bf16.msra.mxu0 %v2429_v13  ;;  %v763_v13 = vpop.f32.mrb[1].mxu1  ;;  %v762_v14 = vadd.f32 %v761_v12, %v720_v0 }
 0x3b8   : > { %v1890_v56 = vpop.permute.xlu1 %1889  ;;  %v1888_v25 = vpop.permute.xlu0 %1887 }
 0x3b9   : > { %v1983_v28 = vsel %vm1969_vm7, %v1888_v25, %v1890_v56  ;;  %v765_v56 = vpop.f32.mrb[2].mxu1 }
 0x3ba   : > { %2372 = vrot.lane.b32.xlu1 %v2227_v49, %s2952_s15  ;;  %1939 = vrot.lane.b32.xlu0 %v1802_v10, %s2951_s23  ;;  %v724_v49 = vpop.f32.mrb[2].mxu0 }
 0x3bb   : > { %2065 = vmatprep.subr.bf16.mxu1 %v1983_v28 }
 0x3bc   : > { %v2323_v9 = vpop.permute.xlu1 %2322  ;;  %v2321_v30 = vpop.permute.xlu0 %2320 }
 0x3bd   : > { %v2432_v5 = vsel %vm682_vm4, %v2321_v30, %v2323_v9 }
 0x3be   : > { %2382 = vrot.lane.b32.xlu1 %v4209_v22, %s2952_s15  ;;  %2380 = vrot.lane.b32.xlu0 %v2254_v31, %s2952_s15  ;;  %v766_v31 = vpop.f32.mrb[3].mxu1 }
 0x3bf   : > { %2514 = vmatprep.subr.bf16.mxu0 %v2432_v5  ;;  %v725_v5 = vpop.f32.mrb[3].mxu0 }
 0x3c0   : > { %v2319_v36 = vpop.permute.xlu1 %2318  ;;  %v1886_v3 = vpop.permute.xlu0 %1885 }
 0x3c1   : > { %v2431_v6 = vsel %vm682_vm4, %v2319_v36, %v2321_v30  ;;  %v1982_v11 = vsel %vm1969_vm7, %v1886_v3, %v1888_v25  ;;  %v764_v25 = vadd.f32 %v763_v13, %v722_v41 }
 0x3c2   : > { %2406 = vrot.lane.b32.xlu1 %v4219_v38, %s2952_s15  ;;  %2404 = vrot.lane.b32.xlu0 %v2286_v4, %s2952_s15 }
 0x3c3   : > { %2066 = vmatpush1.bf16.msra.mxu1 %v1982_v11  ;;  %2515 = vmatpush1.bf16.msra.mxu0 %v2431_v6 }
 0x3c4   : > { %v1896_v22 = vpop.permute.xlu1 %1895  ;;  %v1894_v15 = vpop.permute.xlu0 %1893 }
 0x3c5   : > { %v1985_v32 = vsel %vm1969_vm7, %v1894_v15, %v1896_v22 }
 0x3c6   : > { %2402 = vrot.lane.b32.xlu1 %v2285_v34, %s2952_s15  ;;  %2378 = vrot.lane.b32.xlu0 %v2253_v8, %s2952_s15  ;;  %v2600_v8 = vld [vmem:[%s4632_s3] sm:$0xff] }
 0x3c7   : > { %2067 = vmatprep.subr.bf16.mxu1 %v1985_v32 }
 0x3c8   : > { %v2329_v38 = vpop.permute.xlu1 %2328  ;;  %v2327_v37 = vpop.permute.xlu0 %2326 }
 0x3c9   : > { %v2434_v55 = vsel %vm682_vm4, %v2327_v37, %v2329_v38 }
 0x3ca   : > { %2388 = vrot.lane.b32.xlu1 %v4263_v46, %s2952_s15  ;;  %2386 = vrot.lane.b32.xlu0 %v2256_v17, %s2952_s15 }
 0x3cb   : > { %2516 = vmatprep.subr.bf16.mxu0 %v2434_v55 }
 0x3cc   : > { %v2325_v21 = vpop.permute.xlu1 %2324  ;;  %v1892_v43 = vpop.permute.xlu0 %1891 }
 0x3cd   : > { %v2433_v19 = vsel %vm682_vm4, %v2325_v21, %v2327_v37  ;;  %v1984_v18 = vsel %vm1969_vm7, %v1892_v43, %v1894_v15 }
 0x3ce   : > { %2412 = vrot.lane.b32.xlu1 %v4275_v50, %s2952_s15  ;;  %2410 = vrot.lane.b32.xlu0 %v2288_v59, %s2952_s15 }
 0x3cf   : > { %2068 = vmatpush1.bf16.msra.mxu1 %v1984_v18  ;;  %2517 = vmatpush1.bf16.msra.mxu0 %v2433_v19 }
 0x3d0   : > { %v1902_v46 = vpop.permute.xlu1 %1901  ;;  %v1900_v39 = vpop.permute.xlu0 %1899 }
 0x3d1   : > { %v1987_v29 = vsel %vm1969_vm7, %v1900_v39, %v1902_v46 }
 0x3d2   : > { %2408 = vrot.lane.b32.xlu1 %v2287_v60, %s2952_s15  ;;  %2384 = vrot.lane.b32.xlu0 %v2255_v61, %s2952_s15 }
 0x3d3   : > { %2069 = vmatprep.subr.bf16.mxu1 %v1987_v29 }
 0x3d4   : > { %v2335_v50 = vpop.permute.xlu1 %2334  ;;  %v2333_v58 = vpop.permute.xlu0 %2332 }
 0x3d5   : > { %v2436_v63 = vsel %vm682_vm4, %v2333_v58, %v2335_v50 }
 0x3d6   : > { %2394 = vrot.lane.b32.xlu1 %v4322_v54, %s2952_s15  ;;  %2392 = vrot.lane.b32.xlu0 %v2258_v23, %s2952_s15 }
 0x3d7   : > { %2518 = vmatprep.subr.bf16.mxu0 %v2436_v63 }
 0x3d8   : > { %v2331_v33 = vpop.permute.xlu1 %2330  ;;  %v1898_v16 = vpop.permute.xlu0 %1897 }
 0x3d9   : > { %v2435_v51 = vsel %vm682_vm4, %v2331_v33, %v2333_v58  ;;  %v1986_v47 = vsel %vm1969_vm7, %v1898_v16, %v1900_v39 }
 0x3da   : > { %2418 = vrot.lane.b32.xlu1 %v4335_v42, %s2952_s15  ;;  %2416 = vrot.lane.b32.xlu0 %v2290_v27, %s2952_s15  ;;  %v4532_v42 = vld [vmem:[%s4631_s2 + $0x30] sm:$0xff] }
 0x3db   : > { %2070 = vmatpush1.bf16.msra.mxu1 %v1986_v47  ;;  %2519 = vmatpush1.bf16.msra.mxu0 %v2435_v51  ;;  %v2789_v48 = vcombine.high %v4532_v42, %v4532_v42 }
 0x3dc   : > { %v1908_v54 = vpop.permute.xlu1 %1907  ;;  %v1906_v52 = vpop.permute.xlu0 %1905 }
 0x3dd   : > { %v1989_v1 = vsel %vm1969_vm7, %v1906_v52, %v1908_v54  ;;  %2542 = vmatprep.mubr.bf16.mxu0 %v2789_v48 }
 0x3de   : > { %2414 = vrot.lane.b32.xlu1 %v2289_v53, %s2952_s15  ;;  %2390 = vrot.lane.b32.xlu0 %v2257_v40, %s2952_s15 }
 0x3df   : > { %2071 = vmatprep.subr.bf16.mxu1 %v1989_v1 }
 0x3e0   : > { %v2341_v44 = vpop.permute.xlu1 %2340  ;;  %v2339_v62 = vpop.permute.xlu0 %2338 }
 0x3e1   : > { %v2438_v2 = vsel %vm682_vm4, %v2339_v62, %v2341_v44 }
 0x3e2   : > { %2398 = vrot.lane.b32.xlu0 %v4388_v24, %s2952_s15  ;;  %2400 = vrot.lane.b32.xlu1 %v4378_v26, %s2952_s15  ;;  %v1173_v26 = vpop.f32.mrb[4].mxu1  ;;  %v1630_v24 = vpop.f32.mrb[4].mxu0 }
 0x3e3   : > { %2520 = vmatprep.subr.bf16.mxu0 %v2438_v2  ;;  %v1175_v36 = vpop.f32.mrb[5].mxu1  ;;  %v1632_v3 = vpop.f32.mrb[5].mxu0 }
 0x3e4   : > { %v2337_v10 = vpop.permute.xlu1 %2336  ;;  %v1904_v28 = vpop.permute.xlu0 %1903 }
 0x3e5   : > { %v2437_v9 = vsel %vm682_vm4, %v2337_v10, %v2339_v62  ;;  %v1988_v30 = vsel %vm1969_vm7, %v1904_v28, %v1906_v52  ;;  %v1177_v22 = vpop.f32.mrb[6].mxu1  ;;  %v1634_v15 = vpop.f32.mrb[6].mxu0 }
 0x3e6   : > { %2422 = vrot.lane.b32.xlu0 %v4397_v35, %s2952_s15  ;;  %2424 = vrot.lane.b32.xlu1 %v4392_v57, %s2952_s15  ;;  %v1178_v35 = vpop.f32.mrb[7].mxu1  ;;  %v1635_v57 = vpop.f32.mrb[7].mxu0 }
 0x3e7   : > { %2072 = vmatpush1.bf16.msra.mxu1 %v1988_v30  ;;  %2521 = vmatpush1.bf16.msra.mxu0 %v2437_v9  ;;  %v1214_v34 = vpop.f32.mrb[8].mxu1 }
 0x3e8   : > { %v1914_v6 = vpop.permute.xlu1 %1913  ;;  %v1912_v11 = vpop.permute.xlu0 %1911  ;;  %v1215_v37 = vadd.f32 %v1214_v34, %v1173_v26 }
 0x3e9   : > { %v1991_v4 = vsel %vm1969_vm7, %v1912_v11, %v1914_v6  ;;  %v1216_v55 = vpop.f32.mrb[9].mxu1 }
 0x3ea   : > { %2420 = vrot.lane.b32.xlu1 %v4406_v7, %s2952_s15  ;;  %2396 = vrot.lane.b32.xlu0 %v4409_v45, %s2952_s15  ;;  %v1223_v21 = vadd.f32 %v1215_v37, %v762_v14  ;;  %v1217_v7 = vadd.f32 %v1216_v55, %v1175_v36  ;;  %v1218_v43 = vpop.f32.mrb[10].mxu1 }
 0x3eb   : > { %2073 = vmatprep.subr.bf16.mxu1 %v1991_v4  ;;  %v1219_v45 = vpop.f32.mrb[11].mxu1 }
 0x3ec   : > { %v2347_v32 = vpop.permute.xlu1 %2346  ;;  %v2345_v38 = vpop.permute.xlu0 %2344  ;;  %v1224_v59 = vadd.f32 %v1217_v7, %v764_v25 }
 0x3ed   : > { %v2440_v17 = vsel %vm682_vm4, %v2345_v38, %v2347_v32  ;;  %v1671_v60 = vpop.f32.mrb[12].mxu1 }
 0x3ee   : > { %2522 = vmatprep.subr.bf16.mxu0 %v2440_v17  ;;  %2603 = vperm.xlu0 %2848, %v2600_v8   ;;  %v1672_v61 = vadd.f32 %v1671_v60, %v1630_v24  ;;  %v1673_v29 = vpop.f32.mrb[13].mxu1  ;;  %v4643_v60 = vmov 0  }
 0x3ef   : > { %v1674_v50 = vadd.f32 %v1673_v29, %v1632_v3  ;;  %v1675_v58 = vpop.f32.mrb[14].mxu1 }
 0x3f0   : > { %v2343_v19 = vpop.permute.xlu1 %2342  ;;  %v1910_v18 = vpop.permute.xlu0 %1909  ;;  %v4558_v33 = vadd.f32 %v1672_v61, %v1223_v21 }
 0x3f1   : > { %v2439_v46 = vsel %vm682_vm4, %v2343_v19, %v2345_v38  ;;  %v1990_v39 = vsel %vm1969_vm7, %v1910_v18, %v1912_v11  ;;  %v4561_v51 = vadd.f32 %v1674_v50, %v1224_v59  ;;  %v1676_v47 = vpop.f32.mrb[15].mxu1  ;;  %v2782_v18 = vcombine.low %v4429_v20, %v4429_v20 }
 0x3f2   : > { %2074 = vmatpush1.bf16.msra.mxu1 %v1990_v39  ;;  %2523 = vmatpush1.bf16.msra.mxu0 %v2439_v46 }
 0x3f4   : > { %v1920_v23 = vpop.permute.xlu1 %1919  ;;  %v1918_v63 = vpop.permute.xlu0 %1917 }
 0x3f5   : > { %v1993_v16 = vsel %vm1969_vm7, %v1918_v63, %v1920_v23 }
 0x3f6   : > { %2075 = vmatprep.subr.bf16.mxu1 %v1993_v16 }
 0x3f8   : > { %v2353_v27 = vpop.permute.xlu1 %2352  ;;  %v2351_v54 = vpop.permute.xlu0 %2350 }
 0x3f9   : > { %v2442_v52 = vsel %vm682_vm4, %v2351_v54, %v2353_v27 }
 0x3fa   : > { %2524 = vmatprep.subr.bf16.mxu0 %v2442_v52 }
 0x3fc   : > { %v2349_v53 = vpop.permute.xlu1 %2348  ;;  %v1916_v40 = vpop.permute.xlu0 %1915 }
 0x3fd   : > { %v2441_v1 = vsel %vm682_vm4, %v2349_v53, %v2351_v54  ;;  %v1992_v48 = vsel %vm1969_vm7, %v1916_v40, %v1918_v63 }
 0x3fe   : > { %2076 = vmatpush1.bf16.msra.mxu1 %v1992_v48  ;;  %2525 = vmatpush1.bf16.msra.mxu0 %v2441_v1 }
 0x400   : > { %v1926_v44 = vpop.permute.xlu1 %1925  ;;  %v1924_v62 = vpop.permute.xlu0 %1923 }
 0x401   : > { %v1995_v2 = vsel %vm1969_vm7, %v1924_v62, %v1926_v44 }
 0x402   : > { %2077 = vmatprep.subr.bf16.mxu1 %v1995_v2 }
 0x404   : > { %v2359_v12 = vpop.permute.xlu1 %2358  ;;  %v2357_v0 = vpop.permute.xlu0 %2356 }
 0x405   : > { %v2444_v13 = vsel %vm682_vm4, %v2357_v0, %v2359_v12 }
 0x406   : > { %2526 = vmatprep.subr.bf16.mxu0 %v2444_v13 }
 0x408   : > { %v2355_v14 = vpop.permute.xlu1 %2354  ;;  %v1922_v41 = vpop.permute.xlu0 %1921 }
 0x409   : > { %v2443_v56 = vsel %vm682_vm4, %v2355_v14, %v2357_v0  ;;  %v1994_v25 = vsel %vm1969_vm7, %v1922_v41, %v1924_v62 }
 0x40a   : > { %2078 = vmatpush1.bf16.msra.mxu1 %v1994_v25  ;;  %2527 = vmatpush1.bf16.msra.mxu0 %v2443_v56 }
 0x40c   : > { %v1932_v49 = vpop.permute.xlu1 %1931  ;;  %v1930_v10 = vpop.permute.xlu0 %1929 }
 0x40d   : > { %v1997_v28 = vsel %vm1969_vm7, %v1930_v10, %v1932_v49 }
 0x40e   : > { %2079 = vmatprep.subr.bf16.mxu1 %v1997_v28 }
 0x410   : > { %v2365_v9 = vpop.permute.xlu1 %2364  ;;  %v2363_v30 = vpop.permute.xlu0 %2362 }
 0x411   : > { %v2446_v31 = vsel %vm682_vm4, %v2363_v30, %v2365_v9 }
 0x412   : > { %2528 = vmatprep.subr.bf16.mxu0 %v2446_v31 }
 0x414   : > { %v2361_v5 = vpop.permute.xlu1 %2360  ;;  %v1928_v26 = vpop.permute.xlu0 %1927 }
 0x415   : > { %v2445_v24 = vsel %vm682_vm4, %v2361_v5, %v2363_v30  ;;  %v1996_v36 = vsel %vm1969_vm7, %v1928_v26, %v1930_v10 }
 0x416   : > { %2080 = vmatpush1.bf16.msra.mxu1 %v1996_v36  ;;  %2529 = vmatpush1.bf16.msra.mxu0 %v2445_v24 }
 0x418   : > { %v1938_v3 = vpop.permute.xlu1 %1937  ;;  %v1936_v6 = vpop.permute.xlu0 %1935 }
 0x419   : > { %v1999_v11 = vsel %vm1969_vm7, %v1936_v6, %v1938_v3 }
 0x41a   : > { %2081 = vmatprep.subr.bf16.mxu1 %v1999_v11  ;;  %v2879_v11 = vld [vmem:[%s4631_s2 + $0x38] ss:$0 sps:$4 sm:$0xff]  }
 0x41c   : > { %v2371_v4 = vpop.permute.xlu1 %2370  ;;  %v2369_v22 = vpop.permute.xlu0 %2368 }
 0x41d   : > { %v2448_v15 = vsel %vm682_vm4, %v2369_v22, %v2371_v4 }
 0x41e   : > { %2530 = vmatprep.subr.bf16.mxu0 %v2448_v15 }
 0x420   : > { %v2367_v35 = vpop.permute.xlu1 %2366  ;;  %v1934_v57 = vpop.permute.xlu0 %1933 }
 0x421   : > { %v2447_v34 = vsel %vm682_vm4, %v2367_v35, %v2369_v22  ;;  %v1998_v8 = vsel %vm1969_vm7, %v1934_v57, %v1936_v6  ;;  %v2788_v6 = vcombine.low %v4532_v42, %v4532_v42 }
 0x422   : > { %2082 = vmatpush1.bf16.msra.mxu1 %v1998_v8  ;;  %2531 = vmatpush1.bf16.msra.mxu0 %v2447_v34 }
 0x424   : > { %v1944_v32 = vpop.permute.xlu1 %1943  ;;  %v1942_v38 = vpop.permute.xlu0 %1941 }
 0x425   : > { %v2001_v37 = vsel %vm1969_vm7, %v1942_v38, %v1944_v32 }
 0x426   : > { %2083 = vmatprep.subr.bf16.mxu1 %v2001_v37 }
 0x428   : > { %v2377_v17 = vpop.permute.xlu1 %2376  ;;  %v2375_v55 = vpop.permute.xlu0 %2374 }
 0x429   : > { %v2450_v21 = vsel %vm682_vm4, %v2375_v55, %v2377_v17 }
 0x42a   : > { %2532 = vmatprep.subr.bf16.mxu0 %v2450_v21 }
 0x42c   : > { %v2373_v7 = vpop.permute.xlu1 %2372  ;;  %v1940_v43 = vpop.permute.xlu0 %1939 }
 0x42d   : > { %v2449_v45 = vsel %vm682_vm4, %v2373_v7, %v2375_v55  ;;  %v2000_v19 = vsel %vm1969_vm7, %v1940_v43, %v1942_v38 }
 0x42e   : > { %2084 = vmatpush1.bf16.msra.mxu1 %v2000_v19  ;;  %2533 = vmatpush1.bf16.msra.mxu0 %v2449_v45 }
 0x430   : > { %v2383_v59 = vpop.permute.xlu1 %2382  ;;  %v2381_v46 = vpop.permute.xlu0 %2380 }
 0x431   : > { %2086 = vmatmul.mubr.bf16.vlgmr.msra.gmra.mrb[16].mxu1 %v2782_v18  ;;  %v2452_v39 = vsel %vm682_vm4, %v2381_v46, %v2383_v59 }
 0x432   : > { %2534 = vmatprep.subr.bf16.mxu0 %v2452_v39  ;;  %2583 = vmatprep.mubr.bf16.mxu1 %v4643_v60 }
 0x434   : > { %v2407_v61 = vpop.permute.xlu1 %2406  ;;  %v2405_v29 = vpop.permute.xlu0 %2404 }
 0x435   : > { %v2460_v50 = vsel %vm682_vm4, %v2405_v29, %v2407_v61 }
 0x436   : > { %2551 = vmatprep.subr.bf16.mxu1 %v2460_v50 }
 0x438   : > { %v2403_v58 = vpop.permute.xlu1 %2402  ;;  %v2379_v23 = vpop.permute.xlu0 %2378 }
 0x439   : > { %v2459_v63 = vsel %vm682_vm4, %v2403_v58, %v2405_v29  ;;  %v2451_v20 = vsel %vm682_vm4, %v2379_v23, %v2381_v46 }
 0x43a   : > { %2535 = vmatpush1.bf16.msra.mxu0 %v2451_v20  ;;  %2552 = vmatpush1.bf16.msra.mxu1 %v2459_v63 }
 0x43c   : > { %v2389_v16 = vpop.permute.xlu1 %2388  ;;  %v2387_v47 = vpop.permute.xlu0 %2386 }
 0x43d   : > { %v2454_v27 = vsel %vm682_vm4, %v2387_v47, %v2389_v16 }
 0x43e   : > { %2536 = vmatprep.subr.bf16.mxu0 %v2454_v27 }
 0x440   : > { %v2413_v54 = vpop.permute.xlu1 %2412  ;;  %v2411_v52 = vpop.permute.xlu0 %2410 }
 0x441   : > { %v2462_v53 = vsel %vm682_vm4, %v2411_v52, %v2413_v54 }
 0x442   : > { %2553 = vmatprep.subr.bf16.mxu1 %v2462_v53 }
 0x444   : > { %v2409_v40 = vpop.permute.xlu1 %2408  ;;  %v2385_v1 = vpop.permute.xlu0 %2384 }
 0x445   : > { %v2461_v48 = vsel %vm682_vm4, %v2409_v40, %v2411_v52  ;;  %v2453_v44 = vsel %vm682_vm4, %v2385_v1, %v2387_v47 }
 0x446   : > { %2537 = vmatpush1.bf16.msra.mxu0 %v2453_v44  ;;  %2554 = vmatpush1.bf16.msra.mxu1 %v2461_v48 }
 0x448   : > { %v2395_v62 = vpop.permute.xlu1 %2394  ;;  %v2393_v2 = vpop.permute.xlu0 %2392 }
 0x449   : > { %v2456_v12 = vsel %vm682_vm4, %v2393_v2, %v2395_v62 }
 0x44a   : > { %2538 = vmatprep.subr.bf16.mxu0 %v2456_v12 }
 0x44c   : > { %v2419_v0 = vpop.permute.xlu1 %2418  ;;  %v2417_v13 = vpop.permute.xlu0 %2416 }
 0x44d   : > { %v2464_v14 = vsel %vm682_vm4, %v2417_v13, %v2419_v0 }
 0x44e   : > { %2555 = vmatprep.subr.bf16.mxu1 %v2464_v14 }
 0x450   : > { %v2415_v41 = vpop.permute.xlu1 %2414  ;;  %v2391_v56 = vpop.permute.xlu0 %2390 }
 0x451   : > { %v2463_v25 = vsel %vm682_vm4, %v2415_v41, %v2417_v13  ;;  %v2455_v49 = vsel %vm682_vm4, %v2391_v56, %v2393_v2 }
 0x452   : > { %2539 = vmatpush1.bf16.msra.mxu0 %v2455_v49  ;;  %2556 = vmatpush1.bf16.msra.mxu1 %v2463_v25 }
 0x454   : > { %v2401_v10 = vpop.permute.xlu1 %2400  ;;  %v2399_v28 = vpop.permute.xlu0 %2398 }
 0x455   : > { %v2458_v9 = vsel %vm682_vm4, %v2399_v28, %v2401_v10 }
 0x456   : > { %2540 = vmatprep.subr.bf16.mxu0 %v2458_v9 }
 0x458   : > { %v2425_v30 = vpop.permute.xlu1 %2424  ;;  %v2423_v31 = vpop.permute.xlu0 %2422 }
 0x459   : > { %v2466_v5 = vsel %vm682_vm4, %v2423_v31, %v2425_v30 }
 0x45a   : > { %2557 = vmatprep.subr.bf16.mxu1 %v2466_v5 }
 0x45c   : > { %v2421_v26 = vpop.permute.xlu1 %2420  ;;  %v2397_v24 = vpop.permute.xlu0 %2396 }
 0x45d   : > { %v2465_v36 = vsel %vm682_vm4, %v2421_v26, %v2423_v31  ;;  %v2457_v3 = vsel %vm682_vm4, %v2397_v24, %v2399_v28 }
 0x45e   : > { %2541 = vmatpush1.bf16.msra.mxu0 %v2457_v3  ;;  %2558 = vmatpush1.bf16.msra.mxu1 %v2465_v36  ;;  %v2128_v4 = vpop.f32.mrb[8].mxu0 }
 0x45f   : > { %v2130_v22 = vpop.f32.mrb[9].mxu0 }
 0x460   : > { %v2132_v15 = vpop.f32.mrb[10].mxu0 }
 0x461   : > { %2543 = vmatmul.mubr.bf16.vlgmr.msra.gmra.mrb[12].mxu0 %v2788_v6  ;;  %2791 = vmatmul.mubr.msk.bf16.vlgmr.msra.gmra.mrb[20].mxu1 %vm682_vm4, %v2879_v11  ;;  %v2133_v35 = vpop.f32.mrb[11].mxu0 }
 0x46d   : > { %v2604_v55 = vpop.permute.xlu0 %2603 }
 0x504   : > { %v2087_v57 = vpop.f32.mrb[16].mxu1 }
 0x505   : > { %v2129_v34 = vadd.f32 %v2128_v4, %v2087_v57  ;;  %v2089_v8 = vpop.f32.mrb[17].mxu1 }
 0x506   : > { %v2131_v32 = vadd.f32 %v2130_v22, %v2089_v8  ;;  %v2091_v42 = vpop.f32.mrb[18].mxu1 }
 0x507   : > { %v2137_v38 = vadd.f32 %v2129_v34, %v4558_v33  ;;  %v2092_v37 = vpop.f32.mrb[19].mxu1 }
 0x508   : > { %v2138_v17 = vadd.f32 %v2131_v32, %v4561_v51 }
 0x534   : > { %v2544_v21 = vpop.f32.mrb[12].mxu0  ;;  %v2585_v7 = vpop.f32.mrb[20].mxu1 }
 0x535   : > { %v2586_v43 = vadd.f32 %v2585_v7, %v2544_v21  ;;  %v2546_v45 = vpop.f32.mrb[13].mxu0  ;;  %v2587_v19 = vpop.f32.mrb[21].mxu1 }
 0x536   : > { %v2588_v18 = vadd.f32 %v2587_v19, %v2546_v45  ;;  %v2548_v59 = vpop.f32.mrb[14].mxu0  ;;  %v2589_v46 = vpop.f32.mrb[22].mxu1 }
 0x537   : > { %v2549_v39 = vpop.f32.mrb[15].mxu0  ;;  %v2590_v60 = vpop.f32.mrb[23].mxu1  ;;  %v2594_v61 = vadd.f32 %v2586_v43, %v2137_v38 }
 0x538   : > { %v2595_v29 = vadd.f32 %v2588_v18, %v2138_v17 }
 0x539   : > { %v2606_v33 = vadd.f32 %v2604_v55, %v2594_v61 }
 0x53a   : > { %v2607_v50 = vadd.f32 %v2604_v55, %v2595_v29 }
 0x53c   : > { %v2798_v51 = vpack.c.bf16 %v2607_v50, %v2606_v33 }
 0x53e   : > { %2616 = vst [vmem:[%s379_s10] sm:$0xff] %v2798_v51 }
 0x53f PF: > { %s14_s19 = sadd.s32 1, %s2942_s19   ;;  %s4644_s15 = smov %s2930_s16 }
 0x540   : > { %p11_p10 = scmp.ge.s32.totalorder %s14_s19, 4   ;;  %s4645_s16 = smov %s3017_s24 }
 0x541   : > { %s4646_s17 = smov %s2938_s18  ;;  %s4647_s18 = smov %s4649_s20 }
 0x542   :  { %13 = sbr.rel (!%p11_p10) target bundleno = 3 (0x3), region = 159 }

</bundles_post_ra>
